<compile_context>
chip_gen: v6e
topology: v6e:2x2x1
jax: 0.10.0
libtpu: 0.0.40
codegen_flags: <defaults>
</compile_context>

<pallas_src>
import functools

import jax
import jax.numpy as jnp
from jax import lax
from jax.experimental import pallas as pl
from jax.experimental.pallas import tpu as pltpu

EPS = 1e-5
PB_ATTN = 9   # max row-halo of the three attn DW convs (7x7, dilation 3)
PB_FFN = 1    # row-halo of the 3x3 FFN DW conv

# packed per-channel vector rows (attention stage)
(A_SCALE1, A_SHIFT1, A_P1B, A_SIGP, A_GATEB, A_DW0B, A_DW1B, A_DW2B,
 A_MASK0, A_PWB, A_P2B, A_LS1) = range(12)
# packed per-channel vector rows (FFN stage)
(F_SCALE2, F_SHIFT2, F_FC2B, F_LS2, F_DECB) = range(5)
(F_FC1B, F_DWFB, F_SIGP) = range(3)


# ----------------------------- in-kernel helpers -----------------------------

def _silu(x):
    return x * jax.nn.sigmoid(x)


def _erf(x):
    # Abramowitz & Stegun 7.1.26 (|err| < 1.5e-7); exp uses the EUP slot.
    a1, a2, a3, a4, a5 = 0.254829592, -0.284496736, 1.421413741, -1.453152027, 1.061405429
    p = 0.3275911
    s = jnp.where(x >= 0.0, 1.0, -1.0)
    ax = jnp.abs(x)
    t = 1.0 / (1.0 + p * ax)
    poly = ((((a5 * t + a4) * t + a3) * t + a2) * t + a1) * t
    return s * (1.0 - poly * jnp.exp(-ax * ax))


def _gelu(x):
    # exact GELU: 0.5 * x * (1 + erf(x / sqrt(2)))  (nn.GELU default)
    return 0.5 * x * (1.0 + _erf(x * 0.7071067811865476))


def _dwconv_mm(pad_ref, cmat_ref, row0, *, K, dil, H, PB):
    """Depthwise (dilated) conv, lane-dense.

    Vertical taps: K row-offset slab loads from the row-haloed scratch
    (pad_ref rows [PB, PB+H) hold the input, halo rows are zero).
    Horizontal taps + their out-of-bounds mask + the per-channel weights are
    folded into a single (K*W*D, W*D) lane-mixing matrix (precomputed in the
    wrapper), applied as one MXU matmul against the lane-concatenated slabs.
    """
    p = ((K - 1) * dil) // 2
    wd = pad_ref.shape[1]                                  # W*D lanes
    slabs = jnp.concatenate(
        [pad_ref[PB - p + i * dil:PB - p + i * dil + H, :] for i in range(K)],
        axis=1)                                            # (H, K*W*D), 128-aligned concat
    return jnp.dot(slabs, cmat_ref[row0:row0 + K * wd, :],
                   preferred_element_type=jnp.float32)


# ------------------------------- Pallas kernels -------------------------------

def _attn_kernel(x_ref, sxd_ref, vec_ref, mm_ref, cmat_ref,
                 y_ref, st_ref, pad_ref):
    """y = x + layer_scale_1 * MultiOrderGatedAggregation(norm1(x)).

    Also emits per-sample row-sums of y and y^2 (for the norm2 batch stats)."""
    H, WC = x_ref.shape[1], x_ref.shape[2]
    x = x_ref[0]                                           # (H, W*C) lane-dense

    # norm1 (batch statistics folded into scale/shift by the XLA prepass)
    xn = x * vec_ref[A_SCALE1, :] + vec_ref[A_SHIFT1, :]

    # feat_decompose: proj_1 (block-diag 1x1), ElementScale vs spatial mean, SiLU
    xp = jnp.dot(xn, mm_ref[:, 0:WC], preferred_element_type=jnp.float32) + vec_ref[A_P1B, :]
    xp = xp * vec_ref[A_SIGP, :] - sxd_ref[0, 0, :]        # xp*(1+sigma) - sigma*x_d
    xv = _silu(xp)

    # gate branch (1x1 conv)
    g = jnp.dot(xv, mm_ref[:, WC:2 * WC], preferred_element_type=jnp.float32) + vec_ref[A_GATEB, :]

    # value branch: MultiOrderDWConv on one shared row-haloed scratch.
    # Only the halo rows are re-zeroed (step-independent -> megacore-safe).
    zrows = jnp.zeros((PB_ATTN, WC), jnp.float32)
    pad_ref[0:PB_ATTN, :] = zrows
    pad_ref[PB_ATTN + H:, :] = zrows
    pad_ref[PB_ATTN:PB_ATTN + H, :] = xv
    x0 = _dwconv_mm(pad_ref, cmat_ref, 0, K=5, dil=1, H=H, PB=PB_ATTN) + vec_ref[A_DW0B, :]
    pad_ref[PB_ATTN:PB_ATTN + H, :] = x0                   # x0 feeds both dw1 and dw2
    x1 = _dwconv_mm(pad_ref, cmat_ref, 5 * WC, K=5, dil=2, H=H, PB=PB_ATTN) + vec_ref[A_DW1B, :]
    x2 = _dwconv_mm(pad_ref, cmat_ref, 10 * WC, K=7, dil=3, H=H, PB=PB_ATTN) + vec_ref[A_DW2B, :]
    # dw1/dw2 weights & biases are zero outside their channel split, so the
    # torch.cat over channel ranges is a masked add.
    xc = x0 * vec_ref[A_MASK0, :] + x1 + x2
    v = jnp.dot(xc, mm_ref[:, 2 * WC:3 * WC], preferred_element_type=jnp.float32) + vec_ref[A_PWB, :]

    # gated aggregation + inner residual (with norm1(x))
    a = _silu(g) * _silu(v)
    attn = jnp.dot(a, mm_ref[:, 3 * WC:4 * WC], preferred_element_type=jnp.float32) \
        + vec_ref[A_P2B, :] + xn

    y = x + vec_ref[A_LS1, :] * attn
    y_ref[0] = y
    # tiny per-sample partials for norm2 (w-groups reduced in the XLA epilogue)
    st_ref[0, 0:1, :] = jnp.sum(y, axis=0, keepdims=True)
    st_ref[0, 1:2, :] = jnp.sum(y * y, axis=0, keepdims=True)


def _ffn_kernel(x_ref, vecc_ref, vech_ref, mma_ref, mmb_ref, cmat_ref,
                o_ref, pad_ref):
    """o = x + layer_scale_2 * ChannelAggregationFFN(norm2(x))."""
    H, WC = x_ref.shape[1], x_ref.shape[2]
    WHd = pad_ref.shape[1]
    x = x_ref[0]                                           # (H, W*C)

    xn = x * vecc_ref[F_SCALE2, :] + vecc_ref[F_SHIFT2, :]

    # fc1 (block-diag 1x1): (H, W*C) @ (W*C, W*Hd)
    h = jnp.dot(xn, mma_ref[0:WC, :], preferred_element_type=jnp.float32) + vech_ref[F_FC1B, :]

    # 3x3 depthwise conv on the row-haloed scratch
    zrow = jnp.zeros((PB_FFN, WHd), jnp.float32)
    pad_ref[0:PB_FFN, :] = zrow
    pad_ref[PB_FFN + H:, :] = zrow
    pad_ref[PB_FFN:PB_FFN + H, :] = h
    h = _dwconv_mm(pad_ref, cmat_ref, 0, K=3, dil=1, H=H, PB=PB_FFN) + vech_ref[F_DWFB, :]
    h = _gelu(h)                                           # act (dropout p=0)

    # feat_decompose: 1x1 conv Hd -> 1 (lane-padded reduce matmul), GELU,
    # ElementScale (sigma folded into the expand matrix): h*(1+s) - gelu(d)@E_s
    d = _gelu(jnp.dot(h, mmb_ref[:, WC:2 * WC], preferred_element_type=jnp.float32)
              + vecc_ref[F_DECB, :])                       # (H, W*C), cols >= W are dead
    h = h * vech_ref[F_SIGP, :] - jnp.dot(d, mma_ref[WC:2 * WC, :],
                                          preferred_element_type=jnp.float32)

    y = jnp.dot(h, mmb_ref[:, 0:WC], preferred_element_type=jnp.float32) + vecc_ref[F_FC2B, :]
    o_ref[0] = x + vecc_ref[F_LS2, :] * y


# --------------------------------- wrapper ------------------------------------

def _rep_spec(a):
    # Full-array block, same block every grid step (stays resident in VMEM).
    zeros = (0,) * a.ndim
    return pl.BlockSpec(a.shape, lambda n, _z=zeros: _z)


@jax.jit
def moga_block(x_nchw, params):
    f32 = jnp.float32
    N, C, H, W = x_nchw.shape
    WC = W * C
    Hd = params["fc1_w"].shape[1]
    WHd = W * Hd
    nhw = N * H * W

    # layout: NCHW (PyTorch) -> lane-dense (N, H, W*C) for the kernels.
    x = jnp.transpose(x_nchw.astype(f32), (0, 2, 3, 1)).reshape(N, H, WC)

    eye_w = jnp.eye(W, dtype=f32)

    def tile_w(v):
        """(D,) per-channel vector -> (1, W*D) lane vector (replicated per w)."""
        return jnp.tile(jnp.reshape(v, (1, -1)).astype(f32), (1, W))

    def blockdiag(m):
        """(Din, Dout) 1x1-conv matrix -> (W*Din, W*Dout) block-diagonal."""
        return jnp.kron(eye_w, m.astype(f32))

    def conv_mat(w_flat, K, dil, D):
        """(K*K, D) depthwise taps -> (K*W*D, W*D) lane-mixing matrix.

        Horizontal taps + the horizontal zero-padding mask are folded in; the
        K kernel-row blocks are stacked along the contraction dim in the same
        order as the slab concat inside the kernel."""
        p = ((K - 1) * dil) // 2
        WD = W * D
        src = jnp.arange(WD)[:, None]
        dst = jnp.arange(WD)[None, :]
        c_dst = dst % D
        w_dst = dst // D
        mats = []
        for i in range(K):
            m = jnp.zeros((WD, WD), f32)
            for j in range(K):
                dj = j * dil - p
                ok = (src - dst == dj * D) & (w_dst + dj >= 0) & (w_dst + dj < W)
                m = m + jnp.where(ok, w_flat[i * K + j][c_dst], 0.0)
            mats.append(m)
        return jnp.concatenate(mats, axis=0)

    # ---- fused prepass (single read of x): norm1 batch stats + x_d ----
    s1 = jnp.sum(x, axis=1).reshape(N, W, C).sum(axis=1)            # (N, C)
    s2 = jnp.sum(jnp.square(x), axis=1).reshape(N, W, C).sum(axis=1)
    mean1 = jnp.sum(s1, axis=0) / nhw
    var1 = jnp.maximum(jnp.sum(s2, axis=0) / nhw - jnp.square(mean1), 0.0)  # biased
    scale1 = params["bn1_w"] * lax.rsqrt(var1 + EPS)
    shift1 = params["bn1_b"] - mean1 * scale1
    # mean_{H,W} proj_1(norm1(x)) == proj_1(mean_{H,W} norm1(x))  (1x1 conv is affine)
    xn_m = (s1 / (H * W)) * scale1 + shift1                         # (N, C)
    x_d = xn_m @ params["p1_w"] + params["p1_b"]                    # (N, C)
    sig_xd = jnp.tile(params["sigma_a"] * x_d, (1, W)).reshape(N, 1, WC)

    # ---- packed attention-stage parameters ----
    d1 = params["dw1_w"].shape[1]
    d2 = params["dw2_w"].shape[1]
    d0 = C - d1 - d2
    dw1_w = jnp.zeros((25, C), f32).at[:, d0:d0 + d1].set(params["dw1_w"])
    dw1_b = jnp.zeros((C,), f32).at[d0:d0 + d1].set(params["dw1_b"])
    dw2_w = jnp.zeros((49, C), f32).at[:, d0 + d1:].set(params["dw2_w"])
    dw2_b = jnp.zeros((C,), f32).at[d0 + d1:].set(params["dw2_b"])
    mask0 = (jnp.arange(C) < d0).astype(f32)

    vec_a = jnp.concatenate([
        tile_w(scale1), tile_w(shift1), tile_w(params["p1_b"]),
        tile_w(1.0 + params["sigma_a"]), tile_w(params["gate_b"]),
        tile_w(params["dw0_b"]), tile_w(dw1_b), tile_w(dw2_b),
        tile_w(mask0), tile_w(params["pw_b"]), tile_w(params["p2_b"]),
        tile_w(params["ls1"]),
    ], axis=0)                                                      # (12, W*C)
    mm_a = jnp.concatenate([blockdiag(params["p1_w"]), blockdiag(params["gate_w"]),
                            blockdiag(params["pw_w"]), blockdiag(params["p2_w"])],
                           axis=1)                                  # (W*C, 4*W*C)
    cmat_a = jnp.concatenate([conv_mat(params["dw0_w"], 5, 1, C),
                              conv_mat(dw1_w, 5, 2, C),
                              conv_mat(dw2_w, 7, 3, C)], axis=0)    # (17*W*C, W*C)

    tile_spec = pl.BlockSpec((1, H, WC), lambda n: (n, 0, 0))
    svec_spec = pl.BlockSpec((1, 1, WC), lambda n: (n, 0, 0))
    stat_spec = pl.BlockSpec((1, 2, WC), lambda n: (n, 0, 0))
    parallel = pltpu.CompilerParams(dimension_semantics=("parallel",))
    # TODO(synk): at larger H, additionally row-tile the spatial dim (with halo
    # overlap) so each TensorCore sees >= 4-8 grid steps; at H=16 the 19-row
    # receptive field of the dilated 7x7 conv spans the whole image.

    # ------------------------------ stage 1: attn ------------------------------
    attn_cost = pl.CostEstimate(
        flops=int(N * (2 * H * WC * WC * 21 + 40 * H * WC)),
        transcendentals=int(N * 3 * H * WC),
        bytes_accessed=int(3 * N * H * WC * 4
                           + (vec_a.size + mm_a.size + cmat_a.size) * 4))
    y, st = pl.pallas_call(
        _attn_kernel,
        out_shape=(jax.ShapeDtypeStruct((N, H, WC), f32),
                   jax.ShapeDtypeStruct((N, 2, WC), f32)),
        grid=(N,),
        in_specs=[tile_spec, svec_spec,
                  _rep_spec(vec_a), _rep_spec(mm_a), _rep_spec(cmat_a)],
        out_specs=(tile_spec, stat_spec),
        scratch_shapes=[pltpu.VMEM((H + 2 * PB_ATTN, WC), f32)],
        compiler_params=parallel,
        cost_estimate=attn_cost,
    )(x, sig_xd, vec_a, mm_a, cmat_a)

    # ---- norm2 batch stats from the tiny per-sample sums (no re-read of y) ----
    sum_y = jnp.sum(st[:, 0, :], axis=0).reshape(W, C).sum(axis=0)
    sum_y2 = jnp.sum(st[:, 1, :], axis=0).reshape(W, C).sum(axis=0)
    mean2 = sum_y / nhw
    var2 = jnp.maximum(sum_y2 / nhw - jnp.square(mean2), 0.0)       # biased, one-pass
    scale2 = params["bn2_w"] * lax.rsqrt(var2 + EPS)
    shift2 = params["bn2_b"] - mean2 * scale2

    # ---- packed FFN-stage parameters ----
    vec_c = jnp.concatenate([
        tile_w(scale2), tile_w(shift2), tile_w(params["fc2_b"]), tile_w(params["ls2"]),
        jnp.tile(params["dec_b"].reshape(1, 1).astype(f32), (1, WC)),
    ], axis=0)                                                      # (5, W*C)
    vec_h = jnp.concatenate([tile_w(params["fc1_b"]), tile_w(params["dwf_b"]),
                             tile_w(1.0 + params["sigma_f"])], axis=0)   # (3, W*Hd)
    # fc1 + (decompose-expand with sigma folded in), stacked along rows:
    expand = jnp.zeros((WC, WHd), f32).at[:W, :].set(
        jnp.kron(eye_w, params["sigma_f"].reshape(1, Hd)))
    mm_f1 = jnp.concatenate([blockdiag(params["fc1_w"]), expand], axis=0)   # (2*W*C, W*Hd)
    # fc2 + (decompose-reduce, lane-padded to W*C), stacked along lanes:
    reduce = jnp.zeros((WHd, WC), f32).at[:, :W].set(
        jnp.kron(eye_w, params["dec_w"].reshape(Hd, 1)))
    mm_f2 = jnp.concatenate([blockdiag(params["fc2_w"]), reduce], axis=1)   # (W*Hd, 2*W*C)
    cmat_f = conv_mat(params["dwf_w"], 3, 1, Hd)                            # (3*W*Hd, W*Hd)

    # ------------------------------ stage 2: FFN -------------------------------
    ffn_cost = pl.CostEstimate(
        flops=int(N * 2 * H * (2 * WC * WHd + 3 * WHd * WHd + 2 * WHd * WC)
                  + N * 40 * H * WHd),
        transcendentals=int(N * 2 * H * WHd),
        bytes_accessed=int(2 * N * H * WC * 4
                           + (mm_f1.size + mm_f2.size + cmat_f.size) * 4))
    out = pl.pallas_call(
        _ffn_kernel,
        out_shape=jax.ShapeDtypeStruct((N, H, WC), f32),
        grid=(N,),
        in_specs=[tile_spec, _rep_spec(vec_c), _rep_spec(vec_h),
                  _rep_spec(mm_f1), _rep_spec(mm_f2), _rep_spec(cmat_f)],
        out_specs=tile_spec,
        scratch_shapes=[pltpu.VMEM((H + 2 * PB_FFN, WHd), f32)],
        compiler_params=parallel,
        cost_estimate=ffn_cost,
    )(y, vec_c, vec_h, mm_f1, mm_f2, cmat_f)

    return jnp.transpose(out.reshape(N, H, W, C), (0, 3, 1, 2))


# ----------------------------- deterministic init -----------------------------

def init_params(key, C, Hd, d0, d1, d2):
    ks = jax.random.split(key, 24)
    f32 = jnp.float32

    def nrm(k, shape, fan_in):
        return jax.random.normal(k, shape, f32) / jnp.sqrt(float(fan_in))

    p = {}
    # norm1 / norm2 (BatchNorm2d defaults: weight=1, bias=0)
    p["bn1_w"] = jnp.ones((C,), f32); p["bn1_b"] = jnp.zeros((C,), f32)
    p["bn2_w"] = jnp.ones((C,), f32); p["bn2_b"] = jnp.zeros((C,), f32)

    # MultiOrderGatedAggregation (1x1 weights stored as (in, out); transpose
    # PyTorch's (out, in, 1, 1) Conv2d weights when importing checkpoints).
    p["p1_w"], p["p1_b"] = nrm(ks[0], (C, C), C), nrm(ks[1], (C,), C)
    p["sigma_a"] = jnp.full((C,), 1e-5, f32)                  # ElementScale
    p["gate_w"], p["gate_b"] = nrm(ks[2], (C, C), C), nrm(ks[3], (C,), C)
    p["dw0_w"], p["dw0_b"] = nrm(ks[4], (25, C), 25), nrm(ks[5], (C,), 25)
    p["dw1_w"], p["dw1_b"] = nrm(ks[6], (25, d1), 25), nrm(ks[7], (d1,), 25)
    p["dw2_w"], p["dw2_b"] = nrm(ks[8], (49, d2), 49), nrm(ks[9], (d2,), 49)
    p["pw_w"], p["pw_b"] = nrm(ks[10], (C, C), C), nrm(ks[11], (C,), C)
    p["p2_w"], p["p2_b"] = nrm(ks[12], (C, C), C), nrm(ks[13], (C,), C)
    p["ls1"] = jnp.full((C,), 1e-5, f32)                      # layer_scale_1

    # ChannelAggregationFFN
    p["fc1_w"], p["fc1_b"] = nrm(ks[14], (C, Hd), C), nrm(ks[15], (Hd,), C)
    p["dwf_w"], p["dwf_b"] = nrm(ks[16], (9, Hd), 9), nrm(ks[17], (Hd,), 9)
    p["dec_w"], p["dec_b"] = nrm(ks[18], (Hd,), Hd), nrm(ks[19], (1,), Hd)
    p["sigma_f"] = jnp.full((Hd,), 1e-5, f32)                 # ElementScale
    p["fc2_w"], p["fc2_b"] = nrm(ks[20], (Hd, C), Hd), nrm(ks[21], (C,), Hd)
    p["ls2"] = jnp.full((C,), 1e-5, f32)                      # layer_scale_2
    return p


if __name__ == "__main__":
    # embed_dims must be divisible by sum(channel_split)=8; W*C = 128 -> lane-dense.
    C, ffn_ratio = 8, 4
    Hd = C * ffn_ratio
    d1 = int(3 / 8 * C)          # channels for DW_conv1
    d2 = int(4 / 8 * C)          # channels for DW_conv2
    d0 = C - d1 - d2             # channels kept from DW_conv0
    N, H, W = 2, 16, 16

    key = jax.random.PRNGKey(0)
    kx, kp = jax.random.split(key)
    x = jax.random.normal(kx, (N, C, H, W), jnp.float32)     # NCHW, like PyTorch
    params = init_params(kp, C, Hd, d0, d1, d2)

    out = moga_block(x, params)
    jax.block_until_ready(out)
    assert out.shape == (N, C, H, W) and out.dtype == jnp.float32
    assert bool(jnp.all(jnp.isfinite(out)))
    print("KERNEL_OK")
</pallas_src>

<mosaic_0001>
module attributes {stable_mosaic.version = 11 : i64} {
  func.func @_attn_kernel(%arg0: i32, %arg1: memref<1x16x128xf32, #tpu.memory_space<vmem>>, %arg2: memref<1x1x128xf32, #tpu.memory_space<vmem>>, %arg3: memref<12x128xf32, #tpu.memory_space<vmem>>, %arg4: memref<128x512xf32, #tpu.memory_space<vmem>>, %arg5: memref<2176x128xf32, #tpu.memory_space<vmem>>, %arg6: memref<1x16x128xf32, #tpu.memory_space<vmem>>, %arg7: memref<1x2x128xf32, #tpu.memory_space<vmem>>, %arg8: memref<34x128xf32, #tpu.memory_space<vmem>>) attributes {dimension_semantics = [#tpu.dimension_semantics<parallel>], iteration_bounds = array<i64: 2>, scalar_prefetch = 0 : i64, scratch_operands = 1 : i64, tpu.core_type = #tpu.core_type<tc>, window_params = [{transform_indices = @transform_0, window_bounds = array<i64: 1, 16, 128>}, {transform_indices = @transform_1, window_bounds = array<i64: 1, 1, 128>}, {pipeline_mode = #tpu.pipeline_mode<synchronous>, transform_indices = @transform_2, window_bounds = array<i64: 12, 128>}, {pipeline_mode = #tpu.pipeline_mode<synchronous>, transform_indices = @transform_3, window_bounds = array<i64: 128, 512>}, {pipeline_mode = #tpu.pipeline_mode<synchronous>, transform_indices = @transform_4, window_bounds = array<i64: 2176, 128>}, {transform_indices = @transform_5, window_bounds = array<i64: 1, 16, 128>}, {transform_indices = @transform_6, window_bounds = array<i64: 1, 2, 128>}]} {
    %c0 = arith.constant 0 : index
    %c0_0 = arith.constant 0 : index
    %c0_1 = arith.constant 0 : index
    %0 = vector.load %arg1[%c0, %c0_0, %c0_1] : memref<1x16x128xf32, #tpu.memory_space<vmem>>, vector<1x16x128xf32>
    %1 = vector.shape_cast %0 : vector<1x16x128xf32> to vector<16x128xf32>
    %c0_2 = arith.constant 0 : index
    %c0_3 = arith.constant 0 : index
    %2 = vector.load %arg3[%c0_2, %c0_3] : memref<12x128xf32, #tpu.memory_space<vmem>>, vector<1x128xf32>
    %3 = vector.shape_cast %2 : vector<1x128xf32> to vector<128xf32>
    %4 = vector.shape_cast %3 : vector<128xf32> to vector<1x128xf32>
    %5 = vector.broadcast %4 : vector<1x128xf32> to vector<16x128xf32>
    %6 = arith.mulf %1, %5 : vector<16x128xf32>
    %c1 = arith.constant 1 : index
    %c0_4 = arith.constant 0 : index
    %7 = vector.load %arg3[%c1, %c0_4] : memref<12x128xf32, #tpu.memory_space<vmem>>, vector<1x128xf32>
    %8 = vector.shape_cast %7 : vector<1x128xf32> to vector<128xf32>
    %9 = vector.shape_cast %8 : vector<128xf32> to vector<1x128xf32>
    %10 = vector.broadcast %9 : vector<1x128xf32> to vector<16x128xf32>
    %11 = arith.addf %6, %10 : vector<16x128xf32>
    %c0_5 = arith.constant 0 : index
    %c0_6 = arith.constant 0 : index
    %12 = vector.load %arg4[%c0_5, %c0_6] : memref<128x512xf32, #tpu.memory_space<vmem>>, vector<128x128xf32>
    %cst = arith.constant dense<0.000000e+00> : vector<16x128xf32>
    %13 = tpu.matmul %11, %12, %cst {dimension_numbers = #tpu.dot_dimension_numbers<[1], [0], [0], [1], [0, 0, 1, 1], [], []>} : vector<16x128xf32>, vector<128x128xf32>, vector<16x128xf32> -> vector<16x128xf32>
    %c2 = arith.constant 2 : index
    %c0_7 = arith.constant 0 : index
    %14 = vector.load %arg3[%c2, %c0_7] : memref<12x128xf32, #tpu.memory_space<vmem>>, vector<1x128xf32>
    %15 = vector.shape_cast %14 : vector<1x128xf32> to vector<128xf32>
    %16 = vector.shape_cast %15 : vector<128xf32> to vector<1x128xf32>
    %17 = vector.broadcast %16 : vector<1x128xf32> to vector<16x128xf32>
    %18 = arith.addf %13, %17 : vector<16x128xf32>
    %c3 = arith.constant 3 : index
    %c0_8 = arith.constant 0 : index
    %19 = vector.load %arg3[%c3, %c0_8] : memref<12x128xf32, #tpu.memory_space<vmem>>, vector<1x128xf32>
    %20 = vector.shape_cast %19 : vector<1x128xf32> to vector<128xf32>
    %21 = vector.shape_cast %20 : vector<128xf32> to vector<1x128xf32>
    %22 = vector.broadcast %21 : vector<1x128xf32> to vector<16x128xf32>
    %23 = arith.mulf %18, %22 : vector<16x128xf32>
    %c0_9 = arith.constant 0 : index
    %c0_10 = arith.constant 0 : index
    %c0_11 = arith.constant 0 : index
    %24 = vector.load %arg2[%c0_9, %c0_10, %c0_11] : memref<1x1x128xf32, #tpu.memory_space<vmem>>, vector<1x1x128xf32>
    %25 = vector.shape_cast %24 : vector<1x1x128xf32> to vector<128xf32>
    %26 = vector.shape_cast %25 : vector<128xf32> to vector<1x128xf32>
    %27 = vector.broadcast %26 : vector<1x128xf32> to vector<16x128xf32>
    %28 = arith.subf %23, %27 : vector<16x128xf32>
    %29 = arith.negf %28 : vector<16x128xf32>
    %30 = math.exp %29 : vector<16x128xf32>
    %cst_12 = arith.constant 1.000000e+00 : f32
    %31 = vector.broadcast %cst_12 : f32 to vector<16x128xf32>
    %32 = arith.addf %31, %30 : vector<16x128xf32>
    %33 = arith.divf %31, %32 : vector<16x128xf32>
    %34 = arith.mulf %28, %33 : vector<16x128xf32>
    %c0_13 = arith.constant 0 : index
    %c128 = arith.constant 128 : index
    %35 = vector.load %arg4[%c0_13, %c128] : memref<128x512xf32, #tpu.memory_space<vmem>>, vector<128x128xf32>
    %cst_14 = arith.constant dense<0.000000e+00> : vector<16x128xf32>
    %36 = tpu.matmul %34, %35, %cst_14 {dimension_numbers = #tpu.dot_dimension_numbers<[1], [0], [0], [1], [0, 0, 1, 1], [], []>} : vector<16x128xf32>, vector<128x128xf32>, vector<16x128xf32> -> vector<16x128xf32>
    %c4 = arith.constant 4 : index
    %c0_15 = arith.constant 0 : index
    %37 = vector.load %arg3[%c4, %c0_15] : memref<12x128xf32, #tpu.memory_space<vmem>>, vector<1x128xf32>
    %38 = vector.shape_cast %37 : vector<1x128xf32> to vector<128xf32>
    %39 = vector.shape_cast %38 : vector<128xf32> to vector<1x128xf32>
    %40 = vector.broadcast %39 : vector<1x128xf32> to vector<16x128xf32>
    %41 = arith.addf %36, %40 : vector<16x128xf32>
    %cst_16 = arith.constant 0.000000e+00 : f32
    %42 = vector.broadcast %cst_16 : f32 to vector<9x128xf32>
    %c0_17 = arith.constant 0 : index
    %c0_18 = arith.constant 0 : index
    %43 = vector.load %arg8[%c0_17, %c0_18] : memref<34x128xf32, #tpu.memory_space<vmem>>, vector<9x128xf32>
    tpu.vector_store %arg8[%c0_17, %c0_18], %42 {strides = array<i32>} : memref<34x128xf32, #tpu.memory_space<vmem>>, vector<9x128xf32>,
    %c25 = arith.constant 25 : index
    %c0_19 = arith.constant 0 : index
    %44 = vector.load %arg8[%c25, %c0_19] : memref<34x128xf32, #tpu.memory_space<vmem>>, vector<9x128xf32>
    tpu.vector_store %arg8[%c25, %c0_19], %42 {strides = array<i32>} : memref<34x128xf32, #tpu.memory_space<vmem>>, vector<9x128xf32>,
    %c9 = arith.constant 9 : index
    %c0_20 = arith.constant 0 : index
    %45 = vector.load %arg8[%c9, %c0_20] : memref<34x128xf32, #tpu.memory_space<vmem>>, vector<16x128xf32>
    tpu.vector_store %arg8[%c9, %c0_20], %34 {strides = array<i32>} : memref<34x128xf32, #tpu.memory_space<vmem>>, vector<16x128xf32>,
    %c7 = arith.constant 7 : index
    %c0_21 = arith.constant 0 : index
    %46 = vector.load %arg8[%c7, %c0_21] : memref<34x128xf32, #tpu.memory_space<vmem>>, vector<16x128xf32>
    %c8 = arith.constant 8 : index
    %c0_22 = arith.constant 0 : index
    %47 = vector.load %arg8[%c8, %c0_22] : memref<34x128xf32, #tpu.memory_space<vmem>>, vector<16x128xf32>
    %c9_23 = arith.constant 9 : index
    %c0_24 = arith.constant 0 : index
    %48 = vector.load %arg8[%c9_23, %c0_24] : memref<34x128xf32, #tpu.memory_space<vmem>>, vector<16x128xf32>
    %c10 = arith.constant 10 : index
    %c0_25 = arith.constant 0 : index
    %49 = vector.load %arg8[%c10, %c0_25] : memref<34x128xf32, #tpu.memory_space<vmem>>, vector<16x128xf32>
    %c11 = arith.constant 11 : index
    %c0_26 = arith.constant 0 : index
    %50 = vector.load %arg8[%c11, %c0_26] : memref<34x128xf32, #tpu.memory_space<vmem>>, vector<16x128xf32>
    %51 = tpu.concatenate %46, %47, %48, %49, %50 in 1 : vector<16x128xf32>, vector<16x128xf32>, vector<16x128xf32>, vector<16x128xf32>, vector<16x128xf32> -> vector<16x640xf32>
    %c0_27 = arith.constant 0 : index
    %c0_28 = arith.constant 0 : index
    %52 = vector.load %arg5[%c0_27, %c0_28] : memref<2176x128xf32, #tpu.memory_space<vmem>>, vector<640x128xf32>
    %cst_29 = arith.constant dense<0.000000e+00> : vector<16x128xf32>
    %53 = tpu.matmul %51, %52, %cst_29 {dimension_numbers = #tpu.dot_dimension_numbers<[1], [0], [0], [1], [0, 0, 1, 1], [], []>} : vector<16x640xf32>, vector<640x128xf32>, vector<16x128xf32> -> vector<16x128xf32>
    %c5 = arith.constant 5 : index
    %c0_30 = arith.constant 0 : index
    %54 = vector.load %arg3[%c5, %c0_30] : memref<12x128xf32, #tpu.memory_space<vmem>>, vector<1x128xf32>
    %55 = vector.shape_cast %54 : vector<1x128xf32> to vector<128xf32>
    %56 = vector.shape_cast %55 : vector<128xf32> to vector<1x128xf32>
    %57 = vector.broadcast %56 : vector<1x128xf32> to vector<16x128xf32>
    %58 = arith.addf %53, %57 : vector<16x128xf32>
    %c9_31 = arith.constant 9 : index
    %c0_32 = arith.constant 0 : index
    %59 = vector.load %arg8[%c9_31, %c0_32] : memref<34x128xf32, #tpu.memory_space<vmem>>, vector<16x128xf32>
    tpu.vector_store %arg8[%c9_31, %c0_32], %58 {strides = array<i32>} : memref<34x128xf32, #tpu.memory_space<vmem>>, vector<16x128xf32>,
    %c5_33 = arith.constant 5 : index
    %c0_34 = arith.constant 0 : index
    %60 = vector.load %arg8[%c5_33, %c0_34] : memref<34x128xf32, #tpu.memory_space<vmem>>, vector<16x128xf32>
    %c7_35 = arith.constant 7 : index
    %c0_36 = arith.constant 0 : index
    %61 = vector.load %arg8[%c7_35, %c0_36] : memref<34x128xf32, #tpu.memory_space<vmem>>, vector<16x128xf32>
    %c9_37 = arith.constant 9 : index
    %c0_38 = arith.constant 0 : index
    %62 = vector.load %arg8[%c9_37, %c0_38] : memref<34x128xf32, #tpu.memory_space<vmem>>, vector<16x128xf32>
    %c11_39 = arith.constant 11 : index
    %c0_40 = arith.constant 0 : index
    %63 = vector.load %arg8[%c11_39, %c0_40] : memref<34x128xf32, #tpu.memory_space<vmem>>, vector<16x128xf32>
    %c13 = arith.constant 13 : index
    %c0_41 = arith.constant 0 : index
    %64 = vector.load %arg8[%c13, %c0_41] : memref<34x128xf32, #tpu.memory_space<vmem>>, vector<16x128xf32>
    %65 = tpu.concatenate %60, %61, %62, %63, %64 in 1 : vector<16x128xf32>, vector<16x128xf32>, vector<16x128xf32>, vector<16x128xf32>, vector<16x128xf32> -> vector<16x640xf32>
    %c640 = arith.constant 640 : index
    %c0_42 = arith.constant 0 : index
    %66 = vector.load %arg5[%c640, %c0_42] : memref<2176x128xf32, #tpu.memory_space<vmem>>, vector<640x128xf32>
    %cst_43 = arith.constant dense<0.000000e+00> : vector<16x128xf32>
    %67 = tpu.matmul %65, %66, %cst_43 {dimension_numbers = #tpu.dot_dimension_numbers<[1], [0], [0], [1], [0, 0, 1, 1], [], []>} : vector<16x640xf32>, vector<640x128xf32>, vector<16x128xf32> -> vector<16x128xf32>
    %c6 = arith.constant 6 : index
    %c0_44 = arith.constant 0 : index
    %68 = vector.load %arg3[%c6, %c0_44] : memref<12x128xf32, #tpu.memory_space<vmem>>, vector<1x128xf32>
    %69 = vector.shape_cast %68 : vector<1x128xf32> to vector<128xf32>
    %70 = vector.shape_cast %69 : vector<128xf32> to vector<1x128xf32>
    %71 = vector.broadcast %70 : vector<1x128xf32> to vector<16x128xf32>
    %72 = arith.addf %67, %71 : vector<16x128xf32>
    %c0_45 = arith.constant 0 : index
    %c0_46 = arith.constant 0 : index
    %73 = vector.load %arg8[%c0_45, %c0_46] : memref<34x128xf32, #tpu.memory_space<vmem>>, vector<16x128xf32>
    %c3_47 = arith.constant 3 : index
    %c0_48 = arith.constant 0 : index
    %74 = vector.load %arg8[%c3_47, %c0_48] : memref<34x128xf32, #tpu.memory_space<vmem>>, vector<16x128xf32>
    %c6_49 = arith.constant 6 : index
    %c0_50 = arith.constant 0 : index
    %75 = vector.load %arg8[%c6_49, %c0_50] : memref<34x128xf32, #tpu.memory_space<vmem>>, vector<16x128xf32>
    %c9_51 = arith.constant 9 : index
    %c0_52 = arith.constant 0 : index
    %76 = vector.load %arg8[%c9_51, %c0_52] : memref<34x128xf32, #tpu.memory_space<vmem>>, vector<16x128xf32>
    %c12 = arith.constant 12 : index
    %c0_53 = arith.constant 0 : index
    %77 = vector.load %arg8[%c12, %c0_53] : memref<34x128xf32, #tpu.memory_space<vmem>>, vector<16x128xf32>
    %c15 = arith.constant 15 : index
    %c0_54 = arith.constant 0 : index
    %78 = vector.load %arg8[%c15, %c0_54] : memref<34x128xf32, #tpu.memory_space<vmem>>, vector<16x128xf32>
    %c18 = arith.constant 18 : index
    %c0_55 = arith.constant 0 : index
    %79 = vector.load %arg8[%c18, %c0_55] : memref<34x128xf32, #tpu.memory_space<vmem>>, vector<16x128xf32>
    %80 = tpu.concatenate %73, %74, %75, %76, %77, %78, %79 in 1 : vector<16x128xf32>, vector<16x128xf32>, vector<16x128xf32>, vector<16x128xf32>, vector<16x128xf32>, vector<16x128xf32>, vector<16x128xf32> -> vector<16x896xf32>
    %c1280 = arith.constant 1280 : index
    %c0_56 = arith.constant 0 : index
    %81 = vector.load %arg5[%c1280, %c0_56] : memref<2176x128xf32, #tpu.memory_space<vmem>>, vector<896x128xf32>
    %cst_57 = arith.constant dense<0.000000e+00> : vector<16x128xf32>
    %82 = tpu.matmul %80, %81, %cst_57 {dimension_numbers = #tpu.dot_dimension_numbers<[1], [0], [0], [1], [0, 0, 1, 1], [], []>} : vector<16x896xf32>, vector<896x128xf32>, vector<16x128xf32> -> vector<16x128xf32>
    %c7_58 = arith.constant 7 : index
    %c0_59 = arith.constant 0 : index
    %83 = vector.load %arg3[%c7_58, %c0_59] : memref<12x128xf32, #tpu.memory_space<vmem>>, vector<1x128xf32>
    %84 = vector.shape_cast %83 : vector<1x128xf32> to vector<128xf32>
    %85 = vector.shape_cast %84 : vector<128xf32> to vector<1x128xf32>
    %86 = vector.broadcast %85 : vector<1x128xf32> to vector<16x128xf32>
    %87 = arith.addf %82, %86 : vector<16x128xf32>
    %c8_60 = arith.constant 8 : index
    %c0_61 = arith.constant 0 : index
    %88 = vector.load %arg3[%c8_60, %c0_61] : memref<12x128xf32, #tpu.memory_space<vmem>>, vector<1x128xf32>
    %89 = vector.shape_cast %88 : vector<1x128xf32> to vector<128xf32>
    %90 = vector.shape_cast %89 : vector<128xf32> to vector<1x128xf32>
    %91 = vector.broadcast %90 : vector<1x128xf32> to vector<16x128xf32>
    %92 = arith.mulf %58, %91 : vector<16x128xf32>
    %93 = arith.addf %92, %72 : vector<16x128xf32>
    %94 = arith.addf %93, %87 : vector<16x128xf32>
    %c0_62 = arith.constant 0 : index
    %c256 = arith.constant 256 : index
    %95 = vector.load %arg4[%c0_62, %c256] : memref<128x512xf32, #tpu.memory_space<vmem>>, vector<128x128xf32>
    %cst_63 = arith.constant dense<0.000000e+00> : vector<16x128xf32>
    %96 = tpu.matmul %94, %95, %cst_63 {dimension_numbers = #tpu.dot_dimension_numbers<[1], [0], [0], [1], [0, 0, 1, 1], [], []>} : vector<16x128xf32>, vector<128x128xf32>, vector<16x128xf32> -> vector<16x128xf32>
    %c9_64 = arith.constant 9 : index
    %c0_65 = arith.constant 0 : index
    %97 = vector.load %arg3[%c9_64, %c0_65] : memref<12x128xf32, #tpu.memory_space<vmem>>, vector<1x128xf32>
    %98 = vector.shape_cast %97 : vector<1x128xf32> to vector<128xf32>
    %99 = vector.shape_cast %98 : vector<128xf32> to vector<1x128xf32>
    %100 = vector.broadcast %99 : vector<1x128xf32> to vector<16x128xf32>
    %101 = arith.addf %96, %100 : vector<16x128xf32>
    %102 = arith.negf %41 : vector<16x128xf32>
    %103 = math.exp %102 : vector<16x128xf32>
    %cst_66 = arith.constant 1.000000e+00 : f32
    %104 = vector.broadcast %cst_66 : f32 to vector<16x128xf32>
    %105 = arith.addf %104, %103 : vector<16x128xf32>
    %106 = arith.divf %104, %105 : vector<16x128xf32>
    %107 = arith.mulf %41, %106 : vector<16x128xf32>
    %108 = arith.negf %101 : vector<16x128xf32>
    %109 = math.exp %108 : vector<16x128xf32>
    %cst_67 = arith.constant 1.000000e+00 : f32
    %110 = vector.broadcast %cst_67 : f32 to vector<16x128xf32>
    %111 = arith.addf %110, %109 : vector<16x128xf32>
    %112 = arith.divf %110, %111 : vector<16x128xf32>
    %113 = arith.mulf %101, %112 : vector<16x128xf32>
    %114 = arith.mulf %107, %113 : vector<16x128xf32>
    %c0_68 = arith.constant 0 : index
    %c384 = arith.constant 384 : index
    %115 = vector.load %arg4[%c0_68, %c384] : memref<128x512xf32, #tpu.memory_space<vmem>>, vector<128x128xf32>
    %cst_69 = arith.constant dense<0.000000e+00> : vector<16x128xf32>
    %116 = tpu.matmul %114, %115, %cst_69 {dimension_numbers = #tpu.dot_dimension_numbers<[1], [0], [0], [1], [0, 0, 1, 1], [], []>} : vector<16x128xf32>, vector<128x128xf32>, vector<16x128xf32> -> vector<16x128xf32>
    %c10_70 = arith.constant 10 : index
    %c0_71 = arith.constant 0 : index
    %117 = vector.load %arg3[%c10_70, %c0_71] : memref<12x128xf32, #tpu.memory_space<vmem>>, vector<1x128xf32>
    %118 = vector.shape_cast %117 : vector<1x128xf32> to vector<128xf32>
    %119 = vector.shape_cast %118 : vector<128xf32> to vector<1x128xf32>
    %120 = vector.broadcast %119 : vector<1x128xf32> to vector<16x128xf32>
    %121 = arith.addf %116, %120 : vector<16x128xf32>
    %122 = arith.addf %121, %11 : vector<16x128xf32>
    %c11_72 = arith.constant 11 : index
    %c0_73 = arith.constant 0 : index
    %123 = vector.load %arg3[%c11_72, %c0_73] : memref<12x128xf32, #tpu.memory_space<vmem>>, vector<1x128xf32>
    %124 = vector.shape_cast %123 : vector<1x128xf32> to vector<128xf32>
    %125 = vector.shape_cast %124 : vector<128xf32> to vector<1x128xf32>
    %126 = vector.broadcast %125 : vector<1x128xf32> to vector<16x128xf32>
    %127 = arith.mulf %126, %122 : vector<16x128xf32>
    %128 = arith.addf %1, %127 : vector<16x128xf32>
    %c0_74 = arith.constant 0 : index
    %c0_75 = arith.constant 0 : index
    %c0_76 = arith.constant 0 : index
    %129 = vector.load %arg6[%c0_74, %c0_75, %c0_76] : memref<1x16x128xf32, #tpu.memory_space<vmem>>, vector<1x16x128xf32>
    %130 = vector.shape_cast %129 : vector<1x16x128xf32> to vector<16x128xf32>
    %131 = vector.shape_cast %128 : vector<16x128xf32> to vector<1x16x128xf32>
    tpu.vector_store %arg6[%c0_74, %c0_75, %c0_76], %131 {strides = array<i32>} : memref<1x16x128xf32, #tpu.memory_space<vmem>>, vector<1x16x128xf32>,
    %cst_77 = arith.constant dense<0.000000e+00> : vector<128xf32>
    %132 = vector.multi_reduction <add>, %128, %cst_77 [0] : vector<16x128xf32> to vector<128xf32>
    %133 = vector.shape_cast %132 : vector<128xf32> to vector<1x128xf32>
    %c0_78 = arith.constant 0 : index
    %c0_79 = arith.constant 0 : index
    %c0_80 = arith.constant 0 : index
    %134 = vector.load %arg7[%c0_78, %c0_79, %c0_80] : memref<1x2x128xf32, #tpu.memory_space<vmem>>, vector<1x1x128xf32>
    %135 = vector.shape_cast %134 : vector<1x1x128xf32> to vector<1x128xf32>
    %136 = vector.shape_cast %133 : vector<1x128xf32> to vector<1x1x128xf32>
    tpu.vector_store %arg7[%c0_78, %c0_79, %c0_80], %136 {strides = array<i32>} : memref<1x2x128xf32, #tpu.memory_space<vmem>>, vector<1x1x128xf32>,
    %137 = arith.mulf %128, %128 : vector<16x128xf32>
    %cst_81 = arith.constant dense<0.000000e+00> : vector<128xf32>
    %138 = vector.multi_reduction <add>, %137, %cst_81 [0] : vector<16x128xf32> to vector<128xf32>
    %139 = vector.shape_cast %138 : vector<128xf32> to vector<1x128xf32>
    %c0_82 = arith.constant 0 : index
    %c1_83 = arith.constant 1 : index
    %c0_84 = arith.constant 0 : index
    %140 = vector.load %arg7[%c0_82, %c1_83, %c0_84] : memref<1x2x128xf32, #tpu.memory_space<vmem>>, vector<1x1x128xf32>
    %141 = vector.shape_cast %140 : vector<1x1x128xf32> to vector<1x128xf32>
    %142 = vector.shape_cast %139 : vector<1x128xf32> to vector<1x1x128xf32>
    tpu.vector_store %arg7[%c0_82, %c1_83, %c0_84], %142 {strides = array<i32>} : memref<1x2x128xf32, #tpu.memory_space<vmem>>, vector<1x1x128xf32>,
    return
  }
  func.func @transform_0(%arg0: i32) -> (i32, i32, i32) {
    %c0_i32 = arith.constant 0 : i32
    %c0_i32_0 = arith.constant 0 : i32
    %c0_i32_1 = arith.constant 0 : i32
    return %arg0, %c0_i32, %c0_i32_0 : i32, i32, i32
  }
  func.func @transform_1(%arg0: i32) -> (i32, i32, i32) {
    %c0_i32 = arith.constant 0 : i32
    %c0_i32_0 = arith.constant 0 : i32
    %c0_i32_1 = arith.constant 0 : i32
    return %arg0, %c0_i32, %c0_i32_0 : i32, i32, i32
  }
  func.func @transform_2(%arg0: i32) -> (i32, i32) {
    %c0_i32 = arith.constant 0 : i32
    %c0_i32_0 = arith.constant 0 : i32
    %c0_i32_1 = arith.constant 0 : i32
    return %c0_i32, %c0_i32_0 : i32, i32
  }
  func.func @transform_3(%arg0: i32) -> (i32, i32) {
    %c0_i32 = arith.constant 0 : i32
    %c0_i32_0 = arith.constant 0 : i32
    %c0_i32_1 = arith.constant 0 : i32
    return %c0_i32, %c0_i32_0 : i32, i32
  }
  func.func @transform_4(%arg0: i32) -> (i32, i32) {
    %c0_i32 = arith.constant 0 : i32
    %c0_i32_0 = arith.constant 0 : i32
    %c0_i32_1 = arith.constant 0 : i32
    return %c0_i32, %c0_i32_0 : i32, i32
  }
  func.func @transform_5(%arg0: i32) -> (i32, i32, i32) {
    %c0_i32 = arith.constant 0 : i32
    %c0_i32_0 = arith.constant 0 : i32
    %c0_i32_1 = arith.constant 0 : i32
    return %arg0, %c0_i32, %c0_i32_0 : i32, i32, i32
  }
  func.func @transform_6(%arg0: i32) -> (i32, i32, i32) {
    %c0_i32 = arith.constant 0 : i32
    %c0_i32_0 = arith.constant 0 : i32
    %c0_i32_1 = arith.constant 0 : i32
    return %arg0, %c0_i32, %c0_i32_0 : i32, i32, i32
  }
}

module attributes {stable_mosaic.version = 11 : i64} {
  func.func @_ffn_kernel(%arg0: i32, %arg1: memref<1x16x128xf32, #tpu.memory_space<vmem>>, %arg2: memref<5x128xf32, #tpu.memory_space<vmem>>, %arg3: memref<3x512xf32, #tpu.memory_space<vmem>>, %arg4: memref<256x512xf32, #tpu.memory_space<vmem>>, %arg5: memref<512x256xf32, #tpu.memory_space<vmem>>, %arg6: memref<1536x512xf32, #tpu.memory_space<vmem>>, %arg7: memref<1x16x128xf32, #tpu.memory_space<vmem>>, %arg8: memref<18x512xf32, #tpu.memory_space<vmem>>) attributes {dimension_semantics = [#tpu.dimension_semantics<parallel>], iteration_bounds = array<i64: 2>, scalar_prefetch = 0 : i64, scratch_operands = 1 : i64, tpu.core_type = #tpu.core_type<tc>, window_params = [{transform_indices = @transform_0, window_bounds = array<i64: 1, 16, 128>}, {pipeline_mode = #tpu.pipeline_mode<synchronous>, transform_indices = @transform_1, window_bounds = array<i64: 5, 128>}, {pipeline_mode = #tpu.pipeline_mode<synchronous>, transform_indices = @transform_2, window_bounds = array<i64: 3, 512>}, {pipeline_mode = #tpu.pipeline_mode<synchronous>, transform_indices = @transform_3, window_bounds = array<i64: 256, 512>}, {pipeline_mode = #tpu.pipeline_mode<synchronous>, transform_indices = @transform_4, window_bounds = array<i64: 512, 256>}, {pipeline_mode = #tpu.pipeline_mode<synchronous>, transform_indices = @transform_5, window_bounds = array<i64: 1536, 512>}, {transform_indices = @transform_6, window_bounds = array<i64: 1, 16, 128>}]} {
    %c0 = arith.constant 0 : index
    %c0_0 = arith.constant 0 : index
    %c0_1 = arith.constant 0 : index
    %0 = vector.load %arg1[%c0, %c0_0, %c0_1] : memref<1x16x128xf32, #tpu.memory_space<vmem>>, vector<1x16x128xf32>
    %1 = vector.shape_cast %0 : vector<1x16x128xf32> to vector<16x128xf32>
    %c0_2 = arith.constant 0 : index
    %c0_3 = arith.constant 0 : index
    %2 = vector.load %arg2[%c0_2, %c0_3] : memref<5x128xf32, #tpu.memory_space<vmem>>, vector<1x128xf32>
    %3 = vector.shape_cast %2 : vector<1x128xf32> to vector<128xf32>
    %4 = vector.shape_cast %3 : vector<128xf32> to vector<1x128xf32>
    %5 = vector.broadcast %4 : vector<1x128xf32> to vector<16x128xf32>
    %6 = arith.mulf %1, %5 : vector<16x128xf32>
    %c1 = arith.constant 1 : index
    %c0_4 = arith.constant 0 : index
    %7 = vector.load %arg2[%c1, %c0_4] : memref<5x128xf32, #tpu.memory_space<vmem>>, vector<1x128xf32>
    %8 = vector.shape_cast %7 : vector<1x128xf32> to vector<128xf32>
    %9 = vector.shape_cast %8 : vector<128xf32> to vector<1x128xf32>
    %10 = vector.broadcast %9 : vector<1x128xf32> to vector<16x128xf32>
    %11 = arith.addf %6, %10 : vector<16x128xf32>
    %c0_5 = arith.constant 0 : index
    %c0_6 = arith.constant 0 : index
    %12 = vector.load %arg4[%c0_5, %c0_6] : memref<256x512xf32, #tpu.memory_space<vmem>>, vector<128x512xf32>
    %cst = arith.constant dense<0.000000e+00> : vector<16x512xf32>
    %13 = tpu.matmul %11, %12, %cst {dimension_numbers = #tpu.dot_dimension_numbers<[1], [0], [0], [1], [0, 0, 1, 1], [], []>} : vector<16x128xf32>, vector<128x512xf32>, vector<16x512xf32> -> vector<16x512xf32>
    %c0_7 = arith.constant 0 : index
    %c0_8 = arith.constant 0 : index
    %14 = vector.load %arg3[%c0_7, %c0_8] : memref<3x512xf32, #tpu.memory_space<vmem>>, vector<1x512xf32>
    %15 = vector.shape_cast %14 : vector<1x512xf32> to vector<512xf32>
    %16 = vector.shape_cast %15 : vector<512xf32> to vector<1x512xf32>
    %17 = vector.broadcast %16 : vector<1x512xf32> to vector<16x512xf32>
    %18 = arith.addf %13, %17 : vector<16x512xf32>
    %cst_9 = arith.constant 0.000000e+00 : f32
    %19 = vector.broadcast %cst_9 : f32 to vector<1x512xf32>
    %c0_10 = arith.constant 0 : index
    %c0_11 = arith.constant 0 : index
    %20 = vector.load %arg8[%c0_10, %c0_11] : memref<18x512xf32, #tpu.memory_space<vmem>>, vector<1x512xf32>
    tpu.vector_store %arg8[%c0_10, %c0_11], %19 {strides = array<i32>} : memref<18x512xf32, #tpu.memory_space<vmem>>, vector<1x512xf32>,
    %c17 = arith.constant 17 : index
    %c0_12 = arith.constant 0 : index
    %21 = vector.load %arg8[%c17, %c0_12] : memref<18x512xf32, #tpu.memory_space<vmem>>, vector<1x512xf32>
    tpu.vector_store %arg8[%c17, %c0_12], %19 {strides = array<i32>} : memref<18x512xf32, #tpu.memory_space<vmem>>, vector<1x512xf32>,
    %c1_13 = arith.constant 1 : index
    %c0_14 = arith.constant 0 : index
    %22 = vector.load %arg8[%c1_13, %c0_14] : memref<18x512xf32, #tpu.memory_space<vmem>>, vector<16x512xf32>
    tpu.vector_store %arg8[%c1_13, %c0_14], %18 {strides = array<i32>} : memref<18x512xf32, #tpu.memory_space<vmem>>, vector<16x512xf32>,
    %c0_15 = arith.constant 0 : index
    %c0_16 = arith.constant 0 : index
    %23 = vector.load %arg8[%c0_15, %c0_16] : memref<18x512xf32, #tpu.memory_space<vmem>>, vector<16x512xf32>
    %c1_17 = arith.constant 1 : index
    %c0_18 = arith.constant 0 : index
    %24 = vector.load %arg8[%c1_17, %c0_18] : memref<18x512xf32, #tpu.memory_space<vmem>>, vector<16x512xf32>
    %c2 = arith.constant 2 : index
    %c0_19 = arith.constant 0 : index
    %25 = vector.load %arg8[%c2, %c0_19] : memref<18x512xf32, #tpu.memory_space<vmem>>, vector<16x512xf32>
    %26 = tpu.concatenate %23, %24, %25 in 1 : vector<16x512xf32>, vector<16x512xf32>, vector<16x512xf32> -> vector<16x1536xf32>
    %c0_20 = arith.constant 0 : index
    %c0_21 = arith.constant 0 : index
    %27 = vector.load %arg6[%c0_20, %c0_21] : memref<1536x512xf32, #tpu.memory_space<vmem>>, vector<1536x512xf32>
    %cst_22 = arith.constant dense<0.000000e+00> : vector<16x512xf32>
    %28 = tpu.matmul %26, %27, %cst_22 {dimension_numbers = #tpu.dot_dimension_numbers<[1], [0], [0], [1], [0, 0, 1, 1], [], []>} : vector<16x1536xf32>, vector<1536x512xf32>, vector<16x512xf32> -> vector<16x512xf32>
    %c1_23 = arith.constant 1 : index
    %c0_24 = arith.constant 0 : index
    %29 = vector.load %arg3[%c1_23, %c0_24] : memref<3x512xf32, #tpu.memory_space<vmem>>, vector<1x512xf32>
    %30 = vector.shape_cast %29 : vector<1x512xf32> to vector<512xf32>
    %31 = vector.shape_cast %30 : vector<512xf32> to vector<1x512xf32>
    %32 = vector.broadcast %31 : vector<1x512xf32> to vector<16x512xf32>
    %33 = arith.addf %28, %32 : vector<16x512xf32>
    %cst_25 = arith.constant 5.000000e-01 : f32
    %34 = vector.broadcast %cst_25 : f32 to vector<16x512xf32>
    %35 = arith.mulf %34, %33 : vector<16x512xf32>
    %cst_26 = arith.constant 0.707106769 : f32
    %36 = vector.broadcast %cst_26 : f32 to vector<16x512xf32>
    %37 = arith.mulf %33, %36 : vector<16x512xf32>
    %cst_27 = arith.constant 0.000000e+00 : f32
    %38 = vector.broadcast %cst_27 : f32 to vector<16x512xf32>
    %39 = arith.cmpf oge, %37, %38 : vector<16x512xf32>
    %cst_28 = arith.constant 1.000000e+00 : f32
    %cst_29 = arith.constant -1.000000e+00 : f32
    %40 = vector.broadcast %cst_28 : f32 to vector<16x512xf32>
    %41 = vector.broadcast %cst_29 : f32 to vector<16x512xf32>
    %42 = arith.select %39, %40, %41 : vector<16x512xi1>, vector<16x512xf32>
    %43 = math.absf %37 : vector<16x512xf32>
    %cst_30 = arith.constant 0.327591091 : f32
    %44 = vector.broadcast %cst_30 : f32 to vector<16x512xf32>
    %45 = arith.mulf %44, %43 : vector<16x512xf32>
    %cst_31 = arith.constant 1.000000e+00 : f32
    %46 = vector.broadcast %cst_31 : f32 to vector<16x512xf32>
    %47 = arith.addf %46, %45 : vector<16x512xf32>
    %cst_32 = arith.constant 1.000000e+00 : f32
    %48 = vector.broadcast %cst_32 : f32 to vector<16x512xf32>
    %49 = arith.divf %48, %47 : vector<16x512xf32>
    %cst_33 = arith.constant 1.06140542 : f32
    %50 = vector.broadcast %cst_33 : f32 to vector<16x512xf32>
    %51 = arith.mulf %50, %49 : vector<16x512xf32>
    %cst_34 = arith.constant -1.45315206 : f32
    %52 = vector.broadcast %cst_34 : f32 to vector<16x512xf32>
    %53 = arith.addf %51, %52 : vector<16x512xf32>
    %54 = arith.mulf %53, %49 : vector<16x512xf32>
    %cst_35 = arith.constant 1.42141378 : f32
    %55 = vector.broadcast %cst_35 : f32 to vector<16x512xf32>
    %56 = arith.addf %54, %55 : vector<16x512xf32>
    %57 = arith.mulf %56, %49 : vector<16x512xf32>
    %cst_36 = arith.constant -0.284496725 : f32
    %58 = vector.broadcast %cst_36 : f32 to vector<16x512xf32>
    %59 = arith.addf %57, %58 : vector<16x512xf32>
    %60 = arith.mulf %59, %49 : vector<16x512xf32>
    %cst_37 = arith.constant 0.254829586 : f32
    %61 = vector.broadcast %cst_37 : f32 to vector<16x512xf32>
    %62 = arith.addf %60, %61 : vector<16x512xf32>
    %63 = arith.mulf %62, %49 : vector<16x512xf32>
    %cst_38 = arith.constant 0.000000e+00 : f32
    %64 = vector.broadcast %cst_38 : f32 to vector<16x512xf32>
    %65 = arith.subf %64, %43 : vector<16x512xf32>
    %66 = arith.mulf %65, %43 : vector<16x512xf32>
    %67 = math.exp %66 : vector<16x512xf32>
    %68 = arith.mulf %63, %67 : vector<16x512xf32>
    %cst_39 = arith.constant 1.000000e+00 : f32
    %69 = vector.broadcast %cst_39 : f32 to vector<16x512xf32>
    %70 = arith.subf %69, %68 : vector<16x512xf32>
    %71 = arith.mulf %42, %70 : vector<16x512xf32>
    %cst_40 = arith.constant 1.000000e+00 : f32
    %72 = vector.broadcast %cst_40 : f32 to vector<16x512xf32>
    %73 = arith.addf %72, %71 : vector<16x512xf32>
    %74 = arith.mulf %35, %73 : vector<16x512xf32>
    %c0_41 = arith.constant 0 : index
    %c128 = arith.constant 128 : index
    %75 = vector.load %arg5[%c0_41, %c128] : memref<512x256xf32, #tpu.memory_space<vmem>>, vector<512x128xf32>
    %cst_42 = arith.constant dense<0.000000e+00> : vector<16x128xf32>
    %76 = tpu.matmul %74, %75, %cst_42 {dimension_numbers = #tpu.dot_dimension_numbers<[1], [0], [0], [1], [0, 0, 1, 1], [], []>} : vector<16x512xf32>, vector<512x128xf32>, vector<16x128xf32> -> vector<16x128xf32>
    %c4 = arith.constant 4 : index
    %c0_43 = arith.constant 0 : index
    %77 = vector.load %arg2[%c4, %c0_43] : memref<5x128xf32, #tpu.memory_space<vmem>>, vector<1x128xf32>
    %78 = vector.shape_cast %77 : vector<1x128xf32> to vector<128xf32>
    %79 = vector.shape_cast %78 : vector<128xf32> to vector<1x128xf32>
    %80 = vector.broadcast %79 : vector<1x128xf32> to vector<16x128xf32>
    %81 = arith.addf %76, %80 : vector<16x128xf32>
    %cst_44 = arith.constant 5.000000e-01 : f32
    %82 = vector.broadcast %cst_44 : f32 to vector<16x128xf32>
    %83 = arith.mulf %82, %81 : vector<16x128xf32>
    %cst_45 = arith.constant 0.707106769 : f32
    %84 = vector.broadcast %cst_45 : f32 to vector<16x128xf32>
    %85 = arith.mulf %81, %84 : vector<16x128xf32>
    %cst_46 = arith.constant 0.000000e+00 : f32
    %86 = vector.broadcast %cst_46 : f32 to vector<16x128xf32>
    %87 = arith.cmpf oge, %85, %86 : vector<16x128xf32>
    %cst_47 = arith.constant 1.000000e+00 : f32
    %cst_48 = arith.constant -1.000000e+00 : f32
    %88 = vector.broadcast %cst_47 : f32 to vector<16x128xf32>
    %89 = vector.broadcast %cst_48 : f32 to vector<16x128xf32>
    %90 = arith.select %87, %88, %89 : vector<16x128xi1>, vector<16x128xf32>
    %91 = math.absf %85 : vector<16x128xf32>
    %cst_49 = arith.constant 0.327591091 : f32
    %92 = vector.broadcast %cst_49 : f32 to vector<16x128xf32>
    %93 = arith.mulf %92, %91 : vector<16x128xf32>
    %cst_50 = arith.constant 1.000000e+00 : f32
    %94 = vector.broadcast %cst_50 : f32 to vector<16x128xf32>
    %95 = arith.addf %94, %93 : vector<16x128xf32>
    %cst_51 = arith.constant 1.000000e+00 : f32
    %96 = vector.broadcast %cst_51 : f32 to vector<16x128xf32>
    %97 = arith.divf %96, %95 : vector<16x128xf32>
    %cst_52 = arith.constant 1.06140542 : f32
    %98 = vector.broadcast %cst_52 : f32 to vector<16x128xf32>
    %99 = arith.mulf %98, %97 : vector<16x128xf32>
    %cst_53 = arith.constant -1.45315206 : f32
    %100 = vector.broadcast %cst_53 : f32 to vector<16x128xf32>
    %101 = arith.addf %99, %100 : vector<16x128xf32>
    %102 = arith.mulf %101, %97 : vector<16x128xf32>
    %cst_54 = arith.constant 1.42141378 : f32
    %103 = vector.broadcast %cst_54 : f32 to vector<16x128xf32>
    %104 = arith.addf %102, %103 : vector<16x128xf32>
    %105 = arith.mulf %104, %97 : vector<16x128xf32>
    %cst_55 = arith.constant -0.284496725 : f32
    %106 = vector.broadcast %cst_55 : f32 to vector<16x128xf32>
    %107 = arith.addf %105, %106 : vector<16x128xf32>
    %108 = arith.mulf %107, %97 : vector<16x128xf32>
    %cst_56 = arith.constant 0.254829586 : f32
    %109 = vector.broadcast %cst_56 : f32 to vector<16x128xf32>
    %110 = arith.addf %108, %109 : vector<16x128xf32>
    %111 = arith.mulf %110, %97 : vector<16x128xf32>
    %cst_57 = arith.constant 0.000000e+00 : f32
    %112 = vector.broadcast %cst_57 : f32 to vector<16x128xf32>
    %113 = arith.subf %112, %91 : vector<16x128xf32>
    %114 = arith.mulf %113, %91 : vector<16x128xf32>
    %115 = math.exp %114 : vector<16x128xf32>
    %116 = arith.mulf %111, %115 : vector<16x128xf32>
    %cst_58 = arith.constant 1.000000e+00 : f32
    %117 = vector.broadcast %cst_58 : f32 to vector<16x128xf32>
    %118 = arith.subf %117, %116 : vector<16x128xf32>
    %119 = arith.mulf %90, %118 : vector<16x128xf32>
    %cst_59 = arith.constant 1.000000e+00 : f32
    %120 = vector.broadcast %cst_59 : f32 to vector<16x128xf32>
    %121 = arith.addf %120, %119 : vector<16x128xf32>
    %122 = arith.mulf %83, %121 : vector<16x128xf32>
    %c2_60 = arith.constant 2 : index
    %c0_61 = arith.constant 0 : index
    %123 = vector.load %arg3[%c2_60, %c0_61] : memref<3x512xf32, #tpu.memory_space<vmem>>, vector<1x512xf32>
    %124 = vector.shape_cast %123 : vector<1x512xf32> to vector<512xf32>
    %125 = vector.shape_cast %124 : vector<512xf32> to vector<1x512xf32>
    %126 = vector.broadcast %125 : vector<1x512xf32> to vector<16x512xf32>
    %127 = arith.mulf %74, %126 : vector<16x512xf32>
    %c128_62 = arith.constant 128 : index
    %c0_63 = arith.constant 0 : index
    %128 = vector.load %arg4[%c128_62, %c0_63] : memref<256x512xf32, #tpu.memory_space<vmem>>, vector<128x512xf32>
    %cst_64 = arith.constant dense<0.000000e+00> : vector<16x512xf32>
    %129 = tpu.matmul %122, %128, %cst_64 {dimension_numbers = #tpu.dot_dimension_numbers<[1], [0], [0], [1], [0, 0, 1, 1], [], []>} : vector<16x128xf32>, vector<128x512xf32>, vector<16x512xf32> -> vector<16x512xf32>
    %130 = arith.subf %127, %129 : vector<16x512xf32>
    %c0_65 = arith.constant 0 : index
    %c0_66 = arith.constant 0 : index
    %131 = vector.load %arg5[%c0_65, %c0_66] : memref<512x256xf32, #tpu.memory_space<vmem>>, vector<512x128xf32>
    %cst_67 = arith.constant dense<0.000000e+00> : vector<16x128xf32>
    %132 = tpu.matmul %130, %131, %cst_67 {dimension_numbers = #tpu.dot_dimension_numbers<[1], [0], [0], [1], [0, 0, 1, 1], [], []>} : vector<16x512xf32>, vector<512x128xf32>, vector<16x128xf32> -> vector<16x128xf32>
    %c2_68 = arith.constant 2 : index
    %c0_69 = arith.constant 0 : index
    %133 = vector.load %arg2[%c2_68, %c0_69] : memref<5x128xf32, #tpu.memory_space<vmem>>, vector<1x128xf32>
    %134 = vector.shape_cast %133 : vector<1x128xf32> to vector<128xf32>
    %135 = vector.shape_cast %134 : vector<128xf32> to vector<1x128xf32>
    %136 = vector.broadcast %135 : vector<1x128xf32> to vector<16x128xf32>
    %137 = arith.addf %132, %136 : vector<16x128xf32>
    %c3 = arith.constant 3 : index
    %c0_70 = arith.constant 0 : index
    %138 = vector.load %arg2[%c3, %c0_70] : memref<5x128xf32, #tpu.memory_space<vmem>>, vector<1x128xf32>
    %139 = vector.shape_cast %138 : vector<1x128xf32> to vector<128xf32>
    %140 = vector.shape_cast %139 : vector<128xf32> to vector<1x128xf32>
    %141 = vector.broadcast %140 : vector<1x128xf32> to vector<16x128xf32>
    %142 = arith.mulf %141, %137 : vector<16x128xf32>
    %143 = arith.addf %1, %142 : vector<16x128xf32>
    %c0_71 = arith.constant 0 : index
    %c0_72 = arith.constant 0 : index
    %c0_73 = arith.constant 0 : index
    %144 = vector.load %arg7[%c0_71, %c0_72, %c0_73] : memref<1x16x128xf32, #tpu.memory_space<vmem>>, vector<1x16x128xf32>
    %145 = vector.shape_cast %144 : vector<1x16x128xf32> to vector<16x128xf32>
    %146 = vector.shape_cast %143 : vector<16x128xf32> to vector<1x16x128xf32>
    tpu.vector_store %arg7[%c0_71, %c0_72, %c0_73], %146 {strides = array<i32>} : memref<1x16x128xf32, #tpu.memory_space<vmem>>, vector<1x16x128xf32>,
    return
  }
  func.func @transform_0(%arg0: i32) -> (i32, i32, i32) {
    %c0_i32 = arith.constant 0 : i32
    %c0_i32_0 = arith.constant 0 : i32
    %c0_i32_1 = arith.constant 0 : i32
    return %arg0, %c0_i32, %c0_i32_0 : i32, i32, i32
  }
  func.func @transform_1(%arg0: i32) -> (i32, i32) {
    %c0_i32 = arith.constant 0 : i32
    %c0_i32_0 = arith.constant 0 : i32
    %c0_i32_1 = arith.constant 0 : i32
    return %c0_i32, %c0_i32_0 : i32, i32
  }
  func.func @transform_2(%arg0: i32) -> (i32, i32) {
    %c0_i32 = arith.constant 0 : i32
    %c0_i32_0 = arith.constant 0 : i32
    %c0_i32_1 = arith.constant 0 : i32
    return %c0_i32, %c0_i32_0 : i32, i32
  }
  func.func @transform_3(%arg0: i32) -> (i32, i32) {
    %c0_i32 = arith.constant 0 : i32
    %c0_i32_0 = arith.constant 0 : i32
    %c0_i32_1 = arith.constant 0 : i32
    return %c0_i32, %c0_i32_0 : i32, i32
  }
  func.func @transform_4(%arg0: i32) -> (i32, i32) {
    %c0_i32 = arith.constant 0 : i32
    %c0_i32_0 = arith.constant 0 : i32
    %c0_i32_1 = arith.constant 0 : i32
    return %c0_i32, %c0_i32_0 : i32, i32
  }
  func.func @transform_5(%arg0: i32) -> (i32, i32) {
    %c0_i32 = arith.constant 0 : i32
    %c0_i32_0 = arith.constant 0 : i32
    %c0_i32_1 = arith.constant 0 : i32
    return %c0_i32, %c0_i32_0 : i32, i32
  }
  func.func @transform_6(%arg0: i32) -> (i32, i32, i32) {
    %c0_i32 = arith.constant 0 : i32
    %c0_i32_0 = arith.constant 0 : i32
    %c0_i32_1 = arith.constant 0 : i32
    return %arg0, %c0_i32, %c0_i32_0 : i32, i32, i32
  }
}

</mosaic_0001>

<bundles_post_ra>
// kernel: moga_block.2
= control target key start
LH: loop header
LB: loop body
LE: loop exit
PB: predicated region body
PF: predicated region fallthrough
CT: control target
= control target key end

     0   :  { %s2699_s21 = smov 0   ;;  %s3830_s0 = inlined_call_operand.vmem [shape: f32[2,16,128], index: 0, kind: input, shape index: {}]   ;;  %s3831_s1 = inlined_call_operand.vmem [shape: f32[2,1,128], index: 1, kind: input, shape index: {}]   ;;  %s3832_s2 = inlined_call_operand.vmem [shape: f32[12,128], index: 2, kind: input, shape index: {}]   ;;  %s3833_s3 = inlined_call_operand.vmem [shape: f32[128,512], index: 3, kind: input, shape index: {}]   ;;  %s3834_s4 = inlined_call_operand.vmem [shape: f32[2176,128], index: 4, kind: input, shape index: {}]   ;;  %s3835_s5 = inlined_call_operand.vmem [shape: f32[2,16,128], index: 5, kind: output, shape index: {0}]   ;;  %s3836_s6 = inlined_call_operand.vmem [shape: f32[2,2,128], index: 6, kind: output, shape index: {1}]  }
   0x1 LB: > { %s1950_s22 = sadd.s32 4294967295, %s2661_s21   ;;  %p1954_p0 = scmp.ge.s32.totalorder %s2661_s21, 1  ;;  %s2661_s21 = sphi %s2699_s21, %s17_s21  }
   0x2   : > { %p223_p1 = scmp.lt.s32.totalorder %s2661_s21, 3 }
   0x4   : > { %p224_p2 = pnand %p1954_p0, %p223_p1 }
   0x5   : > { %p260_p3 = scmp.lt.s32.totalorder (!%p224_p2), %s1950_s22, 1 }
   0x6   : > { %227 = sbr.rel (%p224_p2) target bundleno = 1286 (0x506), region = 40 }
   0xb   : > { %v308_v0 = vld [vmem:[%s3833_s3 + $0x1e0] sm:$0xff]  ;;  %s3838_s22 = smov (!%p260_p3, %s1950_s22), 1  ;;  %v434_v24 = vld [vmem:[%s3833_s3 + $0x1e8] sm:$0xff]  ;;  %v562_v29 = vld [vmem:[%s3834_s4 + $0xf8] sm:$0xff] }
   0xc   : > { %v307_v1 = vld [vmem:[%s3833_s3 + $0x1c0] sm:$0xff]  ;;  %2375 = vmatprep.subr.mxu0 %v308_v0  ;;  %s1981_s7 = sshll.u32 %s3838_s22, 4  ;;  %2410 = vmatprep.subr.mxu1 %v434_v24  ;;  %v433_v25 = vld [vmem:[%s3833_s3 + $0x1c8] sm:$0xff]  ;;  %v546_v30 = vld [vmem:[%s3834_s4 + $0x78] sm:$0xff]  ;;  %s267_s25 = scalar_lea.vmem %s3831_s1, %s3838_s22 }
   0xd   : > { %2376 = vmatpush3.msra.mxu0 %v308_v0  ;;  %v306_v2 = vld [vmem:[%s3833_s3 + $0x1a0] sm:$0xff]  ;;  %s2727_s10 = scalar_lea.vmem %s3830_s0, %s1981_s7  ;;  %2411 = vmatpush3.msra.mxu1 %v434_v24  ;;  %v432_v26 = vld [vmem:[%s3833_s3 + $0x1a8] sm:$0xff]  ;;  %v561_v32 = vld [vmem:[%s3834_s4 + $0xf0] sm:$0xff]  ;;  %s272_s26 = scalar_lea.vmem %s3835_s5, %s1981_s7 }
   0xe   : > { %2377 = vmatprep.subr.mxu0 %v307_v1  ;;  %v305_v3 = vld [vmem:[%s3833_s3 + $0x180] sm:$0xff]  ;;  %v278_v18 = vld [vmem:[%s2727_s10 + $0x8] sm:$0xff]  ;;  %2412 = vmatprep.subr.mxu1 %v433_v25  ;;  %v545_v33 = vld [vmem:[%s3834_s4 + $0x70] sm:$0xff]  ;;  %s1959_s27 = sshll.u32 %s3838_s22, 1 }
   0xf   : > { %2378 = vmatpush3.msra.mxu0 %v307_v1  ;;  %v1960_v4 = vld [vmem:[%s3832_s2] ss:$0 sm:$0xff]  ;;  %v1961_v7 = vld [vmem:[%s3832_s2 + $0x1] ss:$0 sm:$0xff]  ;;  %2413 = vmatpush3.msra.mxu1 %v433_v25  ;;  %v431_v27 = vld [vmem:[%s3833_s3 + $0x188] sm:$0xff] }
  0x10   : > { %2379 = vmatprep.subr.mxu0 %v306_v2  ;;  %v304_v5 = vld [vmem:[%s3833_s3 + $0x160] sm:$0xff]  ;;  %v285_v20 = vmul.f32 %v1960_v4, %v278_v18  ;;  %2414 = vmatprep.subr.mxu1 %v432_v26  ;;  %v430_v28 = vld [vmem:[%s3833_s3 + $0x168] sm:$0xff]  ;;  %v558_v41 = vld [vmem:[%s3834_s4 + $0xd8] sm:$0xff] }
  0x11   : > { %2380 = vmatpush3.msra.mxu0 %v306_v2  ;;  %v277_v6 = vld [vmem:[%s2727_s10] sm:$0xff]  ;;  %2415 = vmatpush3.msra.mxu1 %v432_v26  ;;  %v429_v31 = vld [vmem:[%s3833_s3 + $0x148] sm:$0xff]  ;;  %v542_v42 = vld [vmem:[%s3834_s4 + $0x58] sm:$0xff]  ;;  %v2663_v2 = vmov 0.0  }
  0x12   : > { %2381 = vmatprep.subr.mxu0 %v305_v3  ;;  %v284_v8 = vmul.f32 %v1960_v4, %v277_v6  ;;  %v303_v9 = vld [vmem:[%s3833_s3 + $0x140] sm:$0xff]  ;;  %v2776_v23 = vadd.f32 %v1961_v7, %v285_v20  ;;  %2416 = vmatprep.subr.mxu1 %v431_v27  ;;  %v428_v34 = vld [vmem:[%s3833_s3 + $0x128] sm:$0xff]  ;;  %v557_v44 = vld [vmem:[%s3834_s4 + $0xd0] sm:$0xff]  ;;  %516 = vst [vmem:[#allocation2 + $0x8] sm:$0x1] %v2663_v2 }
  0x13   : > { %2382 = vmatpush3.msra.mxu0 %v305_v3  ;;  %v302_v11 = vld [vmem:[%s3833_s3 + $0x120] sm:$0xff]  ;;  %2417 = vmatpush3.msra.mxu1 %v431_v27  ;;  %v560_v35 = vld [vmem:[%s3834_s4 + $0xe8] sm:$0xff]  ;;  %v541_v45 = vld [vmem:[%s3834_s4 + $0x50] sm:$0xff]  ;;  %515 = vst [vmem:[#allocation2] sm:$0xff] %v2663_v2 }
  0x14   : > { %2383 = vmatprep.subr.mxu0 %v304_v5  ;;  %v2742_v10 = vadd.f32 %v1961_v7, %v284_v8  ;;  %v301_v12 = vld [vmem:[%s3833_s3 + $0x100] sm:$0xff]  ;;  %2418 = vmatprep.subr.mxu1 %v430_v28  ;;  %v544_v36 = vld [vmem:[%s3834_s4 + $0x68] sm:$0xff]  ;;  %v554_v53 = vld [vmem:[%s3834_s4 + $0xb8] sm:$0xff]  ;;  %517 = vst [vmem:[#allocation2 + $0x19] sm:$0xff] %v2663_v2 }
  0x15   : > { %2384 = vmatpush3.msra.mxu0 %v304_v5  ;;  %v300_v13 = vld [vmem:[%s3833_s3 + $0xe0] sm:$0xff]  ;;  %2419 = vmatpush3.msra.mxu1 %v430_v28  ;;  %v427_v37 = vld [vmem:[%s3833_s3 + $0x108] sm:$0xff]  ;;  %v538_v54 = vld [vmem:[%s3834_s4 + $0x38] sm:$0xff]  ;;  %518 = vst [vmem:[#allocation2 + $0x21] sm:$0x1] %v2663_v2 }
  0x16   : > { %2385 = vmatprep.subr.mxu0 %v303_v9  ;;  %2407 = vmatprep.mubr.f32.mxu0 %v2742_v10  ;;  %v299_v14 = vld [vmem:[%s3833_s3 + $0xc0] sm:$0xff]  ;;  %v426_v40 = vld [vmem:[%s3833_s3 + $0xe8] sm:$0xff]  ;;  %v553_v56 = vld [vmem:[%s3834_s4 + $0xb0] sm:$0xff] }
  0x17   : > { %2386 = vmatpush3.msra.mxu0 %v303_v9  ;;  %v298_v15 = vld [vmem:[%s3833_s3 + $0xa0] sm:$0xff]  ;;  %2420 = vmatprep.subr.mxu1 %v429_v31  ;;  %v425_v43 = vld [vmem:[%s3833_s3 + $0xc8] sm:$0xff]  ;;  %v537_v57 = vld [vmem:[%s3834_s4 + $0x30] sm:$0xff] }
  0x18   : > { %2387 = vmatprep.subr.mxu0 %v302_v11  ;;  %v297_v16 = vld [vmem:[%s3833_s3 + $0x80] sm:$0xff]  ;;  %2421 = vmatpush3.msra.mxu1 %v429_v31  ;;  %v424_v46 = vld [vmem:[%s3833_s3 + $0xa8] sm:$0xff]  ;;  %v550_v0 = vld [vmem:[%s3834_s4 + $0x98] sm:$0xff] }
  0x19   : > { %2388 = vmatpush3.msra.mxu0 %v302_v11  ;;  %v296_v17 = vld [vmem:[%s3833_s3 + $0x60] sm:$0xff]  ;;  %2422 = vmatprep.subr.mxu1 %v428_v34  ;;  %v556_v47 = vld [vmem:[%s3834_s4 + $0xc8] sm:$0xff]  ;;  %v594_v1 = vld [vmem:[%s3834_s4 + $0x1f8] sm:$0xff] }
  0x1a   : > { %2389 = vmatprep.subr.mxu0 %v301_v12  ;;  %v295_v19 = vld [vmem:[%s3833_s3 + $0x40] sm:$0xff]  ;;  %2423 = vmatpush3.msra.mxu1 %v428_v34  ;;  %v540_v48 = vld [vmem:[%s3834_s4 + $0x48] sm:$0xff]  ;;  %v534_v3 = vld [vmem:[%s3834_s4 + $0x18] sm:$0xff] }
  0x1b   : > { %2390 = vmatpush3.msra.mxu0 %v301_v12  ;;  %v294_v21 = vld [vmem:[%s3833_s3 + $0x20] sm:$0xff]  ;;  %2424 = vmatprep.subr.mxu1 %v427_v37  ;;  %v423_v49 = vld [vmem:[%s3833_s3 + $0x88] sm:$0xff]  ;;  %v549_v4 = vld [vmem:[%s3834_s4 + $0x90] sm:$0xff] }
  0x1c   : > { %2391 = vmatprep.subr.mxu0 %v300_v13  ;;  %v293_v22 = vld [vmem:[%s3833_s3] sm:$0xff]  ;;  %2425 = vmatpush3.msra.mxu1 %v427_v37  ;;  %v422_v52 = vld [vmem:[%s3833_s3 + $0x68] sm:$0xff]  ;;  %v533_v5 = vld [vmem:[%s3834_s4 + $0x10] sm:$0xff] }
  0x1d   : > { %2392 = vmatpush3.msra.mxu0 %v300_v13  ;;  %v559_v38 = vld [vmem:[%s3834_s4 + $0xe0] sm:$0xff]  ;;  %2426 = vmatprep.subr.mxu1 %v426_v40  ;;  %v421_v55 = vld [vmem:[%s3833_s3 + $0x48] sm:$0xff]  ;;  %v610_v11 = vld [vmem:[%s3834_s4 + $0x278] sm:$0xff] }
  0x1e   : > { %2393 = vmatprep.subr.mxu0 %v299_v14  ;;  %v543_v39 = vld [vmem:[%s3834_s4 + $0x60] sm:$0xff]  ;;  %2427 = vmatpush3.msra.mxu1 %v426_v40  ;;  %v420_v58 = vld [vmem:[%s3833_s3 + $0x28] sm:$0xff]  ;;  %v578_v34 = vld [vmem:[%s3834_s4 + $0x178] sm:$0xff] }
  0x1f   : > { %2394 = vmatpush3.msra.mxu0 %v299_v14  ;;  %2428 = vmatprep.subr.mxu1 %v425_v43  ;;  %v555_v50 = vld [vmem:[%s3834_s4 + $0xc0] sm:$0xff]  ;;  %v552_v59 = vld [vmem:[%s3834_s4 + $0xa8] sm:$0xff] }
  0x20   : > { %2395 = vmatprep.subr.mxu0 %v298_v15  ;;  %2429 = vmatpush3.msra.mxu1 %v425_v43  ;;  %v539_v51 = vld [vmem:[%s3834_s4 + $0x40] sm:$0xff]  ;;  %v536_v60 = vld [vmem:[%s3834_s4 + $0x28] sm:$0xff] }
  0x21   : > { %2396 = vmatpush3.msra.mxu0 %v298_v15  ;;  %2430 = vmatprep.subr.mxu1 %v424_v46  ;;  %v419_v61 = vld [vmem:[%s3833_s3 + $0x8] sm:$0xff]  ;;  %v551_v62 = vld [vmem:[%s3834_s4 + $0xa0] sm:$0xff] }
  0x22   : > { %2397 = vmatprep.subr.mxu0 %v297_v16  ;;  %2431 = vmatpush3.msra.mxu1 %v424_v46  ;;  %v535_v63 = vld [vmem:[%s3834_s4 + $0x20] sm:$0xff]  ;;  %v548_v6 = vld [vmem:[%s3834_s4 + $0x88] sm:$0xff]  ;;  %v589_v46 = vld [vmem:[%s3834_s4 + $0x1d0] sm:$0xff] }
  0x23   : > { %2398 = vmatpush3.msra.mxu0 %v297_v16  ;;  %2432 = vmatprep.subr.mxu1 %v423_v49  ;;  %v532_v7 = vld [vmem:[%s3834_s4 + $0x8] sm:$0xff]  ;;  %v547_v8 = vld [vmem:[%s3834_s4 + $0x80] sm:$0xff] }
  0x24   : > { %2399 = vmatprep.subr.mxu0 %v296_v17  ;;  %2433 = vmatpush3.msra.mxu1 %v423_v49  ;;  %v531_v9 = vld [vmem:[%s3834_s4] sm:$0xff]  ;;  %v592_v37 = vld [vmem:[%s3834_s4 + $0x1e8] sm:$0xff]  ;;  %v573_v49 = vld [vmem:[%s3834_s4 + $0x150] sm:$0xff] }
  0x25   : > { %2400 = vmatpush3.msra.mxu0 %v296_v17  ;;  %2434 = vmatprep.subr.mxu1 %v422_v52  ;;  %v1962_v12 = vld [vmem:[%s3832_s2 + $0x2] ss:$0 sm:$0xff]  ;;  %v1963_v14 = vld [vmem:[%s3832_s2 + $0x3] ss:$0 sm:$0xff]  ;;  %v1964_v16 = vld [vmem:[%s267_s25] ss:$0 sm:$0xff] }
  0x26   : > { %2401 = vmatprep.subr.mxu0 %v295_v19  ;;  %2435 = vmatpush3.msra.mxu1 %v422_v52  ;;  %v575_v40 = vld [vmem:[%s3834_s4 + $0x160] sm:$0xff]  ;;  %v572_v52 = vld [vmem:[%s3834_s4 + $0x148] sm:$0xff] }
  0x27   : > { %2402 = vmatpush3.msra.mxu0 %v295_v19  ;;  %2436 = vmatprep.subr.mxu1 %v421_v55 }
  0x28   : > { %2403 = vmatprep.subr.mxu0 %v294_v21  ;;  %2437 = vmatpush3.msra.mxu1 %v421_v55  ;;  %v607_v55 = vld [vmem:[%s3834_s4 + $0x260] sm:$0xff] }
  0x29   : > { %2404 = vmatpush3.msra.mxu0 %v294_v21  ;;  %2438 = vmatprep.subr.mxu1 %v420_v58 }
  0x2a   : > { %2405 = vmatprep.subr.mxu0 %v293_v22  ;;  %2439 = vmatpush3.msra.mxu1 %v420_v58  ;;  %v586_v58 = vld [vmem:[%s3834_s4 + $0x1b8] sm:$0xff] }
  0x2b   : > { %2406 = vmatpush3.msra.mxu0 %v293_v22  ;;  %2440 = vmatprep.subr.mxu1 %v419_v61 }
  0x2c   : > { %2408 = vmatmul.mubr.f32.vlgmr.msra.gmra.mxu0 %v2776_v23  ;;  %2019 = vmatprep.subr.mxu0 %v562_v29 }
  0x2d   : > { %2020 = vmatpush3.msra.mxu0 %v546_v30  ;;  %2441 = vmatpush3.msra.mxu1 %v419_v61  ;;  %v585_v61 = vld [vmem:[%s3834_s4 + $0x1b0] sm:$0xff] }
  0x2e   : > { %2021 = vmatprep.subr.mxu0 %v561_v32  ;;  %2057 = vmatprep.subr.mxu1 %v594_v1  ;;  %v604_v1 = vld [vmem:[%s3834_s4 + $0x248] sm:$0xff] }
  0x2f   : > { %2022 = vmatpush3.msra.mxu0 %v545_v33 }
  0x30   : > { %2023 = vmatprep.subr.mxu0 %v560_v35  ;;  %v593_v35 = vld [vmem:[%s3834_s4 + $0x1f0] sm:$0xff] }
  0x31   : > { %2024 = vmatpush3.msra.mxu0 %v544_v36  ;;  %v577_v36 = vld [vmem:[%s3834_s4 + $0x170] sm:$0xff] }
  0x32   : > { %2025 = vmatprep.subr.mxu0 %v559_v38  ;;  %v576_v38 = vld [vmem:[%s3834_s4 + $0x168] sm:$0xff] }
  0x33   : > { %2026 = vmatpush3.msra.mxu0 %v543_v39  ;;  %v591_v39 = vld [vmem:[%s3834_s4 + $0x1e0] sm:$0xff] }
  0x34   : > { %2027 = vmatprep.subr.mxu0 %v558_v41  ;;  %v590_v41 = vld [vmem:[%s3834_s4 + $0x1d8] sm:$0xff] }
  0x35   : > { %2028 = vmatpush3.msra.mxu0 %v542_v42  ;;  %v574_v42 = vld [vmem:[%s3834_s4 + $0x158] sm:$0xff] }
  0x36   : > { %2029 = vmatprep.subr.mxu0 %v557_v44 }
  0x37   : > { %2030 = vmatpush3.msra.mxu0 %v541_v45 }
  0x38   : > { %2031 = vmatprep.subr.mxu0 %v556_v47  ;;  %v609_v47 = vld [vmem:[%s3834_s4 + $0x270] sm:$0xff] }
  0x39   : > { %2032 = vmatpush3.msra.mxu0 %v540_v48 }
  0x3a   : > { %2033 = vmatprep.subr.mxu0 %v555_v50  ;;  %v588_v50 = vld [vmem:[%s3834_s4 + $0x1c8] sm:$0xff] }
  0x3b   : > { %2034 = vmatpush3.msra.mxu0 %v539_v51  ;;  %v608_v51 = vld [vmem:[%s3834_s4 + $0x268] sm:$0xff] }
  0x3c   : > { %2035 = vmatprep.subr.mxu0 %v554_v53  ;;  %v587_v53 = vld [vmem:[%s3834_s4 + $0x1c0] sm:$0xff] }
  0x3d   : > { %2036 = vmatpush3.msra.mxu0 %v538_v54 }
  0x3e   : > { %2037 = vmatprep.subr.mxu0 %v553_v56  ;;  %v571_v56 = vld [vmem:[%s3834_s4 + $0x140] sm:$0xff] }
  0x3f   : > { %2038 = vmatpush3.msra.mxu0 %v537_v57 }
  0x40   : > { %2039 = vmatprep.subr.mxu0 %v552_v59  ;;  %v606_v59 = vld [vmem:[%s3834_s4 + $0x258] sm:$0xff] }
  0x41   : > { %2040 = vmatpush3.msra.mxu0 %v536_v60  ;;  %v570_v60 = vld [vmem:[%s3834_s4 + $0x138] sm:$0xff] }
  0x42   : > { %2041 = vmatprep.subr.mxu0 %v551_v62  ;;  %v605_v62 = vld [vmem:[%s3834_s4 + $0x250] sm:$0xff] }
  0x43   : > { %2042 = vmatpush3.msra.mxu0 %v535_v63  ;;  %v569_v63 = vld [vmem:[%s3834_s4 + $0x130] sm:$0xff] }
  0x44   : > { %2043 = vmatprep.subr.mxu0 %v550_v0  ;;  %v584_v0 = vld [vmem:[%s3834_s4 + $0x1a8] sm:$0xff] }
  0x45   : > { %2044 = vmatpush3.msra.mxu0 %v534_v3  ;;  %v568_v3 = vld [vmem:[%s3834_s4 + $0x128] sm:$0xff] }
  0x46   : > { %2045 = vmatprep.subr.mxu0 %v549_v4  ;;  %v583_v4 = vld [vmem:[%s3834_s4 + $0x1a0] sm:$0xff] }
  0x47   : > { %2046 = vmatpush3.msra.mxu0 %v533_v5  ;;  %v603_v5 = vld [vmem:[%s3834_s4 + $0x240] sm:$0xff] }
  0x48   : > { %2047 = vmatprep.subr.mxu0 %v548_v6  ;;  %v567_v6 = vld [vmem:[%s3834_s4 + $0x120] sm:$0xff] }
  0x49   : > { %2048 = vmatpush3.msra.mxu0 %v532_v7  ;;  %v582_v7 = vld [vmem:[%s3834_s4 + $0x198] sm:$0xff] }
  0x4a   : > { %2049 = vmatprep.subr.mxu0 %v547_v8  ;;  %v602_v8 = vld [vmem:[%s3834_s4 + $0x238] sm:$0xff] }
  0x4b   : > { %2050 = vmatpush3.msra.mxu0 %v531_v9  ;;  %v566_v9 = vld [vmem:[%s3834_s4 + $0x118] sm:$0xff] }
  0x4c   : > { %2445 = vmatprep.subr.mxu0 %v610_v11 }
  0xec   : > { %v2409_v13 = vpop.f32.mrf.mxu0 }
  0xed   : > { %v386_v15 = vadd.f32 %v2409_v13, %v1962_v12  ;;  %v565_v13 = vld [vmem:[%s3834_s4 + $0x110] sm:$0xff] }
  0xee   : > { %v380_v17 = vpop.f32.mrf.mxu0 }
  0xef   : > { %v395_v18 = vmul.f32 %v1963_v14, %v386_v15  ;;  %v381_v19 = vadd.f32 %v1962_v12, %v380_v17  ;;  %v601_v12 = vld [vmem:[%s3834_s4 + $0x230] sm:$0xff]  ;;  %v600_v15 = vld [vmem:[%s3834_s4 + $0x228] sm:$0xff]  ;;  %v579_v17 = vld [vmem:[%s3834_s4 + $0x180] sm:$0xff] }
  0xf1   : > { %v404_v20 = vsub.f32 %v395_v18, %v1964_v16  ;;  %v394_v21 = vmul.f32 %v1963_v14, %v381_v19  ;;  %v580_v14 = vld [vmem:[%s3834_s4 + $0x188] sm:$0xff]  ;;  %v599_v18 = vld [vmem:[%s3834_s4 + $0x220] sm:$0xff] }
  0xf2   : > { %v563_v19 = vld [vmem:[%s3834_s4 + $0x100] sm:$0xff] }
  0xf3   : > { %v1966_v22 = vmul.f32 -1.442695, %v404_v20  ;;  %v403_v24 = vsub.f32 %v394_v21, %v1964_v16  ;;  %v564_v16 = vld [vmem:[%s3834_s4 + $0x108] sm:$0xff]  ;;  %v597_v21 = vld [vmem:[%s3834_s4 + $0x210] sm:$0xff] }
  0xf5   : > { %2629 = vpow2.f32 %v1966_v22  ;;  %v1965_v25 = vmul.f32 -1.442695, %v403_v24 }
  0xf7   : > { %2631 = vpow2.f32 %v1965_v25  ;;  %v595_v25 = vld [vmem:[%s3834_s4 + $0x200] sm:$0xff] }
 0x102   : > { %v2630_v26 = vpop.eup %2629 }
 0x103   : > { %v412_v27 = vadd.f32 1.0, %v2630_v26 }
 0x104   : > { %v2632_v28 = vpop.eup %2631 }
 0x105   : > { %2633 = vrcp.f32 %v412_v27  ;;  %v411_v29 = vadd.f32 1.0, %v2632_v28  ;;  %v883_v27 = vld [vmem:[%s3834_s4 + $0x378] sm:$0xff] }
 0x106   : > { %v915_v28 = vld [vmem:[%s3834_s4 + $0x478] sm:$0xff] }
 0x107   : > { %2635 = vrcp.f32 %v411_v29  ;;  %v867_v29 = vld [vmem:[%s3834_s4 + $0x2f8] sm:$0xff] }
 0x112   : > { %v2634_v30 = vpop.eup %2633 }
 0x113   : > { %v2943_v31 = vmul.f32 %v2634_v30, %v404_v20  ;;  %v598_v20 = vld [vmem:[%s3834_s4 + $0x218] sm:$0xff] }
 0x114   : > { %v2636_v32 = vpop.eup %2635  ;;  %v899_v30 = vld [vmem:[%s3834_s4 + $0x3f8] sm:$0xff] }
 0x115   : > { %v2945_v33 = vmul.f32 %v2636_v32, %v403_v24  ;;  %520 = vst [vmem:[#allocation2 + $0x11] sm:$0xff] %v2943_v31  ;;  %v596_v24 = vld [vmem:[%s3834_s4 + $0x208] sm:$0xff]  ;;  %v914_v32 = vld [vmem:[%s3834_s4 + $0x470] sm:$0xff] }
 0x117   : > { %2442 = vmatprep.mubr.f32.mxu1 %v2945_v33  ;;  %519 = vst [vmem:[#allocation2 + $0x9] sm:$0xff] %v2945_v33 }
 0x118   : > { %2443 = vmatmul.mubr.f32.vlgmr.msra.gmra.mxu1 %v2943_v31 }
 0x119   : > { %2058 = vmatpush3.msra.mxu1 %v578_v34  ;;  %v898_v34 = vld [vmem:[%s3834_s4 + $0x3f0] sm:$0xff] }
 0x11a   : > { %2059 = vmatprep.subr.mxu1 %v593_v35  ;;  %v881_v35 = vld [vmem:[%s3834_s4 + $0x368] sm:$0xff] }
 0x11b   : > { %2060 = vmatpush3.msra.mxu1 %v577_v36  ;;  %v913_v36 = vld [vmem:[%s3834_s4 + $0x468] sm:$0xff] }
 0x11c   : > { %2061 = vmatprep.subr.mxu1 %v592_v37  ;;  %v528_v22 = vld [vmem:[#allocation2 + $0x12] sm:$0xff]  ;;  %v865_v37 = vld [vmem:[%s3834_s4 + $0x2e8] sm:$0xff] }
 0x11d   : > { %2062 = vmatpush3.msra.mxu1 %v576_v38  ;;  %v530_v26 = vld [vmem:[#allocation2 + $0x13] sm:$0xff]  ;;  %v897_v38 = vld [vmem:[%s3834_s4 + $0x3e8] sm:$0xff] }
 0x11e   : > { %2063 = vmatprep.subr.mxu1 %v591_v39  ;;  %v523_v43 = vld [vmem:[#allocation2 + $0x8] sm:$0xff]  ;;  %v524_v48 = vld [vmem:[#allocation2 + $0x10] sm:$0xff]  ;;  %v880_v39 = vld [vmem:[%s3834_s4 + $0x360] sm:$0xff] }
 0x11f   : > { %v527_v44 = vld [vmem:[#allocation2 + $0xa] sm:$0xff]  ;;  %2064 = vmatpush3.msra.mxu1 %v575_v40  ;;  %680 = vmatprep.mubr.f32.mxu0 %v523_v43  ;;  %v912_v40 = vld [vmem:[%s3834_s4 + $0x460] sm:$0xff]  ;;  %v879_v43 = vld [vmem:[%s3834_s4 + $0x358] sm:$0xff] }
 0x120   : > { %v521_v45 = vld [vmem:[#allocation2 + $0x7] sm:$0xff]  ;;  %2065 = vmatprep.subr.mxu1 %v590_v41  ;;  %755 = vmatprep.mubr.f32.mxu1 %v527_v44  ;;  %v522_v54 = vld [vmem:[#allocation2 + $0xf] sm:$0xff]  ;;  %v911_v44 = vld [vmem:[%s3834_s4 + $0x458] sm:$0xff] }
 0x121   : > { %681 = vmatmul.mubr.f32.vlgmr.msra.gmra.mxu0 %v521_v45  ;;  %2066 = vmatpush3.msra.mxu1 %v574_v42  ;;  %v529_v57 = vld [vmem:[#allocation2 + $0xb] sm:$0xff]  ;;  %v864_v41 = vld [vmem:[%s3834_s4 + $0x2e0] sm:$0xff]  ;;  %v863_v45 = vld [vmem:[%s3834_s4 + $0x2d8] sm:$0xff] }
 0x122   : > { %2446 = vmatpush3.msra.mxu0 %v610_v11  ;;  %685 = vmatprep.mubr.f32.mxu0 %v524_v48  ;;  %v581_v11 = vld [vmem:[%s3834_s4 + $0x190] sm:$0xff]  ;;  %v896_v42 = vld [vmem:[%s3834_s4 + $0x3e0] sm:$0xff] }
 0x123   : > { %2067 = vmatprep.subr.mxu1 %v589_v46  ;;  %2447 = vmatprep.subr.mxu0 %v609_v47  ;;  %v895_v46 = vld [vmem:[%s3834_s4 + $0x3d8] sm:$0xff]  ;;  %v910_v48 = vld [vmem:[%s3834_s4 + $0x450] sm:$0xff] }
 0x124   : > { %2068 = vmatpush3.msra.mxu1 %v573_v49  ;;  %2448 = vmatpush3.msra.mxu0 %v609_v47  ;;  %v878_v47 = vld [vmem:[%s3834_s4 + $0x350] sm:$0xff] }
 0x125   : > { %2069 = vmatprep.subr.mxu1 %v588_v50  ;;  %2449 = vmatprep.subr.mxu0 %v608_v51  ;;  %v862_v49 = vld [vmem:[%s3834_s4 + $0x2d0] sm:$0xff] }
 0x126   : > { %686 = vmatmul.mubr.f32.gmra.mxu0 %v522_v54  ;;  %2070 = vmatpush3.msra.mxu1 %v572_v52  ;;  %v894_v50 = vld [vmem:[%s3834_s4 + $0x3d0] sm:$0xff]  ;;  %v909_v52 = vld [vmem:[%s3834_s4 + $0x448] sm:$0xff] }
 0x127   : > { %2450 = vmatpush3.msra.mxu0 %v608_v51  ;;  %2071 = vmatprep.subr.mxu1 %v587_v53  ;;  %v877_v51 = vld [vmem:[%s3834_s4 + $0x348] sm:$0xff] }
 0x128   : > { %2451 = vmatprep.subr.mxu0 %v607_v55  ;;  %2477 = vmatprep.mubr.f32.mxu0 %v529_v57  ;;  %v861_v53 = vld [vmem:[%s3834_s4 + $0x2c8] sm:$0xff]  ;;  %v860_v57 = vld [vmem:[%s3834_s4 + $0x2c0] sm:$0xff] }
 0x129   : > { %2072 = vmatpush3.msra.mxu1 %v571_v56  ;;  %2452 = vmatpush3.msra.mxu0 %v607_v55  ;;  %v893_v54 = vld [vmem:[%s3834_s4 + $0x3c8] sm:$0xff]  ;;  %v876_v55 = vld [vmem:[%s3834_s4 + $0x340] sm:$0xff] }
 0x12a   : > { %2073 = vmatprep.subr.mxu1 %v586_v58  ;;  %2453 = vmatprep.subr.mxu0 %v606_v59  ;;  %v908_v56 = vld [vmem:[%s3834_s4 + $0x440] sm:$0xff] }
 0x12b   : > { %2074 = vmatpush3.msra.mxu1 %v570_v60  ;;  %2454 = vmatpush3.msra.mxu0 %v606_v59  ;;  %v892_v58 = vld [vmem:[%s3834_s4 + $0x3c0] sm:$0xff]  ;;  %v875_v59 = vld [vmem:[%s3834_s4 + $0x338] sm:$0xff] }
 0x12c   : > { %2075 = vmatprep.subr.mxu1 %v585_v61  ;;  %2455 = vmatprep.subr.mxu0 %v605_v62  ;;  %v907_v60 = vld [vmem:[%s3834_s4 + $0x438] sm:$0xff] }
 0x12d   : > { %2076 = vmatpush3.msra.mxu1 %v569_v63  ;;  %2456 = vmatpush3.msra.mxu0 %v605_v62  ;;  %v859_v61 = vld [vmem:[%s3834_s4 + $0x2b8] sm:$0xff]  ;;  %v874_v63 = vld [vmem:[%s3834_s4 + $0x330] sm:$0xff] }
 0x12e   : > { %2077 = vmatprep.subr.mxu1 %v584_v0  ;;  %2457 = vmatprep.subr.mxu0 %v604_v1  ;;  %v891_v62 = vld [vmem:[%s3834_s4 + $0x3b8] sm:$0xff]  ;;  %v906_v0 = vld [vmem:[%s3834_s4 + $0x430] sm:$0xff] }
 0x12f   : > { %2078 = vmatpush3.msra.mxu1 %v568_v3  ;;  %2458 = vmatpush3.msra.mxu0 %v604_v1  ;;  %v858_v1 = vld [vmem:[%s3834_s4 + $0x2b0] sm:$0xff] }
 0x130   : > { %2079 = vmatprep.subr.mxu1 %v583_v4  ;;  %2459 = vmatprep.subr.mxu0 %v603_v5  ;;  %v890_v3 = vld [vmem:[%s3834_s4 + $0x3b0] sm:$0xff]  ;;  %v873_v4 = vld [vmem:[%s3834_s4 + $0x328] sm:$0xff] }
 0x131   : > { %2080 = vmatpush3.msra.mxu1 %v567_v6  ;;  %2460 = vmatpush3.msra.mxu0 %v603_v5  ;;  %v905_v5 = vld [vmem:[%s3834_s4 + $0x428] sm:$0xff] }
 0x132   : > { %2081 = vmatprep.subr.mxu1 %v582_v7  ;;  %2461 = vmatprep.subr.mxu0 %v602_v8  ;;  %v857_v6 = vld [vmem:[%s3834_s4 + $0x2a8] sm:$0xff] }
 0x133   : > { %2082 = vmatpush3.msra.mxu1 %v566_v9  ;;  %2462 = vmatpush3.msra.mxu0 %v602_v8  ;;  %v889_v7 = vld [vmem:[%s3834_s4 + $0x3a8] sm:$0xff]  ;;  %v872_v8 = vld [vmem:[%s3834_s4 + $0x320] sm:$0xff] }
 0x134   : > { %2083 = vmatprep.subr.mxu1 %v581_v11  ;;  %2463 = vmatprep.subr.mxu0 %v601_v12  ;;  %v904_v9 = vld [vmem:[%s3834_s4 + $0x420] sm:$0xff] }
 0x135   : > { %2084 = vmatpush3.msra.mxu1 %v565_v13  ;;  %2464 = vmatpush3.msra.mxu0 %v601_v12  ;;  %v856_v11 = vld [vmem:[%s3834_s4 + $0x2a0] sm:$0xff]  ;;  %v871_v13 = vld [vmem:[%s3834_s4 + $0x318] sm:$0xff] }
 0x136   : > { %2085 = vmatprep.subr.mxu1 %v580_v14  ;;  %2465 = vmatprep.subr.mxu0 %v600_v15  ;;  %v888_v12 = vld [vmem:[%s3834_s4 + $0x3a0] sm:$0xff]  ;;  %v903_v14 = vld [vmem:[%s3834_s4 + $0x418] sm:$0xff] }
 0x137   : > { %2086 = vmatpush3.msra.mxu1 %v564_v16  ;;  %2466 = vmatpush3.msra.mxu0 %v600_v15  ;;  %v855_v15 = vld [vmem:[%s3834_s4 + $0x298] sm:$0xff] }
 0x138   : > { %2087 = vmatprep.subr.mxu1 %v579_v17  ;;  %2467 = vmatprep.subr.mxu0 %v599_v18  ;;  %v887_v16 = vld [vmem:[%s3834_s4 + $0x398] sm:$0xff]  ;;  %v870_v17 = vld [vmem:[%s3834_s4 + $0x310] sm:$0xff] }
 0x139   : > { %2088 = vmatpush3.msra.mxu1 %v563_v19  ;;  %2468 = vmatpush3.msra.mxu0 %v599_v18  ;;  %v902_v18 = vld [vmem:[%s3834_s4 + $0x410] sm:$0xff] }
 0x13a   : > { %756 = vmatmul.mubr.f32.vlgmr.msra.gmra.mxu1 %v2945_v33  ;;  %2469 = vmatprep.subr.mxu0 %v598_v20  ;;  %v866_v33 = vld [vmem:[%s3834_s4 + $0x2f0] sm:$0xff] }
 0x13b   : > { %760 = vmatprep.mubr.f32.mxu1 %v528_v22  ;;  %2470 = vmatpush3.msra.mxu0 %v598_v20  ;;  %v854_v19 = vld [vmem:[%s3834_s4 + $0x290] sm:$0xff]  ;;  %v901_v22 = vld [vmem:[%s3834_s4 + $0x408] sm:$0xff] }
 0x13c   : > { %2471 = vmatprep.subr.mxu0 %v597_v21  ;;  %2113 = vmatprep.subr.mxu1 %v883_v27  ;;  %v886_v20 = vld [vmem:[%s3834_s4 + $0x390] sm:$0xff]  ;;  %v900_v27 = vld [vmem:[%s3834_s4 + $0x400] sm:$0xff] }
 0x13d   : > { %2472 = vmatpush3.msra.mxu0 %v597_v21  ;;  %2114 = vmatpush3.msra.mxu1 %v867_v29  ;;  %v869_v21 = vld [vmem:[%s3834_s4 + $0x308] sm:$0xff]  ;;  %v884_v29 = vld [vmem:[%s3834_s4 + $0x380] sm:$0xff] }
 0x13e   : > { %761 = vmatmul.mubr.f32.gmra.mxu1 %v2943_v31  ;;  %2473 = vmatprep.subr.mxu0 %v596_v24  ;;  %v882_v31 = vld [vmem:[%s3834_s4 + $0x370] sm:$0xff] }
 0x13f   : > { %2474 = vmatpush3.msra.mxu0 %v596_v24  ;;  %2115 = vmatprep.subr.mxu1 %v882_v31  ;;  %v853_v24 = vld [vmem:[%s3834_s4 + $0x288] sm:$0xff]  ;;  %v1205_v31 = vld [vmem:[%s3834_s4 + $0x5f8] sm:$0xff] }
 0x140   : > { %2475 = vmatprep.subr.mxu0 %v595_v25  ;;  %2116 = vmatpush3.msra.mxu1 %v866_v33 }
 0x141   : > { %2476 = vmatpush3.msra.mxu0 %v595_v25  ;;  %2117 = vmatprep.subr.mxu1 %v881_v35  ;;  %v885_v25 = vld [vmem:[%s3834_s4 + $0x388] sm:$0xff] }
 0x142   : > { %2478 = vmatmul.mubr.f32.vlgmr.msra.gmra.mxu0 %v530_v26  ;;  %2151 = vmatprep.subr.mxu0 %v915_v28  ;;  %v868_v26 = vld [vmem:[%s3834_s4 + $0x300] sm:$0xff] }
 0x143   : > { %2152 = vmatpush3.msra.mxu0 %v899_v30  ;;  %2118 = vmatpush3.msra.mxu1 %v865_v37  ;;  %v852_v28 = vld [vmem:[%s3834_s4 + $0x280] sm:$0xff]  ;;  %v931_v30 = vld [vmem:[%s3834_s4 + $0x4f8] sm:$0xff] }
 0x144   : > { %2153 = vmatprep.subr.mxu0 %v914_v32  ;;  %2119 = vmatprep.subr.mxu1 %v880_v39 }
 0x145   : > { %2154 = vmatpush3.msra.mxu0 %v898_v34  ;;  %2120 = vmatpush3.msra.mxu1 %v864_v41 }
 0x146   : > { %2155 = vmatprep.subr.mxu0 %v913_v36  ;;  %2121 = vmatprep.subr.mxu1 %v879_v43 }
 0x147   : > { %2156 = vmatpush3.msra.mxu0 %v897_v38  ;;  %2122 = vmatpush3.msra.mxu1 %v863_v45 }
 0x148   : > { %2157 = vmatprep.subr.mxu0 %v912_v40  ;;  %2123 = vmatprep.subr.mxu1 %v878_v47 }
 0x149   : > { %2158 = vmatpush3.msra.mxu0 %v896_v42  ;;  %2124 = vmatpush3.msra.mxu1 %v862_v49  ;;  %v1968_v42 = vld [vmem:[%s3832_s2 + $0x5] ss:$0 sm:$0xff] }
 0x14a   : > { %2159 = vmatprep.subr.mxu0 %v911_v44  ;;  %2125 = vmatprep.subr.mxu1 %v877_v51 }
 0x14b   : > { %2160 = vmatpush3.msra.mxu0 %v895_v46  ;;  %2126 = vmatpush3.msra.mxu1 %v861_v53 }
 0x14c   : > { %2161 = vmatprep.subr.mxu0 %v910_v48  ;;  %2127 = vmatprep.subr.mxu1 %v876_v55  ;;  %v1189_v55 = vld [vmem:[%s3834_s4 + $0x578] sm:$0xff] }
 0x14d   : > { %2162 = vmatpush3.msra.mxu0 %v894_v50  ;;  %2128 = vmatpush3.msra.mxu1 %v860_v57 }
 0x14e   : > { %2163 = vmatprep.subr.mxu0 %v909_v52  ;;  %2129 = vmatprep.subr.mxu1 %v875_v59  ;;  %v930_v59 = vld [vmem:[%s3834_s4 + $0x4f0] sm:$0xff] }
 0x14f   : > { %2164 = vmatpush3.msra.mxu0 %v893_v54  ;;  %2130 = vmatpush3.msra.mxu1 %v859_v61 }
 0x150   : > { %2165 = vmatprep.subr.mxu0 %v908_v56  ;;  %2131 = vmatprep.subr.mxu1 %v874_v63  ;;  %v1188_v63 = vld [vmem:[%s3834_s4 + $0x570] sm:$0xff] }
 0x151   : > { %2166 = vmatpush3.msra.mxu0 %v892_v58  ;;  %2132 = vmatpush3.msra.mxu1 %v858_v1  ;;  %v1203_v1 = vld [vmem:[%s3834_s4 + $0x5e8] sm:$0xff] }
 0x152   : > { %2167 = vmatprep.subr.mxu0 %v907_v60  ;;  %2133 = vmatprep.subr.mxu1 %v873_v4  ;;  %v1204_v60 = vld [vmem:[%s3834_s4 + $0x5f0] sm:$0xff] }
 0x153   : > { %2168 = vmatpush3.msra.mxu0 %v891_v62  ;;  %2134 = vmatpush3.msra.mxu1 %v857_v6  ;;  %v1202_v6 = vld [vmem:[%s3834_s4 + $0x5e0] sm:$0xff] }
 0x154   : > { %2169 = vmatprep.subr.mxu0 %v906_v0  ;;  %2135 = vmatprep.subr.mxu1 %v872_v8  ;;  %v929_v0 = vld [vmem:[%s3834_s4 + $0x4e8] sm:$0xff] }
 0x155   : > { %2170 = vmatpush3.msra.mxu0 %v890_v3  ;;  %2136 = vmatpush3.msra.mxu1 %v856_v11  ;;  %v1187_v3 = vld [vmem:[%s3834_s4 + $0x568] sm:$0xff]  ;;  %v1201_v11 = vld [vmem:[%s3834_s4 + $0x5d8] sm:$0xff] }
 0x156   : > { %2171 = vmatprep.subr.mxu0 %v905_v5  ;;  %2137 = vmatprep.subr.mxu1 %v871_v13  ;;  %v928_v5 = vld [vmem:[%s3834_s4 + $0x4e0] sm:$0xff]  ;;  %v926_v13 = vld [vmem:[%s3834_s4 + $0x4d0] sm:$0xff] }
 0x157   : > { %2172 = vmatpush3.msra.mxu0 %v889_v7  ;;  %2138 = vmatpush3.msra.mxu1 %v855_v15  ;;  %v1186_v7 = vld [vmem:[%s3834_s4 + $0x560] sm:$0xff]  ;;  %v1184_v15 = vld [vmem:[%s3834_s4 + $0x550] sm:$0xff] }
 0x158   : > { %2173 = vmatprep.subr.mxu0 %v904_v9  ;;  %2139 = vmatprep.subr.mxu1 %v870_v17  ;;  %v927_v9 = vld [vmem:[%s3834_s4 + $0x4d8] sm:$0xff]  ;;  %v1199_v17 = vld [vmem:[%s3834_s4 + $0x5c8] sm:$0xff] }
 0x159   : > { %2174 = vmatpush3.msra.mxu0 %v888_v12  ;;  %2140 = vmatpush3.msra.mxu1 %v854_v19  ;;  %v1185_v12 = vld [vmem:[%s3834_s4 + $0x558] sm:$0xff]  ;;  %v924_v19 = vld [vmem:[%s3834_s4 + $0x4c0] sm:$0xff] }
 0x15a   : > { %2175 = vmatprep.subr.mxu0 %v903_v14  ;;  %2141 = vmatprep.subr.mxu1 %v869_v21  ;;  %v1200_v14 = vld [vmem:[%s3834_s4 + $0x5d0] sm:$0xff]  ;;  %v1182_v21 = vld [vmem:[%s3834_s4 + $0x540] sm:$0xff] }
 0x15b   : > { %2176 = vmatpush3.msra.mxu0 %v887_v16  ;;  %2142 = vmatpush3.msra.mxu1 %v853_v24  ;;  %v925_v16 = vld [vmem:[%s3834_s4 + $0x4c8] sm:$0xff]  ;;  %v1197_v24 = vld [vmem:[%s3834_s4 + $0x5b8] sm:$0xff] }
 0x15c   : > { %2177 = vmatprep.subr.mxu0 %v902_v18  ;;  %2143 = vmatprep.subr.mxu1 %v868_v26  ;;  %v1183_v18 = vld [vmem:[%s3834_s4 + $0x548] sm:$0xff]  ;;  %v922_v26 = vld [vmem:[%s3834_s4 + $0x4b0] sm:$0xff] }
 0x15d   : > { %2178 = vmatpush3.msra.mxu0 %v886_v20  ;;  %2144 = vmatpush3.msra.mxu1 %v852_v28  ;;  %v1198_v20 = vld [vmem:[%s3834_s4 + $0x5c0] sm:$0xff]  ;;  %v1180_v28 = vld [vmem:[%s3834_s4 + $0x530] sm:$0xff] }
 0x15e   : > { %2179 = vmatprep.subr.mxu0 %v901_v22  ;;  %2480 = vmatprep.subr.mxu1 %v931_v30  ;;  %v923_v22 = vld [vmem:[%s3834_s4 + $0x4b8] sm:$0xff] }
 0x15f   : > { %2180 = vmatpush3.msra.mxu0 %v885_v25  ;;  %v1181_v25 = vld [vmem:[%s3834_s4 + $0x538] sm:$0xff] }
 0x160   : > { %2181 = vmatprep.subr.mxu0 %v900_v27  ;;  %v1196_v27 = vld [vmem:[%s3834_s4 + $0x5b0] sm:$0xff] }
 0x161   : > { %2182 = vmatpush3.msra.mxu0 %v884_v29  ;;  %v921_v29 = vld [vmem:[%s3834_s4 + $0x4a8] sm:$0xff] }
 0x162   : > { %2207 = vmatprep.subr.mxu0 %v1205_v31  ;;  %v1179_v31 = vld [vmem:[%s3834_s4 + $0x528] sm:$0xff] }
 0x1d8   : > { %v3289_v34 = vpop.f32.mrf.mxu1 }
 0x1da   : > { %v3291_v36 = vpop.f32.mrf.mxu1 }
 0x1e1   : > { %v2051_v32 = vpop.f32.mrf.mxu0 }
 0x1e3   : > { %v2052_v33 = vpop.f32.mrf.mxu0 }
 0x1e4   : > { %v2053_v40 = vadd.f32 %v2052_v33, %v2051_v32  ;;  %v920_v32 = vld [vmem:[%s3834_s4 + $0x4a0] sm:$0xff] }
 0x1e5   : > { %v1194_v33 = vld [vmem:[%s3834_s4 + $0x5a0] sm:$0xff] }
 0x1e6   : > { %v2054_v35 = vpop.f32.mrf.mxu0  ;;  %v683_v46 = vadd.f32 %v2053_v40, %v1968_v42  ;;  %v918_v40 = vld [vmem:[%s3834_s4 + $0x490] sm:$0xff] }
 0x1e8   : > { %v2055_v37 = vpop.f32.mrf.mxu0 }
 0x1e9   : > { %v2056_v41 = vadd.f32 %v2055_v37, %v2054_v35  ;;  %v1178_v35 = vld [vmem:[%s3834_s4 + $0x520] sm:$0xff]  ;;  %v919_v37 = vld [vmem:[%s3834_s4 + $0x498] sm:$0xff] }
 0x1eb   : > { %v688_v47 = vadd.f32 %v2056_v41, %v1968_v42  ;;  %v1192_v41 = vld [vmem:[%s3834_s4 + $0x590] sm:$0xff] }
 0x1ec   : > { %v1176_v42 = vld [vmem:[%s3834_s4 + $0x510] sm:$0xff] }
 0x1fa   : > { %v2089_v38 = vpop.f32.mrf.mxu1 }
 0x1fc   : > { %v2090_v39 = vpop.f32.mrf.mxu1 }
 0x1fd   : > { %v2091_v44 = vadd.f32 %v2090_v39, %v2089_v38  ;;  %v1193_v38 = vld [vmem:[%s3834_s4 + $0x598] sm:$0xff] }
 0x1fe   : > { %v2092_v43 = vpop.f32.mrf.mxu1  ;;  %v1177_v39 = vld [vmem:[%s3834_s4 + $0x518] sm:$0xff] }
 0x1ff   : > { %v758_v51 = vadd.f32 %v2091_v44, %v683_v46  ;;  %v1191_v44 = vld [vmem:[%s3834_s4 + $0x588] sm:$0xff]  ;;  %v916_v46 = vld [vmem:[%s3834_s4 + $0x480] sm:$0xff] }
 0x200   : > { %v2093_v45 = vpop.f32.mrf.mxu1 }
 0x201   : > { %v2094_v48 = vadd.f32 %v2093_v45, %v2092_v43  ;;  %v917_v43 = vld [vmem:[%s3834_s4 + $0x488] sm:$0xff] }
 0x202   : > { %v2479_v49 = vpop.f32.mrf.mxu0  ;;  %v1175_v45 = vld [vmem:[%s3834_s4 + $0x508] sm:$0xff] }
 0x203   : > { %v763_v50 = vadd.f32 %v2094_v48, %v688_v47  ;;  %v1190_v47 = vld [vmem:[%s3834_s4 + $0x580] sm:$0xff] }
 0x204   : > { %v832_v52 = vpop.f32.mrf.mxu0  ;;  %v1174_v48 = vld [vmem:[%s3834_s4 + $0x500] sm:$0xff] }
 0x205   : > { %v3296_v53 = vadd.f32 %v2479_v49, %v763_v50  ;;  %v3298_v54 = vadd.f32 %v832_v52, %v758_v51  ;;  %v1237_v49 = vld [vmem:[%s3834_s4 + $0x6f8] sm:$0xff] }
 0x206   : > { %v1269_v50 = vld [vmem:[%s3834_s4 + $0x7f8] sm:$0xff] }
 0x207   : > { %842 = vst [vmem:[#allocation2 + $0x11] sm:$0xff] %v3296_v53  ;;  %841 = vst [vmem:[#allocation2 + $0x9] sm:$0xff] %v3298_v54  ;;  %v1221_v52 = vld [vmem:[%s3834_s4 + $0x678] sm:$0xff] }
 0x20e   : > { %v845_v56 = vld [vmem:[#allocation2 + $0x7] sm:$0xff]  ;;  %v3315_v61 = vld [vmem:[#allocation2 + $0xf] sm:$0xff] }
 0x20f   : > { %v3305_v57 = vld [vmem:[#allocation2 + $0xb] sm:$0xff]  ;;  %1001 = vmatprep.mubr.f32.mxu1 %v845_v56  ;;  %v850_v62 = vld [vmem:[#allocation2 + $0x13] sm:$0xff]  ;;  %v1164_v8 = vld [vmem:[#allocation2 + $0x3] sm:$0xff] }
 0x210   : > { %v843_v58 = vld [vmem:[#allocation2 + $0x5] sm:$0xff]  ;;  %1076 = vmatprep.mubr.f32.mxu0 %v3305_v57  ;;  %v844_v4 = vld [vmem:[#allocation2 + $0xd] sm:$0xff]  ;;  %v851_v51 = vld [vmem:[#allocation2 + $0x15] sm:$0xff] }
 0x211   : > { %1002 = vmatmul.mubr.f32.vlgmr.msra.gmra.mxu1 %v843_v58  ;;  %1077 = vmatmul.mubr.f32.vlgmr.msra.gmra.mxu0 %v3298_v54  ;;  %v1236_v56 = vld [vmem:[%s3834_s4 + $0x6f0] sm:$0xff] }
 0x212   : > { %2481 = vmatpush3.msra.mxu1 %v931_v30  ;;  %2208 = vmatpush3.msra.mxu0 %v1189_v55  ;;  %v1195_v30 = vld [vmem:[%s3834_s4 + $0x5a8] sm:$0xff]  ;;  %v1253_v55 = vld [vmem:[%s3834_s4 + $0x778] sm:$0xff]  ;;  %v1268_v58 = vld [vmem:[%s3834_s4 + $0x7f0] sm:$0xff] }
 0x213   : > { %1006 = vmatprep.mubr.f32.mxu1 %v3315_v61  ;;  %1081 = vmatprep.mubr.f32.mxu0 %v850_v62  ;;  %v1219_v62 = vld [vmem:[%s3834_s4 + $0x668] sm:$0xff] }
 0x214   : > { %2482 = vmatprep.subr.mxu1 %v930_v59  ;;  %2209 = vmatprep.subr.mxu0 %v1204_v60  ;;  %v1235_v60 = vld [vmem:[%s3834_s4 + $0x6e8] sm:$0xff] }
 0x215   : > { %2483 = vmatpush3.msra.mxu1 %v930_v59  ;;  %2210 = vmatpush3.msra.mxu0 %v1188_v63  ;;  %v1252_v59 = vld [vmem:[%s3834_s4 + $0x770] sm:$0xff]  ;;  %v1163_v63 = vld [vmem:[#allocation2 + $0x8] sm:$0xff] }
 0x216   : > { %2484 = vmatprep.subr.mxu1 %v929_v0  ;;  %2211 = vmatprep.subr.mxu0 %v1203_v1  ;;  %v1234_v1 = vld [vmem:[%s3834_s4 + $0x6e0] sm:$0xff] }
 0x217   : > { %1007 = vmatmul.mubr.f32.gmra.mxu1 %v844_v4  ;;  %1082 = vmatmul.mubr.f32.gmra.mxu0 %v3296_v53 }
 0x218   : > { %2485 = vmatpush3.msra.mxu1 %v929_v0  ;;  %2212 = vmatpush3.msra.mxu0 %v1187_v3  ;;  %v1251_v0 = vld [vmem:[%s3834_s4 + $0x768] sm:$0xff]  ;;  %v1266_v3 = vld [vmem:[%s3834_s4 + $0x7e0] sm:$0xff] }
 0x219   : > { %2486 = vmatprep.subr.mxu1 %v928_v5  ;;  %2512 = vmatprep.mubr.f32.mxu1 %v844_v4  ;;  %v1218_v4 = vld [vmem:[%s3834_s4 + $0x660] sm:$0xff] }
 0x21a   : > { %2213 = vmatprep.subr.mxu0 %v1202_v6  ;;  %1355 = vmatprep.mubr.f32.mxu0 %v1164_v8  ;;  %v1233_v6 = vld [vmem:[%s3834_s4 + $0x6d8] sm:$0xff] }
 0x21b   : > { %2487 = vmatpush3.msra.mxu1 %v928_v5  ;;  %2214 = vmatpush3.msra.mxu0 %v1186_v7  ;;  %v1250_v5 = vld [vmem:[%s3834_s4 + $0x760] sm:$0xff]  ;;  %v1265_v7 = vld [vmem:[%s3834_s4 + $0x7d8] sm:$0xff] }
 0x21c   : > { %2488 = vmatprep.subr.mxu1 %v927_v9  ;;  %2215 = vmatprep.subr.mxu0 %v1201_v11  ;;  %v1217_v8 = vld [vmem:[%s3834_s4 + $0x658] sm:$0xff]  ;;  %v1264_v11 = vld [vmem:[%s3834_s4 + $0x7d0] sm:$0xff] }
 0x21d   : > { %2489 = vmatpush3.msra.mxu1 %v927_v9  ;;  %2216 = vmatpush3.msra.mxu0 %v1185_v12  ;;  %v1249_v9 = vld [vmem:[%s3834_s4 + $0x758] sm:$0xff]  ;;  %v1216_v12 = vld [vmem:[%s3834_s4 + $0x650] sm:$0xff] }
 0x21e   : > { %2490 = vmatprep.subr.mxu1 %v926_v13  ;;  %2217 = vmatprep.subr.mxu0 %v1200_v14  ;;  %v1231_v14 = vld [vmem:[%s3834_s4 + $0x6c8] sm:$0xff] }
 0x21f   : > { %2491 = vmatpush3.msra.mxu1 %v926_v13  ;;  %2218 = vmatpush3.msra.mxu0 %v1184_v15  ;;  %v1248_v13 = vld [vmem:[%s3834_s4 + $0x750] sm:$0xff]  ;;  %v1263_v15 = vld [vmem:[%s3834_s4 + $0x7c8] sm:$0xff] }
 0x220   : > { %2492 = vmatprep.subr.mxu1 %v925_v16  ;;  %2219 = vmatprep.subr.mxu0 %v1199_v17  ;;  %v1247_v17 = vld [vmem:[%s3834_s4 + $0x748] sm:$0xff] }
 0x221   : > { %2493 = vmatpush3.msra.mxu1 %v925_v16  ;;  %2220 = vmatpush3.msra.mxu0 %v1183_v18  ;;  %v1215_v16 = vld [vmem:[%s3834_s4 + $0x648] sm:$0xff]  ;;  %v1230_v18 = vld [vmem:[%s3834_s4 + $0x6c0] sm:$0xff] }
 0x222   : > { %2494 = vmatprep.subr.mxu1 %v924_v19  ;;  %2221 = vmatprep.subr.mxu0 %v1198_v20  ;;  %v1214_v20 = vld [vmem:[%s3834_s4 + $0x640] sm:$0xff] }
 0x223   : > { %2495 = vmatpush3.msra.mxu1 %v924_v19  ;;  %2222 = vmatpush3.msra.mxu0 %v1182_v21  ;;  %v1262_v19 = vld [vmem:[%s3834_s4 + $0x7c0] sm:$0xff] }
 0x224   : > { %2496 = vmatprep.subr.mxu1 %v923_v22  ;;  %2223 = vmatprep.subr.mxu0 %v1197_v24  ;;  %v1246_v21 = vld [vmem:[%s3834_s4 + $0x740] sm:$0xff]  ;;  %v1261_v24 = vld [vmem:[%s3834_s4 + $0x7b8] sm:$0xff] }
 0x225   : > { %2497 = vmatpush3.msra.mxu1 %v923_v22  ;;  %2224 = vmatpush3.msra.mxu0 %v1181_v25  ;;  %v1229_v22 = vld [vmem:[%s3834_s4 + $0x6b8] sm:$0xff] }
 0x226   : > { %2498 = vmatprep.subr.mxu1 %v922_v26  ;;  %2225 = vmatprep.subr.mxu0 %v1196_v27  ;;  %v1213_v25 = vld [vmem:[%s3834_s4 + $0x638] sm:$0xff]  ;;  %v1228_v27 = vld [vmem:[%s3834_s4 + $0x6b0] sm:$0xff] }
 0x227   : > { %2499 = vmatpush3.msra.mxu1 %v922_v26  ;;  %2226 = vmatpush3.msra.mxu0 %v1180_v28  ;;  %v1245_v26 = vld [vmem:[%s3834_s4 + $0x738] sm:$0xff]  ;;  %v1260_v28 = vld [vmem:[%s3834_s4 + $0x7b0] sm:$0xff] }
 0x228   : > { %2500 = vmatprep.subr.mxu1 %v921_v29  ;;  %2227 = vmatprep.subr.mxu0 %v1195_v30  ;;  %v1244_v30 = vld [vmem:[%s3834_s4 + $0x730] sm:$0xff] }
 0x229   : > { %2501 = vmatpush3.msra.mxu1 %v921_v29  ;;  %2228 = vmatpush3.msra.mxu0 %v1179_v31  ;;  %v1212_v29 = vld [vmem:[%s3834_s4 + $0x630] sm:$0xff]  ;;  %v1227_v31 = vld [vmem:[%s3834_s4 + $0x6a8] sm:$0xff] }
 0x22a   : > { %2502 = vmatprep.subr.mxu1 %v920_v32  ;;  %2229 = vmatprep.subr.mxu0 %v1194_v33  ;;  %v1211_v33 = vld [vmem:[%s3834_s4 + $0x628] sm:$0xff] }
 0x22b   : > { %2503 = vmatpush3.msra.mxu1 %v920_v32  ;;  %2230 = vmatpush3.msra.mxu0 %v1178_v35  ;;  %v1259_v32 = vld [vmem:[%s3834_s4 + $0x7a8] sm:$0xff] }
 0x22c   : > { %2504 = vmatprep.subr.mxu1 %v919_v37  ;;  %2231 = vmatprep.subr.mxu0 %v1193_v38  ;;  %v1243_v35 = vld [vmem:[%s3834_s4 + $0x728] sm:$0xff]  ;;  %v1258_v38 = vld [vmem:[%s3834_s4 + $0x7a0] sm:$0xff] }
 0x22d   : > { %2505 = vmatpush3.msra.mxu1 %v919_v37  ;;  %2232 = vmatpush3.msra.mxu0 %v1177_v39  ;;  %v1226_v37 = vld [vmem:[%s3834_s4 + $0x6a0] sm:$0xff] }
 0x22e   : > { %2506 = vmatprep.subr.mxu1 %v918_v40  ;;  %2233 = vmatprep.subr.mxu0 %v1192_v41  ;;  %v1210_v39 = vld [vmem:[%s3834_s4 + $0x620] sm:$0xff]  ;;  %v1225_v41 = vld [vmem:[%s3834_s4 + $0x698] sm:$0xff] }
 0x22f   : > { %2507 = vmatpush3.msra.mxu1 %v918_v40  ;;  %2234 = vmatpush3.msra.mxu0 %v1176_v42  ;;  %v1242_v40 = vld [vmem:[%s3834_s4 + $0x720] sm:$0xff]  ;;  %v1257_v42 = vld [vmem:[%s3834_s4 + $0x798] sm:$0xff] }
 0x230   : > { %2508 = vmatprep.subr.mxu1 %v917_v43  ;;  %2235 = vmatprep.subr.mxu0 %v1191_v44  ;;  %v1241_v44 = vld [vmem:[%s3834_s4 + $0x718] sm:$0xff] }
 0x231   : > { %2509 = vmatpush3.msra.mxu1 %v917_v43  ;;  %2236 = vmatpush3.msra.mxu0 %v1175_v45  ;;  %v1209_v43 = vld [vmem:[%s3834_s4 + $0x618] sm:$0xff]  ;;  %v1224_v45 = vld [vmem:[%s3834_s4 + $0x690] sm:$0xff] }
 0x232   : > { %2510 = vmatprep.subr.mxu1 %v916_v46  ;;  %2237 = vmatprep.subr.mxu0 %v1190_v47  ;;  %v1208_v47 = vld [vmem:[%s3834_s4 + $0x610] sm:$0xff] }
 0x233   : > { %2511 = vmatpush3.msra.mxu1 %v916_v46  ;;  %2238 = vmatpush3.msra.mxu0 %v1174_v48  ;;  %v1256_v46 = vld [vmem:[%s3834_s4 + $0x790] sm:$0xff] }
 0x234   : > { %2513 = vmatmul.mubr.f32.vlgmr.msra.gmra.mxu1 %v851_v51  ;;  %1356 = vmatmul.mubr.f32.vlgmr.msra.gmra.mxu0 %v2663_v2  ;;  %v1220_v2 = vld [vmem:[%s3834_s4 + $0x670] sm:$0xff]  ;;  %v1207_v51 = vld [vmem:[%s3834_s4 + $0x608] sm:$0xff] }
 0x235   : > { %2245 = vmatprep.subr.mxu1 %v1237_v49  ;;  %2283 = vmatprep.subr.mxu0 %v1269_v50  ;;  %v1240_v48 = vld [vmem:[%s3834_s4 + $0x710] sm:$0xff]  ;;  %v1223_v49 = vld [vmem:[%s3834_s4 + $0x688] sm:$0xff] }
 0x236   : > { %1360 = vmatprep.mubr.f32.mxu0 %v3305_v57  ;;  %2246 = vmatpush3.msra.mxu1 %v1221_v52  ;;  %v1267_v57 = vld [vmem:[%s3834_s4 + $0x7e8] sm:$0xff] }
 0x237   : > { %1430 = vmatprep.mubr.f32.mxu1 %v3298_v54  ;;  %2284 = vmatpush3.msra.mxu0 %v1253_v55  ;;  %v1255_v50 = vld [vmem:[%s3834_s4 + $0x788] sm:$0xff]  ;;  %v1222_v55 = vld [vmem:[%s3834_s4 + $0x680] sm:$0xff] }
 0x238   : > { %2247 = vmatprep.subr.mxu1 %v1236_v56  ;;  %2285 = vmatprep.subr.mxu0 %v1268_v58  ;;  %v1239_v52 = vld [vmem:[%s3834_s4 + $0x708] sm:$0xff]  ;;  %v1254_v56 = vld [vmem:[%s3834_s4 + $0x780] sm:$0xff] }
 0x239   : > { %2248 = vmatpush3.msra.mxu1 %v1220_v2  ;;  %2286 = vmatpush3.msra.mxu0 %v1252_v59  ;;  %v1206_v58 = vld [vmem:[%s3834_s4 + $0x600] sm:$0xff]  ;;  %v1285_v59 = vld [vmem:[%s3834_s4 + $0x878] sm:$0xff] }
 0x23a   : > { %1361 = vmatmul.mubr.f32.gmra.mxu0 %v1163_v63  ;;  %2249 = vmatprep.subr.mxu1 %v1235_v60  ;;  %v1238_v2 = vld [vmem:[%s3834_s4 + $0x700] sm:$0xff]  ;;  %v1171_v63 = vld [vmem:[#allocation2 + $0x17] sm:$0xff] }
 0x23b   : > { %2287 = vmatprep.subr.mxu0 %v1267_v57  ;;  %2250 = vmatpush3.msra.mxu1 %v1219_v62  ;;  %v1166_v60 = vld [vmem:[#allocation2 + $0x6] sm:$0xff]  ;;  %v1284_v62 = vld [vmem:[%s3834_s4 + $0x870] sm:$0xff] }
 0x23c   : > { %2288 = vmatpush3.msra.mxu0 %v1251_v0  ;;  %1505 = vmatprep.mubr.f32.mxu0 %v3315_v61  ;;  %v1232_v61 = vld [vmem:[%s3834_s4 + $0x6d0] sm:$0xff]  ;;  %v1283_v0 = vld [vmem:[%s3834_s4 + $0x868] sm:$0xff] }
 0x23d   : > { %2251 = vmatprep.subr.mxu1 %v1234_v1  ;;  %2289 = vmatprep.subr.mxu0 %v1266_v3  ;;  %v1168_v57 = vld [vmem:[#allocation2 + $0xc] sm:$0xff]  ;;  %v1169_v1 = vld [vmem:[#allocation2 + $0x14] sm:$0xff] }
 0x23e   : > { %2252 = vmatpush3.msra.mxu1 %v1218_v4  ;;  %2290 = vmatpush3.msra.mxu0 %v1250_v5  ;;  %v1167_v3 = vld [vmem:[#allocation2 + $0xe] sm:$0xff]  ;;  %v1282_v4 = vld [vmem:[%s3834_s4 + $0x860] sm:$0xff] }
 0x23f   : > { %2253 = vmatprep.subr.mxu1 %v1233_v6  ;;  %2291 = vmatprep.subr.mxu0 %v1265_v7  ;;  %v1172_v5 = vld [vmem:[#allocation2 + $0x12] sm:$0xff] }
 0x240   : > { %2254 = vmatpush3.msra.mxu1 %v1217_v8  ;;  %2292 = vmatpush3.msra.mxu0 %v1249_v9  ;;  %v1281_v6 = vld [vmem:[%s3834_s4 + $0x858] sm:$0xff]  ;;  %v1280_v7 = vld [vmem:[%s3834_s4 + $0x850] sm:$0xff]  ;;  %v1279_v8 = vld [vmem:[%s3834_s4 + $0x848] sm:$0xff] }
 0x241   : > { %2255 = vmatprep.subr.mxu1 %v1232_v61  ;;  %2293 = vmatprep.subr.mxu0 %v1264_v11  ;;  %v1278_v9 = vld [vmem:[%s3834_s4 + $0x840] sm:$0xff]  ;;  %v1277_v61 = vld [vmem:[%s3834_s4 + $0x838] sm:$0xff]  ;;  %v1276_v11 = vld [vmem:[%s3834_s4 + $0x830] sm:$0xff] }
 0x242   : > { %2256 = vmatpush3.msra.mxu1 %v1216_v12  ;;  %2294 = vmatpush3.msra.mxu0 %v1248_v13  ;;  %v1275_v12 = vld [vmem:[%s3834_s4 + $0x828] sm:$0xff]  ;;  %v1274_v13 = vld [vmem:[%s3834_s4 + $0x820] sm:$0xff] }
 0x243   : > { %2257 = vmatprep.subr.mxu1 %v1231_v14  ;;  %2295 = vmatprep.subr.mxu0 %v1263_v15  ;;  %v1273_v14 = vld [vmem:[%s3834_s4 + $0x818] sm:$0xff]  ;;  %v1272_v15 = vld [vmem:[%s3834_s4 + $0x810] sm:$0xff] }
 0x244   : > { %2258 = vmatpush3.msra.mxu1 %v1215_v16  ;;  %2296 = vmatpush3.msra.mxu0 %v1247_v17  ;;  %v1271_v16 = vld [vmem:[%s3834_s4 + $0x808] sm:$0xff]  ;;  %v1270_v17 = vld [vmem:[%s3834_s4 + $0x800] sm:$0xff] }
 0x245   : > { %2259 = vmatprep.subr.mxu1 %v1230_v18  ;;  %2297 = vmatprep.subr.mxu0 %v1262_v19  ;;  %v1173_v18 = vld [vmem:[#allocation2 + $0x1a] sm:$0xff]  ;;  %v1617_v19 = vld [vmem:[%s3833_s3 + $0x1f0] sm:$0xff] }
 0x246   : > { %2260 = vmatpush3.msra.mxu1 %v1214_v20  ;;  %2298 = vmatpush3.msra.mxu0 %v1246_v21  ;;  %v1616_v20 = vld [vmem:[%s3833_s3 + $0x1d0] sm:$0xff] }
 0x247   : > { %2261 = vmatprep.subr.mxu1 %v1229_v22  ;;  %2299 = vmatprep.subr.mxu0 %v1261_v24  ;;  %v1615_v21 = vld [vmem:[%s3833_s3 + $0x1b0] sm:$0xff] }
 0x248   : > { %2262 = vmatpush3.msra.mxu1 %v1213_v25  ;;  %2300 = vmatpush3.msra.mxu0 %v1245_v26  ;;  %v1614_v22 = vld [vmem:[%s3833_s3 + $0x190] sm:$0xff] }
 0x249   : > { %2263 = vmatprep.subr.mxu1 %v1228_v27  ;;  %2301 = vmatprep.subr.mxu0 %v1260_v28  ;;  %v1613_v24 = vld [vmem:[%s3833_s3 + $0x170] sm:$0xff] }
 0x24a   : > { %2264 = vmatpush3.msra.mxu1 %v1212_v29  ;;  %2302 = vmatpush3.msra.mxu0 %v1244_v30  ;;  %v1612_v25 = vld [vmem:[%s3833_s3 + $0x150] sm:$0xff] }
 0x24b   : > { %2265 = vmatprep.subr.mxu1 %v1227_v31  ;;  %2303 = vmatprep.subr.mxu0 %v1259_v32  ;;  %v1611_v26 = vld [vmem:[%s3833_s3 + $0x130] sm:$0xff] }
 0x24c   : > { %2266 = vmatpush3.msra.mxu1 %v1211_v33  ;;  %2304 = vmatpush3.msra.mxu0 %v1243_v35  ;;  %v1610_v27 = vld [vmem:[%s3833_s3 + $0x110] sm:$0xff] }
 0x24d   : > { %2267 = vmatprep.subr.mxu1 %v1226_v37  ;;  %2305 = vmatprep.subr.mxu0 %v1258_v38  ;;  %v1609_v28 = vld [vmem:[%s3833_s3 + $0xf0] sm:$0xff] }
 0x24e   : > { %2268 = vmatpush3.msra.mxu1 %v1210_v39  ;;  %2306 = vmatpush3.msra.mxu0 %v1242_v40  ;;  %v1608_v29 = vld [vmem:[%s3833_s3 + $0xd0] sm:$0xff] }
 0x24f   : > { %2269 = vmatprep.subr.mxu1 %v1225_v41  ;;  %2307 = vmatprep.subr.mxu0 %v1257_v42  ;;  %v1607_v30 = vld [vmem:[%s3833_s3 + $0xb0] sm:$0xff] }
 0x250   : > { %2270 = vmatpush3.msra.mxu1 %v1209_v43  ;;  %2308 = vmatpush3.msra.mxu0 %v1241_v44  ;;  %v1606_v31 = vld [vmem:[%s3833_s3 + $0x90] sm:$0xff] }
 0x251   : > { %2271 = vmatprep.subr.mxu1 %v1224_v45  ;;  %2309 = vmatprep.subr.mxu0 %v1256_v46  ;;  %v1605_v32 = vld [vmem:[%s3833_s3 + $0x70] sm:$0xff] }
 0x252   : > { %2272 = vmatpush3.msra.mxu1 %v1208_v47  ;;  %2310 = vmatpush3.msra.mxu0 %v1240_v48  ;;  %v1604_v33 = vld [vmem:[%s3833_s3 + $0x50] sm:$0xff] }
 0x253   : > { %2273 = vmatprep.subr.mxu1 %v1223_v49  ;;  %2311 = vmatprep.subr.mxu0 %v1255_v50  ;;  %v1603_v35 = vld [vmem:[%s3833_s3 + $0x30] sm:$0xff] }
 0x254   : > { %2274 = vmatpush3.msra.mxu1 %v1207_v51  ;;  %2312 = vmatpush3.msra.mxu0 %v1239_v52  ;;  %v1602_v37 = vld [vmem:[%s3833_s3 + $0x10] sm:$0xff] }
 0x255   : > { %2275 = vmatprep.subr.mxu1 %v1222_v55  ;;  %2313 = vmatprep.subr.mxu0 %v1254_v56 }
 0x256   : > { %2276 = vmatpush3.msra.mxu1 %v1206_v58  ;;  %2314 = vmatpush3.msra.mxu0 %v1238_v2 }
 0x257   : > { %1431 = vmatmul.mubr.f32.vlgmr.msra.gmra.mxu1 %v1166_v60  ;;  %1506 = vmatmul.mubr.f32.vlgmr.msra.gmra.mxu0 %v1168_v57  ;;  %v1969_v57 = vld [vmem:[%s3832_s2 + $0x6] ss:$0 sm:$0xff] }
 0x258   : > { %2515 = vmatprep.subr.mxu1 %v1285_v59  ;;  %1435 = vmatprep.mubr.f32.mxu1 %v3296_v53 }
 0x259   : > { %1510 = vmatprep.mubr.f32.mxu0 %v1171_v63  ;;  %2516 = vmatpush3.msra.mxu1 %v1285_v59 }
 0x25a   : > { %2517 = vmatprep.subr.mxu1 %v1284_v62  ;;  %2550 = vmatprep.subr.mxu0 %v1617_v19 }
 0x25b   : > { %2518 = vmatpush3.msra.mxu1 %v1284_v62  ;;  %1511 = vmatmul.mubr.f32.gmra.mxu0 %v1169_v1 }
 0x25c   : > { %1436 = vmatmul.mubr.f32.gmra.mxu1 %v1167_v3  ;;  %2519 = vmatprep.subr.mxu1 %v1283_v0 }
 0x25d   : > { %2520 = vmatpush3.msra.mxu1 %v1283_v0  ;;  %2547 = vmatprep.mubr.f32.mxu1 %v1172_v5  ;;  %v1970_v0 = vld [vmem:[%s3832_s2 + $0x7] ss:$0 sm:$0xff] }
 0x25e   : > { %2521 = vmatprep.subr.mxu1 %v1282_v4  ;;  %2551 = vmatpush3.msra.mxu0 %v1617_v19 }
 0x25f   : > { %2522 = vmatpush3.msra.mxu1 %v1282_v4  ;;  %2552 = vmatprep.subr.mxu0 %v1616_v20 }
 0x260   : > { %2523 = vmatprep.subr.mxu1 %v1281_v6  ;;  %2553 = vmatpush3.msra.mxu0 %v1616_v20 }
 0x261   : > { %2524 = vmatpush3.msra.mxu1 %v1281_v6  ;;  %2554 = vmatprep.subr.mxu0 %v1615_v21 }
 0x262   : > { %2525 = vmatprep.subr.mxu1 %v1280_v7  ;;  %2555 = vmatpush3.msra.mxu0 %v1615_v21 }
 0x263   : > { %2526 = vmatpush3.msra.mxu1 %v1280_v7  ;;  %2556 = vmatprep.subr.mxu0 %v1614_v22 }
 0x264   : > { %2527 = vmatprep.subr.mxu1 %v1279_v8  ;;  %2557 = vmatpush3.msra.mxu0 %v1614_v22 }
 0x265   : > { %2528 = vmatpush3.msra.mxu1 %v1279_v8  ;;  %2558 = vmatprep.subr.mxu0 %v1613_v24 }
 0x266   : > { %2529 = vmatprep.subr.mxu1 %v1278_v9  ;;  %2559 = vmatpush3.msra.mxu0 %v1613_v24 }
 0x267   : > { %2530 = vmatpush3.msra.mxu1 %v1278_v9  ;;  %2560 = vmatprep.subr.mxu0 %v1612_v25 }
 0x268   : > { %2531 = vmatprep.subr.mxu1 %v1277_v61  ;;  %2561 = vmatpush3.msra.mxu0 %v1612_v25 }
 0x269   : > { %2532 = vmatpush3.msra.mxu1 %v1277_v61  ;;  %2562 = vmatprep.subr.mxu0 %v1611_v26 }
 0x26a   : > { %2533 = vmatprep.subr.mxu1 %v1276_v11  ;;  %2563 = vmatpush3.msra.mxu0 %v1611_v26 }
 0x26b   : > { %2534 = vmatpush3.msra.mxu1 %v1276_v11  ;;  %2564 = vmatprep.subr.mxu0 %v1610_v27 }
 0x26c   : > { %2535 = vmatprep.subr.mxu1 %v1275_v12  ;;  %2565 = vmatpush3.msra.mxu0 %v1610_v27 }
 0x26d   : > { %2536 = vmatpush3.msra.mxu1 %v1275_v12  ;;  %2566 = vmatprep.subr.mxu0 %v1609_v28 }
 0x26e   : > { %2537 = vmatprep.subr.mxu1 %v1274_v13  ;;  %2567 = vmatpush3.msra.mxu0 %v1609_v28 }
 0x26f   : > { %2538 = vmatpush3.msra.mxu1 %v1274_v13  ;;  %2568 = vmatprep.subr.mxu0 %v1608_v29 }
 0x270   : > { %2539 = vmatprep.subr.mxu1 %v1273_v14  ;;  %2569 = vmatpush3.msra.mxu0 %v1608_v29 }
 0x271   : > { %2540 = vmatpush3.msra.mxu1 %v1273_v14  ;;  %2570 = vmatprep.subr.mxu0 %v1607_v30 }
 0x272   : > { %2541 = vmatprep.subr.mxu1 %v1272_v15  ;;  %2571 = vmatpush3.msra.mxu0 %v1607_v30 }
 0x273   : > { %2542 = vmatpush3.msra.mxu1 %v1272_v15  ;;  %2572 = vmatprep.subr.mxu0 %v1606_v31 }
 0x274   : > { %2543 = vmatprep.subr.mxu1 %v1271_v16  ;;  %2573 = vmatpush3.msra.mxu0 %v1606_v31 }
 0x275   : > { %2544 = vmatpush3.msra.mxu1 %v1271_v16  ;;  %2574 = vmatprep.subr.mxu0 %v1605_v32  ;;  %v1971_v16 = vld [vmem:[%s3832_s2 + $0x8] ss:$0 sm:$0xff] }
 0x276   : > { %2545 = vmatprep.subr.mxu1 %v1270_v17  ;;  %2575 = vmatpush3.msra.mxu0 %v1605_v32  ;;  %v1596_v25 = vmul.f32 %v1971_v16, %v3298_v54  ;;  %v1597_v27 = vmul.f32 %v1971_v16, %v3296_v53  ;;  %v1742_v54 = vld [vmem:[%s3833_s3 + $0x1d8] sm:$0xff] }
 0x277   : > { %2546 = vmatpush3.msra.mxu1 %v1270_v17  ;;  %2576 = vmatprep.subr.mxu0 %v1604_v33  ;;  %v1741_v53 = vld [vmem:[%s3833_s3 + $0x1b8] sm:$0xff] }
 0x278   : > { %2548 = vmatmul.mubr.f32.vlgmr.msra.gmra.mxu1 %v1173_v18  ;;  %2577 = vmatpush3.msra.mxu0 %v1604_v33 }
 0x279   : > { %2578 = vmatprep.subr.mxu0 %v1603_v35 }
 0x27a   : > { %2579 = vmatpush3.msra.mxu0 %v1603_v35 }
 0x27b   : > { %2580 = vmatprep.subr.mxu0 %v1602_v37 }
 0x27c   : > { %2581 = vmatpush3.msra.mxu0 %v1602_v37  ;;  %v1743_v37 = vld [vmem:[%s3833_s3 + $0x1f8] sm:$0xff] }
 0x27d   : > { %2585 = vmatprep.subr.mxu1 %v1743_v37 }
 0x27e   : > { %2586 = vmatpush3.msra.mxu1 %v1743_v37 }
 0x27f   : > { %2587 = vmatprep.subr.mxu1 %v1742_v54 }
 0x280   : > { %2588 = vmatpush3.msra.mxu1 %v1742_v54 }
 0x281   : > { %2589 = vmatprep.subr.mxu1 %v1741_v53 }
 0x282   : > { %2590 = vmatpush3.msra.mxu1 %v1741_v53 }
 0x2d1   : > { %v2183_v38 = vpop.f32.mrf.mxu0  ;;  %v2145_v39 = vpop.f32.mrf.mxu1 }
 0x2d3   : > { %v2184_v40 = vpop.f32.mrf.mxu0  ;;  %v2146_v41 = vpop.f32.mrf.mxu1 }
 0x2d4   : > { %v2147_v59 = vadd.f32 %v2146_v41, %v2145_v39  ;;  %v2185_v9 = vadd.f32 %v2184_v40, %v2183_v38  ;;  %v1740_v38 = vld [vmem:[%s3833_s3 + $0x198] sm:$0xff] }
 0x2d5   : > { %2591 = vmatprep.subr.mxu1 %v1740_v38  ;;  %v1739_v39 = vld [vmem:[%s3833_s3 + $0x178] sm:$0xff] }
 0x2d6   : > { %v1004_v5 = vadd.f32 %v2147_v59, %v1969_v57  ;;  %2592 = vmatpush3.msra.mxu1 %v1740_v38  ;;  %v1738_v40 = vld [vmem:[%s3833_s3 + $0x158] sm:$0xff] }
 0x2d7   : > { %v2186_v42 = vpop.f32.mrf.mxu0  ;;  %v2148_v43 = vpop.f32.mrf.mxu1  ;;  %2593 = vmatprep.subr.mxu1 %v1739_v39  ;;  %v1737_v41 = vld [vmem:[%s3833_s3 + $0x138] sm:$0xff] }
 0x2d8   : > { %v1079_v14 = vadd.f32 %v2185_v9, %v1004_v5  ;;  %2594 = vmatpush3.msra.mxu1 %v1739_v39 }
 0x2d9   : > { %v2187_v44 = vpop.f32.mrf.mxu0  ;;  %v2149_v45 = vpop.f32.mrf.mxu1  ;;  %2595 = vmatprep.subr.mxu1 %v1738_v40 }
 0x2da   : > { %v2150_v62 = vadd.f32 %v2149_v45, %v2148_v43  ;;  %v2188_v12 = vadd.f32 %v2187_v44, %v2186_v42  ;;  %2596 = vmatpush3.msra.mxu1 %v1738_v40  ;;  %v1736_v42 = vld [vmem:[%s3833_s3 + $0x118] sm:$0xff] }
 0x2db   : > { %2597 = vmatprep.subr.mxu1 %v1737_v41  ;;  %v1735_v43 = vld [vmem:[%s3833_s3 + $0xf8] sm:$0xff] }
 0x2dc   : > { %v1009_v7 = vadd.f32 %v2150_v62, %v1969_v57  ;;  %2598 = vmatpush3.msra.mxu1 %v1737_v41  ;;  %v1734_v44 = vld [vmem:[%s3833_s3 + $0xd8] sm:$0xff] }
 0x2dd   : > { %2599 = vmatprep.subr.mxu1 %v1736_v42  ;;  %v1733_v45 = vld [vmem:[%s3833_s3 + $0xb8] sm:$0xff] }
 0x2de   : > { %v1084_v17 = vadd.f32 %v2188_v12, %v1009_v7  ;;  %2600 = vmatpush3.msra.mxu1 %v1736_v42 }
 0x2df   : > { %2601 = vmatprep.subr.mxu1 %v1735_v43 }
 0x2e0   : > { %2602 = vmatpush3.msra.mxu1 %v1735_v43 }
 0x2e1   : > { %2603 = vmatprep.subr.mxu1 %v1734_v44 }
 0x2e2   : > { %2604 = vmatpush3.msra.mxu1 %v1734_v44 }
 0x2e3   : > { %2605 = vmatprep.subr.mxu1 %v1733_v45 }
 0x2e4   : > { %2606 = vmatpush3.msra.mxu1 %v1733_v45 }
 0x2f4   : > { %v2239_v46 = vpop.f32.mrf.mxu0  ;;  %v2514_v47 = vpop.f32.mrf.mxu1 }
 0x2f5   : > { %v1159_v21 = vadd.f32 %v2514_v47, %v1084_v17  ;;  %v1731_v47 = vld [vmem:[%s3833_s3 + $0x78] sm:$0xff] }
 0x2f6   : > { %v2240_v48 = vpop.f32.mrf.mxu0  ;;  %v1153_v49 = vpop.f32.mrf.mxu1 }
 0x2f7   : > { %v2241_v1 = vadd.f32 %v2240_v48, %v2239_v46  ;;  %v1154_v19 = vadd.f32 %v1153_v49, %v1079_v14  ;;  %v1599_v32 = vadd.f32 %v1597_v27, %v1159_v21  ;;  %v1732_v46 = vld [vmem:[%s3833_s3 + $0x98] sm:$0xff]  ;;  %v1978_v21 = vld [vmem:[%s3832_s2 + $0xb] ss:$0 sm:$0xff] }
 0x2f8   : > { %2607 = vmatprep.subr.mxu1 %v1732_v46  ;;  %v1730_v48 = vld [vmem:[%s3833_s3 + $0x58] sm:$0xff] }
 0x2f9   : > { %v1358_v61 = vadd.f32 %v2241_v1, %v1970_v0  ;;  %v1598_v30 = vadd.f32 %v1596_v25, %v1154_v19  ;;  %2608 = vmatpush3.msra.mxu1 %v1732_v46  ;;  %v1729_v49 = vld [vmem:[%s3833_s3 + $0x38] sm:$0xff] }
 0x2fa   : > { %v2242_v50 = vpop.f32.mrf.mxu0  ;;  %2609 = vmatprep.subr.mxu1 %v1731_v47 }
 0x2fb   : > { %2610 = vmatpush3.msra.mxu1 %v1731_v47 }
 0x2fc   : > { %v2243_v52 = vpop.f32.mrf.mxu0  ;;  %2611 = vmatprep.subr.mxu1 %v1730_v48 }
 0x2fd   : > { %v2244_v63 = vadd.f32 %v2243_v52, %v2242_v50  ;;  %2612 = vmatpush3.msra.mxu1 %v1730_v48  ;;  %v1728_v50 = vld [vmem:[%s3833_s3 + $0x18] sm:$0xff] }
 0x2fe   : > { %2613 = vmatprep.subr.mxu1 %v1729_v49 }
 0x2ff   : > { %v1363_v8 = vadd.f32 %v2244_v63, %v1970_v0  ;;  %2614 = vmatpush3.msra.mxu1 %v1729_v49 }
 0x300   : > { %2615 = vmatprep.subr.mxu1 %v1728_v50 }
 0x301   : > { %2616 = vmatpush3.msra.mxu1 %v1728_v50 }
 0x317   : > { %v2277_v51 = vpop.f32.mrf.mxu1  ;;  %v2315_v56 = vpop.f32.mrf.mxu0 }
 0x319   : > { %v2278_v55 = vpop.f32.mrf.mxu1  ;;  %v2316_v2 = vpop.f32.mrf.mxu0 }
 0x31a   : > { %v2279_v6 = vadd.f32 %v2278_v55, %v2277_v51  ;;  %v2317_v20 = vadd.f32 %v2316_v2, %v2315_v56  ;;  %v1967_v51 = vld [vmem:[%s3832_s2 + $0x4] ss:$0 sm:$0xff]  ;;  %v1972_v2 = vld [vmem:[%s3832_s2 + $0x9] ss:$0 sm:$0xff] }
 0x31b   : > { %v2318_v3 = vpop.f32.mrf.mxu0  ;;  %v507_v52 = vadd.f32 %v1967_v51, %v3291_v36  ;;  %v512_v55 = vadd.f32 %v3289_v34, %v1967_v51 }
 0x31c   : > { %v2280_v58 = vpop.f32.mrf.mxu1  ;;  %v1433_v15 = vadd.f32 %v2279_v6, %v1358_v61 }
 0x31d   : > { %v2319_v11 = vpop.f32.mrf.mxu0  ;;  %v1973_v56 = vmul.f32 -1.442695, %v507_v52 }
 0x31e   : > { %v2281_v60 = vpop.f32.mrf.mxu1  ;;  %v2320_v18 = vadd.f32 %v2319_v11, %v2318_v3  ;;  %v1508_v26 = vadd.f32 %v2317_v20, %v1433_v15 }
 0x31f   : > { %v2282_v4 = vadd.f32 %v2281_v60, %v2280_v58  ;;  %v1974_v58 = vmul.f32 -1.442695, %v512_v55  ;;  %2637 = vpow2.f32 %v1973_v56 }
 0x321   : > { %v1438_v13 = vadd.f32 %v2282_v4, %v1363_v8  ;;  %2639 = vpow2.f32 %v1974_v58 }
 0x323   : > { %v1513_v22 = vadd.f32 %v2320_v18, %v1438_v13  ;;  %v1977_v18 = vld [vmem:[%s3832_s2 + $0xa] ss:$0 sm:$0xff] }
 0x32c   : > { %v2638_v1 = vpop.eup %2637 }
 0x32d   : > { %v1704_v3 = vadd.f32 1.0, %v2638_v1 }
 0x32e   : > { %v2640_v36 = vpop.eup %2639 }
 0x32f   : > { %v1705_v4 = vadd.f32 1.0, %v2640_v36 }
 0x338   : > { %v2549_v24 = vpop.f32.mrf.mxu1 }
 0x339   : > { %v1588_v28 = vadd.f32 %v2549_v24, %v1513_v22 }
 0x33a   : > { %v1582_v29 = vpop.f32.mrf.mxu1 }
 0x33b   : > { %v1583_v31 = vadd.f32 %v1582_v29, %v1508_v26  ;;  %v1601_v35 = vadd.f32 %v1599_v32, %v1588_v28  ;;  %v2653_v28 = vld [vmem:[%s2727_s10 + $0x8] sm:$0xff] }
 0x33d   : > { %v1600_v33 = vadd.f32 %v1598_v30, %v1583_v31  ;;  %v2654_v31 = vld [vmem:[%s2727_s10] sm:$0xff]  ;;  %s276_s10 = scalar_lea.vmem %s3836_s6, %s1959_s27 }
 0x33f   : > { %2582 = vmatprep.mubr.f32.mxu0 %v1600_v33 }
 0x340   : > { %2583 = vmatmul.mubr.f32.vlgmr.msra.gmra.mxu0 %v1601_v35 }
 0x400   : > { %v2584_v59 = vpop.f32.mrf.mxu0 }
 0x401   : > { %v1695_v60 = vadd.f32 %v2584_v59, %v1972_v2 }
 0x402   : > { %v1689_v57 = vpop.f32.mrf.mxu0 }
 0x403   : > { %v1976_v62 = vmul.f32 -1.442695, %v1695_v60  ;;  %v1690_v63 = vadd.f32 %v1972_v2, %v1689_v57 }
 0x405   : > { %2641 = vpow2.f32 %v1976_v62  ;;  %v1975_v0 = vmul.f32 -1.442695, %v1690_v63 }
 0x407   : > { %2643 = vpow2.f32 %v1975_v0 }
 0x408   : > { %2645 = vrcp.f32 %v1704_v3 }
 0x412   : > { %v2642_v34 = vpop.eup %2641 }
 0x413   : > { %v1719_v5 = vadd.f32 1.0, %v2642_v34 }
 0x414   : > { %v2644_v6 = vpop.eup %2643 }
 0x415   : > { %2647 = vrcp.f32 %v1719_v5  ;;  %v1718_v7 = vadd.f32 1.0, %v2644_v6  ;;  %v2646_v8 = vpop.eup %2645 }
 0x416   : > { %2649 = vrcp.f32 %v1705_v4  ;;  %v1710_v13 = vmul.f32 %v2646_v8, %v507_v52 }
 0x417   : > { %2651 = vrcp.f32 %v1718_v7 }
 0x422   : > { %v2648_v9 = vpop.eup %2647 }
 0x423   : > { %v2650_v61 = vpop.eup %2649  ;;  %v1725_v12 = vmul.f32 %v2648_v9, %v1695_v60 }
 0x424   : > { %v2652_v11 = vpop.eup %2651  ;;  %v1711_v15 = vmul.f32 %v2650_v61, %v512_v55 }
 0x425   : > { %v1724_v14 = vmul.f32 %v2652_v11, %v1690_v63 }
 0x426   : > { %v1727_v17 = vmul.f32 %v1725_v12, %v1711_v15 }
 0x427   : > { %v1726_v16 = vmul.f32 %v1724_v14, %v1710_v13 }
 0x429   : > { %2617 = vmatprep.mubr.f32.mxu1 %v1726_v16 }
 0x42a   : > { %2618 = vmatmul.mubr.f32.vlgmr.msra.gmra.mxu1 %v1727_v17 }
 0x4ea   : > { %v2619_v19 = vpop.f32.mrf.mxu1 }
 0x4eb   : > { %v1821_v20 = vadd.f32 %v2619_v19, %v1977_v18 }
 0x4ec   : > { %v1815_v22 = vpop.f32.mrf.mxu1 }
 0x4ed   : > { %v1825_v24 = vadd.f32 %v1821_v20, %v2776_v23  ;;  %v1816_v25 = vadd.f32 %v1977_v18, %v1815_v22 }
 0x4ef   : > { %v1832_v26 = vmul.f32 %v1978_v21, %v1825_v24  ;;  %v1824_v27 = vadd.f32 %v1816_v25, %v2742_v10 }
 0x4f1   : > { %v1834_v29 = vadd.f32 %v2653_v28, %v1832_v26  ;;  %v1831_v30 = vmul.f32 %v1978_v21, %v1824_v27 }
 0x4f3   : > { %1836 = vst [vmem:[%s272_s26 + $0x8] sm:$0xff] %v1834_v29  ;;  %v1833_v32 = vadd.f32 %v2654_v31, %v1831_v30  ;;  %v1846_v33 = vmul.f32 %v1834_v29, %v1834_v29 }
 0x4f5   : > { %1835 = vst [vmem:[%s272_s26] sm:$0xff] %v1833_v32  ;;  %v1837_v35 = vadd.f32 %v1834_v29, %v1833_v32  ;;  %v1845_v23 = vmul.f32 %v1833_v32, %v1833_v32 }
 0x4f7   : > { %v1838_v37 = vrot.slane %v1837_v35, 4  ;;  %v1847_v54 = vadd.f32 %v1846_v33, %v1845_v23 }
 0x4f9   : > { %v1839_v53 = vadd.f32 %v1838_v37, %v1837_v35  ;;  %v1848_v10 = vrot.slane %v1847_v54, 4 }
 0x4fb   : > { %v1840_v38 = vrot.slane %v1839_v53, 2  ;;  %v1849_v39 = vadd.f32 %v1848_v10, %v1847_v54 }
 0x4fd   : > { %v1841_v40 = vadd.f32 %v1840_v38, %v1839_v53  ;;  %v1850_v41 = vrot.slane %v1849_v39, 2 }
 0x4ff   : > { %v1842_v42 = vrot.slane %v1841_v40, 1  ;;  %v1851_v43 = vadd.f32 %v1850_v41, %v1849_v39 }
 0x501   : > { %v1843_v44 = vadd.f32 %v1842_v42, %v1841_v40  ;;  %v1852_v45 = vrot.slane %v1851_v43, 1 }
 0x503   : > { %1844 = vst [vmem:[%s276_s10] sm:$0x1] %v1843_v44  ;;  %v1853_v46 = vadd.f32 %v1852_v45, %v1851_v43 }
 0x505   : > { %1854 = vst [vmem:[%s276_s10 + $0x1] sm:$0x1] %v1853_v46 }
 0x506 PF: > { %s17_s21 = sadd.s32 1, %s2661_s21  }
 0x507   : > { %p14_p4 = scmp.ge.s32.totalorder %s17_s21, 4  }
 0x509   :  { %16 = sbr.rel (!%p14_p4) target bundleno = 1 (0x1), region = 85 }

// kernel: moga_block.3
= control target key start
LH: loop header
LB: loop body
LE: loop exit
PB: predicated region body
PF: predicated region fallthrough
CT: control target
= control target key end

     0   :  { %s3687_s21 = smov 0   ;;  %s7160_s0 = inlined_call_operand.vmem [shape: f32[2,16,128], index: 0, kind: input, shape index: {}]   ;;  %s7161_s1 = inlined_call_operand.vmem [shape: f32[5,128], index: 1, kind: input, shape index: {}]   ;;  %s7162_s2 = inlined_call_operand.vmem [shape: f32[3,512], index: 2, kind: input, shape index: {}]   ;;  %s7163_s3 = inlined_call_operand.vmem [shape: f32[256,512], index: 3, kind: input, shape index: {}]   ;;  %s7164_s4 = inlined_call_operand.vmem [shape: f32[512,256], index: 4, kind: input, shape index: {}]   ;;  %s7165_s5 = inlined_call_operand.vmem [shape: f32[1536,512], index: 5, kind: input, shape index: {}]   ;;  %s7166_s6 = inlined_call_operand.vmem [shape: f32[2,16,128], index: 6, kind: output, shape index: {}]  }
   0x1 LB: > { %s3410_s22 = sadd.s32 4294967295, %s3648_s21   ;;  %p3414_p0 = scmp.ge.s32.totalorder %s3648_s21, 1  ;;  %s3648_s21 = sphi %s3687_s21, %s16_s21  }
   0x2   : > { %p212_p1 = scmp.lt.s32.totalorder %s3648_s21, 3 }
   0x4   : > { %p213_p2 = pnand %p3414_p0, %p212_p1 }
   0x5   : > { %p3769_p3 = scmp.lt.s32.totalorder (!%p213_p2), %s3410_s22, 1 }
   0x6   : > { %216 = sbr.rel (%p213_p2) target bundleno = 1500 (0x5dc), region = 44 }
   0xb   : > { %v329_v0 = vld [vmem:[%s7163_s3 + $0x1e8] sm:$0xff]  ;;  %v331_v1 = vld [vmem:[%s7163_s3 + $0x1f8] sm:$0xff]  ;;  %v328_v2 = vld [vmem:[%s7163_s3 + $0x1e0] sm:$0xff]  ;;  %s7169_s22 = smov (!%p3769_p3, %s3410_s22), 1  ;;  %vm525_vm1 = vcmask 1040384   ;;  %vm598_vm2 = vcmask 1046528  }
   0xc   : > { %354 = vmatprep.subr.mxu0 %v329_v0  ;;  %431 = vmatprep.subr.mxu1 %v331_v1  ;;  %v330_v3 = vld [vmem:[%s7163_s3 + $0x1f0] sm:$0xff]  ;;  %v325_v4 = vld [vmem:[%s7163_s3 + $0x1c8] sm:$0xff]  ;;  %v327_v5 = vld [vmem:[%s7163_s3 + $0x1d8] sm:$0xff]  ;;  %s3428_s14 = sshll.u32 %s7169_s22, 4  ;;  %vm635_vm3 = vcmask 1045504  }
   0xd   : > { %355 = vmatpush1.msra.mxu0 %v328_v2  ;;  %432 = vmatpush1.msra.mxu1 %v330_v3  ;;  %v324_v6 = vld [vmem:[%s7163_s3 + $0x1c0] sm:$0xff]  ;;  %v326_v7 = vld [vmem:[%s7163_s3 + $0x1d0] sm:$0xff]  ;;  %v321_v8 = vld [vmem:[%s7163_s3 + $0x1a8] sm:$0xff]  ;;  %s3851_s7 = scalar_lea.vmem %s7160_s0, %s3428_s14  ;;  %s251_s25 = scalar_lea.vmem %s7166_s6, %s3428_s14 }
   0xe   : > { %356 = vmatprep.subr.mxu0 %v325_v4  ;;  %433 = vmatprep.subr.mxu1 %v327_v5  ;;  %v323_v9 = vld [vmem:[%s7163_s3 + $0x1b8] sm:$0xff]  ;;  %v320_v10 = vld [vmem:[%s7163_s3 + $0x1a0] sm:$0xff]  ;;  %v322_v11 = vld [vmem:[%s7163_s3 + $0x1b0] sm:$0xff] }
   0xf   : > { %357 = vmatpush1.msra.mxu0 %v324_v6  ;;  %434 = vmatpush1.msra.mxu1 %v326_v7  ;;  %v317_v12 = vld [vmem:[%s7163_s3 + $0x188] sm:$0xff]  ;;  %v319_v13 = vld [vmem:[%s7163_s3 + $0x198] sm:$0xff]  ;;  %v316_v14 = vld [vmem:[%s7163_s3 + $0x180] sm:$0xff]  ;;  %v3650_v7 = vmov 0.0  }
  0x10   : > { %358 = vmatprep.subr.mxu0 %v321_v8  ;;  %435 = vmatprep.subr.mxu1 %v323_v9  ;;  %v318_v15 = vld [vmem:[%s7163_s3 + $0x190] sm:$0xff]  ;;  %v313_v16 = vld [vmem:[%s7163_s3 + $0x168] sm:$0xff]  ;;  %v315_v17 = vld [vmem:[%s7163_s3 + $0x178] sm:$0xff] }
  0x11   : > { %359 = vmatpush1.msra.mxu0 %v320_v10  ;;  %436 = vmatpush1.msra.mxu1 %v322_v11  ;;  %v312_v18 = vld [vmem:[%s7163_s3 + $0x160] sm:$0xff]  ;;  %v314_v19 = vld [vmem:[%s7163_s3 + $0x170] sm:$0xff]  ;;  %v309_v20 = vld [vmem:[%s7163_s3 + $0x148] sm:$0xff] }
  0x12   : > { %360 = vmatprep.subr.mxu0 %v317_v12  ;;  %437 = vmatprep.subr.mxu1 %v319_v13  ;;  %v311_v21 = vld [vmem:[%s7163_s3 + $0x158] sm:$0xff]  ;;  %v308_v22 = vld [vmem:[%s7163_s3 + $0x140] sm:$0xff]  ;;  %v310_v23 = vld [vmem:[%s7163_s3 + $0x150] sm:$0xff] }
  0x13   : > { %361 = vmatpush1.msra.mxu0 %v316_v14  ;;  %438 = vmatpush1.msra.mxu1 %v318_v15  ;;  %v305_v24 = vld [vmem:[%s7163_s3 + $0x128] sm:$0xff]  ;;  %v307_v25 = vld [vmem:[%s7163_s3 + $0x138] sm:$0xff]  ;;  %v304_v26 = vld [vmem:[%s7163_s3 + $0x120] sm:$0xff] }
  0x14   : > { %362 = vmatprep.subr.mxu0 %v313_v16  ;;  %439 = vmatprep.subr.mxu1 %v315_v17  ;;  %v306_v27 = vld [vmem:[%s7163_s3 + $0x130] sm:$0xff]  ;;  %v301_v28 = vld [vmem:[%s7163_s3 + $0x108] sm:$0xff]  ;;  %v303_v29 = vld [vmem:[%s7163_s3 + $0x118] sm:$0xff] }
  0x15   : > { %363 = vmatpush1.msra.mxu0 %v312_v18  ;;  %440 = vmatpush1.msra.mxu1 %v314_v19  ;;  %v300_v30 = vld [vmem:[%s7163_s3 + $0x100] sm:$0xff]  ;;  %v302_v31 = vld [vmem:[%s7163_s3 + $0x110] sm:$0xff]  ;;  %v297_v32 = vld [vmem:[%s7163_s3 + $0xe8] sm:$0xff] }
  0x16   : > { %364 = vmatprep.subr.mxu0 %v309_v20  ;;  %441 = vmatprep.subr.mxu1 %v311_v21  ;;  %v299_v33 = vld [vmem:[%s7163_s3 + $0xf8] sm:$0xff]  ;;  %v296_v34 = vld [vmem:[%s7163_s3 + $0xe0] sm:$0xff]  ;;  %v298_v35 = vld [vmem:[%s7163_s3 + $0xf0] sm:$0xff] }
  0x17   : > { %365 = vmatpush1.msra.mxu0 %v308_v22  ;;  %442 = vmatpush1.msra.mxu1 %v310_v23  ;;  %v293_v36 = vld [vmem:[%s7163_s3 + $0xc8] sm:$0xff]  ;;  %v295_v37 = vld [vmem:[%s7163_s3 + $0xd8] sm:$0xff]  ;;  %v292_v38 = vld [vmem:[%s7163_s3 + $0xc0] sm:$0xff] }
  0x18   : > { %366 = vmatprep.subr.mxu0 %v305_v24  ;;  %443 = vmatprep.subr.mxu1 %v307_v25  ;;  %v294_v39 = vld [vmem:[%s7163_s3 + $0xd0] sm:$0xff]  ;;  %v289_v40 = vld [vmem:[%s7163_s3 + $0xa8] sm:$0xff]  ;;  %v291_v41 = vld [vmem:[%s7163_s3 + $0xb8] sm:$0xff] }
  0x19   : > { %367 = vmatpush1.msra.mxu0 %v304_v26  ;;  %444 = vmatpush1.msra.mxu1 %v306_v27  ;;  %v288_v42 = vld [vmem:[%s7163_s3 + $0xa0] sm:$0xff]  ;;  %v290_v43 = vld [vmem:[%s7163_s3 + $0xb0] sm:$0xff]  ;;  %v285_v44 = vld [vmem:[%s7163_s3 + $0x88] sm:$0xff] }
  0x1a   : > { %368 = vmatprep.subr.mxu0 %v301_v28  ;;  %445 = vmatprep.subr.mxu1 %v303_v29  ;;  %v287_v45 = vld [vmem:[%s7163_s3 + $0x98] sm:$0xff]  ;;  %v284_v46 = vld [vmem:[%s7163_s3 + $0x80] sm:$0xff]  ;;  %v286_v47 = vld [vmem:[%s7163_s3 + $0x90] sm:$0xff] }
  0x1b   : > { %369 = vmatpush1.msra.mxu0 %v300_v30  ;;  %446 = vmatpush1.msra.mxu1 %v302_v31  ;;  %v281_v48 = vld [vmem:[%s7163_s3 + $0x68] sm:$0xff]  ;;  %v283_v49 = vld [vmem:[%s7163_s3 + $0x78] sm:$0xff]  ;;  %v280_v50 = vld [vmem:[%s7163_s3 + $0x60] sm:$0xff] }
  0x1c   : > { %370 = vmatprep.subr.mxu0 %v297_v32  ;;  %447 = vmatprep.subr.mxu1 %v299_v33  ;;  %v282_v51 = vld [vmem:[%s7163_s3 + $0x70] sm:$0xff]  ;;  %v252_v52 = vld [vmem:[%s3851_s7] sm:$0xff]  ;;  %v277_v54 = vld [vmem:[%s7163_s3 + $0x48] sm:$0xff] }
  0x1d   : > { %371 = vmatpush1.msra.mxu0 %v296_v34  ;;  %448 = vmatpush1.msra.mxu1 %v298_v35  ;;  %v3419_v53 = vld [vmem:[%s7161_s1] ss:$0 sm:$0xff]  ;;  %v279_v55 = vld [vmem:[%s7163_s3 + $0x58] sm:$0xff]  ;;  %v278_v57 = vld [vmem:[%s7163_s3 + $0x50] sm:$0xff] }
  0x1e   : > { %372 = vmatprep.subr.mxu0 %v293_v36  ;;  %449 = vmatprep.subr.mxu1 %v295_v37  ;;  %v276_v56 = vld [vmem:[%s7163_s3 + $0x40] sm:$0xff]  ;;  %v273_v58 = vld [vmem:[%s7163_s3 + $0x28] sm:$0xff]  ;;  %v275_v59 = vld [vmem:[%s7163_s3 + $0x38] sm:$0xff]  ;;  %v259_v61 = vmul.f32 %v3419_v53, %v252_v52 }
  0x1f   : > { %373 = vmatpush1.msra.mxu0 %v292_v38  ;;  %450 = vmatpush1.msra.mxu1 %v294_v39  ;;  %v272_v60 = vld [vmem:[%s7163_s3 + $0x20] sm:$0xff]  ;;  %v274_v62 = vld [vmem:[%s7163_s3 + $0x30] sm:$0xff]  ;;  %v253_v0 = vld [vmem:[%s3851_s7 + $0x8] sm:$0xff] }
  0x20   : > { %374 = vmatprep.subr.mxu0 %v289_v40  ;;  %451 = vmatprep.subr.mxu1 %v291_v41  ;;  %v3420_v63 = vld [vmem:[%s7161_s1 + $0x1] ss:$0 sm:$0xff]  ;;  %v269_v1 = vld [vmem:[%s7163_s3 + $0x8] sm:$0xff]  ;;  %v271_v2 = vld [vmem:[%s7163_s3 + $0x18] sm:$0xff]  ;;  %v260_v6 = vmul.f32 %v3419_v53, %v253_v0 }
  0x21   : > { %375 = vmatpush1.msra.mxu0 %v288_v42  ;;  %452 = vmatpush1.msra.mxu1 %v290_v43  ;;  %v268_v3 = vld [vmem:[%s7163_s3] sm:$0xff]  ;;  %v270_v4 = vld [vmem:[%s7163_s3 + $0x10] sm:$0xff]  ;;  %v266_v5 = vadd.f32 %v3420_v63, %v259_v61  ;;  %v725_v8 = vld [vmem:[%s7165_s5 + $0x1e8] sm:$0xff] }
  0x22   : > { %376 = vmatprep.subr.mxu0 %v285_v44  ;;  %453 = vmatprep.subr.mxu1 %v287_v45  ;;  %v853_v9 = vld [vmem:[%s7165_s5 + $0x5e8] sm:$0xff]  ;;  %v267_v10 = vadd.f32 %v3420_v63, %v260_v6  ;;  %v724_v11 = vld [vmem:[%s7165_s5 + $0x1e0] sm:$0xff] }
  0x23   : > { %377 = vmatpush1.msra.mxu0 %v284_v46  ;;  %454 = vmatpush1.msra.mxu1 %v286_v47  ;;  %v852_v12 = vld [vmem:[%s7165_s5 + $0x5e0] sm:$0xff]  ;;  %v721_v13 = vld [vmem:[%s7165_s5 + $0x1c8] sm:$0xff] }
  0x24   : > { %378 = vmatprep.subr.mxu0 %v281_v48  ;;  %455 = vmatprep.subr.mxu1 %v283_v49  ;;  %v849_v14 = vld [vmem:[%s7165_s5 + $0x5c8] sm:$0xff]  ;;  %v720_v15 = vld [vmem:[%s7165_s5 + $0x1c0] sm:$0xff] }
  0x25   : > { %379 = vmatpush1.msra.mxu0 %v280_v50  ;;  %456 = vmatpush1.msra.mxu1 %v282_v51  ;;  %v848_v16 = vld [vmem:[%s7165_s5 + $0x5c0] sm:$0xff]  ;;  %v717_v17 = vld [vmem:[%s7165_s5 + $0x1a8] sm:$0xff] }
  0x26   : > { %380 = vmatprep.subr.mxu0 %v277_v54  ;;  %457 = vmatprep.subr.mxu1 %v279_v55  ;;  %v845_v18 = vld [vmem:[%s7165_s5 + $0x5a8] sm:$0xff]  ;;  %v716_v19 = vld [vmem:[%s7165_s5 + $0x1a0] sm:$0xff] }
  0x27   : > { %381 = vmatpush1.msra.mxu0 %v276_v56  ;;  %458 = vmatpush1.msra.mxu1 %v278_v57  ;;  %v844_v20 = vld [vmem:[%s7165_s5 + $0x5a0] sm:$0xff]  ;;  %v713_v21 = vld [vmem:[%s7165_s5 + $0x188] sm:$0xff] }
  0x28   : > { %382 = vmatprep.subr.mxu0 %v273_v58  ;;  %459 = vmatprep.subr.mxu1 %v275_v59  ;;  %v841_v22 = vld [vmem:[%s7165_s5 + $0x588] sm:$0xff]  ;;  %v712_v23 = vld [vmem:[%s7165_s5 + $0x180] sm:$0xff] }
  0x29   : > { %383 = vmatpush1.msra.mxu0 %v272_v60  ;;  %460 = vmatpush1.msra.mxu1 %v274_v62  ;;  %v840_v24 = vld [vmem:[%s7165_s5 + $0x580] sm:$0xff]  ;;  %v709_v25 = vld [vmem:[%s7165_s5 + $0x168] sm:$0xff] }
  0x2a   : > { %384 = vmatprep.subr.mxu0 %v269_v1  ;;  %461 = vmatprep.subr.mxu1 %v271_v2  ;;  %v837_v26 = vld [vmem:[%s7165_s5 + $0x568] sm:$0xff]  ;;  %v708_v27 = vld [vmem:[%s7165_s5 + $0x160] sm:$0xff] }
  0x2b   : > { %385 = vmatpush1.msra.mxu0 %v268_v3  ;;  %418 = vmatprep.mubr.f32.mxu0 %v3650_v7  ;;  %v836_v28 = vld [vmem:[%s7165_s5 + $0x560] sm:$0xff]  ;;  %v705_v29 = vld [vmem:[%s7165_s5 + $0x148] sm:$0xff] }
  0x2c   : > { %462 = vmatpush1.msra.mxu1 %v270_v4  ;;  %495 = vmatprep.mubr.f32.mxu1 %v3650_v7  ;;  %v833_v30 = vld [vmem:[%s7165_s5 + $0x548] sm:$0xff]  ;;  %v704_v31 = vld [vmem:[%s7165_s5 + $0x140] sm:$0xff] }
  0x2d   : > { %419 = vmatmul.mubr.f32.vlgmr.msra.gmra.mxu0 %v266_v5  ;;  %496 = vmatmul.mubr.f32.vlgmr.msra.gmra.mxu1 %v266_v5  ;;  %v832_v32 = vld [vmem:[%s7165_s5 + $0x540] sm:$0xff]  ;;  %v701_v33 = vld [vmem:[%s7165_s5 + $0x128] sm:$0xff] }
  0x2e   : > { %424 = vmatprep.mubr.f32.mxu0 %v3650_v7  ;;  %501 = vmatprep.mubr.f32.mxu1 %v3650_v7  ;;  %v829_v34 = vld [vmem:[%s7165_s5 + $0x528] sm:$0xff]  ;;  %v700_v35 = vld [vmem:[%s7165_s5 + $0x120] sm:$0xff] }
  0x2f   : > { %1455 = vmatprep.subr.mxu0 %v725_v8  ;;  %1532 = vmatprep.subr.mxu1 %v853_v9  ;;  %v828_v36 = vld [vmem:[%s7165_s5 + $0x520] sm:$0xff]  ;;  %v697_v37 = vld [vmem:[%s7165_s5 + $0x108] sm:$0xff] }
  0x30   : > { %1456 = vmatpush1.msra.mxu0 %v724_v11  ;;  %1533 = vmatpush1.msra.mxu1 %v852_v12  ;;  %v825_v38 = vld [vmem:[%s7165_s5 + $0x508] sm:$0xff]  ;;  %v696_v39 = vld [vmem:[%s7165_s5 + $0x100] sm:$0xff] }
  0x31   : > { %425 = vmatmul.mubr.f32.gmra.mxu0 %v267_v10  ;;  %502 = vmatmul.mubr.f32.gmra.mxu1 %v267_v10  ;;  %v824_v40 = vld [vmem:[%s7165_s5 + $0x500] sm:$0xff]  ;;  %v693_v41 = vld [vmem:[%s7165_s5 + $0xe8] sm:$0xff] }
  0x32   : > { %1457 = vmatprep.subr.mxu0 %v721_v13  ;;  %1534 = vmatprep.subr.mxu1 %v849_v14  ;;  %v821_v42 = vld [vmem:[%s7165_s5 + $0x4e8] sm:$0xff]  ;;  %v692_v43 = vld [vmem:[%s7165_s5 + $0xe0] sm:$0xff] }
  0x33   : > { %1458 = vmatpush1.msra.mxu0 %v720_v15  ;;  %1535 = vmatpush1.msra.mxu1 %v848_v16  ;;  %v820_v44 = vld [vmem:[%s7165_s5 + $0x4e0] sm:$0xff]  ;;  %v689_v45 = vld [vmem:[%s7165_s5 + $0xc8] sm:$0xff] }
  0x34   : > { %1459 = vmatprep.subr.mxu0 %v717_v17  ;;  %1536 = vmatprep.subr.mxu1 %v845_v18  ;;  %v817_v46 = vld [vmem:[%s7165_s5 + $0x4c8] sm:$0xff]  ;;  %v688_v47 = vld [vmem:[%s7165_s5 + $0xc0] sm:$0xff] }
  0x35   : > { %1460 = vmatpush1.msra.mxu0 %v716_v19  ;;  %1537 = vmatpush1.msra.mxu1 %v844_v20  ;;  %v816_v48 = vld [vmem:[%s7165_s5 + $0x4c0] sm:$0xff]  ;;  %v685_v49 = vld [vmem:[%s7165_s5 + $0xa8] sm:$0xff] }
  0x36   : > { %1461 = vmatprep.subr.mxu0 %v713_v21  ;;  %1538 = vmatprep.subr.mxu1 %v841_v22  ;;  %v813_v50 = vld [vmem:[%s7165_s5 + $0x4a8] sm:$0xff]  ;;  %v684_v51 = vld [vmem:[%s7165_s5 + $0xa0] sm:$0xff] }
  0x37   : > { %1462 = vmatpush1.msra.mxu0 %v712_v23  ;;  %1539 = vmatpush1.msra.mxu1 %v840_v24  ;;  %v812_v52 = vld [vmem:[%s7165_s5 + $0x4a0] sm:$0xff]  ;;  %v681_v53 = vld [vmem:[%s7165_s5 + $0x88] sm:$0xff] }
  0x38   : > { %1463 = vmatprep.subr.mxu0 %v709_v25  ;;  %1540 = vmatprep.subr.mxu1 %v837_v26  ;;  %v809_v54 = vld [vmem:[%s7165_s5 + $0x488] sm:$0xff]  ;;  %v680_v55 = vld [vmem:[%s7165_s5 + $0x80] sm:$0xff] }
  0x39   : > { %1464 = vmatpush1.msra.mxu0 %v708_v27  ;;  %1541 = vmatpush1.msra.mxu1 %v836_v28  ;;  %v808_v56 = vld [vmem:[%s7165_s5 + $0x480] sm:$0xff]  ;;  %v677_v57 = vld [vmem:[%s7165_s5 + $0x68] sm:$0xff] }
  0x3a   : > { %1465 = vmatprep.subr.mxu0 %v705_v29  ;;  %1542 = vmatprep.subr.mxu1 %v833_v30  ;;  %v805_v58 = vld [vmem:[%s7165_s5 + $0x468] sm:$0xff]  ;;  %v676_v59 = vld [vmem:[%s7165_s5 + $0x60] sm:$0xff] }
  0x3b   : > { %1466 = vmatpush1.msra.mxu0 %v704_v31  ;;  %1543 = vmatpush1.msra.mxu1 %v832_v32  ;;  %v804_v60 = vld [vmem:[%s7165_s5 + $0x460] sm:$0xff]  ;;  %v673_v61 = vld [vmem:[%s7165_s5 + $0x48] sm:$0xff] }
  0x3c   : > { %1467 = vmatprep.subr.mxu0 %v701_v33  ;;  %1544 = vmatprep.subr.mxu1 %v829_v34  ;;  %v801_v62 = vld [vmem:[%s7165_s5 + $0x448] sm:$0xff]  ;;  %v672_v63 = vld [vmem:[%s7165_s5 + $0x40] sm:$0xff] }
  0x3d   : > { %1468 = vmatpush1.msra.mxu0 %v700_v35  ;;  %1545 = vmatpush1.msra.mxu1 %v828_v36  ;;  %v800_v0 = vld [vmem:[%s7165_s5 + $0x440] sm:$0xff]  ;;  %v669_v1 = vld [vmem:[%s7165_s5 + $0x28] sm:$0xff] }
  0x3e   : > { %1469 = vmatprep.subr.mxu0 %v697_v37  ;;  %1546 = vmatprep.subr.mxu1 %v825_v38  ;;  %v797_v2 = vld [vmem:[%s7165_s5 + $0x428] sm:$0xff]  ;;  %v668_v3 = vld [vmem:[%s7165_s5 + $0x20] sm:$0xff] }
  0x3f   : > { %1470 = vmatpush1.msra.mxu0 %v696_v39  ;;  %1547 = vmatpush1.msra.mxu1 %v824_v40  ;;  %v796_v4 = vld [vmem:[%s7165_s5 + $0x420] sm:$0xff]  ;;  %v665_v5 = vld [vmem:[%s7165_s5 + $0x8] sm:$0xff] }
  0x40   : > { %1471 = vmatprep.subr.mxu0 %v693_v41  ;;  %1548 = vmatprep.subr.mxu1 %v821_v42  ;;  %v793_v6 = vld [vmem:[%s7165_s5 + $0x408] sm:$0xff]  ;;  %v664_v8 = vld [vmem:[%s7165_s5] sm:$0xff] }
  0x41   : > { %1472 = vmatpush1.msra.mxu0 %v692_v43  ;;  %1549 = vmatpush1.msra.mxu1 %v820_v44  ;;  %v792_v9 = vld [vmem:[%s7165_s5 + $0x400] sm:$0xff]  ;;  %v789_v10 = vld [vmem:[%s7165_s5 + $0x3e8] sm:$0xff]  ;;  %v334_v44 = vlaneseq }
  0x42   : > { %1473 = vmatprep.subr.mxu0 %v689_v45  ;;  %1550 = vmatprep.subr.mxu1 %v817_v46  ;;  %v917_v11 = vld [vmem:[%s7165_s5 + $0x7e8] sm:$0xff]  ;;  %v788_v12 = vld [vmem:[%s7165_s5 + $0x3e0] sm:$0xff] }
  0x43   : > { %1474 = vmatpush1.msra.mxu0 %v688_v47  ;;  %1551 = vmatpush1.msra.mxu1 %v816_v48  ;;  %v916_v13 = vld [vmem:[%s7165_s5 + $0x7e0] sm:$0xff]  ;;  %v785_v14 = vld [vmem:[%s7165_s5 + $0x3c8] sm:$0xff]  ;;  %vm510_vm0 = vcmp.lt.s32.totalorder %v334_v44, 512 }
  0x44   : > { %1475 = vmatprep.subr.mxu0 %v685_v49  ;;  %1552 = vmatprep.subr.mxu1 %v813_v50  ;;  %v913_v15 = vld [vmem:[%s7165_s5 + $0x7c8] sm:$0xff]  ;;  %v784_v16 = vld [vmem:[%s7165_s5 + $0x3c0] sm:$0xff]  ;;  %512 = vst.msk [vmem:[#allocation2] ss:$8 sm:$0xf] %vm510_vm0, %v3650_v7 }
  0x45   : > { %1476 = vmatpush1.msra.mxu0 %v684_v51  ;;  %1553 = vmatpush1.msra.mxu1 %v812_v52  ;;  %v912_v17 = vld [vmem:[%s7165_s5 + $0x7c0] sm:$0xff]  ;;  %v781_v18 = vld [vmem:[%s7165_s5 + $0x3a8] sm:$0xff]  ;;  %515 = vst.msk [vmem:[#allocation2 + $0x41] ss:$8 sm:$0xf] %vm510_vm0, %v3650_v7 }
  0x46   : > { %1477 = vmatprep.subr.mxu0 %v681_v53  ;;  %1554 = vmatprep.subr.mxu1 %v809_v54  ;;  %v909_v19 = vld [vmem:[%s7165_s5 + $0x7a8] sm:$0xff]  ;;  %v780_v20 = vld [vmem:[%s7165_s5 + $0x3a0] sm:$0xff] }
  0x47   : > { %1478 = vmatpush1.msra.mxu0 %v680_v55  ;;  %1555 = vmatpush1.msra.mxu1 %v808_v56  ;;  %v908_v21 = vld [vmem:[%s7165_s5 + $0x7a0] sm:$0xff]  ;;  %v777_v22 = vld [vmem:[%s7165_s5 + $0x388] sm:$0xff] }
  0x48   : > { %1479 = vmatprep.subr.mxu0 %v677_v57  ;;  %1556 = vmatprep.subr.mxu1 %v805_v58  ;;  %v905_v23 = vld [vmem:[%s7165_s5 + $0x788] sm:$0xff]  ;;  %v776_v24 = vld [vmem:[%s7165_s5 + $0x380] sm:$0xff] }
  0x49   : > { %1480 = vmatpush1.msra.mxu0 %v676_v59  ;;  %1557 = vmatpush1.msra.mxu1 %v804_v60  ;;  %v904_v25 = vld [vmem:[%s7165_s5 + $0x780] sm:$0xff]  ;;  %v773_v26 = vld [vmem:[%s7165_s5 + $0x368] sm:$0xff] }
  0x4a   : > { %1481 = vmatprep.subr.mxu0 %v673_v61  ;;  %1558 = vmatprep.subr.mxu1 %v801_v62  ;;  %v901_v27 = vld [vmem:[%s7165_s5 + $0x768] sm:$0xff]  ;;  %v772_v28 = vld [vmem:[%s7165_s5 + $0x360] sm:$0xff] }
  0x4b   : > { %1482 = vmatpush1.msra.mxu0 %v672_v63  ;;  %1559 = vmatpush1.msra.mxu1 %v800_v0  ;;  %v900_v29 = vld [vmem:[%s7165_s5 + $0x760] sm:$0xff]  ;;  %v769_v30 = vld [vmem:[%s7165_s5 + $0x348] sm:$0xff] }
  0x4c   : > { %1483 = vmatprep.subr.mxu0 %v669_v1  ;;  %1560 = vmatprep.subr.mxu1 %v797_v2  ;;  %v897_v31 = vld [vmem:[%s7165_s5 + $0x748] sm:$0xff]  ;;  %v768_v32 = vld [vmem:[%s7165_s5 + $0x340] sm:$0xff] }
  0x4d   : > { %1484 = vmatpush1.msra.mxu0 %v668_v3  ;;  %1561 = vmatpush1.msra.mxu1 %v796_v4  ;;  %v896_v33 = vld [vmem:[%s7165_s5 + $0x740] sm:$0xff]  ;;  %v765_v34 = vld [vmem:[%s7165_s5 + $0x328] sm:$0xff] }
  0x4e   : > { %1485 = vmatprep.subr.mxu0 %v665_v5  ;;  %1562 = vmatprep.subr.mxu1 %v793_v6  ;;  %v893_v35 = vld [vmem:[%s7165_s5 + $0x728] sm:$0xff]  ;;  %v764_v36 = vld [vmem:[%s7165_s5 + $0x320] sm:$0xff] }
  0x4f   : > { %1486 = vmatpush1.msra.mxu0 %v664_v8  ;;  %1563 = vmatpush1.msra.mxu1 %v792_v9  ;;  %v892_v37 = vld [vmem:[%s7165_s5 + $0x720] sm:$0xff]  ;;  %v761_v38 = vld [vmem:[%s7165_s5 + $0x308] sm:$0xff] }
  0x50   : > { %1487 = vmatprep.subr.mxu0 %v789_v10  ;;  %1564 = vmatprep.subr.mxu1 %v917_v11  ;;  %v889_v39 = vld [vmem:[%s7165_s5 + $0x708] sm:$0xff]  ;;  %v760_v40 = vld [vmem:[%s7165_s5 + $0x300] sm:$0xff] }
  0x51   : > { %1488 = vmatpush2.msra.mxu0 %v788_v12  ;;  %1565 = vmatpush2.msra.mxu1 %v916_v13  ;;  %v888_v41 = vld [vmem:[%s7165_s5 + $0x700] sm:$0xff]  ;;  %v757_v42 = vld [vmem:[%s7165_s5 + $0x2e8] sm:$0xff] }
  0x52   : > { %1489 = vmatprep.subr.mxu0 %v785_v14  ;;  %1566 = vmatprep.subr.mxu1 %v913_v15  ;;  %v885_v43 = vld [vmem:[%s7165_s5 + $0x6e8] sm:$0xff]  ;;  %v756_v45 = vld [vmem:[%s7165_s5 + $0x2e0] sm:$0xff]  ;;  %v335_v14 = vshrl.u32 %v334_v44, 7 }
  0x53   : > { %1490 = vmatpush2.msra.mxu0 %v784_v16  ;;  %1567 = vmatpush2.msra.mxu1 %v912_v17  ;;  %v884_v46 = vld [vmem:[%s7165_s5 + $0x6e0] sm:$0xff]  ;;  %v753_v47 = vld [vmem:[%s7165_s5 + $0x2c8] sm:$0xff] }
  0x54   : > { %1491 = vmatprep.subr.mxu0 %v781_v18  ;;  %1568 = vmatprep.subr.mxu1 %v909_v19  ;;  %v881_v48 = vld [vmem:[%s7165_s5 + $0x6c8] sm:$0xff]  ;;  %v752_v49 = vld [vmem:[%s7165_s5 + $0x2c0] sm:$0xff]  ;;  %v4313_v15 = vsub.s32 0, %v335_v14  ;;  %v4315_v16 = vsub.s32 2, %v335_v14  ;;  %v4320_v18 = vsub.s32 1, %v335_v14  ;;  %v4322_v19 = vsub.s32 3, %v335_v14 }
  0x55   : > { %1492 = vmatpush2.msra.mxu0 %v780_v20  ;;  %1569 = vmatpush2.msra.mxu1 %v908_v21  ;;  %v880_v50 = vld [vmem:[%s7165_s5 + $0x6c0] sm:$0xff]  ;;  %v749_v51 = vld [vmem:[%s7165_s5 + $0x2a8] sm:$0xff] }
  0x56   : > { %1493 = vmatprep.subr.mxu0 %v777_v22  ;;  %1570 = vmatprep.subr.mxu1 %v905_v23  ;;  %v877_v52 = vld [vmem:[%s7165_s5 + $0x6a8] sm:$0xff]  ;;  %v748_v53 = vld [vmem:[%s7165_s5 + $0x2a0] sm:$0xff] }
  0x57   : > { %1494 = vmatpush2.msra.mxu0 %v776_v24  ;;  %1571 = vmatpush2.msra.mxu1 %v904_v25  ;;  %v876_v54 = vld [vmem:[%s7165_s5 + $0x6a0] sm:$0xff]  ;;  %v745_v55 = vld [vmem:[%s7165_s5 + $0x288] sm:$0xff] }
  0x58   : > { %1495 = vmatprep.subr.mxu0 %v773_v26  ;;  %1572 = vmatprep.subr.mxu1 %v901_v27  ;;  %v873_v56 = vld [vmem:[%s7165_s5 + $0x688] sm:$0xff]  ;;  %v744_v57 = vld [vmem:[%s7165_s5 + $0x280] sm:$0xff] }
  0x59   : > { %1496 = vmatpush2.msra.mxu0 %v772_v28  ;;  %1573 = vmatpush2.msra.mxu1 %v900_v29  ;;  %v872_v58 = vld [vmem:[%s7165_s5 + $0x680] sm:$0xff]  ;;  %v741_v59 = vld [vmem:[%s7165_s5 + $0x268] sm:$0xff] }
  0x5a   : > { %1497 = vmatprep.subr.mxu0 %v769_v30  ;;  %1574 = vmatprep.subr.mxu1 %v897_v31  ;;  %v869_v60 = vld [vmem:[%s7165_s5 + $0x668] sm:$0xff]  ;;  %v740_v61 = vld [vmem:[%s7165_s5 + $0x260] sm:$0xff] }
  0x5b   : > { %1498 = vmatpush2.msra.mxu0 %v768_v32  ;;  %1575 = vmatpush2.msra.mxu1 %v896_v33  ;;  %v868_v62 = vld [vmem:[%s7165_s5 + $0x660] sm:$0xff]  ;;  %v737_v63 = vld [vmem:[%s7165_s5 + $0x248] sm:$0xff] }
  0x5c   : > { %1499 = vmatprep.subr.mxu0 %v765_v34  ;;  %1576 = vmatprep.subr.mxu1 %v893_v35  ;;  %v865_v0 = vld [vmem:[%s7165_s5 + $0x648] sm:$0xff]  ;;  %v736_v1 = vld [vmem:[%s7165_s5 + $0x240] sm:$0xff] }
  0x5d   : > { %1500 = vmatpush2.msra.mxu0 %v764_v36  ;;  %1577 = vmatpush2.msra.mxu1 %v892_v37  ;;  %v864_v2 = vld [vmem:[%s7165_s5 + $0x640] sm:$0xff]  ;;  %v733_v3 = vld [vmem:[%s7165_s5 + $0x228] sm:$0xff] }
  0x5e   : > { %1501 = vmatprep.subr.mxu0 %v761_v38  ;;  %1578 = vmatprep.subr.mxu1 %v889_v39  ;;  %v861_v4 = vld [vmem:[%s7165_s5 + $0x628] sm:$0xff]  ;;  %v732_v5 = vld [vmem:[%s7165_s5 + $0x220] sm:$0xff] }
  0x5f   : > { %1502 = vmatpush2.msra.mxu0 %v760_v40  ;;  %1579 = vmatpush2.msra.mxu1 %v888_v41  ;;  %v860_v6 = vld [vmem:[%s7165_s5 + $0x620] sm:$0xff]  ;;  %v729_v8 = vld [vmem:[%s7165_s5 + $0x208] sm:$0xff] }
  0x60   : > { %1503 = vmatprep.subr.mxu0 %v757_v42  ;;  %1580 = vmatprep.subr.mxu1 %v885_v43  ;;  %v857_v9 = vld [vmem:[%s7165_s5 + $0x608] sm:$0xff]  ;;  %v728_v10 = vld [vmem:[%s7165_s5 + $0x200] sm:$0xff] }
  0x61   : > { %1504 = vmatpush2.msra.mxu0 %v756_v45  ;;  %1581 = vmatpush2.msra.mxu1 %v884_v46  ;;  %v856_v11 = vld [vmem:[%s7165_s5 + $0x600] sm:$0xff]  ;;  %v981_v12 = vld [vmem:[%s7165_s5 + $0x9e8] sm:$0xff] }
  0x62   : > { %1505 = vmatprep.subr.mxu0 %v753_v47  ;;  %1582 = vmatprep.subr.mxu1 %v881_v48  ;;  %v1109_v13 = vld [vmem:[%s7165_s5 + $0xde8] sm:$0xff] }
  0x63   : > { %1506 = vmatpush2.msra.mxu0 %v752_v49  ;;  %1583 = vmatpush2.msra.mxu1 %v880_v50  ;;  %v332_v17 = vld [vmem:[%s7162_s2] ss:$4 sm:$0xf] }
  0x64   : > { %1507 = vmatprep.subr.mxu0 %v749_v51  ;;  %1584 = vmatprep.subr.mxu1 %v877_v52  ;;  %v337_v20 = vrot.slane %v332_v17, %v4313_v15  ;;  %v345_v21 = vrot.slane %v332_v17, %v4315_v16  ;;  %v341_v22 = vrot.slane %v332_v17, %v4320_v18 }
  0x65   : > { %1508 = vmatpush2.msra.mxu0 %v748_v53  ;;  %1585 = vmatpush2.msra.mxu1 %v876_v54  ;;  %v349_v23 = vrot.slane %v332_v17, %v4322_v19  ;;  %v980_v53 = vld [vmem:[%s7165_s5 + $0x9e0] sm:$0xff] }
  0x66   : > { %1509 = vmatprep.subr.mxu0 %v745_v55  ;;  %1586 = vmatprep.subr.mxu1 %v873_v56  ;;  %v1108_v56 = vld [vmem:[%s7165_s5 + $0xde0] sm:$0xff] }
  0x67   : > { %1510 = vmatpush2.msra.mxu0 %v744_v57  ;;  %1587 = vmatpush2.msra.mxu1 %v872_v58  ;;  %v977_v58 = vld [vmem:[%s7165_s5 + $0x9c8] sm:$0xff] }
  0x68   : > { %1511 = vmatprep.subr.mxu0 %v741_v59  ;;  %1588 = vmatprep.subr.mxu1 %v869_v60  ;;  %v1105_v59 = vld [vmem:[%s7165_s5 + $0xdc8] sm:$0xff]  ;;  %v976_v60 = vld [vmem:[%s7165_s5 + $0x9c0] sm:$0xff] }
  0x69   : > { %1512 = vmatpush2.msra.mxu0 %v740_v61  ;;  %1589 = vmatpush2.msra.mxu1 %v868_v62  ;;  %v1104_v61 = vld [vmem:[%s7165_s5 + $0xdc0] sm:$0xff]  ;;  %v973_v62 = vld [vmem:[%s7165_s5 + $0x9a8] sm:$0xff] }
  0x6a   : > { %1513 = vmatprep.subr.mxu0 %v737_v63  ;;  %1590 = vmatprep.subr.mxu1 %v865_v0  ;;  %v1101_v63 = vld [vmem:[%s7165_s5 + $0xda8] sm:$0xff] }
  0x6b   : > { %1514 = vmatpush2.msra.mxu0 %v736_v1  ;;  %1591 = vmatpush2.msra.mxu1 %v864_v2  ;;  %v972_v1 = vld [vmem:[%s7165_s5 + $0x9a0] sm:$0xff] }
  0x6c   : > { %1515 = vmatprep.subr.mxu0 %v733_v3  ;;  %1592 = vmatprep.subr.mxu1 %v861_v4  ;;  %v1100_v2 = vld [vmem:[%s7165_s5 + $0xda0] sm:$0xff]  ;;  %v969_v4 = vld [vmem:[%s7165_s5 + $0x988] sm:$0xff] }
  0x6d   : > { %1516 = vmatpush2.msra.mxu0 %v732_v5  ;;  %1593 = vmatpush2.msra.mxu1 %v860_v6  ;;  %v1097_v5 = vld [vmem:[%s7165_s5 + $0xd88] sm:$0xff] }
  0x6e   : > { %1517 = vmatprep.subr.mxu0 %v729_v8  ;;  %1594 = vmatprep.subr.mxu1 %v857_v9  ;;  %v968_v8 = vld [vmem:[%s7165_s5 + $0x980] sm:$0xff] }
  0x6f   : > { %1518 = vmatpush2.msra.mxu0 %v728_v10  ;;  %1595 = vmatpush2.msra.mxu1 %v856_v11  ;;  %v1096_v9 = vld [vmem:[%s7165_s5 + $0xd80] sm:$0xff]  ;;  %v965_v11 = vld [vmem:[%s7165_s5 + $0x968] sm:$0xff] }
  0x70   : > { %1609 = vmatprep.subr.mxu0 %v981_v12  ;;  %1686 = vmatprep.subr.mxu1 %v1109_v13  ;;  %v1093_v13 = vld [vmem:[%s7165_s5 + $0xd68] sm:$0xff] }
  0xed   : > { %v420_v24 = vpop.f32.mrf.mxu0  ;;  %v497_v25 = vpop.f32.mrf.mxu1 }
  0xee   : > { %v421_v26 = vadd.f32 %v420_v24, %v337_v20  ;;  %v498_v27 = vadd.f32 %v497_v25, %v345_v21  ;;  %v1089_v24 = vld [vmem:[%s7165_s5 + $0xd48] sm:$0xff]  ;;  %v960_v25 = vld [vmem:[%s7165_s5 + $0x940] sm:$0xff] }
  0xef   : > { %v422_v28 = vpop.f32.mrf.mxu0  ;;  %v499_v29 = vpop.f32.mrf.mxu1 }
  0xf0   : > { %v526_v30 = vrot.slane %v421_v26, 7  ;;  %v528_v31 = vrot.slane %v498_v27, 7  ;;  %v423_v32 = vadd.f32 %v422_v28, %v341_v22  ;;  %v500_v33 = vadd.f32 %v499_v29, %v349_v23  ;;  %v1088_v26 = vld [vmem:[%s7165_s5 + $0xd40] sm:$0xff]  ;;  %v957_v27 = vld [vmem:[%s7165_s5 + $0x928] sm:$0xff] }
  0xf1   : > { %v426_v34 = vpop.f32.mrf.mxu0  ;;  %v503_v35 = vpop.f32.mrf.mxu1  ;;  %v1085_v28 = vld [vmem:[%s7165_s5 + $0xd28] sm:$0xff]  ;;  %v956_v29 = vld [vmem:[%s7165_s5 + $0x920] sm:$0xff] }
  0xf2   : > { %550 = vst [vmem:[#allocation2] sm:$0xfe] %v526_v30  ;;  %552 = vst [vmem:[#allocation2 + $0x10] sm:$0xfe] %v528_v31  ;;  %v527_v36 = vrot.slane %v423_v32, 7  ;;  %v529_v37 = vrot.slane %v500_v33, 7  ;;  %v427_v38 = vadd.f32 %v426_v34, %v337_v20  ;;  %v504_v39 = vadd.f32 %v503_v35, %v345_v21 }
  0xf3   : > { %v428_v40 = vpop.f32.mrf.mxu0  ;;  %v505_v41 = vpop.f32.mrf.mxu1  ;;  %v964_v20 = vld [vmem:[%s7165_s5 + $0x960] sm:$0xff]  ;;  %v1081_v32 = vld [vmem:[%s7165_s5 + $0xd08] sm:$0xff] }
  0xf4   : > { %551 = vst [vmem:[#allocation2 + $0x8] sm:$0xfe] %v527_v36  ;;  %553 = vst [vmem:[#allocation2 + $0x18] sm:$0xfe] %v529_v37  ;;  %v530_v42 = vrot.slane %v427_v38, 7  ;;  %v534_v43 = vrot.slane %v504_v39, 7  ;;  %v429_v44 = vadd.f32 %v428_v40, %v341_v22  ;;  %v506_v45 = vadd.f32 %v505_v41, %v349_v23 }
  0xf5   : > { %v1092_v21 = vld [vmem:[%s7165_s5 + $0xd60] sm:$0xff]  ;;  %v961_v23 = vld [vmem:[%s7165_s5 + $0x948] sm:$0xff] }
  0xf6   : > { %v4329_v46 = vsel %vm525_vm1, %v526_v30, %v530_v42  ;;  %558 = vst [vmem:[#allocation2 + $0x40] sm:$0x1] %v530_v42  ;;  %v4332_v47 = vsel %vm525_vm1, %v528_v31, %v534_v43  ;;  %560 = vst [vmem:[#allocation2 + $0x50] sm:$0x1] %v534_v43  ;;  %v532_v48 = vrot.slane %v429_v44, 7  ;;  %v536_v49 = vrot.slane %v506_v45, 7 }
  0xf7   : > { %554 = vst [vmem:[#allocation2 + $0x20] sm:$0xff] %v4329_v46  ;;  %556 = vst [vmem:[#allocation2 + $0x30] sm:$0xff] %v4332_v47  ;;  %v1084_v30 = vld [vmem:[%s7165_s5 + $0xd20] sm:$0xff]  ;;  %v953_v31 = vld [vmem:[%s7165_s5 + $0x908] sm:$0xff] }
  0xf8   : > { %v4337_v50 = vsel %vm525_vm1, %v527_v36, %v532_v48  ;;  %559 = vst [vmem:[#allocation2 + $0x48] sm:$0x1] %v532_v48  ;;  %v4340_v51 = vsel %vm525_vm1, %v529_v37, %v536_v49  ;;  %561 = vst [vmem:[#allocation2 + $0x58] sm:$0x1] %v536_v49  ;;  %v952_v33 = vld [vmem:[%s7165_s5 + $0x900] sm:$0xff]  ;;  %v949_v35 = vld [vmem:[%s7165_s5 + $0x8e8] sm:$0xff] }
  0xf9   : > { %555 = vst [vmem:[#allocation2 + $0x28] sm:$0xff] %v4337_v50  ;;  %557 = vst [vmem:[#allocation2 + $0x38] sm:$0xff] %v4340_v51  ;;  %v564_v52 = vld [vmem:[#allocation2 + $0x10] sm:$0xff]  ;;  %v562_v57 = vld [vmem:[#allocation2] sm:$0xff]  ;;  %v603_v12 = vrot.slane %v4337_v50, 1  ;;  %v609_v14 = vrot.slane %v4340_v51, 1 }
  0xfa   : > { %v1080_v34 = vld [vmem:[%s7165_s5 + $0xd00] sm:$0xff]  ;;  %v1077_v36 = vld [vmem:[%s7165_s5 + $0xce8] sm:$0xff] }
  0xfb   : > { %v563_v54 = vld [vmem:[#allocation2 + $0x8] sm:$0xff]  ;;  %v565_v55 = vld [vmem:[#allocation2 + $0x18] sm:$0xff]  ;;  %v948_v37 = vld [vmem:[%s7165_s5 + $0x8e0] sm:$0xff] }
  0xfc   : > { %1519 = vmatprep.mubr.f32.mxu0 %v563_v54  ;;  %1596 = vmatprep.mubr.f32.mxu1 %v565_v55  ;;  %v571_v0 = vld [vmem:[#allocation2 + $0x8] sm:$0xfe]  ;;  %v573_v3 = vld [vmem:[#allocation2 + $0x18] sm:$0xfe]  ;;  %v1076_v38 = vld [vmem:[%s7165_s5 + $0xce0] sm:$0xff] }
  0xfd   : > { %1520 = vmatmul.mubr.f32.vlgmr.msra.gmra.mxu0 %v562_v57  ;;  %1597 = vmatmul.mubr.f32.vlgmr.msra.gmra.mxu1 %v564_v52  ;;  %v602_v6 = vrot.slane %v571_v0, 1  ;;  %v608_v10 = vrot.slane %v573_v3, 1  ;;  %v945_v39 = vld [vmem:[%s7165_s5 + $0x8c8] sm:$0xff]  ;;  %v944_v41 = vld [vmem:[%s7165_s5 + $0x8c0] sm:$0xff] }
  0xfe   : > { %1610 = vmatpush1.msra.mxu0 %v980_v53  ;;  %1687 = vmatpush1.msra.mxu1 %v1108_v56  ;;  %v1073_v40 = vld [vmem:[%s7165_s5 + $0xcc8] sm:$0xff]  ;;  %v1072_v42 = vld [vmem:[%s7165_s5 + $0xcc0] sm:$0xff] }
  0xff   : > { %1611 = vmatprep.subr.mxu0 %v977_v58  ;;  %1688 = vmatprep.subr.mxu1 %v1105_v59  ;;  %v4401_v17 = vsel %vm598_vm2, %v602_v6, %v603_v12  ;;  %v4413_v22 = vsel %vm598_vm2, %v608_v10, %v609_v14  ;;  %v941_v43 = vld [vmem:[%s7165_s5 + $0x8a8] sm:$0xff]  ;;  %v940_v45 = vld [vmem:[%s7165_s5 + $0x8a0] sm:$0xff] }
 0x100   : > { %1612 = vmatpush1.msra.mxu0 %v976_v60  ;;  %1689 = vmatpush1.msra.mxu1 %v1104_v61  ;;  %v1069_v44 = vld [vmem:[%s7165_s5 + $0xca8] sm:$0xff]  ;;  %v1068_v48 = vld [vmem:[%s7165_s5 + $0xca0] sm:$0xff] }
 0x101   : > { %1613 = vmatprep.subr.mxu0 %v973_v62  ;;  %1690 = vmatprep.subr.mxu1 %v1101_v63  ;;  %v937_v49 = vld [vmem:[%s7165_s5 + $0x888] sm:$0xff]  ;;  %v936_v53 = vld [vmem:[%s7165_s5 + $0x880] sm:$0xff] }
 0x102   : > { %1525 = vmatprep.mubr.f32.mxu0 %v4337_v50  ;;  %1602 = vmatprep.mubr.f32.mxu1 %v4340_v51  ;;  %v1065_v52 = vld [vmem:[%s7165_s5 + $0xc88] sm:$0xff]  ;;  %v1064_v54 = vld [vmem:[%s7165_s5 + $0xc80] sm:$0xff] }
 0x103   : > { %1614 = vmatpush1.msra.mxu0 %v972_v1  ;;  %1691 = vmatpush1.msra.mxu1 %v1100_v2  ;;  %v933_v55 = vld [vmem:[%s7165_s5 + $0x868] sm:$0xff]  ;;  %v932_v57 = vld [vmem:[%s7165_s5 + $0x860] sm:$0xff] }
 0x104   : > { %1526 = vmatmul.mubr.f32.gmra.mxu0 %v4329_v46  ;;  %1603 = vmatmul.mubr.f32.gmra.mxu1 %v4332_v47  ;;  %v1061_v56 = vld [vmem:[%s7165_s5 + $0xc68] sm:$0xff]  ;;  %v1060_v58 = vld [vmem:[%s7165_s5 + $0xc60] sm:$0xff] }
 0x105   : > { %1615 = vmatprep.subr.mxu0 %v969_v4  ;;  %1692 = vmatprep.subr.mxu1 %v1097_v5  ;;  %v929_v59 = vld [vmem:[%s7165_s5 + $0x848] sm:$0xff]  ;;  %v928_v61 = vld [vmem:[%s7165_s5 + $0x840] sm:$0xff] }
 0x106   : > { %1616 = vmatpush1.msra.mxu0 %v968_v8  ;;  %1693 = vmatpush1.msra.mxu1 %v1096_v9  ;;  %v1057_v60 = vld [vmem:[%s7165_s5 + $0xc48] sm:$0xff]  ;;  %v1056_v62 = vld [vmem:[%s7165_s5 + $0xc40] sm:$0xff] }
 0x107   : > { %1617 = vmatprep.subr.mxu0 %v965_v11  ;;  %1673 = vmatprep.mubr.f32.mxu0 %v4401_v17  ;;  %v925_v63 = vld [vmem:[%s7165_s5 + $0x828] sm:$0xff]  ;;  %v924_v1 = vld [vmem:[%s7165_s5 + $0x820] sm:$0xff] }
 0x108   : > { %1694 = vmatprep.subr.mxu1 %v1093_v13  ;;  %1750 = vmatprep.mubr.f32.mxu1 %v4413_v22  ;;  %v1053_v0 = vld [vmem:[%s7165_s5 + $0xc28] sm:$0xff]  ;;  %v1052_v2 = vld [vmem:[%s7165_s5 + $0xc20] sm:$0xff] }
 0x109   : > { %1618 = vmatpush1.msra.mxu0 %v964_v20  ;;  %1695 = vmatpush1.msra.mxu1 %v1092_v21  ;;  %v921_v3 = vld [vmem:[%s7165_s5 + $0x808] sm:$0xff]  ;;  %v920_v5 = vld [vmem:[%s7165_s5 + $0x800] sm:$0xff] }
 0x10a   : > { %1619 = vmatprep.subr.mxu0 %v961_v23  ;;  %1696 = vmatprep.subr.mxu1 %v1089_v24  ;;  %v1049_v4 = vld [vmem:[%s7165_s5 + $0xc08] sm:$0xff]  ;;  %v1048_v6 = vld [vmem:[%s7165_s5 + $0xc00] sm:$0xff] }
 0x10b   : > { %1620 = vmatpush1.msra.mxu0 %v960_v25  ;;  %1697 = vmatpush1.msra.mxu1 %v1088_v26  ;;  %v1045_v8 = vld [vmem:[%s7165_s5 + $0xbe8] sm:$0xff]  ;;  %v1044_v10 = vld [vmem:[%s7165_s5 + $0xbe0] sm:$0xff] }
 0x10c   : > { %1621 = vmatprep.subr.mxu0 %v957_v27  ;;  %1698 = vmatprep.subr.mxu1 %v1085_v28  ;;  %v1173_v9 = vld [vmem:[%s7165_s5 + $0xfe8] sm:$0xff]  ;;  %v1172_v11 = vld [vmem:[%s7165_s5 + $0xfe0] sm:$0xff] }
 0x10d   : > { %1622 = vmatpush1.msra.mxu0 %v956_v29  ;;  %1699 = vmatpush1.msra.mxu1 %v1084_v30  ;;  %v1041_v13 = vld [vmem:[%s7165_s5 + $0xbc8] sm:$0xff]  ;;  %v1040_v21 = vld [vmem:[%s7165_s5 + $0xbc0] sm:$0xff] }
 0x10e   : > { %1623 = vmatprep.subr.mxu0 %v953_v31  ;;  %1700 = vmatprep.subr.mxu1 %v1081_v32  ;;  %v1169_v20 = vld [vmem:[%s7165_s5 + $0xfc8] sm:$0xff]  ;;  %v1168_v23 = vld [vmem:[%s7165_s5 + $0xfc0] sm:$0xff] }
 0x10f   : > { %1624 = vmatpush1.msra.mxu0 %v952_v33  ;;  %1701 = vmatpush1.msra.mxu1 %v1080_v34  ;;  %v1037_v24 = vld [vmem:[%s7165_s5 + $0xba8] sm:$0xff]  ;;  %v1036_v26 = vld [vmem:[%s7165_s5 + $0xba0] sm:$0xff] }
 0x110   : > { %1625 = vmatprep.subr.mxu0 %v949_v35  ;;  %1702 = vmatprep.subr.mxu1 %v1077_v36  ;;  %v1165_v25 = vld [vmem:[%s7165_s5 + $0xfa8] sm:$0xff]  ;;  %v1164_v27 = vld [vmem:[%s7165_s5 + $0xfa0] sm:$0xff] }
 0x111   : > { %1626 = vmatpush1.msra.mxu0 %v948_v37  ;;  %1703 = vmatpush1.msra.mxu1 %v1076_v38  ;;  %v1033_v28 = vld [vmem:[%s7165_s5 + $0xb88] sm:$0xff]  ;;  %v1032_v30 = vld [vmem:[%s7165_s5 + $0xb80] sm:$0xff] }
 0x112   : > { %1627 = vmatprep.subr.mxu0 %v945_v39  ;;  %1704 = vmatprep.subr.mxu1 %v1073_v40  ;;  %v1161_v29 = vld [vmem:[%s7165_s5 + $0xf88] sm:$0xff]  ;;  %v1160_v31 = vld [vmem:[%s7165_s5 + $0xf80] sm:$0xff] }
 0x113   : > { %1628 = vmatpush1.msra.mxu0 %v944_v41  ;;  %1705 = vmatpush1.msra.mxu1 %v1072_v42  ;;  %v1029_v32 = vld [vmem:[%s7165_s5 + $0xb68] sm:$0xff]  ;;  %v1028_v34 = vld [vmem:[%s7165_s5 + $0xb60] sm:$0xff] }
 0x114   : > { %1629 = vmatprep.subr.mxu0 %v941_v43  ;;  %1706 = vmatprep.subr.mxu1 %v1069_v44  ;;  %v1157_v33 = vld [vmem:[%s7165_s5 + $0xf68] sm:$0xff]  ;;  %v1156_v35 = vld [vmem:[%s7165_s5 + $0xf60] sm:$0xff] }
 0x115   : > { %1630 = vmatpush1.msra.mxu0 %v940_v45  ;;  %1707 = vmatpush1.msra.mxu1 %v1068_v48  ;;  %v1025_v36 = vld [vmem:[%s7165_s5 + $0xb48] sm:$0xff]  ;;  %v1024_v38 = vld [vmem:[%s7165_s5 + $0xb40] sm:$0xff] }
 0x116   : > { %1631 = vmatprep.subr.mxu0 %v937_v49  ;;  %1708 = vmatprep.subr.mxu1 %v1065_v52  ;;  %v1153_v37 = vld [vmem:[%s7165_s5 + $0xf48] sm:$0xff]  ;;  %v1152_v39 = vld [vmem:[%s7165_s5 + $0xf40] sm:$0xff] }
 0x117   : > { %1632 = vmatpush1.msra.mxu0 %v936_v53  ;;  %1709 = vmatpush1.msra.mxu1 %v1064_v54  ;;  %v1021_v40 = vld [vmem:[%s7165_s5 + $0xb28] sm:$0xff]  ;;  %v1020_v42 = vld [vmem:[%s7165_s5 + $0xb20] sm:$0xff] }
 0x118   : > { %1633 = vmatprep.subr.mxu0 %v933_v55  ;;  %1710 = vmatprep.subr.mxu1 %v1061_v56  ;;  %v1149_v41 = vld [vmem:[%s7165_s5 + $0xf28] sm:$0xff]  ;;  %v1148_v43 = vld [vmem:[%s7165_s5 + $0xf20] sm:$0xff] }
 0x119   : > { %1634 = vmatpush1.msra.mxu0 %v932_v57  ;;  %1711 = vmatpush1.msra.mxu1 %v1060_v58  ;;  %v1017_v44 = vld [vmem:[%s7165_s5 + $0xb08] sm:$0xff]  ;;  %v1016_v48 = vld [vmem:[%s7165_s5 + $0xb00] sm:$0xff] }
 0x11a   : > { %1635 = vmatprep.subr.mxu0 %v929_v59  ;;  %1712 = vmatprep.subr.mxu1 %v1057_v60  ;;  %v1145_v45 = vld [vmem:[%s7165_s5 + $0xf08] sm:$0xff]  ;;  %v1144_v49 = vld [vmem:[%s7165_s5 + $0xf00] sm:$0xff] }
 0x11b   : > { %1636 = vmatpush1.msra.mxu0 %v928_v61  ;;  %1713 = vmatpush1.msra.mxu1 %v1056_v62  ;;  %v1013_v52 = vld [vmem:[%s7165_s5 + $0xae8] sm:$0xff]  ;;  %v1012_v54 = vld [vmem:[%s7165_s5 + $0xae0] sm:$0xff] }
 0x11c   : > { %1637 = vmatprep.subr.mxu0 %v925_v63  ;;  %1714 = vmatprep.subr.mxu1 %v1053_v0  ;;  %v1141_v53 = vld [vmem:[%s7165_s5 + $0xee8] sm:$0xff]  ;;  %v1140_v55 = vld [vmem:[%s7165_s5 + $0xee0] sm:$0xff] }
 0x11d   : > { %1638 = vmatpush1.msra.mxu0 %v924_v1  ;;  %1715 = vmatpush1.msra.mxu1 %v1052_v2  ;;  %v1009_v56 = vld [vmem:[%s7165_s5 + $0xac8] sm:$0xff]  ;;  %v1008_v58 = vld [vmem:[%s7165_s5 + $0xac0] sm:$0xff] }
 0x11e   : > { %1639 = vmatprep.subr.mxu0 %v921_v3  ;;  %1716 = vmatprep.subr.mxu1 %v1049_v4  ;;  %v1137_v57 = vld [vmem:[%s7165_s5 + $0xec8] sm:$0xff]  ;;  %v1136_v59 = vld [vmem:[%s7165_s5 + $0xec0] sm:$0xff] }
 0x11f   : > { %1640 = vmatpush1.msra.mxu0 %v920_v5  ;;  %1717 = vmatpush1.msra.mxu1 %v1048_v6  ;;  %v1005_v60 = vld [vmem:[%s7165_s5 + $0xaa8] sm:$0xff]  ;;  %v1004_v62 = vld [vmem:[%s7165_s5 + $0xaa0] sm:$0xff] }
 0x120   : > { %1641 = vmatprep.subr.mxu0 %v1045_v8  ;;  %1718 = vmatprep.subr.mxu1 %v1173_v9  ;;  %v1133_v61 = vld [vmem:[%s7165_s5 + $0xea8] sm:$0xff]  ;;  %v1132_v63 = vld [vmem:[%s7165_s5 + $0xea0] sm:$0xff] }
 0x121   : > { %1642 = vmatpush2.msra.mxu0 %v1044_v10  ;;  %1719 = vmatpush2.msra.mxu1 %v1172_v11  ;;  %v1001_v0 = vld [vmem:[%s7165_s5 + $0xa88] sm:$0xff]  ;;  %v1000_v2 = vld [vmem:[%s7165_s5 + $0xa80] sm:$0xff] }
 0x122   : > { %1643 = vmatprep.subr.mxu0 %v1041_v13  ;;  %1720 = vmatprep.subr.mxu1 %v1169_v20  ;;  %v1129_v1 = vld [vmem:[%s7165_s5 + $0xe88] sm:$0xff]  ;;  %v1128_v3 = vld [vmem:[%s7165_s5 + $0xe80] sm:$0xff] }
 0x123   : > { %1644 = vmatpush2.msra.mxu0 %v1040_v21  ;;  %1721 = vmatpush2.msra.mxu1 %v1168_v23  ;;  %v997_v4 = vld [vmem:[%s7165_s5 + $0xa68] sm:$0xff]  ;;  %v996_v6 = vld [vmem:[%s7165_s5 + $0xa60] sm:$0xff]  ;;  %v572_v21 = vld [vmem:[#allocation2 + $0x10] sm:$0xfe] }
 0x124   : > { %1645 = vmatprep.subr.mxu0 %v1037_v24  ;;  %1722 = vmatprep.subr.mxu1 %v1165_v25  ;;  %v1125_v5 = vld [vmem:[%s7165_s5 + $0xe68] sm:$0xff]  ;;  %v1124_v8 = vld [vmem:[%s7165_s5 + $0xe60] sm:$0xff] }
 0x125   : > { %1646 = vmatpush2.msra.mxu0 %v1036_v26  ;;  %1723 = vmatpush2.msra.mxu1 %v1164_v27  ;;  %v993_v9 = vld [vmem:[%s7165_s5 + $0xa48] sm:$0xff]  ;;  %v992_v11 = vld [vmem:[%s7165_s5 + $0xa40] sm:$0xff] }
 0x126   : > { %1647 = vmatprep.subr.mxu0 %v1033_v28  ;;  %1724 = vmatprep.subr.mxu1 %v1161_v29  ;;  %v1121_v10 = vld [vmem:[%s7165_s5 + $0xe48] sm:$0xff]  ;;  %v1120_v13 = vld [vmem:[%s7165_s5 + $0xe40] sm:$0xff]  ;;  %v577_v28 = vld [vmem:[#allocation2 + $0x58] sm:$0x1] }
 0x127   : > { %1648 = vmatpush2.msra.mxu0 %v1032_v30  ;;  %1725 = vmatpush2.msra.mxu1 %v1160_v31  ;;  %v570_v20 = vld [vmem:[#allocation2] sm:$0xfe]  ;;  %v989_v23 = vld [vmem:[%s7165_s5 + $0xa28] sm:$0xff] }
 0x128   : > { %1649 = vmatprep.subr.mxu0 %v1029_v32  ;;  %1726 = vmatprep.subr.mxu1 %v1157_v33  ;;  %v1117_v24 = vld [vmem:[%s7165_s5 + $0xe28] sm:$0xff]  ;;  %v988_v25 = vld [vmem:[%s7165_s5 + $0xa20] sm:$0xff]  ;;  %v599_v31 = vrot.slane %v570_v20, 1  ;;  %v605_v32 = vrot.slane %v572_v21, 1 }
 0x129   : > { %1650 = vmatpush2.msra.mxu0 %v1028_v34  ;;  %1727 = vmatpush2.msra.mxu1 %v1156_v35  ;;  %v1116_v26 = vld [vmem:[%s7165_s5 + $0xe20] sm:$0xff]  ;;  %v575_v27 = vld [vmem:[#allocation2 + $0x48] sm:$0x1]  ;;  %v600_v35 = vrot.slane %v4329_v46, 1 }
 0x12a   : > { %1651 = vmatprep.subr.mxu0 %v1025_v36  ;;  %1728 = vmatprep.subr.mxu1 %v1153_v37  ;;  %v985_v29 = vld [vmem:[%s7165_s5 + $0xa08] sm:$0xff]  ;;  %v984_v33 = vld [vmem:[%s7165_s5 + $0xa00] sm:$0xff]  ;;  %v606_v36 = vrot.slane %v4332_v47, 1 }
 0x12b   : > { %1652 = vmatpush2.msra.mxu0 %v1024_v38  ;;  %1729 = vmatpush2.msra.mxu1 %v1152_v39  ;;  %v1113_v30 = vld [vmem:[%s7165_s5 + $0xe08] sm:$0xff]  ;;  %v1112_v34 = vld [vmem:[%s7165_s5 + $0xe00] sm:$0xff]  ;;  %v613_v38 = vrot.slane %v575_v27, 1  ;;  %v617_v39 = vrot.slane %v577_v28, 1  ;;  %v4749_v46 = vsel %vm598_vm2, %v599_v31, %v600_v35 }
 0x12c   : > { %1653 = vmatprep.subr.mxu0 %v1021_v40  ;;  %1730 = vmatprep.subr.mxu1 %v1149_v41  ;;  %v1237_v37 = vld [vmem:[%s7165_s5 + $0x11e8] sm:$0xff]  ;;  %v574_v41 = vld [vmem:[#allocation2 + $0x40] sm:$0x1]  ;;  %v4752_v47 = vsel %vm598_vm2, %v605_v32, %v606_v36 }
 0x12d   : > { %1654 = vmatpush2.msra.mxu0 %v1020_v42  ;;  %1731 = vmatpush2.msra.mxu1 %v1148_v43  ;;  %v1365_v40 = vld [vmem:[%s7165_s5 + $0x15e8] sm:$0xff]  ;;  %v576_v42 = vld [vmem:[#allocation2 + $0x50] sm:$0x1]  ;;  %v1236_v43 = vld [vmem:[%s7165_s5 + $0x11e0] sm:$0xff] }
 0x12e   : > { %1655 = vmatprep.subr.mxu0 %v1017_v44  ;;  %1732 = vmatprep.subr.mxu1 %v1145_v45  ;;  %v1364_v44 = vld [vmem:[%s7165_s5 + $0x15e0] sm:$0xff]  ;;  %v579_v45 = vld [vmem:[#allocation2 + $0x8] sm:$0xfc] }
 0x12f   : > { %1656 = vmatpush2.msra.mxu0 %v1016_v48  ;;  %1733 = vmatpush2.msra.mxu1 %v1144_v49  ;;  %v4765_v48 = vsel %vm598_vm2, %v603_v12, %v613_v38  ;;  %v4770_v49 = vsel %vm598_vm2, %v609_v14, %v617_v39  ;;  %v1232_v12 = vld [vmem:[%s7165_s5 + $0x11c0] sm:$0xff]  ;;  %v1217_v21 = vld [vmem:[%s7165_s5 + $0x1148] sm:$0xff] }
 0x130   : > { %1657 = vmatprep.subr.mxu0 %v1013_v52  ;;  %1734 = vmatprep.subr.mxu1 %v1141_v53  ;;  %v1233_v52 = vld [vmem:[%s7165_s5 + $0x11c8] sm:$0xff]  ;;  %v1360_v14 = vld [vmem:[%s7165_s5 + $0x15c0] sm:$0xff] }
 0x131   : > { %1658 = vmatpush2.msra.mxu0 %v1012_v54  ;;  %1735 = vmatpush2.msra.mxu1 %v1140_v55  ;;  %v1361_v53 = vld [vmem:[%s7165_s5 + $0x15c8] sm:$0xff]  ;;  %v611_v54 = vrot.slane %v574_v41, 1  ;;  %v615_v55 = vrot.slane %v576_v42, 1  ;;  %v1348_v20 = vld [vmem:[%s7165_s5 + $0x1560] sm:$0xff] }
 0x132   : > { %1659 = vmatprep.subr.mxu0 %v1009_v56  ;;  %1736 = vmatprep.subr.mxu1 %v1137_v57  ;;  %v581_v56 = vld [vmem:[#allocation2 + $0x18] sm:$0xfc]  ;;  %v639_v57 = vrot.slane %v579_v45, 2  ;;  %v1341_v27 = vld [vmem:[%s7165_s5 + $0x1528] sm:$0xff]  ;;  %v1212_v28 = vld [vmem:[%s7165_s5 + $0x1120] sm:$0xff] }
 0x133   : > { %1660 = vmatpush2.msra.mxu0 %v1008_v58  ;;  %1737 = vmatpush2.msra.mxu1 %v1136_v59  ;;  %v1229_v58 = vld [vmem:[%s7165_s5 + $0x11a8] sm:$0xff]  ;;  %v1208_v32 = vld [vmem:[%s7165_s5 + $0x1100] sm:$0xff] }
 0x134   : > { %1661 = vmatprep.subr.mxu0 %v1005_v60  ;;  %1738 = vmatprep.subr.mxu1 %v1133_v61  ;;  %v1357_v59 = vld [vmem:[%s7165_s5 + $0x15a8] sm:$0xff]  ;;  %v645_v60 = vrot.slane %v581_v56, 2  ;;  %v4793_v61 = vsel %vm598_vm2, %v600_v35, %v611_v54  ;;  %v1328_v41 = vld [vmem:[%s7165_s5 + $0x14c0] sm:$0xff] }
 0x135   : > { %1662 = vmatpush2.msra.mxu0 %v1004_v62  ;;  %1739 = vmatpush2.msra.mxu1 %v1132_v63  ;;  %v4796_v62 = vsel %vm598_vm2, %v606_v36, %v615_v55  ;;  %v1228_v63 = vld [vmem:[%s7165_s5 + $0x11a0] sm:$0xff]  ;;  %v1337_v31 = vld [vmem:[%s7165_s5 + $0x1508] sm:$0xff] }
 0x136   : > { %1663 = vmatprep.subr.mxu0 %v1001_v0  ;;  %1740 = vmatprep.subr.mxu1 %v1129_v1  ;;  %v640_v0 = vrot.slane %v4337_v50, 2  ;;  %v1356_v1 = vld [vmem:[%s7165_s5 + $0x15a0] sm:$0xff]  ;;  %v1333_v35 = vld [vmem:[%s7165_s5 + $0x14e8] sm:$0xff]  ;;  %v722_v50 = vld [vmem:[%s7165_s5 + $0x1d0] sm:$0xff] }
 0x137   : > { %1664 = vmatpush2.msra.mxu0 %v1000_v2  ;;  %1741 = vmatpush2.msra.mxu1 %v1128_v3  ;;  %v646_v2 = vrot.slane %v4340_v51, 2  ;;  %v1204_v36 = vld [vmem:[%s7165_s5 + $0x10e0] sm:$0xff]  ;;  %v1201_v38 = vld [vmem:[%s7165_s5 + $0x10c8] sm:$0xff]  ;;  %v850_v51 = vld [vmem:[%s7165_s5 + $0x5d0] sm:$0xff] }
 0x138   : > { %1665 = vmatprep.subr.mxu0 %v997_v4  ;;  %1742 = vmatprep.subr.mxu1 %v1125_v5  ;;  %v4811_v3 = vsel %vm635_vm3, %v639_v57, %v640_v0  ;;  %v1225_v4 = vld [vmem:[%s7165_s5 + $0x1188] sm:$0xff]  ;;  %v1324_v45 = vld [vmem:[%s7165_s5 + $0x14a0] sm:$0xff] }
 0x139   : > { %1666 = vmatpush2.msra.mxu0 %v996_v6  ;;  %1743 = vmatpush2.msra.mxu1 %v1124_v8  ;;  %v1353_v5 = vld [vmem:[%s7165_s5 + $0x1588] sm:$0xff]  ;;  %v4823_v6 = vsel %vm635_vm3, %v645_v60, %v646_v2  ;;  %v1224_v8 = vld [vmem:[%s7165_s5 + $0x1180] sm:$0xff] }
 0x13a   : > { %1667 = vmatprep.subr.mxu0 %v993_v9  ;;  %1744 = vmatprep.subr.mxu1 %v1121_v10  ;;  %v1352_v9 = vld [vmem:[%s7165_s5 + $0x1580] sm:$0xff]  ;;  %v1221_v10 = vld [vmem:[%s7165_s5 + $0x1168] sm:$0xff] }
 0x13b   : > { %1668 = vmatpush2.msra.mxu0 %v992_v11  ;;  %1745 = vmatpush2.msra.mxu1 %v1120_v13  ;;  %v1349_v11 = vld [vmem:[%s7165_s5 + $0x1568] sm:$0xff]  ;;  %v1220_v13 = vld [vmem:[%s7165_s5 + $0x1160] sm:$0xff] }
 0x13c   : > { %1669 = vmatprep.subr.mxu0 %v989_v23  ;;  %1746 = vmatprep.subr.mxu1 %v1117_v24  ;;  %v1345_v23 = vld [vmem:[%s7165_s5 + $0x1548] sm:$0xff]  ;;  %v1216_v24 = vld [vmem:[%s7165_s5 + $0x1140] sm:$0xff] }
 0x13d   : > { %1670 = vmatpush2.msra.mxu0 %v988_v25  ;;  %1747 = vmatpush2.msra.mxu1 %v1116_v26  ;;  %v1344_v25 = vld [vmem:[%s7165_s5 + $0x1540] sm:$0xff]  ;;  %v1213_v26 = vld [vmem:[%s7165_s5 + $0x1128] sm:$0xff] }
 0x13e   : > { %1671 = vmatprep.subr.mxu0 %v985_v29  ;;  %1748 = vmatprep.subr.mxu1 %v1113_v30  ;;  %v1340_v29 = vld [vmem:[%s7165_s5 + $0x1520] sm:$0xff]  ;;  %v1209_v30 = vld [vmem:[%s7165_s5 + $0x1108] sm:$0xff] }
 0x13f   : > { %1672 = vmatpush2.msra.mxu0 %v984_v33  ;;  %1749 = vmatpush2.msra.mxu1 %v1112_v34  ;;  %v1336_v33 = vld [vmem:[%s7165_s5 + $0x1500] sm:$0xff]  ;;  %v1205_v34 = vld [vmem:[%s7165_s5 + $0x10e8] sm:$0xff] }
 0x140   : > { %1674 = vmatmul.mubr.f32.vlgmr.msra.gmra.mxu0 %v4749_v46  ;;  %1751 = vmatmul.mubr.f32.vlgmr.msra.gmra.mxu1 %v4752_v47  ;;  %v1329_v39 = vld [vmem:[%s7165_s5 + $0x14c8] sm:$0xff]  ;;  %v1192_v54 = vld [vmem:[%s7165_s5 + $0x1080] sm:$0xff] }
 0x141   : > { %1763 = vmatprep.subr.mxu0 %v1237_v37  ;;  %1840 = vmatprep.subr.mxu1 %v1365_v40  ;;  %v1332_v37 = vld [vmem:[%s7165_s5 + $0x14e0] sm:$0xff]  ;;  %v1197_v42 = vld [vmem:[%s7165_s5 + $0x10a8] sm:$0xff] }
 0x142   : > { %1679 = vmatprep.mubr.f32.mxu0 %v4765_v48  ;;  %1756 = vmatprep.mubr.f32.mxu1 %v4770_v49  ;;  %v1200_v40 = vld [vmem:[%s7165_s5 + $0x10c0] sm:$0xff]  ;;  %v1189_v56 = vld [vmem:[%s7165_s5 + $0x1068] sm:$0xff] }
 0x143   : > { %1764 = vmatpush1.msra.mxu0 %v1236_v43  ;;  %1841 = vmatpush1.msra.mxu1 %v1364_v44  ;;  %v1325_v43 = vld [vmem:[%s7165_s5 + $0x14a8] sm:$0xff]  ;;  %v1196_v44 = vld [vmem:[%s7165_s5 + $0x10a0] sm:$0xff] }
 0x144   : > { %1765 = vmatprep.subr.mxu0 %v1233_v52  ;;  %1842 = vmatprep.subr.mxu1 %v1361_v53  ;;  %v1193_v52 = vld [vmem:[%s7165_s5 + $0x1088] sm:$0xff]  ;;  %v1320_v55 = vld [vmem:[%s7165_s5 + $0x1480] sm:$0xff] }
 0x145   : > { %1766 = vmatpush1.msra.mxu0 %v1232_v12  ;;  %1843 = vmatpush1.msra.mxu1 %v1360_v14  ;;  %v1321_v53 = vld [vmem:[%s7165_s5 + $0x1488] sm:$0xff]  ;;  %v1188_v14 = vld [vmem:[%s7165_s5 + $0x1060] sm:$0xff] }
 0x146   : > { %1680 = vmatmul.mubr.f32.gmra.mxu0 %v4793_v61  ;;  %1757 = vmatmul.mubr.f32.gmra.mxu1 %v4796_v62  ;;  %v1317_v12 = vld [vmem:[%s7165_s5 + $0x1468] sm:$0xff]  ;;  %v1316_v57 = vld [vmem:[%s7165_s5 + $0x1460] sm:$0xff] }
 0x147   : > { %1767 = vmatprep.subr.mxu0 %v1229_v58  ;;  %1844 = vmatprep.subr.mxu1 %v1357_v59  ;;  %v1185_v58 = vld [vmem:[%s7165_s5 + $0x1048] sm:$0xff]  ;;  %v1184_v60 = vld [vmem:[%s7165_s5 + $0x1040] sm:$0xff] }
 0x148   : > { %1768 = vmatpush1.msra.mxu0 %v1228_v63  ;;  %1827 = vmatprep.mubr.f32.mxu0 %v4811_v3  ;;  %v1313_v59 = vld [vmem:[%s7165_s5 + $0x1448] sm:$0xff]  ;;  %v1312_v63 = vld [vmem:[%s7165_s5 + $0x1440] sm:$0xff] }
 0x149   : > { %1845 = vmatpush1.msra.mxu1 %v1356_v1  ;;  %1904 = vmatprep.mubr.f32.mxu1 %v4823_v6  ;;  %v1181_v1 = vld [vmem:[%s7165_s5 + $0x1028] sm:$0xff] }
 0x14a   : > { %1769 = vmatprep.subr.mxu0 %v1225_v4  ;;  %1846 = vmatprep.subr.mxu1 %v1353_v5  ;;  %v1309_v4 = vld [vmem:[%s7165_s5 + $0x1428] sm:$0xff]  ;;  %v1180_v5 = vld [vmem:[%s7165_s5 + $0x1020] sm:$0xff] }
 0x14b   : > { %1770 = vmatpush1.msra.mxu0 %v1224_v8  ;;  %1847 = vmatpush1.msra.mxu1 %v1352_v9  ;;  %v1308_v8 = vld [vmem:[%s7165_s5 + $0x1420] sm:$0xff]  ;;  %v1177_v9 = vld [vmem:[%s7165_s5 + $0x1008] sm:$0xff] }
 0x14c   : > { %1771 = vmatprep.subr.mxu0 %v1221_v10  ;;  %1848 = vmatprep.subr.mxu1 %v1349_v11  ;;  %v1305_v10 = vld [vmem:[%s7165_s5 + $0x1408] sm:$0xff]  ;;  %v1176_v11 = vld [vmem:[%s7165_s5 + $0x1000] sm:$0xff] }
 0x14d   : > { %1772 = vmatpush1.msra.mxu0 %v1220_v13  ;;  %1849 = vmatpush1.msra.mxu1 %v1348_v20  ;;  %v1304_v13 = vld [vmem:[%s7165_s5 + $0x1400] sm:$0xff]  ;;  %v1301_v20 = vld [vmem:[%s7165_s5 + $0x13e8] sm:$0xff] }
 0x14e   : > { %1773 = vmatprep.subr.mxu0 %v1217_v21  ;;  %1850 = vmatprep.subr.mxu1 %v1345_v23  ;;  %v1429_v21 = vld [vmem:[%s7165_s5 + $0x17e8] sm:$0xff]  ;;  %v1300_v23 = vld [vmem:[%s7165_s5 + $0x13e0] sm:$0xff] }
 0x14f   : > { %1774 = vmatpush1.msra.mxu0 %v1216_v24  ;;  %1851 = vmatpush1.msra.mxu1 %v1344_v25  ;;  %v1428_v24 = vld [vmem:[%s7165_s5 + $0x17e0] sm:$0xff]  ;;  %v1297_v25 = vld [vmem:[%s7165_s5 + $0x13c8] sm:$0xff] }
 0x150   : > { %1775 = vmatprep.subr.mxu0 %v1213_v26  ;;  %1852 = vmatprep.subr.mxu1 %v1341_v27  ;;  %v1425_v26 = vld [vmem:[%s7165_s5 + $0x17c8] sm:$0xff]  ;;  %v1296_v27 = vld [vmem:[%s7165_s5 + $0x13c0] sm:$0xff] }
 0x151   : > { %1776 = vmatpush1.msra.mxu0 %v1212_v28  ;;  %1853 = vmatpush1.msra.mxu1 %v1340_v29  ;;  %v1424_v28 = vld [vmem:[%s7165_s5 + $0x17c0] sm:$0xff]  ;;  %v1293_v29 = vld [vmem:[%s7165_s5 + $0x13a8] sm:$0xff] }
 0x152   : > { %1777 = vmatprep.subr.mxu0 %v1209_v30  ;;  %1854 = vmatprep.subr.mxu1 %v1337_v31  ;;  %v1421_v30 = vld [vmem:[%s7165_s5 + $0x17a8] sm:$0xff]  ;;  %v1292_v31 = vld [vmem:[%s7165_s5 + $0x13a0] sm:$0xff] }
 0x153   : > { %1778 = vmatpush1.msra.mxu0 %v1208_v32  ;;  %1855 = vmatpush1.msra.mxu1 %v1336_v33  ;;  %v1420_v32 = vld [vmem:[%s7165_s5 + $0x17a0] sm:$0xff]  ;;  %v1289_v33 = vld [vmem:[%s7165_s5 + $0x1388] sm:$0xff] }
 0x154   : > { %1779 = vmatprep.subr.mxu0 %v1205_v34  ;;  %1856 = vmatprep.subr.mxu1 %v1333_v35  ;;  %v1417_v34 = vld [vmem:[%s7165_s5 + $0x1788] sm:$0xff]  ;;  %v1288_v35 = vld [vmem:[%s7165_s5 + $0x1380] sm:$0xff] }
 0x155   : > { %1780 = vmatpush1.msra.mxu0 %v1204_v36  ;;  %1857 = vmatpush1.msra.mxu1 %v1332_v37  ;;  %v1416_v36 = vld [vmem:[%s7165_s5 + $0x1780] sm:$0xff]  ;;  %v1285_v37 = vld [vmem:[%s7165_s5 + $0x1368] sm:$0xff] }
 0x156   : > { %1781 = vmatprep.subr.mxu0 %v1201_v38  ;;  %1858 = vmatprep.subr.mxu1 %v1329_v39  ;;  %v1413_v38 = vld [vmem:[%s7165_s5 + $0x1768] sm:$0xff]  ;;  %v1284_v39 = vld [vmem:[%s7165_s5 + $0x1360] sm:$0xff] }
 0x157   : > { %1782 = vmatpush1.msra.mxu0 %v1200_v40  ;;  %1859 = vmatpush1.msra.mxu1 %v1328_v41  ;;  %v1412_v40 = vld [vmem:[%s7165_s5 + $0x1760] sm:$0xff]  ;;  %v1281_v41 = vld [vmem:[%s7165_s5 + $0x1348] sm:$0xff] }
 0x158   : > { %1783 = vmatprep.subr.mxu0 %v1197_v42  ;;  %1860 = vmatprep.subr.mxu1 %v1325_v43  ;;  %v1409_v42 = vld [vmem:[%s7165_s5 + $0x1748] sm:$0xff]  ;;  %v1280_v43 = vld [vmem:[%s7165_s5 + $0x1340] sm:$0xff] }
 0x159   : > { %1784 = vmatpush1.msra.mxu0 %v1196_v44  ;;  %1861 = vmatpush1.msra.mxu1 %v1324_v45  ;;  %v1408_v44 = vld [vmem:[%s7165_s5 + $0x1740] sm:$0xff]  ;;  %v1277_v45 = vld [vmem:[%s7165_s5 + $0x1328] sm:$0xff] }
 0x15a   : > { %1785 = vmatprep.subr.mxu0 %v1193_v52  ;;  %1862 = vmatprep.subr.mxu1 %v1321_v53  ;;  %v1405_v52 = vld [vmem:[%s7165_s5 + $0x1728] sm:$0xff]  ;;  %v1276_v53 = vld [vmem:[%s7165_s5 + $0x1320] sm:$0xff] }
 0x15b   : > { %1786 = vmatpush1.msra.mxu0 %v1192_v54  ;;  %1863 = vmatpush1.msra.mxu1 %v1320_v55  ;;  %v1404_v54 = vld [vmem:[%s7165_s5 + $0x1720] sm:$0xff]  ;;  %v1273_v55 = vld [vmem:[%s7165_s5 + $0x1308] sm:$0xff] }
 0x15c   : > { %1787 = vmatprep.subr.mxu0 %v1189_v56  ;;  %1864 = vmatprep.subr.mxu1 %v1317_v12  ;;  %v1401_v56 = vld [vmem:[%s7165_s5 + $0x1708] sm:$0xff]  ;;  %v1272_v12 = vld [vmem:[%s7165_s5 + $0x1300] sm:$0xff] }
 0x15d   : > { %1788 = vmatpush1.msra.mxu0 %v1188_v14  ;;  %1865 = vmatpush1.msra.mxu1 %v1316_v57  ;;  %v1400_v14 = vld [vmem:[%s7165_s5 + $0x1700] sm:$0xff]  ;;  %v1269_v57 = vld [vmem:[%s7165_s5 + $0x12e8] sm:$0xff] }
 0x15e   : > { %1789 = vmatprep.subr.mxu0 %v1185_v58  ;;  %1866 = vmatprep.subr.mxu1 %v1313_v59  ;;  %v1397_v58 = vld [vmem:[%s7165_s5 + $0x16e8] sm:$0xff]  ;;  %v1268_v59 = vld [vmem:[%s7165_s5 + $0x12e0] sm:$0xff] }
 0x15f   : > { %1790 = vmatpush1.msra.mxu0 %v1184_v60  ;;  %1867 = vmatpush1.msra.mxu1 %v1312_v63  ;;  %v1396_v60 = vld [vmem:[%s7165_s5 + $0x16e0] sm:$0xff]  ;;  %v1265_v63 = vld [vmem:[%s7165_s5 + $0x12c8] sm:$0xff] }
 0x160   : > { %1791 = vmatprep.subr.mxu0 %v1181_v1  ;;  %1868 = vmatprep.subr.mxu1 %v1309_v4  ;;  %v1393_v1 = vld [vmem:[%s7165_s5 + $0x16c8] sm:$0xff]  ;;  %v1264_v4 = vld [vmem:[%s7165_s5 + $0x12c0] sm:$0xff] }
 0x161   : > { %1792 = vmatpush1.msra.mxu0 %v1180_v5  ;;  %1869 = vmatpush1.msra.mxu1 %v1308_v8  ;;  %v1392_v5 = vld [vmem:[%s7165_s5 + $0x16c0] sm:$0xff]  ;;  %v1261_v8 = vld [vmem:[%s7165_s5 + $0x12a8] sm:$0xff] }
 0x162   : > { %1793 = vmatprep.subr.mxu0 %v1177_v9  ;;  %1870 = vmatprep.subr.mxu1 %v1305_v10  ;;  %v1389_v9 = vld [vmem:[%s7165_s5 + $0x16a8] sm:$0xff]  ;;  %v1260_v10 = vld [vmem:[%s7165_s5 + $0x12a0] sm:$0xff] }
 0x163   : > { %1794 = vmatpush1.msra.mxu0 %v1176_v11  ;;  %1871 = vmatpush1.msra.mxu1 %v1304_v13  ;;  %v1388_v11 = vld [vmem:[%s7165_s5 + $0x16a0] sm:$0xff]  ;;  %v1257_v13 = vld [vmem:[%s7165_s5 + $0x1288] sm:$0xff] }
 0x164   : > { %1795 = vmatprep.subr.mxu0 %v1301_v20  ;;  %1872 = vmatprep.subr.mxu1 %v1429_v21  ;;  %v1385_v20 = vld [vmem:[%s7165_s5 + $0x1688] sm:$0xff]  ;;  %v1256_v21 = vld [vmem:[%s7165_s5 + $0x1280] sm:$0xff] }
 0x165   : > { %1796 = vmatpush2.msra.mxu0 %v1300_v23  ;;  %1873 = vmatpush2.msra.mxu1 %v1428_v24  ;;  %v1384_v23 = vld [vmem:[%s7165_s5 + $0x1680] sm:$0xff]  ;;  %v1253_v24 = vld [vmem:[%s7165_s5 + $0x1268] sm:$0xff] }
 0x166   : > { %1797 = vmatprep.subr.mxu0 %v1297_v25  ;;  %1874 = vmatprep.subr.mxu1 %v1425_v26  ;;  %v1381_v25 = vld [vmem:[%s7165_s5 + $0x1668] sm:$0xff]  ;;  %v1252_v26 = vld [vmem:[%s7165_s5 + $0x1260] sm:$0xff] }
 0x167   : > { %1798 = vmatpush2.msra.mxu0 %v1296_v27  ;;  %1875 = vmatpush2.msra.mxu1 %v1424_v28  ;;  %v1380_v27 = vld [vmem:[%s7165_s5 + $0x1660] sm:$0xff]  ;;  %v1249_v28 = vld [vmem:[%s7165_s5 + $0x1248] sm:$0xff] }
 0x168   : > { %1799 = vmatprep.subr.mxu0 %v1293_v29  ;;  %1876 = vmatprep.subr.mxu1 %v1421_v30  ;;  %v1377_v29 = vld [vmem:[%s7165_s5 + $0x1648] sm:$0xff]  ;;  %v1248_v30 = vld [vmem:[%s7165_s5 + $0x1240] sm:$0xff] }
 0x169   : > { %1800 = vmatpush2.msra.mxu0 %v1292_v31  ;;  %1877 = vmatpush2.msra.mxu1 %v1420_v32  ;;  %v1376_v31 = vld [vmem:[%s7165_s5 + $0x1640] sm:$0xff] }
 0x16a   : > { %1801 = vmatprep.subr.mxu0 %v1289_v33  ;;  %1878 = vmatprep.subr.mxu1 %v1417_v34  ;;  %v578_v32 = vld [vmem:[#allocation2] sm:$0xfc]  ;;  %v580_v33 = vld [vmem:[#allocation2 + $0x10] sm:$0xfc]  ;;  %v1245_v34 = vld [vmem:[%s7165_s5 + $0x1228] sm:$0xff] }
 0x16b   : > { %1802 = vmatpush2.msra.mxu0 %v1288_v35  ;;  %1879 = vmatpush2.msra.mxu1 %v1416_v36  ;;  %v1373_v35 = vld [vmem:[%s7165_s5 + $0x1628] sm:$0xff]  ;;  %v1244_v36 = vld [vmem:[%s7165_s5 + $0x1220] sm:$0xff] }
 0x16c   : > { %1803 = vmatprep.subr.mxu0 %v1285_v37  ;;  %1880 = vmatprep.subr.mxu1 %v1413_v38  ;;  %v1372_v37 = vld [vmem:[%s7165_s5 + $0x1620] sm:$0xff]  ;;  %v583_v38 = vld [vmem:[#allocation2 + $0x48] sm:$0x3] }
 0x16d   : > { %1804 = vmatpush2.msra.mxu0 %v1284_v39  ;;  %1881 = vmatpush2.msra.mxu1 %v1412_v40  ;;  %v585_v39 = vld [vmem:[#allocation2 + $0x58] sm:$0x3]  ;;  %v1241_v40 = vld [vmem:[%s7165_s5 + $0x1208] sm:$0xff] }
 0x16e   : > { %1805 = vmatprep.subr.mxu0 %v1281_v41  ;;  %1882 = vmatprep.subr.mxu1 %v1409_v42  ;;  %v1369_v41 = vld [vmem:[%s7165_s5 + $0x1608] sm:$0xff]  ;;  %v636_v42 = vrot.slane %v578_v32, 2  ;;  %v839_v32 = vld [vmem:[%s7165_s5 + $0x578] sm:$0xff] }
 0x16f   : > { %1806 = vmatpush2.msra.mxu0 %v1280_v43  ;;  %1883 = vmatpush2.msra.mxu1 %v1408_v44  ;;  %v642_v43 = vrot.slane %v580_v33, 2  ;;  %v1240_v44 = vld [vmem:[%s7165_s5 + $0x1200] sm:$0xff]  ;;  %v710_v33 = vld [vmem:[%s7165_s5 + $0x170] sm:$0xff] }
 0x170   : > { %1807 = vmatprep.subr.mxu0 %v1277_v45  ;;  %1884 = vmatprep.subr.mxu1 %v1405_v52  ;;  %v1368_v45 = vld [vmem:[%s7165_s5 + $0x1600] sm:$0xff] }
 0x171   : > { %1808 = vmatpush2.msra.mxu0 %v1276_v53  ;;  %1885 = vmatpush2.msra.mxu1 %v1404_v54  ;;  %v5168_v52 = vld [vmem:[#allocation2 + $0x20] sm:$0xff]  ;;  %v5171_v54 = vld [vmem:[#allocation2 + $0x30] sm:$0xff] }
 0x172   : > { %1809 = vmatprep.subr.mxu0 %v1273_v55  ;;  %1886 = vmatprep.subr.mxu1 %v1401_v56  ;;  %v637_v53 = vrot.slane %v5168_v52, 2  ;;  %v643_v55 = vrot.slane %v5171_v54, 2  ;;  %v727_v56 = vld [vmem:[%s7165_s5 + $0x1f8] sm:$0xff] }
 0x173   : > { %1810 = vmatpush2.msra.mxu0 %v1272_v12  ;;  %1887 = vmatpush2.msra.mxu1 %v1400_v14  ;;  %v650_v12 = vrot.slane %v583_v38, 2  ;;  %v654_v14 = vrot.slane %v585_v39, 2  ;;  %v834_v38 = vld [vmem:[%s7165_s5 + $0x550] sm:$0xff]  ;;  %v703_v39 = vld [vmem:[%s7165_s5 + $0x138] sm:$0xff] }
 0x174   : > { %1811 = vmatprep.subr.mxu0 %v1269_v57  ;;  %1888 = vmatprep.subr.mxu1 %v1397_v58  ;;  %v855_v57 = vld [vmem:[%s7165_s5 + $0x5f8] sm:$0xff]  ;;  %v582_v58 = vld [vmem:[#allocation2 + $0x40] sm:$0x3] }
 0x175   : > { %1812 = vmatpush2.msra.mxu0 %v1268_v59  ;;  %1889 = vmatpush2.msra.mxu1 %v1396_v60  ;;  %v584_v59 = vld [vmem:[#allocation2 + $0x50] sm:$0x3]  ;;  %v5181_v60 = vsel %vm635_vm3, %v636_v42, %v637_v53 }
 0x176   : > { %1813 = vmatprep.subr.mxu0 %v1265_v63  ;;  %1890 = vmatprep.subr.mxu1 %v1393_v1  ;;  %v5184_v63 = vsel %vm635_vm3, %v642_v43, %v643_v55  ;;  %v726_v1 = vld [vmem:[%s7165_s5 + $0x1f0] sm:$0xff]  ;;  %v699_v43 = vld [vmem:[%s7165_s5 + $0x118] sm:$0xff] }
 0x177   : > { %1814 = vmatpush2.msra.mxu0 %v1264_v4  ;;  %1891 = vmatpush2.msra.mxu1 %v1392_v5  ;;  %v854_v4 = vld [vmem:[%s7165_s5 + $0x5f0] sm:$0xff]  ;;  %v5197_v5 = vsel %vm635_vm3, %v640_v0, %v650_v12  ;;  %v719_v0 = vld [vmem:[%s7165_s5 + $0x1b8] sm:$0xff] }
 0x178   : > { %1815 = vmatprep.subr.mxu0 %v1261_v8  ;;  %1892 = vmatprep.subr.mxu1 %v1389_v9  ;;  %v5202_v8 = vsel %vm635_vm3, %v646_v2, %v654_v14  ;;  %v723_v9 = vld [vmem:[%s7165_s5 + $0x1d8] sm:$0xff]  ;;  %v830_v42 = vld [vmem:[%s7165_s5 + $0x530] sm:$0xff] }
 0x179   : > { %1816 = vmatpush2.msra.mxu0 %v1260_v10  ;;  %1893 = vmatpush2.msra.mxu1 %v1388_v11  ;;  %v851_v10 = vld [vmem:[%s7165_s5 + $0x5d8] sm:$0xff]  ;;  %v648_v11 = vrot.slane %v582_v58, 2  ;;  %v694_v12 = vld [vmem:[%s7165_s5 + $0xf0] sm:$0xff] }
 0x17a   : > { %1817 = vmatprep.subr.mxu0 %v1257_v13  ;;  %1894 = vmatprep.subr.mxu1 %v1385_v20  ;;  %v652_v13 = vrot.slane %v584_v59, 2  ;;  %v847_v2 = vld [vmem:[%s7165_s5 + $0x5b8] sm:$0xff]  ;;  %v822_v14 = vld [vmem:[%s7165_s5 + $0x4f0] sm:$0xff] }
 0x17b   : > { %1818 = vmatpush2.msra.mxu0 %v1256_v21  ;;  %1895 = vmatpush2.msra.mxu1 %v1384_v23  ;;  %v5225_v20 = vsel %vm635_vm3, %v637_v53, %v648_v11  ;;  %v718_v23 = vld [vmem:[%s7165_s5 + $0x1b0] sm:$0xff]  ;;  %v819_v58 = vld [vmem:[%s7165_s5 + $0x4d8] sm:$0xff] }
 0x17c   : > { %1819 = vmatprep.subr.mxu0 %v1253_v24  ;;  %1896 = vmatprep.subr.mxu1 %v1381_v25  ;;  %v5228_v21 = vsel %vm635_vm3, %v643_v55, %v652_v13  ;;  %v846_v24 = vld [vmem:[%s7165_s5 + $0x5b0] sm:$0xff]  ;;  %v715_v25 = vld [vmem:[%s7165_s5 + $0x198] sm:$0xff] }
 0x17d   : > { %1820 = vmatpush2.msra.mxu0 %v1252_v26  ;;  %1897 = vmatpush2.msra.mxu1 %v1380_v27  ;;  %v843_v26 = vld [vmem:[%s7165_s5 + $0x598] sm:$0xff]  ;;  %v3634_v27 = vld [vmem:[#allocation2 + $0x8] sm:$0xff]  ;;  %v826_v53 = vld [vmem:[%s7165_s5 + $0x510] sm:$0xff] }
 0x17e   : > { %1821 = vmatprep.subr.mxu0 %v1249_v28  ;;  %1898 = vmatprep.subr.mxu1 %v1377_v29  ;;  %v714_v28 = vld [vmem:[%s7165_s5 + $0x190] sm:$0xff]  ;;  %v695_v55 = vld [vmem:[%s7165_s5 + $0xf8] sm:$0xff] }
 0x17f   : > { %1822 = vmatpush2.msra.mxu0 %v1248_v30  ;;  %1899 = vmatpush2.msra.mxu1 %v1376_v31  ;;  %v842_v29 = vld [vmem:[%s7165_s5 + $0x590] sm:$0xff]  ;;  %v3635_v30 = vld [vmem:[#allocation2 + $0x18] sm:$0xff] }
 0x180   : > { %1823 = vmatprep.subr.mxu0 %v1245_v34  ;;  %1900 = vmatprep.subr.mxu1 %v1373_v35  ;;  %v711_v31 = vld [vmem:[%s7165_s5 + $0x178] sm:$0xff]  ;;  %v838_v34 = vld [vmem:[%s7165_s5 + $0x570] sm:$0xff] }
 0x181   : > { %1824 = vmatpush2.msra.mxu0 %v1244_v36  ;;  %1901 = vmatpush2.msra.mxu1 %v1372_v37  ;;  %v707_v35 = vld [vmem:[%s7165_s5 + $0x158] sm:$0xff]  ;;  %v706_v37 = vld [vmem:[%s7165_s5 + $0x150] sm:$0xff] }
 0x182   : > { %1825 = vmatprep.subr.mxu0 %v1241_v40  ;;  %1902 = vmatprep.subr.mxu1 %v1369_v41  ;;  %v835_v36 = vld [vmem:[%s7165_s5 + $0x558] sm:$0xff]  ;;  %v702_v41 = vld [vmem:[%s7165_s5 + $0x130] sm:$0xff] }
 0x183   : > { %1826 = vmatpush2.msra.mxu0 %v1240_v44  ;;  %1903 = vmatpush2.msra.mxu1 %v1368_v45  ;;  %v831_v40 = vld [vmem:[%s7165_s5 + $0x538] sm:$0xff]  ;;  %v698_v45 = vld [vmem:[%s7165_s5 + $0x110] sm:$0xff] }
 0x184   : > { %1828 = vmatmul.mubr.f32.vlgmr.msra.gmra.mxu0 %v5181_v60  ;;  %1905 = vmatmul.mubr.f32.vlgmr.msra.gmra.mxu1 %v5184_v63  ;;  %v827_v44 = vld [vmem:[%s7165_s5 + $0x518] sm:$0xff]  ;;  %v690_v59 = vld [vmem:[%s7165_s5 + $0xd0] sm:$0xff] }
 0x185   : > { %1917 = vmatprep.subr.mxu0 %v727_v56  ;;  %1994 = vmatprep.subr.mxu1 %v855_v57  ;;  %v823_v56 = vld [vmem:[%s7165_s5 + $0x4f8] sm:$0xff]  ;;  %v814_v11 = vld [vmem:[%s7165_s5 + $0x4b0] sm:$0xff] }
 0x186   : > { %1833 = vmatprep.mubr.f32.mxu0 %v5197_v5  ;;  %1910 = vmatprep.mubr.f32.mxu1 %v5202_v8  ;;  %v691_v57 = vld [vmem:[%s7165_s5 + $0xd8] sm:$0xff] }
 0x187   : > { %1918 = vmatpush1.msra.mxu0 %v726_v1  ;;  %1995 = vmatpush1.msra.mxu1 %v854_v4  ;;  %v818_v1 = vld [vmem:[%s7165_s5 + $0x4d0] sm:$0xff]  ;;  %v687_v4 = vld [vmem:[%s7165_s5 + $0xb8] sm:$0xff] }
 0x188   : > { %1919 = vmatprep.subr.mxu0 %v723_v9  ;;  %1996 = vmatprep.subr.mxu1 %v851_v10  ;;  %v815_v9 = vld [vmem:[%s7165_s5 + $0x4b8] sm:$0xff]  ;;  %v686_v10 = vld [vmem:[%s7165_s5 + $0xb0] sm:$0xff] }
 0x189   : > { %1920 = vmatpush1.msra.mxu0 %v722_v50  ;;  %1997 = vmatpush1.msra.mxu1 %v850_v51  ;;  %v683_v13 = vld [vmem:[%s7165_s5 + $0x98] sm:$0xff]  ;;  %v682_v51 = vld [vmem:[%s7165_s5 + $0x90] sm:$0xff] }
 0x18a   : > { %1834 = vmatmul.mubr.f32.gmra.mxu0 %v5225_v20  ;;  %1911 = vmatmul.mubr.f32.gmra.mxu1 %v5228_v21  ;;  %v811_v50 = vld [vmem:[%s7165_s5 + $0x498] sm:$0xff] }
 0x18b   : > { %1921 = vmatprep.subr.mxu0 %v719_v0  ;;  %1998 = vmatprep.subr.mxu1 %v847_v2  ;;  %v810_v0 = vld [vmem:[%s7165_s5 + $0x490] sm:$0xff]  ;;  %v679_v2 = vld [vmem:[%s7165_s5 + $0x78] sm:$0xff] }
 0x18c   : > { %1922 = vmatpush1.msra.mxu0 %v718_v23  ;;  %1981 = vmatprep.mubr.f32.mxu0 %v3634_v27  ;;  %v807_v23 = vld [vmem:[%s7165_s5 + $0x478] sm:$0xff] }
 0x18d   : > { %1999 = vmatpush1.msra.mxu1 %v846_v24  ;;  %2058 = vmatprep.mubr.f32.mxu1 %v3635_v30  ;;  %v678_v24 = vld [vmem:[%s7165_s5 + $0x70] sm:$0xff]  ;;  %v803_v27 = vld [vmem:[%s7165_s5 + $0x458] sm:$0xff] }
 0x18e   : > { %1923 = vmatprep.subr.mxu0 %v715_v25  ;;  %2000 = vmatprep.subr.mxu1 %v843_v26  ;;  %v806_v25 = vld [vmem:[%s7165_s5 + $0x470] sm:$0xff]  ;;  %v675_v26 = vld [vmem:[%s7165_s5 + $0x58] sm:$0xff] }
 0x18f   : > { %1924 = vmatpush1.msra.mxu0 %v714_v28  ;;  %2001 = vmatpush1.msra.mxu1 %v842_v29  ;;  %v674_v28 = vld [vmem:[%s7165_s5 + $0x50] sm:$0xff]  ;;  %v671_v30 = vld [vmem:[%s7165_s5 + $0x38] sm:$0xff] }
 0x190   : > { %1925 = vmatprep.subr.mxu0 %v711_v31  ;;  %2002 = vmatprep.subr.mxu1 %v839_v32  ;;  %v802_v29 = vld [vmem:[%s7165_s5 + $0x450] sm:$0xff]  ;;  %v799_v31 = vld [vmem:[%s7165_s5 + $0x438] sm:$0xff] }
 0x191   : > { %1926 = vmatpush1.msra.mxu0 %v710_v33  ;;  %2003 = vmatpush1.msra.mxu1 %v838_v34  ;;  %v670_v32 = vld [vmem:[%s7165_s5 + $0x30] sm:$0xff]  ;;  %v667_v34 = vld [vmem:[%s7165_s5 + $0x18] sm:$0xff] }
 0x192   : > { %1927 = vmatprep.subr.mxu0 %v707_v35  ;;  %2004 = vmatprep.subr.mxu1 %v835_v36  ;;  %v798_v33 = vld [vmem:[%s7165_s5 + $0x430] sm:$0xff]  ;;  %v795_v35 = vld [vmem:[%s7165_s5 + $0x418] sm:$0xff] }
 0x193   : > { %1928 = vmatpush1.msra.mxu0 %v706_v37  ;;  %2005 = vmatpush1.msra.mxu1 %v834_v38  ;;  %v666_v36 = vld [vmem:[%s7165_s5 + $0x10] sm:$0xff]  ;;  %v791_v38 = vld [vmem:[%s7165_s5 + $0x3f8] sm:$0xff] }
 0x194   : > { %1929 = vmatprep.subr.mxu0 %v703_v39  ;;  %2006 = vmatprep.subr.mxu1 %v831_v40  ;;  %v794_v37 = vld [vmem:[%s7165_s5 + $0x410] sm:$0xff]  ;;  %v919_v39 = vld [vmem:[%s7165_s5 + $0x7f8] sm:$0xff] }
 0x195   : > { %1930 = vmatpush1.msra.mxu0 %v702_v41  ;;  %2007 = vmatpush1.msra.mxu1 %v830_v42  ;;  %v790_v40 = vld [vmem:[%s7165_s5 + $0x3f0] sm:$0xff]  ;;  %v787_v42 = vld [vmem:[%s7165_s5 + $0x3d8] sm:$0xff] }
 0x196   : > { %1931 = vmatprep.subr.mxu0 %v699_v43  ;;  %2008 = vmatprep.subr.mxu1 %v827_v44  ;;  %v918_v41 = vld [vmem:[%s7165_s5 + $0x7f0] sm:$0xff]  ;;  %v915_v43 = vld [vmem:[%s7165_s5 + $0x7d8] sm:$0xff] }
 0x197   : > { %1932 = vmatpush1.msra.mxu0 %v698_v45  ;;  %2009 = vmatpush1.msra.mxu1 %v826_v53  ;;  %v786_v44 = vld [vmem:[%s7165_s5 + $0x3d0] sm:$0xff]  ;;  %v783_v53 = vld [vmem:[%s7165_s5 + $0x3b8] sm:$0xff] }
 0x198   : > { %1933 = vmatprep.subr.mxu0 %v695_v55  ;;  %2010 = vmatprep.subr.mxu1 %v823_v56  ;;  %v914_v45 = vld [vmem:[%s7165_s5 + $0x7d0] sm:$0xff]  ;;  %v911_v55 = vld [vmem:[%s7165_s5 + $0x7b8] sm:$0xff] }
 0x199   : > { %1934 = vmatpush1.msra.mxu0 %v694_v12  ;;  %2011 = vmatpush1.msra.mxu1 %v822_v14  ;;  %v782_v56 = vld [vmem:[%s7165_s5 + $0x3b0] sm:$0xff]  ;;  %v779_v14 = vld [vmem:[%s7165_s5 + $0x398] sm:$0xff] }
 0x19a   : > { %1935 = vmatprep.subr.mxu0 %v691_v57  ;;  %2012 = vmatprep.subr.mxu1 %v819_v58  ;;  %v910_v12 = vld [vmem:[%s7165_s5 + $0x7b0] sm:$0xff]  ;;  %v907_v57 = vld [vmem:[%s7165_s5 + $0x798] sm:$0xff] }
 0x19b   : > { %1936 = vmatpush1.msra.mxu0 %v690_v59  ;;  %2013 = vmatpush1.msra.mxu1 %v818_v1  ;;  %v778_v58 = vld [vmem:[%s7165_s5 + $0x390] sm:$0xff]  ;;  %v775_v1 = vld [vmem:[%s7165_s5 + $0x378] sm:$0xff] }
 0x19c   : > { %1937 = vmatprep.subr.mxu0 %v687_v4  ;;  %2014 = vmatprep.subr.mxu1 %v815_v9  ;;  %v906_v59 = vld [vmem:[%s7165_s5 + $0x790] sm:$0xff]  ;;  %v903_v4 = vld [vmem:[%s7165_s5 + $0x778] sm:$0xff] }
 0x19d   : > { %1938 = vmatpush1.msra.mxu0 %v686_v10  ;;  %2015 = vmatpush1.msra.mxu1 %v814_v11  ;;  %v774_v9 = vld [vmem:[%s7165_s5 + $0x370] sm:$0xff]  ;;  %v771_v11 = vld [vmem:[%s7165_s5 + $0x358] sm:$0xff] }
 0x19e   : > { %1939 = vmatprep.subr.mxu0 %v683_v13  ;;  %2016 = vmatprep.subr.mxu1 %v811_v50  ;;  %v902_v10 = vld [vmem:[%s7165_s5 + $0x770] sm:$0xff]  ;;  %v899_v13 = vld [vmem:[%s7165_s5 + $0x758] sm:$0xff] }
 0x19f   : > { %1940 = vmatpush1.msra.mxu0 %v682_v51  ;;  %2017 = vmatpush1.msra.mxu1 %v810_v0  ;;  %v770_v50 = vld [vmem:[%s7165_s5 + $0x350] sm:$0xff]  ;;  %v767_v0 = vld [vmem:[%s7165_s5 + $0x338] sm:$0xff] }
 0x1a0   : > { %1941 = vmatprep.subr.mxu0 %v679_v2  ;;  %2018 = vmatprep.subr.mxu1 %v807_v23  ;;  %v898_v51 = vld [vmem:[%s7165_s5 + $0x750] sm:$0xff]  ;;  %v895_v2 = vld [vmem:[%s7165_s5 + $0x738] sm:$0xff] }
 0x1a1   : > { %1942 = vmatpush1.msra.mxu0 %v678_v24  ;;  %2019 = vmatpush1.msra.mxu1 %v806_v25  ;;  %v766_v23 = vld [vmem:[%s7165_s5 + $0x330] sm:$0xff]  ;;  %v763_v25 = vld [vmem:[%s7165_s5 + $0x318] sm:$0xff] }
 0x1a2   : > { %1943 = vmatprep.subr.mxu0 %v675_v26  ;;  %2020 = vmatprep.subr.mxu1 %v803_v27  ;;  %v894_v24 = vld [vmem:[%s7165_s5 + $0x730] sm:$0xff]  ;;  %v891_v26 = vld [vmem:[%s7165_s5 + $0x718] sm:$0xff] }
 0x1a3   : > { %1944 = vmatpush1.msra.mxu0 %v674_v28  ;;  %2021 = vmatpush1.msra.mxu1 %v802_v29  ;;  %v762_v27 = vld [vmem:[%s7165_s5 + $0x310] sm:$0xff]  ;;  %v759_v29 = vld [vmem:[%s7165_s5 + $0x2f8] sm:$0xff] }
 0x1a4   : > { %1945 = vmatprep.subr.mxu0 %v671_v30  ;;  %2022 = vmatprep.subr.mxu1 %v799_v31  ;;  %v890_v28 = vld [vmem:[%s7165_s5 + $0x710] sm:$0xff]  ;;  %v887_v30 = vld [vmem:[%s7165_s5 + $0x6f8] sm:$0xff] }
 0x1a5   : > { %1946 = vmatpush1.msra.mxu0 %v670_v32  ;;  %2023 = vmatpush1.msra.mxu1 %v798_v33  ;;  %v758_v31 = vld [vmem:[%s7165_s5 + $0x2f0] sm:$0xff]  ;;  %v755_v33 = vld [vmem:[%s7165_s5 + $0x2d8] sm:$0xff] }
 0x1a6   : > { %1947 = vmatprep.subr.mxu0 %v667_v34  ;;  %2024 = vmatprep.subr.mxu1 %v795_v35  ;;  %v886_v32 = vld [vmem:[%s7165_s5 + $0x6f0] sm:$0xff]  ;;  %v883_v34 = vld [vmem:[%s7165_s5 + $0x6d8] sm:$0xff] }
 0x1a7   : > { %1948 = vmatpush1.msra.mxu0 %v666_v36  ;;  %2025 = vmatpush1.msra.mxu1 %v794_v37  ;;  %v754_v35 = vld [vmem:[%s7165_s5 + $0x2d0] sm:$0xff]  ;;  %v751_v37 = vld [vmem:[%s7165_s5 + $0x2b8] sm:$0xff] }
 0x1a8   : > { %1949 = vmatprep.subr.mxu0 %v791_v38  ;;  %2026 = vmatprep.subr.mxu1 %v919_v39  ;;  %v882_v36 = vld [vmem:[%s7165_s5 + $0x6d0] sm:$0xff]  ;;  %v879_v38 = vld [vmem:[%s7165_s5 + $0x6b8] sm:$0xff] }
 0x1a9   : > { %1950 = vmatpush2.msra.mxu0 %v790_v40  ;;  %2027 = vmatpush2.msra.mxu1 %v918_v41  ;;  %v750_v39 = vld [vmem:[%s7165_s5 + $0x2b0] sm:$0xff]  ;;  %v747_v41 = vld [vmem:[%s7165_s5 + $0x298] sm:$0xff] }
 0x1aa   : > { %1951 = vmatprep.subr.mxu0 %v787_v42  ;;  %2028 = vmatprep.subr.mxu1 %v915_v43  ;;  %v878_v40 = vld [vmem:[%s7165_s5 + $0x6b0] sm:$0xff]  ;;  %v875_v42 = vld [vmem:[%s7165_s5 + $0x698] sm:$0xff] }
 0x1ab   : > { %1952 = vmatpush2.msra.mxu0 %v786_v44  ;;  %2029 = vmatpush2.msra.mxu1 %v914_v45  ;;  %v746_v43 = vld [vmem:[%s7165_s5 + $0x290] sm:$0xff]  ;;  %v743_v45 = vld [vmem:[%s7165_s5 + $0x278] sm:$0xff] }
 0x1ac   : > { %1953 = vmatprep.subr.mxu0 %v783_v53  ;;  %2030 = vmatprep.subr.mxu1 %v911_v55  ;;  %v874_v44 = vld [vmem:[%s7165_s5 + $0x690] sm:$0xff]  ;;  %v871_v53 = vld [vmem:[%s7165_s5 + $0x678] sm:$0xff] }
 0x1ad   : > { %1954 = vmatpush2.msra.mxu0 %v782_v56  ;;  %2031 = vmatpush2.msra.mxu1 %v910_v12  ;;  %v742_v55 = vld [vmem:[%s7165_s5 + $0x270] sm:$0xff]  ;;  %v739_v12 = vld [vmem:[%s7165_s5 + $0x258] sm:$0xff] }
 0x1ae   : > { %1955 = vmatprep.subr.mxu0 %v779_v14  ;;  %2032 = vmatprep.subr.mxu1 %v907_v57  ;;  %v870_v56 = vld [vmem:[%s7165_s5 + $0x670] sm:$0xff]  ;;  %v867_v14 = vld [vmem:[%s7165_s5 + $0x658] sm:$0xff] }
 0x1af   : > { %1956 = vmatpush2.msra.mxu0 %v778_v58  ;;  %2033 = vmatpush2.msra.mxu1 %v906_v59  ;;  %v738_v57 = vld [vmem:[%s7165_s5 + $0x250] sm:$0xff]  ;;  %v735_v59 = vld [vmem:[%s7165_s5 + $0x238] sm:$0xff] }
 0x1b0   : > { %1957 = vmatprep.subr.mxu0 %v775_v1  ;;  %2034 = vmatprep.subr.mxu1 %v903_v4  ;;  %v866_v58 = vld [vmem:[%s7165_s5 + $0x650] sm:$0xff]  ;;  %v863_v1 = vld [vmem:[%s7165_s5 + $0x638] sm:$0xff] }
 0x1b1   : > { %1958 = vmatpush2.msra.mxu0 %v774_v9  ;;  %2035 = vmatpush2.msra.mxu1 %v902_v10  ;;  %v734_v4 = vld [vmem:[%s7165_s5 + $0x230] sm:$0xff]  ;;  %v731_v10 = vld [vmem:[%s7165_s5 + $0x218] sm:$0xff] }
 0x1b2   : > { %1959 = vmatprep.subr.mxu0 %v771_v11  ;;  %2036 = vmatprep.subr.mxu1 %v899_v13  ;;  %v862_v9 = vld [vmem:[%s7165_s5 + $0x630] sm:$0xff]  ;;  %v859_v11 = vld [vmem:[%s7165_s5 + $0x618] sm:$0xff] }
 0x1b3   : > { %1960 = vmatpush2.msra.mxu0 %v770_v50  ;;  %2037 = vmatpush2.msra.mxu1 %v898_v51  ;;  %v730_v13 = vld [vmem:[%s7165_s5 + $0x210] sm:$0xff]  ;;  %v983_v51 = vld [vmem:[%s7165_s5 + $0x9f8] sm:$0xff] }
 0x1b4   : > { %1961 = vmatprep.subr.mxu0 %v767_v0  ;;  %2038 = vmatprep.subr.mxu1 %v895_v2  ;;  %v858_v50 = vld [vmem:[%s7165_s5 + $0x610] sm:$0xff]  ;;  %v1111_v0 = vld [vmem:[%s7165_s5 + $0xdf8] sm:$0xff]  ;;  %v3636_v2 = vld [vmem:[#allocation2] sm:$0xff] }
 0x1b5   : > { %1962 = vmatpush2.msra.mxu0 %v766_v23  ;;  %2039 = vmatpush2.msra.mxu1 %v894_v24  ;;  %v3637_v23 = vld [vmem:[#allocation2 + $0x10] sm:$0xff] }
 0x1b6   : > { %1963 = vmatprep.subr.mxu0 %v763_v25  ;;  %2040 = vmatprep.subr.mxu1 %v891_v26  ;;  %v982_v24 = vld [vmem:[%s7165_s5 + $0x9f0] sm:$0xff]  ;;  %v979_v26 = vld [vmem:[%s7165_s5 + $0x9d8] sm:$0xff] }
 0x1b7   : > { %1964 = vmatpush2.msra.mxu0 %v762_v27  ;;  %2041 = vmatpush2.msra.mxu1 %v890_v28  ;;  %v1110_v25 = vld [vmem:[%s7165_s5 + $0xdf0] sm:$0xff]  ;;  %v1107_v27 = vld [vmem:[%s7165_s5 + $0xdd8] sm:$0xff]  ;;  %v3638_v28 = vld [vmem:[#allocation2 + $0x28] sm:$0xff] }
 0x1b8   : > { %1965 = vmatprep.subr.mxu0 %v759_v29  ;;  %2042 = vmatprep.subr.mxu1 %v887_v30  ;;  %v3639_v29 = vld [vmem:[#allocation2 + $0x38] sm:$0xff]  ;;  %v978_v30 = vld [vmem:[%s7165_s5 + $0x9d0] sm:$0xff] }
 0x1b9   : > { %1966 = vmatpush2.msra.mxu0 %v758_v31  ;;  %2043 = vmatpush2.msra.mxu1 %v886_v32  ;;  %v1106_v31 = vld [vmem:[%s7165_s5 + $0xdd0] sm:$0xff]  ;;  %v975_v32 = vld [vmem:[%s7165_s5 + $0x9b8] sm:$0xff] }
 0x1ba   : > { %1967 = vmatprep.subr.mxu0 %v755_v33  ;;  %2044 = vmatprep.subr.mxu1 %v883_v34  ;;  %v1103_v33 = vld [vmem:[%s7165_s5 + $0xdb8] sm:$0xff]  ;;  %v974_v34 = vld [vmem:[%s7165_s5 + $0x9b0] sm:$0xff] }
 0x1bb   : > { %1968 = vmatpush2.msra.mxu0 %v754_v35  ;;  %2045 = vmatpush2.msra.mxu1 %v882_v36  ;;  %v1102_v35 = vld [vmem:[%s7165_s5 + $0xdb0] sm:$0xff]  ;;  %v971_v36 = vld [vmem:[%s7165_s5 + $0x998] sm:$0xff] }
 0x1bc   : > { %1969 = vmatprep.subr.mxu0 %v751_v37  ;;  %2046 = vmatprep.subr.mxu1 %v879_v38  ;;  %v1099_v37 = vld [vmem:[%s7165_s5 + $0xd98] sm:$0xff] }
 0x1bd   : > { %1970 = vmatpush2.msra.mxu0 %v750_v39  ;;  %2047 = vmatpush2.msra.mxu1 %v878_v40  ;;  %v967_v38 = vld [vmem:[%s7165_s5 + $0x978] sm:$0xff]  ;;  %v1094_v40 = vld [vmem:[%s7165_s5 + $0xd70] sm:$0xff] }
 0x1be   : > { %1971 = vmatprep.subr.mxu0 %v747_v41  ;;  %2048 = vmatprep.subr.mxu1 %v875_v42  ;;  %v1095_v39 = vld [vmem:[%s7165_s5 + $0xd78] sm:$0xff]  ;;  %v962_v42 = vld [vmem:[%s7165_s5 + $0x950] sm:$0xff] }
 0x1bf   : > { %1972 = vmatpush2.msra.mxu0 %v746_v43  ;;  %2049 = vmatpush2.msra.mxu1 %v874_v44  ;;  %v1091_v41 = vld [vmem:[%s7165_s5 + $0xd58] sm:$0xff]  ;;  %v1090_v43 = vld [vmem:[%s7165_s5 + $0xd50] sm:$0xff] }
 0x1c0   : > { %1973 = vmatprep.subr.mxu0 %v743_v45  ;;  %2050 = vmatprep.subr.mxu1 %v871_v53  ;;  %v959_v44 = vld [vmem:[%s7165_s5 + $0x938] sm:$0xff]  ;;  %v958_v53 = vld [vmem:[%s7165_s5 + $0x930] sm:$0xff] }
 0x1c1   : > { %1974 = vmatpush2.msra.mxu0 %v742_v55  ;;  %2051 = vmatpush2.msra.mxu1 %v870_v56  ;;  %v1087_v45 = vld [vmem:[%s7165_s5 + $0xd38] sm:$0xff]  ;;  %v1086_v55 = vld [vmem:[%s7165_s5 + $0xd30] sm:$0xff] }
 0x1c2   : > { %1975 = vmatprep.subr.mxu0 %v739_v12  ;;  %2052 = vmatprep.subr.mxu1 %v867_v14  ;;  %v955_v56 = vld [vmem:[%s7165_s5 + $0x918] sm:$0xff]  ;;  %v954_v14 = vld [vmem:[%s7165_s5 + $0x910] sm:$0xff] }
 0x1c3   : > { %1976 = vmatpush2.msra.mxu0 %v738_v57  ;;  %2053 = vmatpush2.msra.mxu1 %v866_v58  ;;  %v1083_v12 = vld [vmem:[%s7165_s5 + $0xd18] sm:$0xff]  ;;  %v1082_v57 = vld [vmem:[%s7165_s5 + $0xd10] sm:$0xff] }
 0x1c4   : > { %1977 = vmatprep.subr.mxu0 %v735_v59  ;;  %2054 = vmatprep.subr.mxu1 %v863_v1  ;;  %v951_v58 = vld [vmem:[%s7165_s5 + $0x8f8] sm:$0xff]  ;;  %v950_v1 = vld [vmem:[%s7165_s5 + $0x8f0] sm:$0xff] }
 0x1c5   : > { %1978 = vmatpush2.msra.mxu0 %v734_v4  ;;  %2055 = vmatpush2.msra.mxu1 %v862_v9  ;;  %v1079_v59 = vld [vmem:[%s7165_s5 + $0xcf8] sm:$0xff]  ;;  %v1078_v4 = vld [vmem:[%s7165_s5 + $0xcf0] sm:$0xff] }
 0x1c6   : > { %1979 = vmatprep.subr.mxu0 %v731_v10  ;;  %2056 = vmatprep.subr.mxu1 %v859_v11  ;;  %v947_v9 = vld [vmem:[%s7165_s5 + $0x8d8] sm:$0xff]  ;;  %v946_v11 = vld [vmem:[%s7165_s5 + $0x8d0] sm:$0xff] }
 0x1c7   : > { %1980 = vmatpush2.msra.mxu0 %v730_v13  ;;  %2057 = vmatpush2.msra.mxu1 %v858_v50  ;;  %v1075_v10 = vld [vmem:[%s7165_s5 + $0xcd8] sm:$0xff]  ;;  %v1074_v13 = vld [vmem:[%s7165_s5 + $0xcd0] sm:$0xff] }
 0x1c8   : > { %1982 = vmatmul.mubr.f32.vlgmr.msra.gmra.mxu0 %v3636_v2  ;;  %2059 = vmatmul.mubr.f32.vlgmr.msra.gmra.mxu1 %v3637_v23  ;;  %v943_v50 = vld [vmem:[%s7165_s5 + $0x8b8] sm:$0xff]  ;;  %v1070_v2 = vld [vmem:[%s7165_s5 + $0xcb0] sm:$0xff] }
 0x1c9   : > { %2071 = vmatprep.subr.mxu0 %v983_v51  ;;  %2148 = vmatprep.subr.mxu1 %v1111_v0  ;;  %v1071_v51 = vld [vmem:[%s7165_s5 + $0xcb8] sm:$0xff]  ;;  %v942_v0 = vld [vmem:[%s7165_s5 + $0x8b0] sm:$0xff] }
 0x1ca   : > { %1987 = vmatprep.mubr.f32.mxu0 %v3638_v28  ;;  %2064 = vmatprep.mubr.f32.mxu1 %v3639_v29  ;;  %v939_v23 = vld [vmem:[%s7165_s5 + $0x898] sm:$0xff]  ;;  %v934_v29 = vld [vmem:[%s7165_s5 + $0x870] sm:$0xff] }
 0x1cb   : > { %2072 = vmatpush1.msra.mxu0 %v982_v24  ;;  %2149 = vmatpush1.msra.mxu1 %v1110_v25  ;;  %v1067_v24 = vld [vmem:[%s7165_s5 + $0xc98] sm:$0xff]  ;;  %v938_v25 = vld [vmem:[%s7165_s5 + $0x890] sm:$0xff] }
 0x1cc   : > { %2073 = vmatprep.subr.mxu0 %v979_v26  ;;  %2150 = vmatprep.subr.mxu1 %v1107_v27  ;;  %v1066_v26 = vld [vmem:[%s7165_s5 + $0xc90] sm:$0xff]  ;;  %v935_v27 = vld [vmem:[%s7165_s5 + $0x878] sm:$0xff] }
 0x1cd   : > { %2074 = vmatpush1.msra.mxu0 %v978_v30  ;;  %2151 = vmatpush1.msra.mxu1 %v1106_v31  ;;  %v1063_v28 = vld [vmem:[%s7165_s5 + $0xc78] sm:$0xff]  ;;  %v1062_v30 = vld [vmem:[%s7165_s5 + $0xc70] sm:$0xff] }
 0x1ce   : > { %1988 = vmatmul.mubr.f32.gmra.mxu0 %v5168_v52  ;;  %2065 = vmatmul.mubr.f32.gmra.mxu1 %v5171_v54  ;;  %v970_v52 = vld [vmem:[%s7165_s5 + $0x990] sm:$0xff]  ;;  %v931_v31 = vld [vmem:[%s7165_s5 + $0x858] sm:$0xff] }
 0x1cf   : > { %2075 = vmatprep.subr.mxu0 %v975_v32  ;;  %2152 = vmatprep.subr.mxu1 %v1103_v33  ;;  %v1098_v54 = vld [vmem:[%s7165_s5 + $0xd90] sm:$0xff]  ;;  %v1059_v32 = vld [vmem:[%s7165_s5 + $0xc58] sm:$0xff] }
 0x1d0   : > { %2076 = vmatpush1.msra.mxu0 %v974_v34  ;;  %2135 = vmatprep.mubr.f32.mxu0 %v4401_v17  ;;  %v966_v17 = vld [vmem:[%s7165_s5 + $0x970] sm:$0xff] }
 0x1d1   : > { %2153 = vmatpush1.msra.mxu1 %v1102_v35  ;;  %2212 = vmatprep.mubr.f32.mxu1 %v4413_v22  ;;  %v963_v22 = vld [vmem:[%s7165_s5 + $0x958] sm:$0xff]  ;;  %v930_v33 = vld [vmem:[%s7165_s5 + $0x850] sm:$0xff] }
 0x1d2   : > { %2077 = vmatprep.subr.mxu0 %v971_v36  ;;  %2154 = vmatprep.subr.mxu1 %v1099_v37  ;;  %v1058_v34 = vld [vmem:[%s7165_s5 + $0xc50] sm:$0xff]  ;;  %v927_v35 = vld [vmem:[%s7165_s5 + $0x838] sm:$0xff] }
 0x1d3   : > { %2078 = vmatpush1.msra.mxu0 %v970_v52  ;;  %2155 = vmatpush1.msra.mxu1 %v1098_v54  ;;  %v1055_v36 = vld [vmem:[%s7165_s5 + $0xc38] sm:$0xff]  ;;  %v926_v37 = vld [vmem:[%s7165_s5 + $0x830] sm:$0xff] }
 0x1d4   : > { %2079 = vmatprep.subr.mxu0 %v967_v38  ;;  %2156 = vmatprep.subr.mxu1 %v1095_v39  ;;  %v1054_v52 = vld [vmem:[%s7165_s5 + $0xc30] sm:$0xff]  ;;  %v923_v54 = vld [vmem:[%s7165_s5 + $0x818] sm:$0xff] }
 0x1d5   : > { %2080 = vmatpush1.msra.mxu0 %v966_v17  ;;  %2157 = vmatpush1.msra.mxu1 %v1094_v40  ;;  %v1051_v38 = vld [vmem:[%s7165_s5 + $0xc18] sm:$0xff]  ;;  %v922_v39 = vld [vmem:[%s7165_s5 + $0x810] sm:$0xff] }
 0x1d6   : > { %2081 = vmatprep.subr.mxu0 %v963_v22  ;;  %2158 = vmatprep.subr.mxu1 %v1091_v41  ;;  %v1050_v17 = vld [vmem:[%s7165_s5 + $0xc10] sm:$0xff]  ;;  %v1047_v40 = vld [vmem:[%s7165_s5 + $0xbf8] sm:$0xff] }
 0x1d7   : > { %2082 = vmatpush1.msra.mxu0 %v962_v42  ;;  %2159 = vmatpush1.msra.mxu1 %v1090_v43  ;;  %v1175_v22 = vld [vmem:[%s7165_s5 + $0xff8] sm:$0xff]  ;;  %v1046_v41 = vld [vmem:[%s7165_s5 + $0xbf0] sm:$0xff] }
 0x1d8   : > { %2083 = vmatprep.subr.mxu0 %v959_v44  ;;  %2160 = vmatprep.subr.mxu1 %v1087_v45  ;;  %v1174_v42 = vld [vmem:[%s7165_s5 + $0xff0] sm:$0xff]  ;;  %v1043_v43 = vld [vmem:[%s7165_s5 + $0xbd8] sm:$0xff] }
 0x1d9   : > { %2084 = vmatpush1.msra.mxu0 %v958_v53  ;;  %2161 = vmatpush1.msra.mxu1 %v1086_v55  ;;  %v1171_v44 = vld [vmem:[%s7165_s5 + $0xfd8] sm:$0xff]  ;;  %v1042_v45 = vld [vmem:[%s7165_s5 + $0xbd0] sm:$0xff] }
 0x1da   : > { %2085 = vmatprep.subr.mxu0 %v955_v56  ;;  %2162 = vmatprep.subr.mxu1 %v1083_v12  ;;  %v1170_v53 = vld [vmem:[%s7165_s5 + $0xfd0] sm:$0xff]  ;;  %v1039_v55 = vld [vmem:[%s7165_s5 + $0xbb8] sm:$0xff] }
 0x1db   : > { %2086 = vmatpush1.msra.mxu0 %v954_v14  ;;  %2163 = vmatpush1.msra.mxu1 %v1082_v57  ;;  %v1167_v56 = vld [vmem:[%s7165_s5 + $0xfb8] sm:$0xff]  ;;  %v1038_v12 = vld [vmem:[%s7165_s5 + $0xbb0] sm:$0xff] }
 0x1dc   : > { %2087 = vmatprep.subr.mxu0 %v951_v58  ;;  %2164 = vmatprep.subr.mxu1 %v1079_v59  ;;  %v1166_v14 = vld [vmem:[%s7165_s5 + $0xfb0] sm:$0xff]  ;;  %v1035_v57 = vld [vmem:[%s7165_s5 + $0xb98] sm:$0xff] }
 0x1dd   : > { %2088 = vmatpush1.msra.mxu0 %v950_v1  ;;  %2165 = vmatpush1.msra.mxu1 %v1078_v4  ;;  %v1163_v58 = vld [vmem:[%s7165_s5 + $0xf98] sm:$0xff]  ;;  %v1034_v59 = vld [vmem:[%s7165_s5 + $0xb90] sm:$0xff] }
 0x1de   : > { %2089 = vmatprep.subr.mxu0 %v947_v9  ;;  %2166 = vmatprep.subr.mxu1 %v1075_v10  ;;  %v1162_v1 = vld [vmem:[%s7165_s5 + $0xf90] sm:$0xff]  ;;  %v1031_v4 = vld [vmem:[%s7165_s5 + $0xb78] sm:$0xff] }
 0x1df   : > { %2090 = vmatpush1.msra.mxu0 %v946_v11  ;;  %2167 = vmatpush1.msra.mxu1 %v1074_v13  ;;  %v1159_v9 = vld [vmem:[%s7165_s5 + $0xf78] sm:$0xff]  ;;  %v1030_v10 = vld [vmem:[%s7165_s5 + $0xb70] sm:$0xff] }
 0x1e0   : > { %2091 = vmatprep.subr.mxu0 %v943_v50  ;;  %2168 = vmatprep.subr.mxu1 %v1071_v51  ;;  %v1158_v11 = vld [vmem:[%s7165_s5 + $0xf70] sm:$0xff]  ;;  %v1027_v13 = vld [vmem:[%s7165_s5 + $0xb58] sm:$0xff] }
 0x1e1   : > { %2092 = vmatpush1.msra.mxu0 %v942_v0  ;;  %2169 = vmatpush1.msra.mxu1 %v1070_v2  ;;  %v1155_v50 = vld [vmem:[%s7165_s5 + $0xf58] sm:$0xff]  ;;  %v1026_v51 = vld [vmem:[%s7165_s5 + $0xb50] sm:$0xff] }
 0x1e2   : > { %2093 = vmatprep.subr.mxu0 %v939_v23  ;;  %2170 = vmatprep.subr.mxu1 %v1067_v24  ;;  %v1154_v0 = vld [vmem:[%s7165_s5 + $0xf50] sm:$0xff]  ;;  %v1023_v2 = vld [vmem:[%s7165_s5 + $0xb38] sm:$0xff] }
 0x1e3   : > { %2094 = vmatpush1.msra.mxu0 %v938_v25  ;;  %2171 = vmatpush1.msra.mxu1 %v1066_v26  ;;  %v1151_v23 = vld [vmem:[%s7165_s5 + $0xf38] sm:$0xff]  ;;  %v1022_v24 = vld [vmem:[%s7165_s5 + $0xb30] sm:$0xff] }
 0x1e4   : > { %2095 = vmatprep.subr.mxu0 %v935_v27  ;;  %2172 = vmatprep.subr.mxu1 %v1063_v28  ;;  %v1150_v25 = vld [vmem:[%s7165_s5 + $0xf30] sm:$0xff]  ;;  %v1019_v26 = vld [vmem:[%s7165_s5 + $0xb18] sm:$0xff] }
 0x1e5   : > { %2096 = vmatpush1.msra.mxu0 %v934_v29  ;;  %2173 = vmatpush1.msra.mxu1 %v1062_v30  ;;  %v1147_v27 = vld [vmem:[%s7165_s5 + $0xf18] sm:$0xff]  ;;  %v1018_v28 = vld [vmem:[%s7165_s5 + $0xb10] sm:$0xff] }
 0x1e6   : > { %2097 = vmatprep.subr.mxu0 %v931_v31  ;;  %2174 = vmatprep.subr.mxu1 %v1059_v32  ;;  %v1146_v29 = vld [vmem:[%s7165_s5 + $0xf10] sm:$0xff]  ;;  %v1015_v30 = vld [vmem:[%s7165_s5 + $0xaf8] sm:$0xff] }
 0x1e7   : > { %2098 = vmatpush1.msra.mxu0 %v930_v33  ;;  %2175 = vmatpush1.msra.mxu1 %v1058_v34  ;;  %v1143_v31 = vld [vmem:[%s7165_s5 + $0xef8] sm:$0xff]  ;;  %v1014_v32 = vld [vmem:[%s7165_s5 + $0xaf0] sm:$0xff] }
 0x1e8   : > { %2099 = vmatprep.subr.mxu0 %v927_v35  ;;  %2176 = vmatprep.subr.mxu1 %v1055_v36  ;;  %v1142_v33 = vld [vmem:[%s7165_s5 + $0xef0] sm:$0xff]  ;;  %v1011_v34 = vld [vmem:[%s7165_s5 + $0xad8] sm:$0xff] }
 0x1e9   : > { %2100 = vmatpush1.msra.mxu0 %v926_v37  ;;  %2177 = vmatpush1.msra.mxu1 %v1054_v52  ;;  %v1139_v35 = vld [vmem:[%s7165_s5 + $0xed8] sm:$0xff]  ;;  %v1010_v36 = vld [vmem:[%s7165_s5 + $0xad0] sm:$0xff] }
 0x1ea   : > { %2101 = vmatprep.subr.mxu0 %v923_v54  ;;  %2178 = vmatprep.subr.mxu1 %v1051_v38  ;;  %v1138_v37 = vld [vmem:[%s7165_s5 + $0xed0] sm:$0xff]  ;;  %v1007_v52 = vld [vmem:[%s7165_s5 + $0xab8] sm:$0xff] }
 0x1eb   : > { %2102 = vmatpush1.msra.mxu0 %v922_v39  ;;  %2179 = vmatpush1.msra.mxu1 %v1050_v17  ;;  %v1135_v54 = vld [vmem:[%s7165_s5 + $0xeb8] sm:$0xff]  ;;  %v1006_v38 = vld [vmem:[%s7165_s5 + $0xab0] sm:$0xff] }
 0x1ec   : > { %2103 = vmatprep.subr.mxu0 %v1047_v40  ;;  %2180 = vmatprep.subr.mxu1 %v1175_v22  ;;  %v1134_v39 = vld [vmem:[%s7165_s5 + $0xeb0] sm:$0xff]  ;;  %v1003_v17 = vld [vmem:[%s7165_s5 + $0xa98] sm:$0xff] }
 0x1ed   : > { %2104 = vmatpush2.msra.mxu0 %v1046_v41  ;;  %2181 = vmatpush2.msra.mxu1 %v1174_v42  ;;  %v1131_v40 = vld [vmem:[%s7165_s5 + $0xe98] sm:$0xff]  ;;  %v1002_v22 = vld [vmem:[%s7165_s5 + $0xa90] sm:$0xff] }
 0x1ee   : > { %2105 = vmatprep.subr.mxu0 %v1043_v43  ;;  %2182 = vmatprep.subr.mxu1 %v1171_v44  ;;  %v1130_v41 = vld [vmem:[%s7165_s5 + $0xe90] sm:$0xff]  ;;  %v999_v42 = vld [vmem:[%s7165_s5 + $0xa78] sm:$0xff] }
 0x1ef   : > { %2106 = vmatpush2.msra.mxu0 %v1042_v45  ;;  %2183 = vmatpush2.msra.mxu1 %v1170_v53  ;;  %v1127_v43 = vld [vmem:[%s7165_s5 + $0xe78] sm:$0xff]  ;;  %v998_v44 = vld [vmem:[%s7165_s5 + $0xa70] sm:$0xff] }
 0x1f0   : > { %2107 = vmatprep.subr.mxu0 %v1039_v55  ;;  %2184 = vmatprep.subr.mxu1 %v1167_v56  ;;  %v1126_v45 = vld [vmem:[%s7165_s5 + $0xe70] sm:$0xff]  ;;  %v995_v53 = vld [vmem:[%s7165_s5 + $0xa58] sm:$0xff] }
 0x1f1   : > { %2108 = vmatpush2.msra.mxu0 %v1038_v12  ;;  %2185 = vmatpush2.msra.mxu1 %v1166_v14  ;;  %v1123_v55 = vld [vmem:[%s7165_s5 + $0xe58] sm:$0xff]  ;;  %v994_v56 = vld [vmem:[%s7165_s5 + $0xa50] sm:$0xff] }
 0x1f2   : > { %2109 = vmatprep.subr.mxu0 %v1035_v57  ;;  %2186 = vmatprep.subr.mxu1 %v1163_v58  ;;  %v1122_v12 = vld [vmem:[%s7165_s5 + $0xe50] sm:$0xff]  ;;  %v991_v14 = vld [vmem:[%s7165_s5 + $0xa38] sm:$0xff] }
 0x1f3   : > { %2110 = vmatpush2.msra.mxu0 %v1034_v59  ;;  %2187 = vmatpush2.msra.mxu1 %v1162_v1  ;;  %v1119_v57 = vld [vmem:[%s7165_s5 + $0xe38] sm:$0xff]  ;;  %v990_v58 = vld [vmem:[%s7165_s5 + $0xa30] sm:$0xff] }
 0x1f4   : > { %2111 = vmatprep.subr.mxu0 %v1031_v4  ;;  %2188 = vmatprep.subr.mxu1 %v1159_v9  ;;  %v1118_v59 = vld [vmem:[%s7165_s5 + $0xe30] sm:$0xff]  ;;  %v987_v1 = vld [vmem:[%s7165_s5 + $0xa18] sm:$0xff] }
 0x1f5   : > { %2112 = vmatpush2.msra.mxu0 %v1030_v10  ;;  %2189 = vmatpush2.msra.mxu1 %v1158_v11  ;;  %v1115_v4 = vld [vmem:[%s7165_s5 + $0xe18] sm:$0xff]  ;;  %v986_v9 = vld [vmem:[%s7165_s5 + $0xa10] sm:$0xff] }
 0x1f6   : > { %2113 = vmatprep.subr.mxu0 %v1027_v13  ;;  %2190 = vmatprep.subr.mxu1 %v1155_v50  ;;  %v1114_v10 = vld [vmem:[%s7165_s5 + $0xe10] sm:$0xff]  ;;  %v1239_v11 = vld [vmem:[%s7165_s5 + $0x11f8] sm:$0xff] }
 0x1f7   : > { %2114 = vmatpush2.msra.mxu0 %v1026_v51  ;;  %2191 = vmatpush2.msra.mxu1 %v1154_v0  ;;  %v1367_v13 = vld [vmem:[%s7165_s5 + $0x15f8] sm:$0xff]  ;;  %v1238_v50 = vld [vmem:[%s7165_s5 + $0x11f0] sm:$0xff] }
 0x1f8   : > { %2115 = vmatprep.subr.mxu0 %v1023_v2  ;;  %2192 = vmatprep.subr.mxu1 %v1151_v23  ;;  %v1366_v51 = vld [vmem:[%s7165_s5 + $0x15f0] sm:$0xff]  ;;  %v1235_v0 = vld [vmem:[%s7165_s5 + $0x11d8] sm:$0xff] }
 0x1f9   : > { %2116 = vmatpush2.msra.mxu0 %v1022_v24  ;;  %2193 = vmatpush2.msra.mxu1 %v1150_v25  ;;  %v1362_v2 = vld [vmem:[%s7165_s5 + $0x15d0] sm:$0xff]  ;;  %v1231_v23 = vld [vmem:[%s7165_s5 + $0x11b8] sm:$0xff] }
 0x1fa   : > { %2117 = vmatprep.subr.mxu0 %v1019_v26  ;;  %2194 = vmatprep.subr.mxu1 %v1147_v27  ;;  %v1358_v24 = vld [vmem:[%s7165_s5 + $0x15b0] sm:$0xff]  ;;  %v1227_v25 = vld [vmem:[%s7165_s5 + $0x1198] sm:$0xff] }
 0x1fb   : > { %2118 = vmatpush2.msra.mxu0 %v1018_v28  ;;  %2195 = vmatpush2.msra.mxu1 %v1146_v29  ;;  %v1355_v26 = vld [vmem:[%s7165_s5 + $0x1598] sm:$0xff]  ;;  %v1350_v29 = vld [vmem:[%s7165_s5 + $0x1570] sm:$0xff] }
 0x1fc   : > { %2119 = vmatprep.subr.mxu0 %v1015_v30  ;;  %2196 = vmatprep.subr.mxu1 %v1143_v31  ;;  %v1223_v27 = vld [vmem:[%s7165_s5 + $0x1178] sm:$0xff]  ;;  %v1218_v31 = vld [vmem:[%s7165_s5 + $0x1150] sm:$0xff] }
 0x1fd   : > { %2120 = vmatpush2.msra.mxu0 %v1014_v32  ;;  %2197 = vmatpush2.msra.mxu1 %v1142_v33  ;;  %v1351_v28 = vld [vmem:[%s7165_s5 + $0x1578] sm:$0xff]  ;;  %v1346_v32 = vld [vmem:[%s7165_s5 + $0x1550] sm:$0xff] }
 0x1fe   : > { %2121 = vmatprep.subr.mxu0 %v1011_v34  ;;  %2198 = vmatprep.subr.mxu1 %v1139_v35  ;;  %v1347_v30 = vld [vmem:[%s7165_s5 + $0x1558] sm:$0xff]  ;;  %v1214_v35 = vld [vmem:[%s7165_s5 + $0x1130] sm:$0xff] }
 0x1ff   : > { %2122 = vmatpush2.msra.mxu0 %v1010_v36  ;;  %2199 = vmatpush2.msra.mxu1 %v1138_v37  ;;  %v1215_v33 = vld [vmem:[%s7165_s5 + $0x1138] sm:$0xff]  ;;  %v1342_v36 = vld [vmem:[%s7165_s5 + $0x1530] sm:$0xff] }
 0x200   : > { %2123 = vmatprep.subr.mxu0 %v1007_v52  ;;  %2200 = vmatprep.subr.mxu1 %v1135_v54  ;;  %v1343_v34 = vld [vmem:[%s7165_s5 + $0x1538] sm:$0xff]  ;;  %v1210_v54 = vld [vmem:[%s7165_s5 + $0x1110] sm:$0xff] }
 0x201   : > { %2124 = vmatpush2.msra.mxu0 %v1006_v38  ;;  %2201 = vmatpush2.msra.mxu1 %v1134_v39  ;;  %v1211_v37 = vld [vmem:[%s7165_s5 + $0x1118] sm:$0xff]  ;;  %v1338_v38 = vld [vmem:[%s7165_s5 + $0x1510] sm:$0xff] }
 0x202   : > { %2125 = vmatprep.subr.mxu0 %v1003_v17  ;;  %2202 = vmatprep.subr.mxu1 %v1131_v40  ;;  %v1339_v52 = vld [vmem:[%s7165_s5 + $0x1518] sm:$0xff]  ;;  %v1206_v40 = vld [vmem:[%s7165_s5 + $0x10f0] sm:$0xff] }
 0x203   : > { %2126 = vmatpush2.msra.mxu0 %v1002_v22  ;;  %2203 = vmatpush2.msra.mxu1 %v1130_v41  ;;  %v1207_v39 = vld [vmem:[%s7165_s5 + $0x10f8] sm:$0xff]  ;;  %v1334_v22 = vld [vmem:[%s7165_s5 + $0x14f0] sm:$0xff] }
 0x204   : > { %2127 = vmatprep.subr.mxu0 %v999_v42  ;;  %2204 = vmatprep.subr.mxu1 %v1127_v43  ;;  %v1335_v17 = vld [vmem:[%s7165_s5 + $0x14f8] sm:$0xff]  ;;  %v1202_v43 = vld [vmem:[%s7165_s5 + $0x10d0] sm:$0xff] }
 0x205   : > { %2128 = vmatpush2.msra.mxu0 %v998_v44  ;;  %2205 = vmatpush2.msra.mxu1 %v1126_v45  ;;  %v1203_v41 = vld [vmem:[%s7165_s5 + $0x10d8] sm:$0xff]  ;;  %v1330_v44 = vld [vmem:[%s7165_s5 + $0x14d0] sm:$0xff] }
 0x206   : > { %2129 = vmatprep.subr.mxu0 %v995_v53  ;;  %2206 = vmatprep.subr.mxu1 %v1123_v55  ;;  %v1331_v42 = vld [vmem:[%s7165_s5 + $0x14d8] sm:$0xff]  ;;  %v1198_v55 = vld [vmem:[%s7165_s5 + $0x10b0] sm:$0xff] }
 0x207   : > { %2130 = vmatpush2.msra.mxu0 %v994_v56  ;;  %2207 = vmatpush2.msra.mxu1 %v1122_v12  ;;  %v1199_v45 = vld [vmem:[%s7165_s5 + $0x10b8] sm:$0xff]  ;;  %v1326_v56 = vld [vmem:[%s7165_s5 + $0x14b0] sm:$0xff] }
 0x208   : > { %2131 = vmatprep.subr.mxu0 %v991_v14  ;;  %2208 = vmatprep.subr.mxu1 %v1119_v57  ;;  %v1327_v53 = vld [vmem:[%s7165_s5 + $0x14b8] sm:$0xff]  ;;  %v1194_v57 = vld [vmem:[%s7165_s5 + $0x1090] sm:$0xff] }
 0x209   : > { %2132 = vmatpush2.msra.mxu0 %v990_v58  ;;  %2209 = vmatpush2.msra.mxu1 %v1118_v59  ;;  %v1195_v12 = vld [vmem:[%s7165_s5 + $0x1098] sm:$0xff]  ;;  %v1322_v58 = vld [vmem:[%s7165_s5 + $0x1490] sm:$0xff] }
 0x20a   : > { %2133 = vmatprep.subr.mxu0 %v987_v1  ;;  %2210 = vmatprep.subr.mxu1 %v1115_v4  ;;  %v1323_v14 = vld [vmem:[%s7165_s5 + $0x1498] sm:$0xff]  ;;  %v1190_v4 = vld [vmem:[%s7165_s5 + $0x1070] sm:$0xff] }
 0x20b   : > { %2134 = vmatpush2.msra.mxu0 %v986_v9  ;;  %2211 = vmatpush2.msra.mxu1 %v1114_v10  ;;  %v1191_v59 = vld [vmem:[%s7165_s5 + $0x1078] sm:$0xff]  ;;  %v1318_v9 = vld [vmem:[%s7165_s5 + $0x1470] sm:$0xff] }
 0x20c   : > { %2136 = vmatmul.mubr.f32.vlgmr.msra.gmra.mxu0 %v4749_v46  ;;  %2213 = vmatmul.mubr.f32.vlgmr.msra.gmra.mxu1 %v4752_v47  ;;  %v1363_v46 = vld [vmem:[%s7165_s5 + $0x15d8] sm:$0xff]  ;;  %v1234_v47 = vld [vmem:[%s7165_s5 + $0x11d0] sm:$0xff] }
 0x20d   : > { %2225 = vmatprep.subr.mxu0 %v1239_v11  ;;  %2302 = vmatprep.subr.mxu1 %v1367_v13  ;;  %v1319_v1 = vld [vmem:[%s7165_s5 + $0x1478] sm:$0xff]  ;;  %v6144_v13 = vpop.f32.mrf.mxu0 }
 0x20e   : > { %2141 = vmatprep.mubr.f32.mxu0 %v4765_v48  ;;  %2218 = vmatprep.mubr.f32.mxu1 %v4770_v49  ;;  %v1359_v48 = vld [vmem:[%s7165_s5 + $0x15b8] sm:$0xff]  ;;  %v1230_v49 = vld [vmem:[%s7165_s5 + $0x11b0] sm:$0xff] }
 0x20f   : > { %2226 = vmatpush1.msra.mxu0 %v1238_v50  ;;  %2303 = vmatpush1.msra.mxu1 %v1366_v51  ;;  %v1187_v10 = vld [vmem:[%s7165_s5 + $0x1058] sm:$0xff]  ;;  %v6146_v50 = vpop.f32.mrf.mxu1  ;;  %v1186_v51 = vld [vmem:[%s7165_s5 + $0x1050] sm:$0xff] }
 0x210   : > { %2227 = vmatprep.subr.mxu0 %v1235_v0  ;;  %2304 = vmatprep.subr.mxu1 %v1363_v46  ;;  %v1315_v11 = vld [vmem:[%s7165_s5 + $0x1458] sm:$0xff]  ;;  %v1314_v0 = vld [vmem:[%s7165_s5 + $0x1450] sm:$0xff] }
 0x211   : > { %2228 = vmatpush1.msra.mxu0 %v1234_v47  ;;  %2305 = vmatpush1.msra.mxu1 %v1362_v2  ;;  %v1183_v46 = vld [vmem:[%s7165_s5 + $0x1038] sm:$0xff]  ;;  %v1182_v2 = vld [vmem:[%s7165_s5 + $0x1030] sm:$0xff] }
 0x212   : > { %2142 = vmatmul.mubr.f32.gmra.mxu0 %v4793_v61  ;;  %2219 = vmatmul.mubr.f32.gmra.mxu1 %v4796_v62  ;;  %v1226_v61 = vld [vmem:[%s7165_s5 + $0x1190] sm:$0xff]  ;;  %v1311_v47 = vld [vmem:[%s7165_s5 + $0x1438] sm:$0xff] }
 0x213   : > { %2229 = vmatprep.subr.mxu0 %v1231_v23  ;;  %2306 = vmatprep.subr.mxu1 %v1359_v48  ;;  %v1354_v62 = vld [vmem:[%s7165_s5 + $0x1590] sm:$0xff]  ;;  %v1179_v48 = vld [vmem:[%s7165_s5 + $0x1018] sm:$0xff] }
 0x214   : > { %2230 = vmatpush1.msra.mxu0 %v1230_v49  ;;  %2289 = vmatprep.mubr.f32.mxu0 %v4811_v3  ;;  %v1222_v3 = vld [vmem:[%s7165_s5 + $0x1170] sm:$0xff]  ;;  %v1307_v49 = vld [vmem:[%s7165_s5 + $0x1418] sm:$0xff] }
 0x215   : > { %2307 = vmatpush1.msra.mxu1 %v1358_v24  ;;  %2366 = vmatprep.mubr.f32.mxu1 %v4823_v6  ;;  %v1219_v6 = vld [vmem:[%s7165_s5 + $0x1158] sm:$0xff]  ;;  %v1310_v23 = vld [vmem:[%s7165_s5 + $0x1430] sm:$0xff]  ;;  %v6172_v24 = vpop.f32.mrf.mxu0 }
 0x216   : > { %2231 = vmatprep.subr.mxu0 %v1227_v25  ;;  %2308 = vmatprep.subr.mxu1 %v1355_v26  ;;  %v6174_v25 = vpop.f32.mrf.mxu1  ;;  %v1178_v26 = vld [vmem:[%s7165_s5 + $0x1010] sm:$0xff] }
 0x217   : > { %2232 = vmatpush1.msra.mxu0 %v1226_v61  ;;  %2309 = vmatpush1.msra.mxu1 %v1354_v62  ;;  %v1306_v61 = vld [vmem:[%s7165_s5 + $0x1410] sm:$0xff]  ;;  %v1303_v62 = vld [vmem:[%s7165_s5 + $0x13f8] sm:$0xff] }
 0x218   : > { %2233 = vmatprep.subr.mxu0 %v1223_v27  ;;  %2310 = vmatprep.subr.mxu1 %v1351_v28  ;;  %v1431_v27 = vld [vmem:[%s7165_s5 + $0x17f8] sm:$0xff]  ;;  %v1302_v28 = vld [vmem:[%s7165_s5 + $0x13f0] sm:$0xff] }
 0x219   : > { %2234 = vmatpush1.msra.mxu0 %v1222_v3  ;;  %2311 = vmatpush1.msra.mxu1 %v1350_v29  ;;  %v1430_v3 = vld [vmem:[%s7165_s5 + $0x17f0] sm:$0xff]  ;;  %v1299_v29 = vld [vmem:[%s7165_s5 + $0x13d8] sm:$0xff] }
 0x21a   : > { %2235 = vmatprep.subr.mxu0 %v1219_v6  ;;  %2312 = vmatprep.subr.mxu1 %v1347_v30  ;;  %v1427_v6 = vld [vmem:[%s7165_s5 + $0x17d8] sm:$0xff]  ;;  %v6200_v30 = vpop.f32.mrf.mxu0 }
 0x21b   : > { %2236 = vmatpush1.msra.mxu0 %v1218_v31  ;;  %2313 = vmatpush1.msra.mxu1 %v1346_v32  ;;  %v6202_v31 = vpop.f32.mrf.mxu1  ;;  %v1298_v32 = vld [vmem:[%s7165_s5 + $0x13d0] sm:$0xff] }
 0x21c   : > { %2237 = vmatprep.subr.mxu0 %v1215_v33  ;;  %2314 = vmatprep.subr.mxu1 %v1343_v34  ;;  %v1426_v33 = vld [vmem:[%s7165_s5 + $0x17d0] sm:$0xff]  ;;  %v1295_v34 = vld [vmem:[%s7165_s5 + $0x13b8] sm:$0xff] }
 0x21d   : > { %2238 = vmatpush1.msra.mxu0 %v1214_v35  ;;  %2315 = vmatpush1.msra.mxu1 %v1342_v36  ;;  %v1423_v35 = vld [vmem:[%s7165_s5 + $0x17b8] sm:$0xff]  ;;  %v6219_v36 = vld [vmem:[%s7162_s2 + $0x1] ss:$4 sm:$0xf] }
 0x21e   : > { %2239 = vmatprep.subr.mxu0 %v1211_v37  ;;  %2316 = vmatprep.subr.mxu1 %v1339_v52  ;;  %v1294_v37 = vld [vmem:[%s7165_s5 + $0x13b0] sm:$0xff] }
 0x21f   : > { %2240 = vmatpush1.msra.mxu0 %v1210_v54  ;;  %2317 = vmatpush1.msra.mxu1 %v1338_v38  ;;  %v1422_v52 = vld [vmem:[%s7165_s5 + $0x17b0] sm:$0xff]  ;;  %v1291_v54 = vld [vmem:[%s7165_s5 + $0x1398] sm:$0xff] }
 0x220   : > { %2241 = vmatprep.subr.mxu0 %v1207_v39  ;;  %2318 = vmatprep.subr.mxu1 %v1335_v17  ;;  %v1419_v38 = vld [vmem:[%s7165_s5 + $0x1798] sm:$0xff]  ;;  %v6233_v39 = vpop.f32.mrf.mxu0  ;;  %v6235_v17 = vpop.f32.mrf.mxu1 }
 0x221   : > { %2242 = vmatpush1.msra.mxu0 %v1206_v40  ;;  %2319 = vmatpush1.msra.mxu1 %v1334_v22  ;;  %v1290_v40 = vld [vmem:[%s7165_s5 + $0x1390] sm:$0xff] }
 0x222   : > { %2243 = vmatprep.subr.mxu0 %v1203_v41  ;;  %2320 = vmatprep.subr.mxu1 %v1331_v42  ;;  %v1418_v22 = vld [vmem:[%s7165_s5 + $0x1790] sm:$0xff]  ;;  %v1438_v41 = vrot.slane %v6219_v36, %v4313_v15  ;;  %v1287_v42 = vld [vmem:[%s7165_s5 + $0x1378] sm:$0xff] }
 0x223   : > { %2244 = vmatpush1.msra.mxu0 %v1202_v43  ;;  %2321 = vmatpush1.msra.mxu1 %v1330_v44  ;;  %v1415_v43 = vld [vmem:[%s7165_s5 + $0x1778] sm:$0xff]  ;;  %v1675_v44 = vpop.f32.mrf.mxu0 }
 0x224   : > { %2245 = vmatprep.subr.mxu0 %v1199_v45  ;;  %2322 = vmatprep.subr.mxu1 %v1327_v53  ;;  %v6251_v45 = vpop.f32.mrf.mxu1  ;;  %v1286_v53 = vld [vmem:[%s7165_s5 + $0x1370] sm:$0xff] }
 0x225   : > { %2246 = vmatpush1.msra.mxu0 %v1198_v55  ;;  %2323 = vmatpush1.msra.mxu1 %v1326_v56  ;;  %v1414_v55 = vld [vmem:[%s7165_s5 + $0x1770] sm:$0xff]  ;;  %v1442_v56 = vrot.slane %v6219_v36, %v4320_v18 }
 0x226   : > { %2247 = vmatprep.subr.mxu0 %v1195_v12  ;;  %2324 = vmatprep.subr.mxu1 %v1323_v14  ;;  %v1283_v12 = vld [vmem:[%s7165_s5 + $0x1358] sm:$0xff] }
 0x227   : > { %2248 = vmatpush1.msra.mxu0 %v1194_v57  ;;  %2325 = vmatpush1.msra.mxu1 %v1322_v58  ;;  %v1411_v14 = vld [vmem:[%s7165_s5 + $0x1758] sm:$0xff]  ;;  %v1282_v57 = vld [vmem:[%s7165_s5 + $0x1350] sm:$0xff] }
 0x228   : > { %2249 = vmatprep.subr.mxu0 %v1191_v59  ;;  %2326 = vmatprep.subr.mxu1 %v1319_v1  ;;  %v1410_v58 = vld [vmem:[%s7165_s5 + $0x1750] sm:$0xff]  ;;  %v1522_v59 = vadd.f32 %v6144_v13, %v1438_v41  ;;  %v1279_v1 = vld [vmem:[%s7165_s5 + $0x1338] sm:$0xff] }
 0x229   : > { %2250 = vmatpush1.msra.mxu0 %v1190_v4  ;;  %2327 = vmatpush1.msra.mxu1 %v1318_v9  ;;  %v1407_v4 = vld [vmem:[%s7165_s5 + $0x1738] sm:$0xff]  ;;  %v1677_v9 = vpop.f32.mrf.mxu0  ;;  %v1406_v13 = vld [vmem:[%s7165_s5 + $0x1730] sm:$0xff] }
 0x22a   : > { %2251 = vmatprep.subr.mxu0 %v1187_v10  ;;  %2328 = vmatprep.subr.mxu1 %v1315_v11  ;;  %v1754_v10 = vpop.f32.mrf.mxu1  ;;  %v1278_v11 = vld [vmem:[%s7165_s5 + $0x1330] sm:$0xff] }
 0x22b   : > { %2252 = vmatpush1.msra.mxu0 %v1186_v51  ;;  %2329 = vmatpush1.msra.mxu1 %v1314_v0  ;;  %v1524_v51 = vadd.f32 %v6172_v24, %v1442_v56  ;;  %v1275_v0 = vld [vmem:[%s7165_s5 + $0x1318] sm:$0xff]  ;;  %v1681_v24 = vpop.f32.mrf.mxu0 }
 0x22c   : > { %2253 = vmatprep.subr.mxu0 %v1183_v46  ;;  %2330 = vmatprep.subr.mxu1 %v1311_v47  ;;  %v1403_v46 = vld [vmem:[%s7165_s5 + $0x1718] sm:$0xff]  ;;  %v1274_v47 = vld [vmem:[%s7165_s5 + $0x1310] sm:$0xff] }
 0x22d   : > { %2254 = vmatpush1.msra.mxu0 %v1182_v2  ;;  %2331 = vmatpush1.msra.mxu1 %v1310_v23  ;;  %v1402_v2 = vld [vmem:[%s7165_s5 + $0x1710] sm:$0xff]  ;;  %v1599_v23 = vadd.f32 %v6146_v50, %v1522_v59  ;;  %v1251_v59 = vld [vmem:[%s7165_s5 + $0x1258] sm:$0xff] }
 0x22e   : > { %2255 = vmatprep.subr.mxu0 %v1179_v48  ;;  %2332 = vmatprep.subr.mxu1 %v1307_v49  ;;  %v1271_v48 = vld [vmem:[%s7165_s5 + $0x12f8] sm:$0xff]  ;;  %v1398_v50 = vld [vmem:[%s7165_s5 + $0x16f0] sm:$0xff] }
 0x22f   : > { %2256 = vmatpush1.msra.mxu0 %v1178_v26  ;;  %2333 = vmatpush1.msra.mxu1 %v1306_v61  ;;  %v1399_v49 = vld [vmem:[%s7165_s5 + $0x16f8] sm:$0xff]  ;;  %v6306_v26 = vpop.f32.mrf.mxu1  ;;  %v1270_v61 = vld [vmem:[%s7165_s5 + $0x12f0] sm:$0xff] }
 0x230   : > { %2257 = vmatprep.subr.mxu0 %v1303_v62  ;;  %2334 = vmatprep.subr.mxu1 %v1431_v27  ;;  %v1601_v62 = vadd.f32 %v6174_v25, %v1524_v51  ;;  %v1676_v27 = vadd.f32 %v1675_v44, %v1599_v23  ;;  %v1394_v25 = vld [vmem:[%s7165_s5 + $0x16d0] sm:$0xff]  ;;  %v1247_v51 = vld [vmem:[%s7165_s5 + $0x1238] sm:$0xff] }
 0x231   : > { %2258 = vmatpush2.msra.mxu0 %v1302_v28  ;;  %2335 = vmatpush2.msra.mxu1 %v1430_v3  ;;  %v1267_v28 = vld [vmem:[%s7165_s5 + $0x12d8] sm:$0xff]  ;;  %v1246_v23 = vld [vmem:[%s7165_s5 + $0x1230] sm:$0xff] }
 0x232   : > { %2259 = vmatprep.subr.mxu0 %v1299_v29  ;;  %2336 = vmatprep.subr.mxu1 %v1427_v6  ;;  %v1395_v3 = vld [vmem:[%s7165_s5 + $0x16d8] sm:$0xff]  ;;  %v1528_v29 = vadd.f32 %v6200_v30, %v1438_v41  ;;  %v1266_v6 = vld [vmem:[%s7165_s5 + $0x12d0] sm:$0xff] }
 0x233   : > { %2260 = vmatpush2.msra.mxu0 %v1298_v32  ;;  %2337 = vmatpush2.msra.mxu1 %v1426_v33  ;;  %v1678_v32 = vadd.f32 %v1677_v9, %v1601_v62  ;;  %v1263_v33 = vld [vmem:[%s7165_s5 + $0x12b8] sm:$0xff]  ;;  %v1258_v41 = vld [vmem:[%s7165_s5 + $0x1290] sm:$0xff] }
 0x234   : > { %2261 = vmatprep.subr.mxu0 %v1295_v34  ;;  %2338 = vmatprep.subr.mxu1 %v1423_v35  ;;  %v1391_v30 = vld [vmem:[%s7165_s5 + $0x16b8] sm:$0xff]  ;;  %v1530_v34 = vadd.f32 %v6233_v39, %v1442_v56  ;;  %v1683_v35 = vpop.f32.mrf.mxu0 }
 0x235   : > { %2262 = vmatpush2.msra.mxu0 %v1294_v37  ;;  %2339 = vmatpush2.msra.mxu1 %v1422_v52  ;;  %v1760_v37 = vpop.f32.mrf.mxu1  ;;  %v1262_v52 = vld [vmem:[%s7165_s5 + $0x12b0] sm:$0xff]  ;;  %v1259_v39 = vld [vmem:[%s7165_s5 + $0x1298] sm:$0xff] }
 0x236   : > { %2263 = vmatprep.subr.mxu0 %v1291_v54  ;;  %2340 = vmatprep.subr.mxu1 %v1419_v38  ;;  %v1390_v54 = vld [vmem:[%s7165_s5 + $0x16b0] sm:$0xff]  ;;  %v1753_v38 = vadd.f32 %v6251_v45, %v1676_v27  ;;  %v1755_v45 = vadd.f32 %v1754_v10, %v1678_v32  ;;  %v1607_v56 = vadd.f32 %v6235_v17, %v1530_v34  ;;  %v1379_v17 = vld [vmem:[%s7165_s5 + $0x1658] sm:$0xff] }
 0x237   : > { %2264 = vmatpush2.msra.mxu0 %v1290_v40  ;;  %2341 = vmatpush2.msra.mxu1 %v1418_v22  ;;  %v1387_v40 = vld [vmem:[%s7165_s5 + $0x1698] sm:$0xff]  ;;  %v1605_v22 = vadd.f32 %v6202_v31, %v1528_v29 }
 0x238   : > { %2265 = vmatprep.subr.mxu0 %v1287_v42  ;;  %2342 = vmatprep.subr.mxu1 %v1415_v43  ;;  %v1386_v42 = vld [vmem:[%s7165_s5 + $0x1690] sm:$0xff]  ;;  %v1383_v31 = vld [vmem:[%s7165_s5 + $0x1678] sm:$0xff]  ;;  %v1684_v10 = vadd.f32 %v1683_v35, %v1607_v56 }
 0x239   : > { %2266 = vmatpush2.msra.mxu0 %v1286_v53  ;;  %2343 = vmatpush2.msra.mxu1 %v1414_v55  ;;  %v1255_v53 = vld [vmem:[%s7165_s5 + $0x1278] sm:$0xff] }
 0x23a   : > { %2267 = vmatprep.subr.mxu0 %v1283_v12  ;;  %2344 = vmatprep.subr.mxu1 %v1411_v14  ;;  %v1682_v12 = vadd.f32 %v1681_v24, %v1605_v22  ;;  %v1254_v14 = vld [vmem:[%s7165_s5 + $0x1270] sm:$0xff]  ;;  %v1243_v24 = vld [vmem:[%s7165_s5 + $0x1218] sm:$0xff]  ;;  %v1761_v27 = vadd.f32 %v1760_v37, %v1684_v10 }
 0x23b   : > { %2268 = vmatpush2.msra.mxu0 %v1282_v57  ;;  %2345 = vmatpush2.msra.mxu1 %v1410_v58  ;;  %v1382_v57 = vld [vmem:[%s7165_s5 + $0x1670] sm:$0xff]  ;;  %v2606_v56 = vld [vmem:[%s7164_s4 + $0xb8] sm:$0xff] }
 0x23c   : > { %2269 = vmatprep.subr.mxu0 %v1279_v1  ;;  %2346 = vmatprep.subr.mxu1 %v1407_v4 }
 0x23d   : > { %2270 = vmatpush2.msra.mxu0 %v1278_v11  ;;  %2347 = vmatpush2.msra.mxu1 %v1406_v13  ;;  %v1250_v11 = vld [vmem:[%s7165_s5 + $0x1250] sm:$0xff] }
 0x23e   : > { %2271 = vmatprep.subr.mxu0 %v1275_v0  ;;  %2348 = vmatprep.subr.mxu1 %v1403_v46  ;;  %v1378_v13 = vld [vmem:[%s7165_s5 + $0x1650] sm:$0xff]  ;;  %v1375_v0 = vld [vmem:[%s7165_s5 + $0x1638] sm:$0xff] }
 0x23f   : > { %2272 = vmatpush2.msra.mxu0 %v1274_v47  ;;  %2349 = vmatpush2.msra.mxu1 %v1402_v2  ;;  %v1759_v2 = vadd.f32 %v6306_v26, %v1682_v12  ;;  %v1371_v26 = vld [vmem:[%s7165_s5 + $0x1618] sm:$0xff] }
 0x240   : > { %2273 = vmatprep.subr.mxu0 %v1271_v48  ;;  %2350 = vmatprep.subr.mxu1 %v1399_v49  ;;  %v1374_v48 = vld [vmem:[%s7165_s5 + $0x1630] sm:$0xff] }
 0x241   : > { %2274 = vmatpush2.msra.mxu0 %v1270_v61  ;;  %2351 = vmatpush2.msra.mxu1 %v1398_v50 }
 0x242   : > { %2275 = vmatprep.subr.mxu0 %v1267_v28  ;;  %2352 = vmatprep.subr.mxu1 %v1395_v3  ;;  %v1242_v28 = vld [vmem:[%s7165_s5 + $0x1210] sm:$0xff] }
 0x243   : > { %2276 = vmatpush2.msra.mxu0 %v1266_v6  ;;  %2353 = vmatpush2.msra.mxu1 %v1394_v25  ;;  %v1370_v3 = vld [vmem:[%s7165_s5 + $0x1610] sm:$0xff] }
 0x244   : > { %2277 = vmatprep.subr.mxu0 %v1263_v33  ;;  %2354 = vmatprep.subr.mxu1 %v1391_v30  ;;  %v1829_v43 = vpop.f32.mrf.mxu0  ;;  %v1906_v44 = vpop.f32.mrf.mxu1 }
 0x245   : > { %2278 = vmatpush2.msra.mxu0 %v1262_v52  ;;  %2355 = vmatpush2.msra.mxu1 %v1390_v54  ;;  %v1830_v55 = vadd.f32 %v1829_v43, %v1753_v38  ;;  %v2626_v52 = vld [vmem:[%s7164_s4 + $0x1f8] sm:$0xff] }
 0x246   : > { %2279 = vmatprep.subr.mxu0 %v1259_v39  ;;  %2356 = vmatprep.subr.mxu1 %v1387_v40  ;;  %v1831_v58 = vpop.f32.mrf.mxu0  ;;  %v1908_v9 = vpop.f32.mrf.mxu1  ;;  %v2610_v39 = vld [vmem:[%s7164_s4 + $0xf8] sm:$0xff] }
 0x247   : > { %2280 = vmatpush2.msra.mxu0 %v1258_v41  ;;  %2357 = vmatpush2.msra.mxu1 %v1386_v42  ;;  %v6374_v1 = vadd.f32 %v1906_v44, %v1830_v55  ;;  %v1832_v4 = vadd.f32 %v1831_v58, %v1755_v45  ;;  %v2609_v41 = vld [vmem:[%s7164_s4 + $0xe8] sm:$0xff]  ;;  %v2608_v43 = vld [vmem:[%s7164_s4 + $0xd8] sm:$0xff] }
 0x248   : > { %2281 = vmatprep.subr.mxu0 %v1255_v53  ;;  %2358 = vmatprep.subr.mxu1 %v1383_v31  ;;  %v2623_v45 = vld [vmem:[%s7164_s4 + $0x1c8] sm:$0xff]  ;;  %v2622_v31 = vld [vmem:[%s7164_s4 + $0x1b8] sm:$0xff] }
 0x249   : > { %2282 = vmatpush2.msra.mxu0 %v1254_v14  ;;  %2359 = vmatpush2.msra.mxu1 %v1382_v57  ;;  %v6389_v46 = vmul.f32 0.70710677, %v6374_v1  ;;  %v6391_v47 = vadd.f32 %v1908_v9, %v1832_v4  ;;  %v2607_v53 = vld [vmem:[%s7164_s4 + $0xc8] sm:$0xff] }
 0x24a   : > { %2283 = vmatprep.subr.mxu0 %v1251_v59  ;;  %2360 = vmatprep.subr.mxu1 %v1379_v17  ;;  %v1835_v49 = vpop.f32.mrf.mxu0  ;;  %v1912_v62 = vpop.f32.mrf.mxu1  ;;  %v2621_v14 = vld [vmem:[%s7164_s4 + $0x1a8] sm:$0xff]  ;;  %v2620_v59 = vld [vmem:[%s7164_s4 + $0x198] sm:$0xff] }
 0x24b   : > { %2284 = vmatpush2.msra.mxu0 %v1250_v11  ;;  %2361 = vmatpush2.msra.mxu1 %v1378_v13  ;;  %v6407_v61 = vand.u32 2147483647, %v6389_v46  ;;  %v6410_v50 = vmul.f32 0.70710677, %v6391_v47  ;;  %v1836_v29 = vadd.f32 %v1835_v49, %v1759_v2  ;;  %v2605_v58 = vld [vmem:[%s7164_s4 + $0xa8] sm:$0xff]  ;;  %v2604_v17 = vld [vmem:[%s7164_s4 + $0x98] sm:$0xff] }
 0x24c   : > { %2285 = vmatprep.subr.mxu0 %v1247_v51  ;;  %2362 = vmatprep.subr.mxu1 %v1375_v0  ;;  %v1837_v6 = vpop.f32.mrf.mxu0  ;;  %v1914_v37 = vpop.f32.mrf.mxu1  ;;  %v2619_v11 = vld [vmem:[%s7164_s4 + $0x188] sm:$0xff]  ;;  %v2618_v2 = vld [vmem:[%s7164_s4 + $0x178] sm:$0xff]  ;;  %vm2395_vm4 = vcmp.ge.f32.partialorder %v6389_v46, 0.0 }
 0x24d   : > { %2286 = vmatpush2.msra.mxu0 %v1246_v23  ;;  %2363 = vmatpush2.msra.mxu1 %v1374_v48  ;;  %v2419_v25 = vmul.f32 0.3275911, %v6407_v61  ;;  %v2412_v32 = vand.u32 2147483647, %v6410_v50  ;;  %v6420_v33 = vadd.f32 %v1912_v62, %v1836_v29  ;;  %v1838_v30 = vadd.f32 %v1837_v6, %v1761_v27  ;;  %v2603_v0 = vld [vmem:[%s7164_s4 + $0x88] sm:$0xff]  ;;  %v2616_v29 = vld [vmem:[%s7164_s4 + $0x158] sm:$0xff] }
 0x24e   : > { %2287 = vmatprep.subr.mxu0 %v1243_v24  ;;  %2364 = vmatprep.subr.mxu1 %v1371_v26  ;;  %v2602_v24 = vld [vmem:[%s7164_s4 + $0x78] sm:$0xff]  ;;  %v2617_v62 = vld [vmem:[%s7164_s4 + $0x168] sm:$0xff]  ;;  %vm2396_vm5 = vcmp.ge.f32.partialorder %v6410_v50, 0.0 }
 0x24f   : > { %2288 = vmatpush2.msra.mxu0 %v1242_v28  ;;  %2365 = vmatpush2.msra.mxu1 %v1370_v3  ;;  %v2427_v34 = vadd.f32 1.0, %v2419_v25  ;;  %v2420_v35 = vmul.f32 0.3275911, %v2412_v32  ;;  %v6428_v54 = vmul.f32 0.70710677, %v6420_v33  ;;  %v6430_v38 = vadd.f32 %v1914_v37, %v1838_v30  ;;  %v2601_v3 = vld [vmem:[%s7164_s4 + $0x68] sm:$0xff] }
 0x250   : > { %2290 = vmatmul.mubr.f32.vlgmr.msra.gmra.mxu0 %v5181_v60  ;;  %2367 = vmatmul.mubr.f32.vlgmr.msra.gmra.mxu1 %v5184_v63  ;;  %v2625_v63 = vld [vmem:[%s7164_s4 + $0x1e8] sm:$0xff]  ;;  %v2524_v12 = vsub.f32 0.0, %v2412_v32 }
 0x251   : > { %3592 = vrcp.f32 %v2427_v34  ;;  %2295 = vmatprep.mubr.f32.mxu0 %v5197_v5  ;;  %2372 = vmatprep.mubr.f32.mxu1 %v5202_v8  ;;  %v2428_v40 = vadd.f32 1.0, %v2420_v35  ;;  %v2415_v22 = vand.u32 2147483647, %v6428_v54  ;;  %v6439_v60 = vmul.f32 0.70710677, %v6430_v38  ;;  %v2624_v8 = vld [vmem:[%s7164_s4 + $0x1d8] sm:$0xff] }
 0x252   : > { %3430 = vmatprep.subr.mxu0 %v2626_v52  ;;  %v2532_v9 = vmul.f32 %v2524_v12, %v2412_v32  ;;  %v2600_v34 = vld [vmem:[%s7164_s4 + $0x58] sm:$0xff]  ;;  %v2615_v37 = vld [vmem:[%s7164_s4 + $0x148] sm:$0xff]  ;;  %vm2399_vm6 = vcmp.ge.f32.partialorder %v6428_v54, 0.0 }
 0x253   : > { %3431 = vmatpush3.msra.mxu0 %v2610_v39  ;;  %3594 = vrcp.f32 %v2428_v40  ;;  %v2423_v5 = vmul.f32 0.3275911, %v2415_v22  ;;  %v2416_v42 = vand.u32 2147483647, %v6439_v60  ;;  %v2527_v10 = vsub.f32 0.0, %v2415_v22  ;;  %v2612_v12 = vld [vmem:[%s7164_s4 + $0x118] sm:$0xff] }
 0x254   : > { %2296 = vmatmul.mubr.f32.gmra.mxu0 %v5225_v20  ;;  %2373 = vmatmul.mubr.f32.gmra.mxu1 %v5228_v21  ;;  %v2523_v20 = vsub.f32 0.0, %v6407_v61  ;;  %v2541_v26 = vmul.f32 1.442695, %v2532_v9  ;;  %v2611_v9 = vld [vmem:[%s7164_s4 + $0x108] sm:$0xff]  ;;  %vm2400_vm7 = vcmp.ge.f32.partialorder %v6439_v60, 0.0  ;;  %v2383_v60 = vmul.f32 0.5, %v6420_v33 }
 0x255   : > { %3432 = vmatprep.subr.mxu0 %v2625_v63  ;;  %v2431_v44 = vadd.f32 1.0, %v2423_v5  ;;  %v2424_v21 = vmul.f32 0.3275911, %v2416_v42  ;;  %v2528_v49 = vsub.f32 0.0, %v2416_v42  ;;  %v2598_v5 = vld [vmem:[%s7164_s4 + $0x38] sm:$0xff]  ;;  %v2657_v33 = vld [vmem:[%s7164_s4 + $0x3e8] sm:$0xff] }
 0x256   : > { %3433 = vmatpush3.msra.mxu0 %v2609_v41  ;;  %v2531_v57 = vmul.f32 %v2523_v20, %v6407_v61  ;;  %v2535_v61 = vmul.f32 %v2527_v10, %v2415_v22  ;;  %v2599_v22 = vld [vmem:[%s7164_s4 + $0x48] sm:$0xff]  ;;  %v2614_v41 = vld [vmem:[%s7164_s4 + $0x138] sm:$0xff] }
 0x257   : > { %3434 = vmatprep.subr.mxu0 %v2624_v8  ;;  %3596 = vrcp.f32 %v2431_v44  ;;  %v2432_v55 = vadd.f32 1.0, %v2424_v21  ;;  %v2536_v30 = vmul.f32 %v2528_v49, %v2416_v42  ;;  %v2613_v20 = vld [vmem:[%s7164_s4 + $0x128] sm:$0xff] }
 0x258   : > { %3435 = vmatpush3.msra.mxu0 %v2608_v43  ;;  %v2539_v51 = vmul.f32 1.442695, %v2531_v57  ;;  %v2547_v35 = vmul.f32 1.442695, %v2535_v61 }
 0x259   : > { %3436 = vmatprep.subr.mxu0 %v2623_v45  ;;  %3598 = vrcp.f32 %v2432_v55  ;;  %v2549_v44 = vmul.f32 1.442695, %v2536_v30  ;;  %v2597_v55 = vld [vmem:[%s7164_s4 + $0x28] sm:$0xff] }
 0x25a   : > { %3437 = vmatpush3.msra.mxu0 %v2607_v53  ;;  %3600 = vpow2.f32 %v2539_v51  ;;  %v2595_v51 = vld [vmem:[%s7164_s4 + $0x8] sm:$0xff] }
 0x25b   : > { %3438 = vmatprep.subr.mxu0 %v2622_v31  ;;  %3602 = vpow2.f32 %v2541_v26 }
 0x25c   : > { %3439 = vmatpush3.msra.mxu0 %v2606_v56  ;;  %3604 = vpow2.f32 %v2547_v35 }
 0x25d   : > { %3440 = vmatprep.subr.mxu0 %v2621_v14  ;;  %3606 = vpow2.f32 %v2549_v44 }
 0x25e   : > { %v6482_v4 = vpop.eup %3592  ;;  %3441 = vmatpush3.msra.mxu0 %v2605_v58 }
 0x25f   : > { %v2451_v13 = vmul.f32 1.0614054, %v6482_v4  ;;  %3442 = vmatprep.subr.mxu0 %v2620_v59  ;;  %v2596_v59 = vld [vmem:[%s7164_s4 + $0x18] sm:$0xff] }
 0x260   : > { %3443 = vmatpush3.msra.mxu0 %v2604_v17  ;;  %v6494_v23 = vpop.eup %3594 }
 0x261   : > { %v2459_v48 = vadd.f32 -1.4531521, %v2451_v13  ;;  %3444 = vmatprep.subr.mxu0 %v2619_v11  ;;  %v2452_v27 = vmul.f32 1.0614054, %v6494_v23 }
 0x262   : > { %3445 = vmatpush3.msra.mxu0 %v2603_v0 }
 0x263   : > { %v2467_v28 = vmul.f32 %v6482_v4, %v2459_v48  ;;  %3446 = vmatprep.subr.mxu0 %v2618_v2  ;;  %v2460_v6 = vadd.f32 -1.4531521, %v2452_v27 }
 0x264   : > { %3447 = vmatpush3.msra.mxu0 %v2602_v24  ;;  %v6510_v25 = vpop.eup %3596 }
 0x265   : > { %v2475_v32 = vadd.f32 1.4214138, %v2467_v28  ;;  %3448 = vmatprep.subr.mxu0 %v2617_v62  ;;  %v2468_v52 = vmul.f32 %v6494_v23, %v2460_v6  ;;  %v2455_v39 = vmul.f32 1.0614054, %v6510_v25 }
 0x266   : > { %3449 = vmatpush3.msra.mxu0 %v2601_v3  ;;  %v6524_v63 = vpop.eup %3598  ;;  %v3651_v3 = vmov -1.0  }
 0x267   : > { %v2483_v40 = vmul.f32 %v6482_v4, %v2475_v32  ;;  %3450 = vmatprep.subr.mxu0 %v2616_v29  ;;  %v2476_v8 = vadd.f32 1.4214138, %v2468_v52  ;;  %v2463_v42 = vadd.f32 -1.4531521, %v2455_v39  ;;  %v2456_v45 = vmul.f32 1.0614054, %v6524_v63  ;;  %v3601_v2 = vpop.eup %3600 }
 0x268   : > { %3451 = vmatpush3.msra.mxu0 %v2600_v34  ;;  %v3603_v62 = vpop.eup %3602  ;;  %v2403_v29 = vsel %vm2395_vm4, 1.0, %v3651_v3 }
 0x269   : > { %v2491_v43 = vadd.f32 -0.28449672, %v2483_v40  ;;  %3452 = vmatprep.subr.mxu0 %v2615_v37  ;;  %v2484_v21 = vmul.f32 %v6494_v23, %v2476_v8  ;;  %v2471_v53 = vmul.f32 %v6510_v25, %v2463_v42  ;;  %v2464_v56 = vadd.f32 -1.4531521, %v2456_v45  ;;  %v3605_v37 = vpop.eup %3604 }
 0x26a   : > { %3453 = vmatpush3.msra.mxu0 %v2599_v22  ;;  %v3607_v50 = vpop.eup %3606 }
 0x26b   : > { %v2499_v31 = vmul.f32 %v6482_v4, %v2491_v43  ;;  %3454 = vmatprep.subr.mxu0 %v2614_v41  ;;  %v2492_v14 = vadd.f32 -0.28449672, %v2484_v21  ;;  %v2479_v57 = vadd.f32 1.4214138, %v2471_v53  ;;  %v2472_v17 = vmul.f32 %v6524_v63, %v2464_v56 }
 0x26c   : > { %3455 = vmatpush3.msra.mxu0 %v2598_v5  ;;  %v2380_v5 = vmul.f32 0.5, %v6391_v47  ;;  %v2379_v43 = vmul.f32 0.5, %v6374_v1  ;;  %v2384_v1 = vmul.f32 0.5, %v6430_v38  ;;  %v2642_v38 = vld [vmem:[%s7164_s4 + $0x2f8] sm:$0xff] }
 0x26d   : > { %v2507_v58 = vadd.f32 0.2548296, %v2499_v31  ;;  %3456 = vmatprep.subr.mxu0 %v2613_v20  ;;  %v2500_v10 = vmul.f32 %v6494_v23, %v2492_v14  ;;  %v2487_v11 = vmul.f32 %v6510_v25, %v2479_v57  ;;  %v2480_v0 = vadd.f32 1.4214138, %v2472_v17  ;;  %v2641_v14 = vld [vmem:[%s7164_s4 + $0x2e8] sm:$0xff]  ;;  %v2656_v57 = vld [vmem:[%s7164_s4 + $0x3d8] sm:$0xff] }
 0x26e   : > { %3457 = vmatpush3.msra.mxu0 %v2597_v55  ;;  %v2639_v17 = vld [vmem:[%s7164_s4 + $0x2c8] sm:$0xff] }
 0x26f   : > { %v2515_v13 = vmul.f32 %v6482_v4, %v2507_v58  ;;  %3458 = vmatprep.subr.mxu0 %v2612_v12  ;;  %v2508_v48 = vadd.f32 0.2548296, %v2500_v10  ;;  %v2495_v49 = vadd.f32 -0.28449672, %v2487_v11  ;;  %v2488_v26 = vmul.f32 %v6524_v63, %v2480_v0  ;;  %v2658_v12 = vld [vmem:[%s7164_s4 + $0x3f8] sm:$0xff]  ;;  %v2653_v11 = vld [vmem:[%s7164_s4 + $0x3a8] sm:$0xff] }
 0x270   : > { %3459 = vmatpush3.msra.mxu0 %v2596_v59  ;;  %3468 = vmatprep.subr.mxu1 %v2658_v12  ;;  %v2640_v58 = vld [vmem:[%s7164_s4 + $0x2d8] sm:$0xff]  ;;  %v2655_v59 = vld [vmem:[%s7164_s4 + $0x3c8] sm:$0xff] }
 0x271   : > { %v2555_v24 = vmul.f32 %v3601_v2, %v2515_v13  ;;  %3460 = vmatprep.subr.mxu0 %v2611_v9  ;;  %v2516_v61 = vmul.f32 %v6494_v23, %v2508_v48  ;;  %v2503_v4 = vmul.f32 %v6510_v25, %v2495_v49  ;;  %v2496_v28 = vadd.f32 -0.28449672, %v2488_v26  ;;  %3469 = vmatpush3.msra.mxu1 %v2642_v38  ;;  %v2654_v9 = vld [vmem:[%s7164_s4 + $0x3b8] sm:$0xff]  ;;  %v2637_v13 = vld [vmem:[%s7164_s4 + $0x2a8] sm:$0xff] }
 0x272   : > { %3461 = vmatpush3.msra.mxu0 %v2595_v51  ;;  %v2404_v23 = vsel %vm2396_vm5, 1.0, %v3651_v3  ;;  %3470 = vmatprep.subr.mxu1 %v2657_v33  ;;  %v2638_v10 = vld [vmem:[%s7164_s4 + $0x2b8] sm:$0xff]  ;;  %v2651_v2 = vld [vmem:[%s7164_s4 + $0x388] sm:$0xff] }
 0x273   : > { %v2563_v27 = vsub.f32 1.0, %v2555_v24  ;;  %v2556_v6 = vmul.f32 %v3603_v62, %v2516_v61  ;;  %v2511_v32 = vadd.f32 0.2548296, %v2503_v4  ;;  %v2504_v30 = vmul.f32 %v6524_v63, %v2496_v28  ;;  %3471 = vmatpush3.msra.mxu1 %v2641_v14  ;;  %v2652_v51 = vld [vmem:[%s7164_s4 + $0x398] sm:$0xff]  ;;  %v2635_v48 = vld [vmem:[%s7164_s4 + $0x288] sm:$0xff] }
 0x274   : > { %3472 = vmatprep.subr.mxu1 %v2656_v57  ;;  %v2636_v0 = vld [vmem:[%s7164_s4 + $0x298] sm:$0xff]  ;;  %v2649_v26 = vld [vmem:[%s7164_s4 + $0x368] sm:$0xff] }
 0x275   : > { %v2571_v46 = vmul.f32 %v2563_v27, %v2403_v29  ;;  %v2564_v34 = vsub.f32 1.0, %v2556_v6  ;;  %v2519_v35 = vmul.f32 %v6510_v25, %v2511_v32  ;;  %v2512_v52 = vadd.f32 0.2548296, %v2504_v30  ;;  %3473 = vmatpush3.msra.mxu1 %v2640_v58  ;;  %v2650_v49 = vld [vmem:[%s7164_s4 + $0x378] sm:$0xff]  ;;  %v2633_v61 = vld [vmem:[%s7164_s4 + $0x268] sm:$0xff] }
 0x276   : > { %v2407_v25 = vsel %vm2399_vm6, 1.0, %v3651_v3  ;;  %3474 = vmatprep.subr.mxu1 %v2655_v59  ;;  %v2634_v24 = vld [vmem:[%s7164_s4 + $0x278] sm:$0xff]  ;;  %v2647_v27 = vld [vmem:[%s7164_s4 + $0x348] sm:$0xff] }
 0x277   : > { %v2572_v39 = vmul.f32 %v2564_v34, %v2404_v23  ;;  %v2559_v40 = vmul.f32 %v3605_v37, %v2519_v35  ;;  %v2579_v22 = vadd.f32 1.0, %v2571_v46  ;;  %v2520_v41 = vmul.f32 %v6524_v63, %v2512_v52  ;;  %3475 = vmatpush3.msra.mxu1 %v2639_v17  ;;  %v2648_v4 = vld [vmem:[%s7164_s4 + $0x358] sm:$0xff]  ;;  %v2631_v28 = vld [vmem:[%s7164_s4 + $0x248] sm:$0xff] }
 0x278   : > { %v2408_v63 = vsel %vm2400_vm7, 1.0, %v3651_v3  ;;  %3476 = vmatprep.subr.mxu1 %v2654_v9  ;;  %v2632_v62 = vld [vmem:[%s7164_s4 + $0x258] sm:$0xff]  ;;  %v2645_v32 = vld [vmem:[%s7164_s4 + $0x328] sm:$0xff] }
 0x279   : > { %v2580_v8 = vadd.f32 1.0, %v2572_v39  ;;  %v2567_v42 = vsub.f32 1.0, %v2559_v40  ;;  %v2560_v44 = vmul.f32 %v3607_v50, %v2520_v41  ;;  %v6575_v20 = vmul.f32 %v2579_v22, %v2379_v43  ;;  %3477 = vmatpush3.msra.mxu1 %v2638_v10  ;;  %v2646_v29 = vld [vmem:[%s7164_s4 + $0x338] sm:$0xff]  ;;  %v2629_v46 = vld [vmem:[%s7164_s4 + $0x228] sm:$0xff] }
 0x27a   : > { %3478 = vmatprep.subr.mxu1 %v2653_v11  ;;  %v2630_v6 = vld [vmem:[%s7164_s4 + $0x238] sm:$0xff]  ;;  %v2643_v35 = vld [vmem:[%s7164_s4 + $0x308] sm:$0xff] }
 0x27b   : > { %v6573_v45 = vmul.f32 %v2580_v8, %v2380_v5  ;;  %v2575_v54 = vmul.f32 %v2567_v42, %v2407_v25  ;;  %v2568_v21 = vsub.f32 1.0, %v2560_v44  ;;  %3479 = vmatpush3.msra.mxu1 %v2637_v13  ;;  %v2644_v30 = vld [vmem:[%s7164_s4 + $0x318] sm:$0xff]  ;;  %v2627_v37 = vld [vmem:[%s7164_s4 + $0x208] sm:$0xff]  ;;  %v1446_v8 = vrot.slane %v6219_v36, %v4315_v16 }
 0x27c   : > { %3480 = vmatprep.subr.mxu1 %v2652_v51  ;;  %v2628_v34 = vld [vmem:[%s7164_s4 + $0x218] sm:$0xff]  ;;  %v1450_v25 = vrot.slane %v6219_v36, %v4322_v19 }
 0x27d   : > { %2728 = vmatprep.mubr.f32.mxu0 %v6573_v45  ;;  %v2576_v47 = vmul.f32 %v2568_v21, %v2408_v63  ;;  %v2583_v53 = vadd.f32 1.0, %v2575_v54  ;;  %3481 = vmatpush3.msra.mxu1 %v2636_v0 }
 0x27e   : > { %2729 = vmatmul.mubr.f32.vlgmr.msra.gmra.mxu0 %v6575_v20  ;;  %3482 = vmatprep.subr.mxu1 %v2651_v2 }
 0x27f   : > { %v2584_v31 = vadd.f32 1.0, %v2576_v47  ;;  %v6584_v56 = vmul.f32 %v2583_v53, %v2383_v60  ;;  %3483 = vmatpush3.msra.mxu1 %v2635_v48 }
 0x280   : > { %3484 = vmatprep.subr.mxu1 %v2650_v49 }
 0x281   : > { %v6582_v55 = vmul.f32 %v2584_v31, %v2384_v1  ;;  %3485 = vmatpush3.msra.mxu1 %v2634_v24 }
 0x282   : > { %3486 = vmatprep.subr.mxu1 %v2649_v26 }
 0x283   : > { %2733 = vmatprep.mubr.f32.mxu0 %v6582_v55  ;;  %3487 = vmatpush3.msra.mxu1 %v2633_v61 }
 0x284   : > { %2734 = vmatmul.mubr.f32.gmra.mxu0 %v6584_v56  ;;  %3488 = vmatprep.subr.mxu1 %v2648_v4 }
 0x285   : > { %3027 = vmatprep.mubr.f32.mxu0 %v3650_v7  ;;  %3489 = vmatpush3.msra.mxu1 %v2632_v62 }
 0x286   : > { %3490 = vmatprep.subr.mxu1 %v2647_v27 }
 0x287   : > { %3491 = vmatpush3.msra.mxu1 %v2631_v28 }
 0x288   : > { %3492 = vmatprep.subr.mxu1 %v2646_v29  ;;  %v1983_v23 = vpop.f32.mrf.mxu0  ;;  %v2060_v52 = vpop.f32.mrf.mxu1 }
 0x289   : > { %3493 = vmatpush3.msra.mxu1 %v2630_v6  ;;  %v1984_v44 = vadd.f32 %v1983_v23, %v1446_v8 }
 0x28a   : > { %3494 = vmatprep.subr.mxu1 %v2645_v32  ;;  %v1985_v39 = vpop.f32.mrf.mxu0  ;;  %v2062_v40 = vpop.f32.mrf.mxu1 }
 0x28b   : > { %3495 = vmatpush3.msra.mxu1 %v2629_v46  ;;  %v1986_v63 = vadd.f32 %v1985_v39, %v1450_v25  ;;  %v2061_v47 = vadd.f32 %v2060_v52, %v1984_v44 }
 0x28c   : > { %3496 = vmatprep.subr.mxu1 %v2644_v30 }
 0x28d   : > { %3497 = vmatpush3.msra.mxu1 %v2628_v34  ;;  %v2063_v60 = vadd.f32 %v2062_v40, %v1986_v63 }
 0x28e   : > { %3498 = vmatprep.subr.mxu1 %v2643_v35  ;;  %v1989_v22 = vpop.f32.mrf.mxu0  ;;  %v2066_v41 = vpop.f32.mrf.mxu1 }
 0x28f   : > { %3499 = vmatpush3.msra.mxu1 %v2627_v37  ;;  %v1990_v53 = vadd.f32 %v1989_v22, %v1446_v8 }
 0x290   : > { %v1991_v50 = vpop.f32.mrf.mxu0  ;;  %v2068_v5 = vpop.f32.mrf.mxu1 }
 0x291   : > { %v1992_v38 = vadd.f32 %v1991_v50, %v1450_v25  ;;  %v2067_v33 = vadd.f32 %v2066_v41, %v1990_v53 }
 0x293   : > { %v2069_v9 = vadd.f32 %v2068_v5, %v1992_v38 }
 0x2cc   : > { %v2137_v42 = vpop.f32.mrf.mxu0  ;;  %v2214_v43 = vpop.f32.mrf.mxu1 }
 0x2cd   : > { %v2138_v12 = vadd.f32 %v2137_v42, %v2061_v47 }
 0x2ce   : > { %v2139_v54 = vpop.f32.mrf.mxu0  ;;  %v2216_v21 = vpop.f32.mrf.mxu1 }
 0x2cf   : > { %v2140_v14 = vadd.f32 %v2139_v54, %v2063_v60  ;;  %v2215_v59 = vadd.f32 %v2214_v43, %v2138_v12 }
 0x2d1   : > { %v2217_v11 = vadd.f32 %v2216_v21, %v2140_v14 }
 0x2d2   : > { %v2143_v1 = vpop.f32.mrf.mxu0  ;;  %v2220_v31 = vpop.f32.mrf.mxu1 }
 0x2d3   : > { %v2144_v17 = vadd.f32 %v2143_v1, %v2067_v33 }
 0x2d4   : > { %v2145_v57 = vpop.f32.mrf.mxu0  ;;  %v2222_v58 = vpop.f32.mrf.mxu1 }
 0x2d5   : > { %v2146_v51 = vadd.f32 %v2145_v57, %v2069_v9  ;;  %v2221_v48 = vadd.f32 %v2220_v31, %v2144_v17 }
 0x2d7   : > { %v2223_v28 = vadd.f32 %v2222_v58, %v2146_v51 }
 0x310   : > { %v2291_v10 = vpop.f32.mrf.mxu0  ;;  %v2368_v36 = vpop.f32.mrf.mxu1 }
 0x311   : > { %v2292_v13 = vadd.f32 %v2291_v10, %v2215_v59 }
 0x312   : > { %v2293_v0 = vpop.f32.mrf.mxu0  ;;  %v2370_v2 = vpop.f32.mrf.mxu1 }
 0x313   : > { %v6689_v49 = vadd.f32 %v2368_v36, %v2292_v13  ;;  %v2294_v24 = vadd.f32 %v2293_v0, %v2217_v11 }
 0x314   : > { %v2297_v26 = vpop.f32.mrf.mxu0  ;;  %v2374_v27 = vpop.f32.mrf.mxu1 }
 0x315   : > { %v6692_v61 = vmul.f32 0.70710677, %v6689_v49  ;;  %v6694_v4 = vadd.f32 %v2370_v2, %v2294_v24  ;;  %v2298_v62 = vadd.f32 %v2297_v26, %v2221_v48 }
 0x316   : > { %v2299_v29 = vpop.f32.mrf.mxu0  ;;  %v2376_v37 = vpop.f32.mrf.mxu1 }
 0x317   : > { %v2413_v6 = vand.u32 2147483647, %v6692_v61  ;;  %v6698_v32 = vmul.f32 0.70710677, %v6694_v4  ;;  %v6700_v46 = vadd.f32 %v2374_v27, %v2298_v62  ;;  %v2300_v30 = vadd.f32 %v2299_v29, %v2223_v28 }
 0x318   : > { %vm2397_vm8 = vcmp.ge.f32.partialorder %v6692_v61, 0.0 }
 0x319   : > { %v2421_v34 = vmul.f32 0.3275911, %v2413_v6  ;;  %v2414_v35 = vand.u32 2147483647, %v6698_v32  ;;  %v6704_v23 = vmul.f32 0.70710677, %v6700_v46  ;;  %v6706_v52 = vadd.f32 %v2376_v37, %v2300_v30 }
 0x31a   : > { %v2525_v25 = vsub.f32 0.0, %v2413_v6  ;;  %vm2398_vm9 = vcmp.ge.f32.partialorder %v6698_v32, 0.0 }
 0x31b   : > { %v2429_v39 = vadd.f32 1.0, %v2421_v34  ;;  %v2422_v40 = vmul.f32 0.3275911, %v2414_v35  ;;  %v2417_v22 = vand.u32 2147483647, %v6704_v23  ;;  %v2526_v54 = vsub.f32 0.0, %v2414_v35 }
 0x31c   : > { %v6710_v41 = vmul.f32 0.70710677, %v6706_v52  ;;  %v2533_v21 = vmul.f32 %v2525_v25, %v2413_v6  ;;  %vm2401_vm10 = vcmp.ge.f32.partialorder %v6704_v23, 0.0  ;;  %v2381_v23 = vmul.f32 0.5, %v6689_v49 }
 0x31d   : > { %3608 = vrcp.f32 %v2429_v39  ;;  %v2430_v50 = vadd.f32 1.0, %v2422_v40  ;;  %v2425_v5 = vmul.f32 0.3275911, %v2417_v22  ;;  %v2529_v63 = vsub.f32 0.0, %v2417_v22 }
 0x31e   : > { %v2418_v8 = vand.u32 2147483647, %v6710_v41  ;;  %v2534_v53 = vmul.f32 %v2526_v54, %v2414_v35  ;;  %v2543_v31 = vmul.f32 1.442695, %v2533_v21  ;;  %vm2402_vm11 = vcmp.ge.f32.partialorder %v6710_v41, 0.0 }
 0x31f   : > { %3610 = vrcp.f32 %v2430_v50  ;;  %v2433_v42 = vadd.f32 1.0, %v2425_v5  ;;  %v2537_v12 = vmul.f32 %v2529_v63, %v2417_v22  ;;  %v2386_v41 = vmul.f32 0.5, %v6706_v52  ;;  %v2962_v52 = vld [vmem:[%s7163_s3 + $0x3f8] sm:$0xff] }
 0x320   : > { %v2426_v43 = vmul.f32 0.3275911, %v2418_v8  ;;  %v2530_v60 = vsub.f32 0.0, %v2418_v8  ;;  %v2545_v14 = vmul.f32 1.442695, %v2534_v53  ;;  %3040 = vmatprep.subr.mxu1 %v2962_v52  ;;  %v2913_v52 = vld [vmem:[%s7163_s3 + $0x270] sm:$0xff] }
 0x321   : > { %3612 = vrcp.f32 %v2433_v42  ;;  %v2551_v9 = vmul.f32 1.442695, %v2537_v12 }
 0x322   : > { %v2434_v44 = vadd.f32 1.0, %v2426_v43  ;;  %v2538_v17 = vmul.f32 %v2530_v60, %v2418_v8  ;;  %v2405_v60 = vsel %vm2397_vm8, 1.0, %v3651_v3 }
 0x324   : > { %3614 = vrcp.f32 %v2434_v44  ;;  %v2553_v48 = vmul.f32 1.442695, %v2538_v17  ;;  %v2406_v17 = vsel %vm2398_vm9, 1.0, %v3651_v3 }
 0x325   : > { %3616 = vpow2.f32 %v2543_v31 }
 0x326   : > { %3618 = vpow2.f32 %v2545_v14 }
 0x327   : > { %3620 = vpow2.f32 %v2551_v9 }
 0x328   : > { %3622 = vpow2.f32 %v2553_v48 }
 0x32a   : > { %v3609_v47 = vpop.eup %3608 }
 0x32b   : > { %v2453_v1 = vmul.f32 1.0614054, %v3609_v47 }
 0x32c   : > { %v3611_v38 = vpop.eup %3610 }
 0x32d   : > { %v2461_v33 = vadd.f32 -1.4531521, %v2453_v1  ;;  %v2454_v57 = vmul.f32 1.0614054, %v3611_v38 }
 0x32e   : > { %v3613_v58 = vpop.eup %3612 }
 0x32f   : > { %v2469_v59 = vmul.f32 %v3609_v47, %v2461_v33  ;;  %v2462_v10 = vadd.f32 -1.4531521, %v2454_v57  ;;  %v2457_v36 = vmul.f32 1.0614054, %v3613_v58 }
 0x331   : > { %v2477_v11 = vadd.f32 1.4214138, %v2469_v59  ;;  %v3615_v13 = vpop.eup %3614  ;;  %v2470_v51 = vmul.f32 %v3611_v38, %v2462_v10  ;;  %v2465_v0 = vadd.f32 -1.4531521, %v2457_v36 }
 0x332   : > { %v2458_v24 = vmul.f32 1.0614054, %v3615_v13  ;;  %v3617_v42 = vpop.eup %3616 }
 0x333   : > { %v2485_v2 = vmul.f32 %v3609_v47, %v2477_v11  ;;  %v2478_v26 = vadd.f32 1.4214138, %v2470_v51  ;;  %v2473_v62 = vmul.f32 %v3613_v58, %v2465_v0  ;;  %v3619_v53 = vpop.eup %3618  ;;  %v2409_v51 = vsel %vm2401_vm10, 1.0, %v3651_v3 }
 0x334   : > { %v2466_v28 = vadd.f32 -1.4531521, %v2458_v24  ;;  %v2410_v24 = vsel %vm2402_vm11, 1.0, %v3651_v3 }
 0x335   : > { %v2493_v27 = vadd.f32 -0.28449672, %v2485_v2  ;;  %v2486_v29 = vmul.f32 %v3611_v38, %v2478_v26  ;;  %v2481_v6 = vadd.f32 1.4214138, %v2473_v62 }
 0x336   : > { %v2474_v34 = vmul.f32 %v3615_v13, %v2466_v28  ;;  %v2385_v28 = vmul.f32 0.5, %v6700_v46  ;;  %v2959_v46 = vld [vmem:[%s7163_s3 + $0x3e0] sm:$0xff] }
 0x337   : > { %v2501_v30 = vmul.f32 %v3609_v47, %v2493_v27  ;;  %v2494_v35 = vadd.f32 -0.28449672, %v2486_v29  ;;  %v2489_v37 = vmul.f32 %v3613_v58, %v2481_v6  ;;  %v2960_v6 = vld [vmem:[%s7163_s3 + $0x3e8] sm:$0xff] }
 0x338   : > { %v2482_v40 = vadd.f32 1.4214138, %v2474_v34  ;;  %2963 = vmatprep.subr.mxu0 %v2960_v6  ;;  %v2956_v34 = vld [vmem:[%s7163_s3 + $0x3c8] sm:$0xff]  ;;  %v2911_v6 = vld [vmem:[%s7163_s3 + $0x260] sm:$0xff] }
 0x339   : > { %v2509_v39 = vadd.f32 0.2548296, %v2501_v30  ;;  %v2502_v22 = vmul.f32 %v3611_v38, %v2494_v35  ;;  %v2497_v50 = vadd.f32 -0.28449672, %v2489_v37  ;;  %v2961_v30 = vld [vmem:[%s7163_s3 + $0x3f0] sm:$0xff]  ;;  %2964 = vmatpush1.msra.mxu0 %v2959_v46  ;;  %v2958_v35 = vld [vmem:[%s7163_s3 + $0x3d8] sm:$0xff] }
 0x33a   : > { %v2490_v8 = vmul.f32 %v3615_v13, %v2482_v40  ;;  %2965 = vmatprep.subr.mxu0 %v2956_v34  ;;  %v2955_v37 = vld [vmem:[%s7163_s3 + $0x3c0] sm:$0xff]  ;;  %v2952_v40 = vld [vmem:[%s7163_s3 + $0x3a8] sm:$0xff] }
 0x33b   : > { %v2517_v5 = vmul.f32 %v3609_v47, %v2509_v39  ;;  %v2510_v43 = vadd.f32 0.2548296, %v2502_v22  ;;  %v2505_v25 = vmul.f32 %v3613_v58, %v2497_v50  ;;  %v3621_v47 = vpop.eup %3620  ;;  %v2957_v39 = vld [vmem:[%s7163_s3 + $0x3d0] sm:$0xff]  ;;  %2966 = vmatpush1.msra.mxu0 %v2955_v37  ;;  %v2954_v22 = vld [vmem:[%s7163_s3 + $0x3b8] sm:$0xff]  ;;  %v2951_v50 = vld [vmem:[%s7163_s3 + $0x3a0] sm:$0xff] }
 0x33c   : > { %v2498_v54 = vadd.f32 -0.28449672, %v2490_v8  ;;  %v3623_v9 = vpop.eup %3622  ;;  %2967 = vmatprep.subr.mxu0 %v2952_v40  ;;  %v2948_v8 = vld [vmem:[%s7163_s3 + $0x388] sm:$0xff]  ;;  %v2907_v34 = vld [vmem:[%s7163_s3 + $0x240] sm:$0xff] }
 0x33d   : > { %v2557_v44 = vmul.f32 %v3617_v42, %v2517_v5  ;;  %v2518_v21 = vmul.f32 %v3611_v38, %v2510_v43  ;;  %v2513_v63 = vadd.f32 0.2548296, %v2505_v25  ;;  %v2953_v5 = vld [vmem:[%s7163_s3 + $0x3b0] sm:$0xff]  ;;  %2968 = vmatpush1.msra.mxu0 %v2951_v50  ;;  %v2950_v42 = vld [vmem:[%s7163_s3 + $0x398] sm:$0xff]  ;;  %v2947_v43 = vld [vmem:[%s7163_s3 + $0x380] sm:$0xff] }
 0x33e   : > { %v2506_v31 = vmul.f32 %v3615_v13, %v2498_v54  ;;  %2969 = vmatprep.subr.mxu0 %v2948_v8  ;;  %v2949_v25 = vld [vmem:[%s7163_s3 + $0x390] sm:$0xff]  ;;  %v2946_v54 = vld [vmem:[%s7163_s3 + $0x378] sm:$0xff]  ;;  %v2908_v46 = vld [vmem:[%s7163_s3 + $0x248] sm:$0xff] }
 0x33f   : > { %v2565_v1 = vsub.f32 1.0, %v2557_v44  ;;  %v2558_v12 = vmul.f32 %v3619_v53, %v2518_v21  ;;  %v2521_v33 = vmul.f32 %v3613_v58, %v2513_v63  ;;  %v2382_v58 = vmul.f32 0.5, %v6694_v4  ;;  %2970 = vmatpush1.msra.mxu0 %v2947_v43  ;;  %v2944_v44 = vld [vmem:[%s7163_s3 + $0x368] sm:$0xff]  ;;  %v2943_v21 = vld [vmem:[%s7163_s3 + $0x360] sm:$0xff]  ;;  %v2945_v63 = vld [vmem:[%s7163_s3 + $0x370] sm:$0xff] }
 0x340   : > { %v2514_v57 = vadd.f32 0.2548296, %v2506_v31  ;;  %2971 = vmatprep.subr.mxu0 %v2944_v44  ;;  %v2940_v53 = vld [vmem:[%s7163_s3 + $0x348] sm:$0xff]  ;;  %v2939_v31 = vld [vmem:[%s7163_s3 + $0x340] sm:$0xff]  ;;  %v3156_v43 = vld [vmem:[%s7164_s4 + $0x1f0] sm:$0xff]  ;;  %v3462_v44 = vpop.f32.mrf.mxu0 }
 0x341   : > { %v2573_v14 = vmul.f32 %v2565_v1, %v2405_v60  ;;  %v2566_v59 = vsub.f32 1.0, %v2558_v12  ;;  %v2561_v61 = vmul.f32 %v3621_v47, %v2521_v33  ;;  %2972 = vmatpush1.msra.mxu0 %v2943_v21  ;;  %v2942_v1 = vld [vmem:[%s7163_s3 + $0x358] sm:$0xff]  ;;  %v2941_v60 = vld [vmem:[%s7163_s3 + $0x350] sm:$0xff]  ;;  %v2936_v12 = vld [vmem:[%s7163_s3 + $0x328] sm:$0xff] }
 0x342   : > { %v2522_v38 = vmul.f32 %v3615_v13, %v2514_v57  ;;  %2973 = vmatprep.subr.mxu0 %v2940_v53  ;;  %v2938_v33 = vld [vmem:[%s7163_s3 + $0x338] sm:$0xff]  ;;  %v2935_v47 = vld [vmem:[%s7163_s3 + $0x320] sm:$0xff]  ;;  %v2932_v57 = vld [vmem:[%s7163_s3 + $0x308] sm:$0xff] }
 0x343   : > { %v2574_v10 = vmul.f32 %v2566_v59, %v2406_v17  ;;  %v2569_v36 = vsub.f32 1.0, %v2561_v61  ;;  %v2581_v11 = vadd.f32 1.0, %v2573_v14  ;;  %2974 = vmatpush1.msra.mxu0 %v2939_v31  ;;  %v2937_v14 = vld [vmem:[%s7163_s3 + $0x330] sm:$0xff]  ;;  %v2934_v59 = vld [vmem:[%s7163_s3 + $0x318] sm:$0xff]  ;;  %v2931_v61 = vld [vmem:[%s7163_s3 + $0x300] sm:$0xff] }
 0x344   : > { %v2562_v32 = vmul.f32 %v3623_v9, %v2522_v38  ;;  %2975 = vmatprep.subr.mxu0 %v2936_v12  ;;  %v2933_v17 = vld [vmem:[%s7163_s3 + $0x310] sm:$0xff]  ;;  %v2928_v38 = vld [vmem:[%s7163_s3 + $0x2e8] sm:$0xff]  ;;  %v2930_v9 = vld [vmem:[%s7163_s3 + $0x2f8] sm:$0xff] }
 0x345   : > { %v2582_v0 = vadd.f32 1.0, %v2574_v10  ;;  %v2577_v2 = vmul.f32 %v2569_v36, %v2409_v51  ;;  %v6725_v13 = vmul.f32 %v2581_v11, %v2381_v23  ;;  %2976 = vmatpush1.msra.mxu0 %v2935_v47  ;;  %v2927_v10 = vld [vmem:[%s7163_s3 + $0x2e0] sm:$0xff]  ;;  %v2929_v36 = vld [vmem:[%s7163_s3 + $0x2f0] sm:$0xff]  ;;  %v2924_v11 = vld [vmem:[%s7163_s3 + $0x2c8] sm:$0xff] }
 0x346   : > { %v2570_v48 = vsub.f32 1.0, %v2562_v32  ;;  %2977 = vmatprep.subr.mxu0 %v2932_v57  ;;  %v2926_v51 = vld [vmem:[%s7163_s3 + $0x2d8] sm:$0xff]  ;;  %v2923_v32 = vld [vmem:[%s7163_s3 + $0x2c0] sm:$0xff]  ;;  %v2904_v37 = vld [vmem:[%s7163_s3 + $0x228] sm:$0xff] }
 0x347   : > { %v6723_v26 = vmul.f32 %v2582_v0, %v2382_v58  ;;  %v2585_v27 = vadd.f32 1.0, %v2577_v2  ;;  %2978 = vmatpush1.msra.mxu0 %v2931_v61  ;;  %v2925_v58 = vld [vmem:[%s7163_s3 + $0x2d0] sm:$0xff]  ;;  %v2920_v0 = vld [vmem:[%s7163_s3 + $0x2a8] sm:$0xff]  ;;  %v2922_v2 = vld [vmem:[%s7163_s3 + $0x2b8] sm:$0xff] }
 0x348   : > { %v2578_v62 = vmul.f32 %v2570_v48, %v2410_v24  ;;  %2979 = vmatprep.subr.mxu0 %v2928_v38  ;;  %v2919_v23 = vld [vmem:[%s7163_s3 + $0x2a0] sm:$0xff]  ;;  %v2921_v48 = vld [vmem:[%s7163_s3 + $0x2b0] sm:$0xff]  ;;  %v2916_v24 = vld [vmem:[%s7163_s3 + $0x288] sm:$0xff] }
 0x349   : > { %2803 = vmatprep.mubr.f32.mxu1 %v6723_v26  ;;  %v6733_v49 = vmul.f32 %v2585_v27, %v2385_v28  ;;  %2980 = vmatpush1.msra.mxu0 %v2927_v10  ;;  %v2915_v27 = vld [vmem:[%s7163_s3 + $0x280] sm:$0xff]  ;;  %v2914_v28 = vld [vmem:[%s7163_s3 + $0x278] sm:$0xff]  ;;  %v2900_v50 = vld [vmem:[%s7163_s3 + $0x208] sm:$0xff] }
 0x34a   : > { %2804 = vmatmul.mubr.f32.vlgmr.msra.gmra.mxu1 %v6725_v13  ;;  %v2586_v4 = vadd.f32 1.0, %v2578_v62  ;;  %2981 = vmatprep.subr.mxu0 %v2924_v11  ;;  %v2918_v62 = vld [vmem:[%s7163_s3 + $0x298] sm:$0xff]  ;;  %v2903_v40 = vld [vmem:[%s7163_s3 + $0x220] sm:$0xff] }
 0x34b   : > { %3041 = vmatpush1.msra.mxu1 %v2961_v30  ;;  %2982 = vmatpush1.msra.mxu0 %v2923_v32  ;;  %v2910_v30 = vld [vmem:[%s7163_s3 + $0x258] sm:$0xff]  ;;  %v2899_v8 = vld [vmem:[%s7163_s3 + $0x200] sm:$0xff] }
 0x34c   : > { %v6731_v29 = vmul.f32 %v2586_v4, %v2386_v41  ;;  %3042 = vmatprep.subr.mxu1 %v2958_v35  ;;  %2983 = vmatprep.subr.mxu0 %v2920_v0  ;;  %v2917_v41 = vld [vmem:[%s7163_s3 + $0x290] sm:$0xff]  ;;  %v2912_v4 = vld [vmem:[%s7163_s3 + $0x268] sm:$0xff]  ;;  %v3422_v53 = vld [vmem:[%s7161_s1 + $0x4] ss:$0 sm:$0xff] }
 0x34d   : > { %3043 = vmatpush1.msra.mxu1 %v2957_v39  ;;  %2984 = vmatpush1.msra.mxu0 %v2919_v23  ;;  %v2909_v35 = vld [vmem:[%s7163_s3 + $0x250] sm:$0xff]  ;;  %v2906_v39 = vld [vmem:[%s7163_s3 + $0x238] sm:$0xff] }
 0x34e   : > { %2808 = vmatprep.mubr.f32.mxu1 %v6731_v29  ;;  %3044 = vmatprep.subr.mxu1 %v2954_v22  ;;  %v2905_v22 = vld [vmem:[%s7163_s3 + $0x230] sm:$0xff] }
 0x34f   : > { %2809 = vmatmul.mubr.f32.gmra.mxu1 %v6733_v49  ;;  %2985 = vmatprep.subr.mxu0 %v2916_v24 }
 0x350   : > { %3104 = vmatprep.mubr.f32.mxu1 %v3650_v7  ;;  %3045 = vmatpush1.msra.mxu1 %v2953_v5  ;;  %v2902_v5 = vld [vmem:[%s7163_s3 + $0x218] sm:$0xff] }
 0x351   : > { %3046 = vmatprep.subr.mxu1 %v2950_v42  ;;  %2986 = vmatpush1.msra.mxu0 %v2915_v27  ;;  %v2901_v42 = vld [vmem:[%s7163_s3 + $0x210] sm:$0xff] }
 0x352   : > { %3047 = vmatpush1.msra.mxu1 %v2949_v25  ;;  %2987 = vmatprep.subr.mxu0 %v2912_v4  ;;  %v3188_v25 = vld [vmem:[%s7164_s4 + $0x3f0] sm:$0xff] }
 0x353   : > { %3048 = vmatprep.subr.mxu1 %v2946_v54  ;;  %2988 = vmatpush1.msra.mxu0 %v2911_v6  ;;  %v3463_v54 = vpop.f32.mrf.mxu0 }
 0x354   : > { %3049 = vmatpush1.msra.mxu1 %v2945_v63  ;;  %2989 = vmatprep.subr.mxu0 %v2908_v46  ;;  %v3464_v63 = vadd.f32 %v3463_v54, %v3462_v44 }
 0x355   : > { %3050 = vmatprep.subr.mxu1 %v2942_v1  ;;  %2990 = vmatpush1.msra.mxu0 %v2907_v34  ;;  %v3465_v21 = vpop.f32.mrf.mxu0 }
 0x356   : > { %3051 = vmatpush1.msra.mxu1 %v2941_v60  ;;  %2991 = vmatprep.subr.mxu0 %v2904_v37  ;;  %v2731_v12 = vadd.f32 %v3464_v63, %v3422_v53 }
 0x357   : > { %3052 = vmatprep.subr.mxu1 %v2938_v33  ;;  %2992 = vmatpush1.msra.mxu0 %v2903_v40  ;;  %v3466_v31 = vpop.f32.mrf.mxu0 }
 0x358   : > { %3053 = vmatpush1.msra.mxu1 %v2937_v14  ;;  %2993 = vmatprep.subr.mxu0 %v2900_v50  ;;  %v3467_v47 = vadd.f32 %v3466_v31, %v3465_v21 }
 0x359   : > { %3054 = vmatprep.subr.mxu1 %v2934_v59  ;;  %2994 = vmatpush1.msra.mxu0 %v2899_v8 }
 0x35a   : > { %3055 = vmatpush1.msra.mxu1 %v2933_v17  ;;  %3506 = vmatprep.subr.mxu0 %v3156_v43  ;;  %v2736_v17 = vadd.f32 %v3467_v47, %v3422_v53 }
 0x35b   : > { %3056 = vmatprep.subr.mxu1 %v2930_v9 }
 0x35c   : > { %3057 = vmatpush1.msra.mxu1 %v2929_v36 }
 0x35d   : > { %3058 = vmatprep.subr.mxu1 %v2926_v51 }
 0x35e   : > { %3059 = vmatpush1.msra.mxu1 %v2925_v58 }
 0x35f   : > { %3060 = vmatprep.subr.mxu1 %v2922_v2 }
 0x360   : > { %3061 = vmatpush1.msra.mxu1 %v2921_v48 }
 0x361   : > { %3062 = vmatprep.subr.mxu1 %v2918_v62 }
 0x362   : > { %3063 = vmatpush1.msra.mxu1 %v2917_v41 }
 0x363   : > { %3064 = vmatprep.subr.mxu1 %v2914_v28 }
 0x364   : > { %3065 = vmatpush1.msra.mxu1 %v2913_v52 }
 0x365   : > { %3066 = vmatprep.subr.mxu1 %v2910_v30 }
 0x366   : > { %3067 = vmatpush1.msra.mxu1 %v2909_v35 }
 0x367   : > { %3068 = vmatprep.subr.mxu1 %v2906_v39 }
 0x368   : > { %3069 = vmatpush1.msra.mxu1 %v2905_v22 }
 0x369   : > { %3070 = vmatprep.subr.mxu1 %v2902_v5 }
 0x36a   : > { %3071 = vmatpush1.msra.mxu1 %v2901_v42 }
 0x36b   : > { %3544 = vmatprep.subr.mxu1 %v3188_v25 }
 0x40a   : > { %v3500_v1 = vpop.f32.mrf.mxu1 }
 0x40c   : > { %v3501_v60 = vpop.f32.mrf.mxu1 }
 0x40d   : > { %v3502_v33 = vadd.f32 %v3501_v60, %v3500_v1 }
 0x40f   : > { %v2806_v14 = vadd.f32 %v3502_v33, %v2731_v12  ;;  %v3503_v57 = vpop.f32.mrf.mxu1 }
 0x411   : > { %v2816_v59 = vmul.f32 0.70710677, %v2806_v14  ;;  %v3504_v61 = vpop.f32.mrf.mxu1  ;;  %v2814_v12 = vmul.f32 0.5, %v2806_v14  ;;  %v3155_v14 = vld [vmem:[%s7164_s4 + $0x1e0] sm:$0xff] }
 0x412   : > { %v3505_v38 = vadd.f32 %v3504_v61, %v3503_v57 }
 0x413   : > { %v2822_v9 = vand.u32 2147483647, %v2816_v59  ;;  %vm2818_vm12 = vcmp.ge.f32.partialorder %v2816_v59, 0.0  ;;  %v3140_v59 = vld [vmem:[%s7164_s4 + $0xf0] sm:$0xff] }
 0x414   : > { %v2811_v10 = vadd.f32 %v3505_v38, %v2736_v17  ;;  %v2820_v63 = vsel %vm2818_vm12, 1.0, %v3651_v3  ;;  %v3172_v38 = vld [vmem:[%s7164_s4 + $0x2f0] sm:$0xff] }
 0x415   : > { %v2824_v36 = vmul.f32 0.3275911, %v2822_v9  ;;  %v2850_v2 = vsub.f32 0.0, %v2822_v9 }
 0x416   : > { %v2817_v11 = vmul.f32 0.70710677, %v2811_v10 }
 0x417   : > { %v2826_v51 = vadd.f32 1.0, %v2824_v36  ;;  %v2852_v23 = vmul.f32 %v2850_v2, %v2822_v9  ;;  %v3187_v9 = vld [vmem:[%s7164_s4 + $0x3e0] sm:$0xff] }
 0x418   : > { %v2823_v32 = vand.u32 2147483647, %v2817_v11  ;;  %vm2819_vm13 = vcmp.ge.f32.partialorder %v2817_v11, 0.0  ;;  %v3139_v11 = vld [vmem:[%s7164_s4 + $0xe0] sm:$0xff] }
 0x419   : > { %3624 = vrcp.f32 %v2826_v51  ;;  %v2854_v27 = vmul.f32 1.442695, %v2852_v23  ;;  %v2821_v61 = vsel %vm2819_vm13, 1.0, %v3651_v3  ;;  %v2815_v3 = vmul.f32 0.5, %v2811_v10  ;;  %v3171_v51 = vld [vmem:[%s7164_s4 + $0x2e0] sm:$0xff]  ;;  %v3154_v10 = vld [vmem:[%s7164_s4 + $0x1d0] sm:$0xff] }
 0x41a   : > { %v2825_v58 = vmul.f32 0.3275911, %v2823_v32  ;;  %v2851_v48 = vsub.f32 0.0, %v2823_v32  ;;  %v3153_v2 = vld [vmem:[%s7164_s4 + $0x1c0] sm:$0xff] }
 0x41b   : > { %v3185_v23 = vld [vmem:[%s7164_s4 + $0x3c0] sm:$0xff] }
 0x41c   : > { %v2827_v0 = vadd.f32 1.0, %v2825_v58  ;;  %v2853_v41 = vmul.f32 %v2851_v48, %v2823_v32  ;;  %v3138_v58 = vld [vmem:[%s7164_s4 + $0xd0] sm:$0xff]  ;;  %v3137_v48 = vld [vmem:[%s7164_s4 + $0xc0] sm:$0xff] }
 0x41e   : > { %3626 = vrcp.f32 %v2827_v0  ;;  %v2856_v52 = vmul.f32 1.442695, %v2853_v41  ;;  %v3170_v0 = vld [vmem:[%s7164_s4 + $0x2d0] sm:$0xff] }
 0x41f   : > { %3628 = vpow2.f32 %v2854_v27  ;;  %v3184_v27 = vld [vmem:[%s7164_s4 + $0x3b0] sm:$0xff] }
 0x420   : > { %3630 = vpow2.f32 %v2856_v52  ;;  %v3136_v41 = vld [vmem:[%s7164_s4 + $0xb0] sm:$0xff]  ;;  %v3135_v52 = vld [vmem:[%s7164_s4 + $0xa0] sm:$0xff] }
 0x426   : > { %v3625_v24 = vpop.eup %3624 }
 0x427   : > { %v2832_v62 = vmul.f32 1.0614054, %v3625_v24 }
 0x429   : > { %v2834_v4 = vadd.f32 -1.4531521, %v2832_v62  ;;  %v3152_v62 = vld [vmem:[%s7164_s4 + $0x1b0] sm:$0xff] }
 0x42b   : > { %v3627_v28 = vpop.eup %3626  ;;  %v2836_v6 = vmul.f32 %v3625_v24, %v2834_v4  ;;  %v3168_v4 = vld [vmem:[%s7164_s4 + $0x2b0] sm:$0xff] }
 0x42c   : > { %v2833_v46 = vmul.f32 1.0614054, %v3627_v28  ;;  %v3629_v43 = vpop.eup %3628 }
 0x42d   : > { %v2838_v30 = vadd.f32 1.4214138, %v2836_v6  ;;  %v3631_v1 = vpop.eup %3630  ;;  %v3183_v6 = vld [vmem:[%s7164_s4 + $0x3a0] sm:$0xff] }
 0x42e   : > { %v2835_v34 = vadd.f32 -1.4531521, %v2833_v46  ;;  %v3167_v46 = vld [vmem:[%s7164_s4 + $0x2a0] sm:$0xff] }
 0x42f   : > { %v2840_v35 = vmul.f32 %v3625_v24, %v2838_v30  ;;  %v3150_v30 = vld [vmem:[%s7164_s4 + $0x190] sm:$0xff] }
 0x430   : > { %v2837_v37 = vmul.f32 %v3627_v28, %v2835_v34  ;;  %v3182_v34 = vld [vmem:[%s7164_s4 + $0x390] sm:$0xff] }
 0x431   : > { %v2842_v39 = vadd.f32 -0.28449672, %v2840_v35  ;;  %v3134_v35 = vld [vmem:[%s7164_s4 + $0x90] sm:$0xff] }
 0x432   : > { %v2839_v40 = vadd.f32 1.4214138, %v2837_v37  ;;  %v3166_v37 = vld [vmem:[%s7164_s4 + $0x290] sm:$0xff] }
 0x433   : > { %v2844_v22 = vmul.f32 %v3625_v24, %v2842_v39  ;;  %v3149_v39 = vld [vmem:[%s7164_s4 + $0x180] sm:$0xff] }
 0x434   : > { %v2841_v50 = vmul.f32 %v3627_v28, %v2839_v40  ;;  %v3181_v40 = vld [vmem:[%s7164_s4 + $0x380] sm:$0xff] }
 0x435   : > { %v2846_v5 = vadd.f32 0.2548296, %v2844_v22  ;;  %v3133_v22 = vld [vmem:[%s7164_s4 + $0x80] sm:$0xff] }
 0x436   : > { %v2843_v8 = vadd.f32 -0.28449672, %v2841_v50  ;;  %v3165_v50 = vld [vmem:[%s7164_s4 + $0x280] sm:$0xff] }
 0x437   : > { %v2848_v42 = vmul.f32 %v3625_v24, %v2846_v5  ;;  %v3169_v24 = vld [vmem:[%s7164_s4 + $0x2c0] sm:$0xff]  ;;  %v3148_v5 = vld [vmem:[%s7164_s4 + $0x170] sm:$0xff] }
 0x438   : > { %v2845_v25 = vmul.f32 %v3627_v28, %v2843_v8  ;;  %v3180_v8 = vld [vmem:[%s7164_s4 + $0x370] sm:$0xff] }
 0x439   : > { %v2858_v44 = vmul.f32 %v3629_v43, %v2848_v42  ;;  %v3132_v42 = vld [vmem:[%s7164_s4 + $0x70] sm:$0xff] }
 0x43a   : > { %v2847_v54 = vadd.f32 0.2548296, %v2845_v25  ;;  %v3164_v43 = vld [vmem:[%s7164_s4 + $0x270] sm:$0xff]  ;;  %v3147_v25 = vld [vmem:[%s7164_s4 + $0x160] sm:$0xff] }
 0x43b   : > { %v2860_v21 = vsub.f32 1.0, %v2858_v44  ;;  %v3179_v44 = vld [vmem:[%s7164_s4 + $0x360] sm:$0xff] }
 0x43c   : > { %v2849_v53 = vmul.f32 %v3627_v28, %v2847_v54  ;;  %v3151_v28 = vld [vmem:[%s7164_s4 + $0x1a0] sm:$0xff] }
 0x43d   : > { %v2862_v31 = vmul.f32 %v2860_v21, %v2820_v63  ;;  %v3131_v54 = vld [vmem:[%s7164_s4 + $0x60] sm:$0xff]  ;;  %v3146_v63 = vld [vmem:[%s7164_s4 + $0x150] sm:$0xff] }
 0x43e   : > { %v2859_v60 = vmul.f32 %v3631_v1, %v2849_v53  ;;  %v3163_v21 = vld [vmem:[%s7164_s4 + $0x260] sm:$0xff]  ;;  %v3178_v53 = vld [vmem:[%s7164_s4 + $0x350] sm:$0xff] }
 0x43f   : > { %v2864_v33 = vadd.f32 1.0, %v2862_v31  ;;  %v3130_v1 = vld [vmem:[%s7164_s4 + $0x50] sm:$0xff] }
 0x440   : > { %v2861_v47 = vsub.f32 1.0, %v2859_v60  ;;  %v3162_v31 = vld [vmem:[%s7164_s4 + $0x250] sm:$0xff]  ;;  %v3145_v60 = vld [vmem:[%s7164_s4 + $0x140] sm:$0xff] }
 0x441   : > { %v2866_v57 = vmul.f32 %v2864_v33, %v2814_v12  ;;  %v3177_v12 = vld [vmem:[%s7164_s4 + $0x340] sm:$0xff] }
 0x442   : > { %v2863_v17 = vmul.f32 %v2861_v47, %v2821_v61  ;;  %v3129_v33 = vld [vmem:[%s7164_s4 + $0x40] sm:$0xff]  ;;  %v3176_v61 = vld [vmem:[%s7164_s4 + $0x330] sm:$0xff] }
 0x443   : > { %3028 = vmatmul.mubr.f32.vlgmr.msra.gmra.mxu0 %v2866_v57  ;;  %3105 = vmatmul.mubr.f32.vlgmr.msra.gmra.mxu1 %v2866_v57  ;;  %v3161_v47 = vld [vmem:[%s7164_s4 + $0x240] sm:$0xff]  ;;  %v3144_v57 = vld [vmem:[%s7164_s4 + $0x130] sm:$0xff] }
 0x444   : > { %3033 = vmatprep.mubr.f32.mxu0 %v3650_v7  ;;  %3110 = vmatprep.mubr.f32.mxu1 %v3650_v7  ;;  %v2865_v36 = vadd.f32 1.0, %v2863_v17  ;;  %v3186_v7 = vld [vmem:[%s7164_s4 + $0x3d0] sm:$0xff] }
 0x445   : > { %3507 = vmatpush3.msra.mxu0 %v3140_v59  ;;  %3545 = vmatpush3.msra.mxu1 %v3172_v38  ;;  %v3128_v17 = vld [vmem:[%s7164_s4 + $0x30] sm:$0xff]  ;;  %v3143_v38 = vld [vmem:[%s7164_s4 + $0x120] sm:$0xff] }
 0x446   : > { %v2867_v32 = vmul.f32 %v2865_v36, %v2815_v3  ;;  %3508 = vmatprep.subr.mxu0 %v3155_v14  ;;  %3546 = vmatprep.subr.mxu1 %v3187_v9  ;;  %v3160_v59 = vld [vmem:[%s7164_s4 + $0x230] sm:$0xff]  ;;  %v3175_v14 = vld [vmem:[%s7164_s4 + $0x320] sm:$0xff] }
 0x447   : > { %3509 = vmatpush3.msra.mxu0 %v3139_v11  ;;  %3547 = vmatpush3.msra.mxu1 %v3171_v51  ;;  %v3127_v9 = vld [vmem:[%s7164_s4 + $0x20] sm:$0xff]  ;;  %v3142_v36 = vld [vmem:[%s7164_s4 + $0x110] sm:$0xff] }
 0x448   : > { %3034 = vmatmul.mubr.f32.gmra.mxu0 %v2867_v32  ;;  %3111 = vmatmul.mubr.f32.gmra.mxu1 %v2867_v32  ;;  %v3159_v3 = vld [vmem:[%s7164_s4 + $0x220] sm:$0xff]  ;;  %v3174_v11 = vld [vmem:[%s7164_s4 + $0x310] sm:$0xff] }
 0x449   : > { %3510 = vmatprep.subr.mxu0 %v3154_v10  ;;  %3548 = vmatprep.subr.mxu1 %v3186_v7  ;;  %v3126_v51 = vld [vmem:[%s7164_s4 + $0x10] sm:$0xff]  ;;  %v3141_v10 = vld [vmem:[%s7164_s4 + $0x100] sm:$0xff] }
 0x44a   : > { %3511 = vmatpush3.msra.mxu0 %v3138_v58  ;;  %3549 = vmatpush3.msra.mxu1 %v3170_v0  ;;  %v3158_v32 = vld [vmem:[%s7164_s4 + $0x210] sm:$0xff]  ;;  %v3173_v7 = vld [vmem:[%s7164_s4 + $0x300] sm:$0xff] }
 0x44b   : > { %3512 = vmatprep.subr.mxu0 %v3153_v2  ;;  %3550 = vmatprep.subr.mxu1 %v3185_v23  ;;  %v3125_v58 = vld [vmem:[%s7164_s4] sm:$0xff] }
 0x44c   : > { %3513 = vmatpush3.msra.mxu0 %v3137_v48  ;;  %3551 = vmatpush3.msra.mxu1 %v3169_v24  ;;  %v3157_v0 = vld [vmem:[%s7164_s4 + $0x200] sm:$0xff] }
 0x44d   : > { %3514 = vmatprep.subr.mxu0 %v3152_v62  ;;  %3552 = vmatprep.subr.mxu1 %v3184_v27  ;;  %v3423_v2 = vld [vmem:[%s7162_s2 + $0x2] ss:$4 sm:$0xf] }
 0x44e   : > { %3515 = vmatpush3.msra.mxu0 %v3136_v41  ;;  %3553 = vmatpush3.msra.mxu1 %v3168_v4  ;;  %v2878_v23 = vrot.slane %v3423_v2, %v4320_v18  ;;  %v2886_v48 = vrot.slane %v3423_v2, %v4322_v19  ;;  %v2874_v24 = vrot.slane %v3423_v2, %v4313_v15 }
 0x44f   : > { %3516 = vmatprep.subr.mxu0 %v3151_v28  ;;  %3554 = vmatprep.subr.mxu1 %v3183_v6  ;;  %v2882_v62 = vrot.slane %v3423_v2, %v4315_v16 }
 0x450   : > { %3517 = vmatpush3.msra.mxu0 %v3135_v52  ;;  %3555 = vmatpush3.msra.mxu1 %v3167_v46  ;;  %v2892_v4 = vmul.f32 %v2878_v23, %v6573_v45  ;;  %v2894_v28 = vmul.f32 %v2886_v48, %v6723_v26  ;;  %v2891_v6 = vmul.f32 %v2874_v24, %v6575_v20 }
 0x451   : > { %3518 = vmatprep.subr.mxu0 %v3150_v30  ;;  %3556 = vmatprep.subr.mxu1 %v3182_v34  ;;  %v2893_v52 = vmul.f32 %v2882_v62, %v6725_v13  ;;  %v2896_v16 = vmul.f32 %v2878_v23, %v6582_v55  ;;  %v2898_v45 = vmul.f32 %v2886_v48, %v6731_v29  ;;  %v3424_v29 = vld [vmem:[%s7161_s1 + $0x2] ss:$0 sm:$0xff] }
 0x452   : > { %3519 = vmatpush3.msra.mxu0 %v3134_v35  ;;  %3557 = vmatpush3.msra.mxu1 %v3166_v37  ;;  %v2895_v20 = vmul.f32 %v2874_v24, %v6584_v56  ;;  %v2897_v26 = vmul.f32 %v2882_v62, %v6733_v49 }
 0x453   : > { %3520 = vmatprep.subr.mxu0 %v3149_v39  ;;  %3558 = vmatprep.subr.mxu1 %v3181_v40 }
 0x454   : > { %3521 = vmatpush3.msra.mxu0 %v3133_v22  ;;  %3559 = vmatpush3.msra.mxu1 %v3165_v50 }
 0x455   : > { %3522 = vmatprep.subr.mxu0 %v3148_v5  ;;  %3560 = vmatprep.subr.mxu1 %v3180_v8 }
 0x456   : > { %3523 = vmatpush3.msra.mxu0 %v3132_v42  ;;  %3561 = vmatpush3.msra.mxu1 %v3164_v43 }
 0x457   : > { %3524 = vmatprep.subr.mxu0 %v3147_v25  ;;  %3562 = vmatprep.subr.mxu1 %v3179_v44 }
 0x458   : > { %3525 = vmatpush3.msra.mxu0 %v3131_v54  ;;  %3563 = vmatpush3.msra.mxu1 %v3163_v21  ;;  %v3425_v21 = vld [vmem:[%s7161_s1 + $0x3] ss:$0 sm:$0xff] }
 0x459   : > { %3526 = vmatprep.subr.mxu0 %v3146_v63  ;;  %3564 = vmatprep.subr.mxu1 %v3178_v53 }
 0x45a   : > { %3527 = vmatpush3.msra.mxu0 %v3130_v1  ;;  %3565 = vmatpush3.msra.mxu1 %v3162_v31 }
 0x45b   : > { %3528 = vmatprep.subr.mxu0 %v3145_v60  ;;  %3566 = vmatprep.subr.mxu1 %v3177_v12 }
 0x45c   : > { %3529 = vmatpush3.msra.mxu0 %v3129_v33  ;;  %3567 = vmatpush3.msra.mxu1 %v3161_v47  ;;  %v3640_v47 = vld [vmem:[%s3851_s7] sm:$0xff] }
 0x45d   : > { %3530 = vmatprep.subr.mxu0 %v3144_v57  ;;  %3568 = vmatprep.subr.mxu1 %v3176_v61 }
 0x45e   : > { %3531 = vmatpush3.msra.mxu0 %v3128_v17  ;;  %3569 = vmatpush3.msra.mxu1 %v3160_v59  ;;  %v3641_v59 = vld [vmem:[%s3851_s7 + $0x8] sm:$0xff] }
 0x45f   : > { %3532 = vmatprep.subr.mxu0 %v3143_v38  ;;  %3570 = vmatprep.subr.mxu1 %v3175_v14 }
 0x460   : > { %3533 = vmatpush3.msra.mxu0 %v3127_v9  ;;  %3571 = vmatpush3.msra.mxu1 %v3159_v3 }
 0x461   : > { %3534 = vmatprep.subr.mxu0 %v3142_v36  ;;  %3572 = vmatprep.subr.mxu1 %v3174_v11 }
 0x462   : > { %3535 = vmatpush3.msra.mxu0 %v3126_v51  ;;  %3573 = vmatpush3.msra.mxu1 %v3158_v32 }
 0x463   : > { %3536 = vmatprep.subr.mxu0 %v3141_v10  ;;  %3574 = vmatprep.subr.mxu1 %v3173_v7 }
 0x464   : > { %3537 = vmatpush3.msra.mxu0 %v3125_v58  ;;  %3575 = vmatpush3.msra.mxu1 %v3157_v0 }
 0x503   : > { %v3029_v27 = vpop.f32.mrf.mxu0  ;;  %v3106_v41 = vpop.f32.mrf.mxu1 }
 0x504   : > { %v3117_v35 = vsub.f32 %v2891_v6, %v3029_v27  ;;  %v3119_v19 = vsub.f32 %v2893_v52, %v3106_v41 }
 0x505   : > { %v3031_v46 = vpop.f32.mrf.mxu0  ;;  %v3108_v30 = vpop.f32.mrf.mxu1 }
 0x506   : > { %v3118_v34 = vsub.f32 %v2892_v4, %v3031_v46  ;;  %v3120_v18 = vsub.f32 %v2894_v28, %v3108_v30 }
 0x508   : > { %v3035_v37 = vpop.f32.mrf.mxu0  ;;  %v3112_v15 = vpop.f32.mrf.mxu1  ;;  %3258 = vmatprep.mubr.f32.mxu0 %v3118_v34  ;;  %3333 = vmatprep.mubr.f32.mxu1 %v3120_v18 }
 0x509   : > { %3259 = vmatmul.mubr.f32.vlgmr.msra.gmra.mxu0 %v3117_v35  ;;  %3334 = vmatmul.mubr.f32.vlgmr.msra.gmra.mxu1 %v3119_v19  ;;  %v3121_v50 = vsub.f32 %v2895_v20, %v3035_v37  ;;  %v3123_v5 = vsub.f32 %v2897_v26, %v3112_v15 }
 0x50a   : > { %v3037_v13 = vpop.f32.mrf.mxu0  ;;  %v3114_v39 = vpop.f32.mrf.mxu1 }
 0x50b   : > { %v3122_v40 = vsub.f32 %v2896_v16, %v3037_v13  ;;  %v3124_v22 = vsub.f32 %v2898_v45, %v3114_v39 }
 0x50d   : > { %3263 = vmatprep.mubr.f32.mxu0 %v3122_v40  ;;  %3338 = vmatprep.mubr.f32.mxu1 %v3124_v22 }
 0x50e   : > { %3264 = vmatmul.mubr.f32.gmra.mxu0 %v3121_v50  ;;  %3339 = vmatmul.mubr.f32.gmra.mxu1 %v3123_v5 }
 0x5c9   : > { %v3538_v8 = vpop.f32.mrf.mxu0  ;;  %v3576_v55 = vpop.f32.mrf.mxu1 }
 0x5cb   : > { %v3539_v56 = vpop.f32.mrf.mxu0  ;;  %v3577_v49 = vpop.f32.mrf.mxu1 }
 0x5cc   : > { %v3540_v42 = vadd.f32 %v3539_v56, %v3538_v8  ;;  %v3578_v25 = vadd.f32 %v3577_v49, %v3576_v55 }
 0x5ce   : > { %v3261_v43 = vadd.f32 %v3540_v42, %v3424_v29  ;;  %v3541_v44 = vpop.f32.mrf.mxu0  ;;  %v3579_v54 = vpop.f32.mrf.mxu1 }
 0x5d0   : > { %v3336_v63 = vadd.f32 %v3578_v25, %v3261_v43  ;;  %v3542_v53 = vpop.f32.mrf.mxu0  ;;  %v3580_v1 = vpop.f32.mrf.mxu1 }
 0x5d1   : > { %v3543_v31 = vadd.f32 %v3542_v53, %v3541_v44  ;;  %v3581_v33 = vadd.f32 %v3580_v1, %v3579_v54 }
 0x5d2   : > { %v3349_v60 = vmul.f32 %v3425_v21, %v3336_v63 }
 0x5d3   : > { %v3266_v12 = vadd.f32 %v3543_v31, %v3424_v29 }
 0x5d4   : > { %v3351_v57 = vadd.f32 %v3640_v47, %v3349_v60 }
 0x5d5   : > { %v3341_v61 = vadd.f32 %v3581_v33, %v3266_v12 }
 0x5d6   : > { %3353 = vst [vmem:[%s251_s25] sm:$0xff] %v3351_v57 }
 0x5d7   : > { %v3350_v17 = vmul.f32 %v3425_v21, %v3341_v61 }
 0x5d9   : > { %v3352_v38 = vadd.f32 %v3641_v59, %v3350_v17 }
 0x5db   : > { %3354 = vst [vmem:[%s251_s25 + $0x8] sm:$0xff] %v3352_v38 }
 0x5dc PF: > { %s16_s21 = sadd.s32 1, %s3648_s21  }
 0x5dd   : > { %p13_p4 = scmp.ge.s32.totalorder %s16_s21, 4  }
 0x5df   :  { %15 = sbr.rel (!%p13_p4) target bundleno = 1 (0x1), region = 77 }

</bundles_post_ra>
